<compile_context>
chip_gen: v5e
topology: v5e:2x2
jax: 0.10.0
libtpu: 0.0.40
codegen_flags: <defaults>
</compile_context>

<pallas_src>
import functools

import jax
import jax.numpy as jnp
from jax.experimental import pallas as pl
from jax.experimental.pallas import tpu as pltpu

EPS = 1e-5          # nn.BatchNorm1d default eps
NUM_PASSES = 4


def _bn_relu_rows(h, gamma, beta):
    """Training-mode BatchNorm+ReLU over the row axis of a small resident tensor."""
    mu = jnp.mean(h, axis=0, keepdims=True)
    var = jnp.mean(h * h, axis=0, keepdims=True) - mu * mu
    return jnp.maximum(gamma * (h - mu) * jax.lax.rsqrt(var + EPS) + beta, 0.0)


def stn3d_kernel(x_ref,
                 w1t_ref, cb1_ref, g1_ref, be1_ref,
                 w2_ref, cb2_ref, g2_ref, be2_ref,
                 w3_ref, cb3_ref, g3_ref, be3_ref,
                 w4_ref, fb1_ref, g4_ref, be4_ref,
                 w5_ref, fb2_ref, g5_ref, be5_ref,
                 w6_ref, fb3_ref, iden_ref,
                 out_ref,
                 stats1, stats2, stats3, pooled,
                 *, batch, npoints):
    p = pl.program_id(0)          # pass index (sequential)
    b = pl.program_id(1)          # batch index
    t = pl.program_id(2)          # point-tile index
    nb = pl.num_programs(1)
    nt = pl.num_programs(2)
    first = jnp.logical_and(b == 0, t == 0)
    last = jnp.logical_and(b == nb - 1, t == nt - 1)
    inv_rows = 1.0 / float(batch * npoints)

    def conv1():
        # x block: (1, C, tile_n) f32 with points (dense) on the lane axis.
        h1t = jnp.dot(w1t_ref[...], x_ref[0],
                      preferred_element_type=jnp.float32)        # (64, tile_n)
        return jnp.transpose(h1t) + cb1_ref[...]                 # (tile_n, 64)

    def bn_relu(h, stats_ref):
        # rows 2/3 hold the folded scale / shift computed at the end of the
        # previous pass.
        return jnp.maximum(h * stats_ref[2:3, :] + stats_ref[3:4, :], 0.0)

    def conv_bf16(h, w_ref, cb_ref):
        return jnp.dot(h.astype(jnp.bfloat16), w_ref[...],
                       preferred_element_type=jnp.float32) + cb_ref[...]

    def accumulate(h, stats_ref):
        s = jnp.sum(h, axis=0, keepdims=True)
        q = jnp.sum(h * h, axis=0, keepdims=True)

        @pl.when(first)
        def _():
            stats_ref[0:1, :] = jnp.zeros_like(s)
            stats_ref[1:2, :] = jnp.zeros_like(q)

        stats_ref[0:1, :] += s
        stats_ref[1:2, :] += q

    def finalize(stats_ref, g_ref, be_ref):
        mu = stats_ref[0:1, :] * inv_rows
        var = stats_ref[1:2, :] * inv_rows - mu * mu
        scale = g_ref[...] * jax.lax.rsqrt(var + EPS)
        stats_ref[2:3, :] = scale
        stats_ref[3:4, :] = be_ref[...] - mu * scale

    # ---- pass 0: conv1 -> bn1 stats -----------------------------------------
    @pl.when(p == 0)
    def _pass0():
        accumulate(conv1(), stats1)

        @pl.when(last)
        def _():
            finalize(stats1, g1_ref, be1_ref)

    # ---- pass 1: conv1+bn1+relu, conv2 -> bn2 stats --------------------------
    @pl.when(p == 1)
    def _pass1():
        h1 = bn_relu(conv1(), stats1)
        accumulate(conv_bf16(h1, w2_ref, cb2_ref), stats2)

        @pl.when(last)
        def _():
            finalize(stats2, g2_ref, be2_ref)

    # ---- pass 2: ... conv3 -> bn3 stats --------------------------------------
    @pl.when(p == 2)
    def _pass2():
        h1 = bn_relu(conv1(), stats1)
        h2 = bn_relu(conv_bf16(h1, w2_ref, cb2_ref), stats2)
        accumulate(conv_bf16(h2, w3_ref, cb3_ref), stats3)

        @pl.when(last)
        def _():
            finalize(stats3, g3_ref, be3_ref)

    # ---- pass 3: full conv stack, per-batch max pool, FC head at the end -----
    @pl.when(p == 3)
    def _pass3():
        @pl.when(first)
        def _():
            # Post-ReLU values are >= 0, so 0 is a valid max-identity.
            pooled[...] = jnp.zeros_like(pooled)

        h1 = bn_relu(conv1(), stats1)
        h2 = bn_relu(conv_bf16(h1, w2_ref, cb2_ref), stats2)
        h3 = bn_relu(conv_bf16(h2, w3_ref, cb3_ref), stats3)
        tile_max = jnp.max(h3, axis=0, keepdims=True)            # (1, 1024)

        row_is_b = jax.lax.broadcasted_iota(jnp.int32, (batch, 1), 0) == b
        pooled[...] = jnp.where(row_is_b,
                                jnp.maximum(pooled[...], tile_max),
                                pooled[...])

        @pl.when(last)
        def _():
            f = pooled[...]                                       # (B, 1024)
            f = _bn_relu_rows(
                jnp.dot(f, w4_ref[...], preferred_element_type=jnp.float32)
                + fb1_ref[...], g4_ref[...], be4_ref[...])
            f = _bn_relu_rows(
                jnp.dot(f, w5_ref[...], preferred_element_type=jnp.float32)
                + fb2_ref[...], g5_ref[...], be5_ref[...])
            out = jnp.dot(f, w6_ref[...], preferred_element_type=jnp.float32)
            out_ref[...] = out + fb3_ref[...] + iden_ref[...]


def _choose_tile(n, target=512):
    """Largest point-tile <= target that is a multiple of 128 and divides n."""
    if n <= target:
        return n
    if n % 128 == 0:
        t = (target // 128) * 128
        while t >= 128:
            if n % t == 0:
                return t
            t -= 128
    # TODO(synk): pad + mask the points axis (BN sums and max-pool) when N has
    # no 128-multiple divisor; for now fall back to a single full-N tile.
    return n


def stn3d_forward(x_bcn, params, tile_n=None):
    """x_bcn: (B, C, N) float32 in the PyTorch Conv1d NCW layout."""
    B, C, N = x_bcn.shape
    if tile_n is None:
        tile_n = _choose_tile(N)
    assert N % tile_n == 0, (N, tile_n)
    n_tiles = N // tile_n

    (w1, cb1, g1, be1, w2, cb2, g2, be2, w3, cb3, g3, be3,
     w4, fb1, g4, be4, w5, fb2, g5, be5, w6, fb3) = params

    f32, bf16 = jnp.float32, jnp.bfloat16
    iden = jnp.eye(3, dtype=f32).reshape(1, 9)
    inputs = (
        x_bcn.astype(f32),
        jnp.transpose(w1).astype(f32), cb1, g1, be1,   # conv1 weight as (64, C)
        w2.astype(bf16), cb2, g2, be2,                 # conv2/conv3 bf16 on the MXU
        w3.astype(bf16), cb3, g3, be3,
        w4, fb1, g4, be4,                              # tiny FC head stays f32
        w5, fb2, g5, be5,
        w6, fb3, iden,
    )

    x_spec = pl.BlockSpec((1, C, tile_n), lambda p, b, t: (b, 0, t))

    def resident_spec(a):
        # Constant block index -> params stay resident in VMEM across the grid.
        return pl.BlockSpec(a.shape, lambda p, b, t, _nd=a.ndim: (0,) * _nd)

    in_specs = [x_spec] + [resident_spec(a) for a in inputs[1:]]

    rows = B * N
    flops = (rows * (4 * 2 * C * 64 + 3 * 2 * 64 * 128 + 2 * 2 * 128 * 1024)
             + 2 * B * (1024 * 512 + 512 * 256 + 256 * 9))
    param_bytes = sum(int(a.size) * a.dtype.itemsize for a in inputs[1:])
    bytes_accessed = (NUM_PASSES * int(x_bcn.size) * 4 + param_bytes + B * 9 * 4)
    cost = pl.CostEstimate(flops=flops,
                           transcendentals=64 + 128 + 1024 + 512 + 256,
                           bytes_accessed=bytes_accessed)

    out = pl.pallas_call(
        functools.partial(stn3d_kernel, batch=B, npoints=N),
        grid=(NUM_PASSES, B, n_tiles),
        in_specs=in_specs,
        out_specs=pl.BlockSpec((B, 9), lambda p, b, t: (0, 0)),
        out_shape=jax.ShapeDtypeStruct((B, 9), jnp.float32),
        scratch_shapes=[
            pltpu.VMEM((4, 64), jnp.float32),     # bn1: sum / sumsq / scale / shift
            pltpu.VMEM((4, 128), jnp.float32),    # bn2
            pltpu.VMEM((4, 1024), jnp.float32),   # bn3
            pltpu.VMEM((B, 1024), jnp.float32),   # per-batch max-pool accumulator
        ],
        compiler_params=pltpu.CompilerParams(
            # Global BN stats + max-pool accumulators are shared across the whole
            # grid, so every axis must run sequentially on a single core.
            dimension_semantics=("arbitrary", "arbitrary", "arbitrary"),
            vmem_limit_bytes=48 * 1024 * 1024,
        ),
        cost_estimate=cost,
    )(*inputs)
    return out.reshape(B, 3, 3)


def init_params(key, channel):
    """Deterministic synthetic parameters matching STN3d.__init__ shapes.

    Per layer: W (Cin, Cout), bias (1, Cout), and (for BN layers) gamma/beta
    (1, Cout).  (PyTorch conv/linear weights are (Cout, Cin[,1]); we store the
    transpose; the wrapper re-transposes conv1's weight for the kernel.)
    """
    dims = [(channel, 64), (64, 128), (128, 1024), (1024, 512), (512, 256), (256, 9)]
    has_bn = [True, True, True, True, True, False]
    params = []
    keys = jax.random.split(key, 4 * len(dims))
    for i, ((cin, cout), bn) in enumerate(zip(dims, has_bn)):
        wk, bk, gk, bek = keys[4 * i:4 * i + 4]
        w = jax.random.normal(wk, (cin, cout), jnp.float32) / jnp.sqrt(float(cin))
        b = 0.05 * jax.random.normal(bk, (1, cout), jnp.float32)
        params += [w, b]
        if bn:
            gamma = 1.0 + 0.1 * jax.random.normal(gk, (1, cout), jnp.float32)
            beta = 0.1 * jax.random.normal(bek, (1, cout), jnp.float32)
            params += [gamma, beta]
    return params


def stn3d_reference(x_bcn, params):
    """Plain-JAX reference of the same forward (training-mode BN).

    conv2/conv3 operands are cast to bf16 exactly like the kernel: training-mode
    BatchNorm over a small batch amplifies rounding differences, so the
    reference must use matching matmul precision to be comparable.
    """
    (w1, cb1, g1, be1, w2, cb2, g2, be2, w3, cb3, g3, be3,
     w4, fb1, g4, be4, w5, fb2, g5, be5, w6, fb3) = params
    B, C, N = x_bcn.shape
    x = jnp.transpose(x_bcn, (0, 2, 1)).reshape(B * N, C).astype(jnp.float32)

    def bnrelu(h, g, b):
        mu = jnp.mean(h, 0, keepdims=True)
        var = jnp.mean(h * h, 0, keepdims=True) - mu * mu
        return jnp.maximum(g * (h - mu) * jax.lax.rsqrt(var + EPS) + b, 0.0)

    def dot_bf16(a, w):
        return jnp.dot(a.astype(jnp.bfloat16), w.astype(jnp.bfloat16),
                       preferred_element_type=jnp.float32)

    h = bnrelu(x @ w1 + cb1, g1, be1)
    h = bnrelu(dot_bf16(h, w2) + cb2, g2, be2)
    h = bnrelu(dot_bf16(h, w3) + cb3, g3, be3)
    pooled = jnp.max(h.reshape(B, N, -1), axis=1)
    f = bnrelu(pooled @ w4 + fb1, g4, be4)
    f = bnrelu(f @ w5 + fb2, g5, be5)
    out = f @ w6 + fb3 + jnp.eye(3, dtype=jnp.float32).reshape(1, 9)
    return out.reshape(B, 3, 3)


if __name__ == "__main__":
    key = jax.random.PRNGKey(0)
    pkey, xkey = jax.random.split(key)

    # Small shapes: batch=4, channels=4, 256 points; tile_n=128 exercises the
    # row tiling (grid = 4 passes x 4 batches x 2 point tiles).
    B, C, N = 4, 4, 256
    params = init_params(pkey, C)
    x = jax.random.normal(xkey, (B, C, N), jnp.float32)  # PyTorch Conv1d NCW layout

    out = jax.block_until_ready(stn3d_forward(x, params, tile_n=128))
    assert out.shape == (B, 3, 3), out.shape

    ref = stn3d_reference(x, params)
    max_err = float(jnp.max(jnp.abs(out - ref)))
    assert jnp.allclose(out, ref, rtol=1e-2, atol=1e-2), (max_err, out, ref)

    print("KERNEL_OK")
</pallas_src>

<mosaic_0001>
module attributes {stable_mosaic.version = 11 : i64} {
  func.func @stn3d_kernel(%arg0: i32, %arg1: i32, %arg2: i32, %arg3: memref<1x4x128xf32, #tpu.memory_space<vmem>>, %arg4: memref<64x4xf32, #tpu.memory_space<vmem>>, %arg5: memref<1x64xf32, #tpu.memory_space<vmem>>, %arg6: memref<1x64xf32, #tpu.memory_space<vmem>>, %arg7: memref<1x64xf32, #tpu.memory_space<vmem>>, %arg8: memref<64x128xbf16, #tpu.memory_space<vmem>>, %arg9: memref<1x128xf32, #tpu.memory_space<vmem>>, %arg10: memref<1x128xf32, #tpu.memory_space<vmem>>, %arg11: memref<1x128xf32, #tpu.memory_space<vmem>>, %arg12: memref<128x1024xbf16, #tpu.memory_space<vmem>>, %arg13: memref<1x1024xf32, #tpu.memory_space<vmem>>, %arg14: memref<1x1024xf32, #tpu.memory_space<vmem>>, %arg15: memref<1x1024xf32, #tpu.memory_space<vmem>>, %arg16: memref<1024x512xf32, #tpu.memory_space<vmem>>, %arg17: memref<1x512xf32, #tpu.memory_space<vmem>>, %arg18: memref<1x512xf32, #tpu.memory_space<vmem>>, %arg19: memref<1x512xf32, #tpu.memory_space<vmem>>, %arg20: memref<512x256xf32, #tpu.memory_space<vmem>>, %arg21: memref<1x256xf32, #tpu.memory_space<vmem>>, %arg22: memref<1x256xf32, #tpu.memory_space<vmem>>, %arg23: memref<1x256xf32, #tpu.memory_space<vmem>>, %arg24: memref<256x9xf32, #tpu.memory_space<vmem>>, %arg25: memref<1x9xf32, #tpu.memory_space<vmem>>, %arg26: memref<1x9xf32, #tpu.memory_space<vmem>>, %arg27: memref<4x9xf32, #tpu.memory_space<vmem>>, %arg28: memref<4x64xf32, #tpu.memory_space<vmem>>, %arg29: memref<4x128xf32, #tpu.memory_space<vmem>>, %arg30: memref<4x1024xf32, #tpu.memory_space<vmem>>, %arg31: memref<4x1024xf32, #tpu.memory_space<vmem>>) attributes {dimension_semantics = [#tpu.dimension_semantics<arbitrary>, #tpu.dimension_semantics<arbitrary>, #tpu.dimension_semantics<arbitrary>], iteration_bounds = array<i64: 4, 4, 2>, scalar_prefetch = 0 : i64, scratch_operands = 4 : i64, tpu.core_type = #tpu.core_type<tc>, window_params = [{transform_indices = @transform_0, window_bounds = array<i64: 1, 4, 128>}, {pipeline_mode = #tpu.pipeline_mode<synchronous>, transform_indices = @transform_1, window_bounds = array<i64: 64, 4>}, {pipeline_mode = #tpu.pipeline_mode<synchronous>, transform_indices = @transform_2, window_bounds = array<i64: 1, 64>}, {pipeline_mode = #tpu.pipeline_mode<synchronous>, transform_indices = @transform_3, window_bounds = array<i64: 1, 64>}, {pipeline_mode = #tpu.pipeline_mode<synchronous>, transform_indices = @transform_4, window_bounds = array<i64: 1, 64>}, {pipeline_mode = #tpu.pipeline_mode<synchronous>, transform_indices = @transform_5, window_bounds = array<i64: 64, 128>}, {pipeline_mode = #tpu.pipeline_mode<synchronous>, transform_indices = @transform_6, window_bounds = array<i64: 1, 128>}, {pipeline_mode = #tpu.pipeline_mode<synchronous>, transform_indices = @transform_7, window_bounds = array<i64: 1, 128>}, {pipeline_mode = #tpu.pipeline_mode<synchronous>, transform_indices = @transform_8, window_bounds = array<i64: 1, 128>}, {pipeline_mode = #tpu.pipeline_mode<synchronous>, transform_indices = @transform_9, window_bounds = array<i64: 128, 1024>}, {pipeline_mode = #tpu.pipeline_mode<synchronous>, transform_indices = @transform_10, window_bounds = array<i64: 1, 1024>}, {pipeline_mode = #tpu.pipeline_mode<synchronous>, transform_indices = @transform_11, window_bounds = array<i64: 1, 1024>}, {pipeline_mode = #tpu.pipeline_mode<synchronous>, transform_indices = @transform_12, window_bounds = array<i64: 1, 1024>}, {pipeline_mode = #tpu.pipeline_mode<synchronous>, transform_indices = @transform_13, window_bounds = array<i64: 1024, 512>}, {pipeline_mode = #tpu.pipeline_mode<synchronous>, transform_indices = @transform_14, window_bounds = array<i64: 1, 512>}, {pipeline_mode = #tpu.pipeline_mode<synchronous>, transform_indices = @transform_15, window_bounds = array<i64: 1, 512>}, {pipeline_mode = #tpu.pipeline_mode<synchronous>, transform_indices = @transform_16, window_bounds = array<i64: 1, 512>}, {pipeline_mode = #tpu.pipeline_mode<synchronous>, transform_indices = @transform_17, window_bounds = array<i64: 512, 256>}, {pipeline_mode = #tpu.pipeline_mode<synchronous>, transform_indices = @transform_18, window_bounds = array<i64: 1, 256>}, {pipeline_mode = #tpu.pipeline_mode<synchronous>, transform_indices = @transform_19, window_bounds = array<i64: 1, 256>}, {pipeline_mode = #tpu.pipeline_mode<synchronous>, transform_indices = @transform_20, window_bounds = array<i64: 1, 256>}, {pipeline_mode = #tpu.pipeline_mode<synchronous>, transform_indices = @transform_21, window_bounds = array<i64: 256, 9>}, {pipeline_mode = #tpu.pipeline_mode<synchronous>, transform_indices = @transform_22, window_bounds = array<i64: 1, 9>}, {pipeline_mode = #tpu.pipeline_mode<synchronous>, transform_indices = @transform_23, window_bounds = array<i64: 1, 9>}, {pipeline_mode = #tpu.pipeline_mode<synchronous>, transform_indices = @transform_24, window_bounds = array<i64: 4, 9>}]} {
    %c0_i32 = arith.constant 0 : i32
    %0 = arith.cmpi eq, %arg1, %c0_i32 : i32
    %c0_i32_0 = arith.constant 0 : i32
    %1 = arith.cmpi eq, %arg2, %c0_i32_0 : i32
    %2 = arith.andi %0, %1 : i1
    %c3_i32 = arith.constant 3 : i32
    %3 = arith.cmpi eq, %arg1, %c3_i32 : i32
    %c1_i32 = arith.constant 1 : i32
    %4 = arith.cmpi eq, %arg2, %c1_i32 : i32
    %5 = arith.andi %3, %4 : i1
    %c0_i32_1 = arith.constant 0 : i32
    %6 = arith.cmpi eq, %arg0, %c0_i32_1 : i32
    %7 = arith.extui %6 : i1 to i32
    %c0_i32_2 = arith.constant 0 : i32
    %8 = arith.cmpi ne, %7, %c0_i32_2 : i32
    scf.if %8 {
      %c0 = arith.constant 0 : index
      %c0_8 = arith.constant 0 : index
      %18 = vector.load %arg4[%c0, %c0_8] : memref<64x4xf32, #tpu.memory_space<vmem>>, vector<64x4xf32>
      %c0_9 = arith.constant 0 : index
      %c0_10 = arith.constant 0 : index
      %c0_11 = arith.constant 0 : index
      %19 = vector.load %arg3[%c0_9, %c0_10, %c0_11] : memref<1x4x128xf32, #tpu.memory_space<vmem>>, vector<1x4x128xf32>
      %20 = vector.shape_cast %19 : vector<1x4x128xf32> to vector<4x128xf32>
      %cst = arith.constant dense<0.000000e+00> : vector<64x128xf32>
      %21 = tpu.matmul %18, %20, %cst {dimension_numbers = #tpu.dot_dimension_numbers<[1], [0], [0], [1], [0, 0, 1, 1], [], []>} : vector<64x4xf32>, vector<4x128xf32>, vector<64x128xf32> -> vector<64x128xf32>
      %22 = tpu.transpose %21, [1, 0] : vector<64x128xf32> -> vector<128x64xf32>
      %c0_12 = arith.constant 0 : index
      %c0_13 = arith.constant 0 : index
      %23 = vector.load %arg5[%c0_12, %c0_13] : memref<1x64xf32, #tpu.memory_space<vmem>>, vector<1x64xf32>
      %24 = vector.broadcast %23 : vector<1x64xf32> to vector<128x64xf32>
      %25 = arith.addf %22, %24 : vector<128x64xf32>
      %cst_14 = arith.constant dense<0.000000e+00> : vector<64xf32>
      %26 = vector.multi_reduction <add>, %25, %cst_14 [0] : vector<128x64xf32> to vector<64xf32>
      %27 = vector.shape_cast %26 : vector<64xf32> to vector<1x64xf32>
      %28 = arith.mulf %25, %25 : vector<128x64xf32>
      %cst_15 = arith.constant dense<0.000000e+00> : vector<64xf32>
      %29 = vector.multi_reduction <add>, %28, %cst_15 [0] : vector<128x64xf32> to vector<64xf32>
      %30 = vector.shape_cast %29 : vector<64xf32> to vector<1x64xf32>
      %31 = arith.extui %2 : i1 to i32
      %c0_i32_16 = arith.constant 0 : i32
      %32 = arith.cmpi ne, %31, %c0_i32_16 : i32
      scf.if %32 {
        %cst_25 = arith.constant 0.000000e+00 : f32
        %41 = vector.broadcast %cst_25 : f32 to vector<1x64xf32>
        %c0_26 = arith.constant 0 : index
        %c0_27 = arith.constant 0 : index
        %42 = vector.load %arg28[%c0_26, %c0_27] : memref<4x64xf32, #tpu.memory_space<vmem>>, vector<1x64xf32>
        tpu.vector_store %arg28[%c0_26, %c0_27], %41 {strides = array<i32>} : memref<4x64xf32, #tpu.memory_space<vmem>>, vector<1x64xf32>,
        %cst_28 = arith.constant 0.000000e+00 : f32
        %43 = vector.broadcast %cst_28 : f32 to vector<1x64xf32>
        %c1_29 = arith.constant 1 : index
        %c0_30 = arith.constant 0 : index
        %44 = vector.load %arg28[%c1_29, %c0_30] : memref<4x64xf32, #tpu.memory_space<vmem>>, vector<1x64xf32>
        tpu.vector_store %arg28[%c1_29, %c0_30], %43 {strides = array<i32>} : memref<4x64xf32, #tpu.memory_space<vmem>>, vector<1x64xf32>,
      } else {
      }
      %c0_17 = arith.constant 0 : index
      %c0_18 = arith.constant 0 : index
      %33 = vector.load %arg28[%c0_17, %c0_18] : memref<4x64xf32, #tpu.memory_space<vmem>>, vector<1x64xf32>
      %34 = arith.addf %33, %27 : vector<1x64xf32>
      %c0_19 = arith.constant 0 : index
      %c0_20 = arith.constant 0 : index
      %35 = vector.load %arg28[%c0_19, %c0_20] : memref<4x64xf32, #tpu.memory_space<vmem>>, vector<1x64xf32>
      tpu.vector_store %arg28[%c0_19, %c0_20], %34 {strides = array<i32>} : memref<4x64xf32, #tpu.memory_space<vmem>>, vector<1x64xf32>,
      %c1 = arith.constant 1 : index
      %c0_21 = arith.constant 0 : index
      %36 = vector.load %arg28[%c1, %c0_21] : memref<4x64xf32, #tpu.memory_space<vmem>>, vector<1x64xf32>
      %37 = arith.addf %36, %30 : vector<1x64xf32>
      %c1_22 = arith.constant 1 : index
      %c0_23 = arith.constant 0 : index
      %38 = vector.load %arg28[%c1_22, %c0_23] : memref<4x64xf32, #tpu.memory_space<vmem>>, vector<1x64xf32>
      tpu.vector_store %arg28[%c1_22, %c0_23], %37 {strides = array<i32>} : memref<4x64xf32, #tpu.memory_space<vmem>>, vector<1x64xf32>,
      %39 = arith.extui %5 : i1 to i32
      %c0_i32_24 = arith.constant 0 : i32
      %40 = arith.cmpi ne, %39, %c0_i32_24 : i32
      scf.if %40 {
        %c0_25 = arith.constant 0 : index
        %c0_26 = arith.constant 0 : index
        %41 = vector.load %arg28[%c0_25, %c0_26] : memref<4x64xf32, #tpu.memory_space<vmem>>, vector<1x64xf32>
        %cst_27 = arith.constant 9.765625E-4 : f32
        %42 = vector.broadcast %cst_27 : f32 to vector<1x64xf32>
        %43 = arith.mulf %41, %42 : vector<1x64xf32>
        %c1_28 = arith.constant 1 : index
        %c0_29 = arith.constant 0 : index
        %44 = vector.load %arg28[%c1_28, %c0_29] : memref<4x64xf32, #tpu.memory_space<vmem>>, vector<1x64xf32>
        %cst_30 = arith.constant 9.765625E-4 : f32
        %45 = vector.broadcast %cst_30 : f32 to vector<1x64xf32>
        %46 = arith.mulf %44, %45 : vector<1x64xf32>
        %47 = arith.mulf %43, %43 : vector<1x64xf32>
        %48 = arith.subf %46, %47 : vector<1x64xf32>
        %c0_31 = arith.constant 0 : index
        %c0_32 = arith.constant 0 : index
        %49 = vector.load %arg6[%c0_31, %c0_32] : memref<1x64xf32, #tpu.memory_space<vmem>>, vector<1x64xf32>
        %cst_33 = arith.constant 9.99999974E-6 : f32
        %50 = vector.broadcast %cst_33 : f32 to vector<1x64xf32>
        %51 = arith.addf %48, %50 : vector<1x64xf32>
        %52 = math.rsqrt %51 : vector<1x64xf32>
        %53 = arith.mulf %49, %52 : vector<1x64xf32>
        %c2 = arith.constant 2 : index
        %c0_34 = arith.constant 0 : index
        %54 = vector.load %arg28[%c2, %c0_34] : memref<4x64xf32, #tpu.memory_space<vmem>>, vector<1x64xf32>
        tpu.vector_store %arg28[%c2, %c0_34], %53 {strides = array<i32>} : memref<4x64xf32, #tpu.memory_space<vmem>>, vector<1x64xf32>,
        %c0_35 = arith.constant 0 : index
        %c0_36 = arith.constant 0 : index
        %55 = vector.load %arg7[%c0_35, %c0_36] : memref<1x64xf32, #tpu.memory_space<vmem>>, vector<1x64xf32>
        %56 = arith.mulf %43, %53 : vector<1x64xf32>
        %57 = arith.subf %55, %56 : vector<1x64xf32>
        %c3 = arith.constant 3 : index
        %c0_37 = arith.constant 0 : index
        %58 = vector.load %arg28[%c3, %c0_37] : memref<4x64xf32, #tpu.memory_space<vmem>>, vector<1x64xf32>
        tpu.vector_store %arg28[%c3, %c0_37], %57 {strides = array<i32>} : memref<4x64xf32, #tpu.memory_space<vmem>>, vector<1x64xf32>,
      } else {
      }
    } else {
    }
    %c1_i32_3 = arith.constant 1 : i32
    %9 = arith.cmpi eq, %arg0, %c1_i32_3 : i32
    %10 = arith.extui %9 : i1 to i32
    %c0_i32_4 = arith.constant 0 : i32
    %11 = arith.cmpi ne, %10, %c0_i32_4 : i32
    scf.if %11 {
      %c0 = arith.constant 0 : index
      %c0_8 = arith.constant 0 : index
      %18 = vector.load %arg4[%c0, %c0_8] : memref<64x4xf32, #tpu.memory_space<vmem>>, vector<64x4xf32>
      %c0_9 = arith.constant 0 : index
      %c0_10 = arith.constant 0 : index
      %c0_11 = arith.constant 0 : index
      %19 = vector.load %arg3[%c0_9, %c0_10, %c0_11] : memref<1x4x128xf32, #tpu.memory_space<vmem>>, vector<1x4x128xf32>
      %20 = vector.shape_cast %19 : vector<1x4x128xf32> to vector<4x128xf32>
      %cst = arith.constant dense<0.000000e+00> : vector<64x128xf32>
      %21 = tpu.matmul %18, %20, %cst {dimension_numbers = #tpu.dot_dimension_numbers<[1], [0], [0], [1], [0, 0, 1, 1], [], []>} : vector<64x4xf32>, vector<4x128xf32>, vector<64x128xf32> -> vector<64x128xf32>
      %22 = tpu.transpose %21, [1, 0] : vector<64x128xf32> -> vector<128x64xf32>
      %c0_12 = arith.constant 0 : index
      %c0_13 = arith.constant 0 : index
      %23 = vector.load %arg5[%c0_12, %c0_13] : memref<1x64xf32, #tpu.memory_space<vmem>>, vector<1x64xf32>
      %24 = vector.broadcast %23 : vector<1x64xf32> to vector<128x64xf32>
      %25 = arith.addf %22, %24 : vector<128x64xf32>
      %c2 = arith.constant 2 : index
      %c0_14 = arith.constant 0 : index
      %26 = vector.load %arg28[%c2, %c0_14] : memref<4x64xf32, #tpu.memory_space<vmem>>, vector<1x64xf32>
      %27 = vector.broadcast %26 : vector<1x64xf32> to vector<128x64xf32>
      %28 = arith.mulf %25, %27 : vector<128x64xf32>
      %c3 = arith.constant 3 : index
      %c0_15 = arith.constant 0 : index
      %29 = vector.load %arg28[%c3, %c0_15] : memref<4x64xf32, #tpu.memory_space<vmem>>, vector<1x64xf32>
      %30 = vector.broadcast %29 : vector<1x64xf32> to vector<128x64xf32>
      %31 = arith.addf %28, %30 : vector<128x64xf32>
      %cst_16 = arith.constant 0.000000e+00 : f32
      %32 = vector.broadcast %cst_16 : f32 to vector<128x64xf32>
      %33 = arith.maximumf %31, %32 : vector<128x64xf32>
      %34 = arith.truncf %33 : vector<128x64xf32> to vector<128x64xbf16>
      %c0_17 = arith.constant 0 : index
      %c0_18 = arith.constant 0 : index
      %35 = vector.load %arg8[%c0_17, %c0_18] : memref<64x128xbf16, #tpu.memory_space<vmem>>, vector<64x128xbf16>
      %cst_19 = arith.constant dense<0.000000e+00> : vector<128x128xf32>
      %36 = tpu.matmul %34, %35, %cst_19 {dimension_numbers = #tpu.dot_dimension_numbers<[1], [0], [0], [1], [0, 0, 1, 1], [], []>} : vector<128x64xbf16>, vector<64x128xbf16>, vector<128x128xf32> -> vector<128x128xf32>
      %c0_20 = arith.constant 0 : index
      %c0_21 = arith.constant 0 : index
      %37 = vector.load %arg9[%c0_20, %c0_21] : memref<1x128xf32, #tpu.memory_space<vmem>>, vector<1x128xf32>
      %38 = vector.broadcast %37 : vector<1x128xf32> to vector<128x128xf32>
      %39 = arith.addf %36, %38 : vector<128x128xf32>
      %cst_22 = arith.constant dense<0.000000e+00> : vector<128xf32>
      %40 = vector.multi_reduction <add>, %39, %cst_22 [0] : vector<128x128xf32> to vector<128xf32>
      %41 = vector.shape_cast %40 : vector<128xf32> to vector<1x128xf32>
      %42 = arith.mulf %39, %39 : vector<128x128xf32>
      %cst_23 = arith.constant dense<0.000000e+00> : vector<128xf32>
      %43 = vector.multi_reduction <add>, %42, %cst_23 [0] : vector<128x128xf32> to vector<128xf32>
      %44 = vector.shape_cast %43 : vector<128xf32> to vector<1x128xf32>
      %45 = arith.extui %2 : i1 to i32
      %c0_i32_24 = arith.constant 0 : i32
      %46 = arith.cmpi ne, %45, %c0_i32_24 : i32
      scf.if %46 {
        %cst_33 = arith.constant 0.000000e+00 : f32
        %55 = vector.broadcast %cst_33 : f32 to vector<1x128xf32>
        %c0_34 = arith.constant 0 : index
        %c0_35 = arith.constant 0 : index
        %56 = vector.load %arg29[%c0_34, %c0_35] : memref<4x128xf32, #tpu.memory_space<vmem>>, vector<1x128xf32>
        tpu.vector_store %arg29[%c0_34, %c0_35], %55 {strides = array<i32>} : memref<4x128xf32, #tpu.memory_space<vmem>>, vector<1x128xf32>,
        %cst_36 = arith.constant 0.000000e+00 : f32
        %57 = vector.broadcast %cst_36 : f32 to vector<1x128xf32>
        %c1_37 = arith.constant 1 : index
        %c0_38 = arith.constant 0 : index
        %58 = vector.load %arg29[%c1_37, %c0_38] : memref<4x128xf32, #tpu.memory_space<vmem>>, vector<1x128xf32>
        tpu.vector_store %arg29[%c1_37, %c0_38], %57 {strides = array<i32>} : memref<4x128xf32, #tpu.memory_space<vmem>>, vector<1x128xf32>,
      } else {
      }
      %c0_25 = arith.constant 0 : index
      %c0_26 = arith.constant 0 : index
      %47 = vector.load %arg29[%c0_25, %c0_26] : memref<4x128xf32, #tpu.memory_space<vmem>>, vector<1x128xf32>
      %48 = arith.addf %47, %41 : vector<1x128xf32>
      %c0_27 = arith.constant 0 : index
      %c0_28 = arith.constant 0 : index
      %49 = vector.load %arg29[%c0_27, %c0_28] : memref<4x128xf32, #tpu.memory_space<vmem>>, vector<1x128xf32>
      tpu.vector_store %arg29[%c0_27, %c0_28], %48 {strides = array<i32>} : memref<4x128xf32, #tpu.memory_space<vmem>>, vector<1x128xf32>,
      %c1 = arith.constant 1 : index
      %c0_29 = arith.constant 0 : index
      %50 = vector.load %arg29[%c1, %c0_29] : memref<4x128xf32, #tpu.memory_space<vmem>>, vector<1x128xf32>
      %51 = arith.addf %50, %44 : vector<1x128xf32>
      %c1_30 = arith.constant 1 : index
      %c0_31 = arith.constant 0 : index
      %52 = vector.load %arg29[%c1_30, %c0_31] : memref<4x128xf32, #tpu.memory_space<vmem>>, vector<1x128xf32>
      tpu.vector_store %arg29[%c1_30, %c0_31], %51 {strides = array<i32>} : memref<4x128xf32, #tpu.memory_space<vmem>>, vector<1x128xf32>,
      %53 = arith.extui %5 : i1 to i32
      %c0_i32_32 = arith.constant 0 : i32
      %54 = arith.cmpi ne, %53, %c0_i32_32 : i32
      scf.if %54 {
        %c0_33 = arith.constant 0 : index
        %c0_34 = arith.constant 0 : index
        %55 = vector.load %arg29[%c0_33, %c0_34] : memref<4x128xf32, #tpu.memory_space<vmem>>, vector<1x128xf32>
        %cst_35 = arith.constant 9.765625E-4 : f32
        %56 = vector.broadcast %cst_35 : f32 to vector<1x128xf32>
        %57 = arith.mulf %55, %56 : vector<1x128xf32>
        %c1_36 = arith.constant 1 : index
        %c0_37 = arith.constant 0 : index
        %58 = vector.load %arg29[%c1_36, %c0_37] : memref<4x128xf32, #tpu.memory_space<vmem>>, vector<1x128xf32>
        %cst_38 = arith.constant 9.765625E-4 : f32
        %59 = vector.broadcast %cst_38 : f32 to vector<1x128xf32>
        %60 = arith.mulf %58, %59 : vector<1x128xf32>
        %61 = arith.mulf %57, %57 : vector<1x128xf32>
        %62 = arith.subf %60, %61 : vector<1x128xf32>
        %c0_39 = arith.constant 0 : index
        %c0_40 = arith.constant 0 : index
        %63 = vector.load %arg10[%c0_39, %c0_40] : memref<1x128xf32, #tpu.memory_space<vmem>>, vector<1x128xf32>
        %cst_41 = arith.constant 9.99999974E-6 : f32
        %64 = vector.broadcast %cst_41 : f32 to vector<1x128xf32>
        %65 = arith.addf %62, %64 : vector<1x128xf32>
        %66 = math.rsqrt %65 : vector<1x128xf32>
        %67 = arith.mulf %63, %66 : vector<1x128xf32>
        %c2_42 = arith.constant 2 : index
        %c0_43 = arith.constant 0 : index
        %68 = vector.load %arg29[%c2_42, %c0_43] : memref<4x128xf32, #tpu.memory_space<vmem>>, vector<1x128xf32>
        tpu.vector_store %arg29[%c2_42, %c0_43], %67 {strides = array<i32>} : memref<4x128xf32, #tpu.memory_space<vmem>>, vector<1x128xf32>,
        %c0_44 = arith.constant 0 : index
        %c0_45 = arith.constant 0 : index
        %69 = vector.load %arg11[%c0_44, %c0_45] : memref<1x128xf32, #tpu.memory_space<vmem>>, vector<1x128xf32>
        %70 = arith.mulf %57, %67 : vector<1x128xf32>
        %71 = arith.subf %69, %70 : vector<1x128xf32>
        %c3_46 = arith.constant 3 : index
        %c0_47 = arith.constant 0 : index
        %72 = vector.load %arg29[%c3_46, %c0_47] : memref<4x128xf32, #tpu.memory_space<vmem>>, vector<1x128xf32>
        tpu.vector_store %arg29[%c3_46, %c0_47], %71 {strides = array<i32>} : memref<4x128xf32, #tpu.memory_space<vmem>>, vector<1x128xf32>,
      } else {
      }
    } else {
    }
    %c2_i32 = arith.constant 2 : i32
    %12 = arith.cmpi eq, %arg0, %c2_i32 : i32
    %13 = arith.extui %12 : i1 to i32
    %c0_i32_5 = arith.constant 0 : i32
    %14 = arith.cmpi ne, %13, %c0_i32_5 : i32
    scf.if %14 {
      %c0 = arith.constant 0 : index
      %c0_8 = arith.constant 0 : index
      %18 = vector.load %arg4[%c0, %c0_8] : memref<64x4xf32, #tpu.memory_space<vmem>>, vector<64x4xf32>
      %c0_9 = arith.constant 0 : index
      %c0_10 = arith.constant 0 : index
      %c0_11 = arith.constant 0 : index
      %19 = vector.load %arg3[%c0_9, %c0_10, %c0_11] : memref<1x4x128xf32, #tpu.memory_space<vmem>>, vector<1x4x128xf32>
      %20 = vector.shape_cast %19 : vector<1x4x128xf32> to vector<4x128xf32>
      %cst = arith.constant dense<0.000000e+00> : vector<64x128xf32>
      %21 = tpu.matmul %18, %20, %cst {dimension_numbers = #tpu.dot_dimension_numbers<[1], [0], [0], [1], [0, 0, 1, 1], [], []>} : vector<64x4xf32>, vector<4x128xf32>, vector<64x128xf32> -> vector<64x128xf32>
      %22 = tpu.transpose %21, [1, 0] : vector<64x128xf32> -> vector<128x64xf32>
      %c0_12 = arith.constant 0 : index
      %c0_13 = arith.constant 0 : index
      %23 = vector.load %arg5[%c0_12, %c0_13] : memref<1x64xf32, #tpu.memory_space<vmem>>, vector<1x64xf32>
      %24 = vector.broadcast %23 : vector<1x64xf32> to vector<128x64xf32>
      %25 = arith.addf %22, %24 : vector<128x64xf32>
      %c2 = arith.constant 2 : index
      %c0_14 = arith.constant 0 : index
      %26 = vector.load %arg28[%c2, %c0_14] : memref<4x64xf32, #tpu.memory_space<vmem>>, vector<1x64xf32>
      %27 = vector.broadcast %26 : vector<1x64xf32> to vector<128x64xf32>
      %28 = arith.mulf %25, %27 : vector<128x64xf32>
      %c3 = arith.constant 3 : index
      %c0_15 = arith.constant 0 : index
      %29 = vector.load %arg28[%c3, %c0_15] : memref<4x64xf32, #tpu.memory_space<vmem>>, vector<1x64xf32>
      %30 = vector.broadcast %29 : vector<1x64xf32> to vector<128x64xf32>
      %31 = arith.addf %28, %30 : vector<128x64xf32>
      %cst_16 = arith.constant 0.000000e+00 : f32
      %32 = vector.broadcast %cst_16 : f32 to vector<128x64xf32>
      %33 = arith.maximumf %31, %32 : vector<128x64xf32>
      %34 = arith.truncf %33 : vector<128x64xf32> to vector<128x64xbf16>
      %c0_17 = arith.constant 0 : index
      %c0_18 = arith.constant 0 : index
      %35 = vector.load %arg8[%c0_17, %c0_18] : memref<64x128xbf16, #tpu.memory_space<vmem>>, vector<64x128xbf16>
      %cst_19 = arith.constant dense<0.000000e+00> : vector<128x128xf32>
      %36 = tpu.matmul %34, %35, %cst_19 {dimension_numbers = #tpu.dot_dimension_numbers<[1], [0], [0], [1], [0, 0, 1, 1], [], []>} : vector<128x64xbf16>, vector<64x128xbf16>, vector<128x128xf32> -> vector<128x128xf32>
      %c0_20 = arith.constant 0 : index
      %c0_21 = arith.constant 0 : index
      %37 = vector.load %arg9[%c0_20, %c0_21] : memref<1x128xf32, #tpu.memory_space<vmem>>, vector<1x128xf32>
      %38 = vector.broadcast %37 : vector<1x128xf32> to vector<128x128xf32>
      %39 = arith.addf %36, %38 : vector<128x128xf32>
      %c2_22 = arith.constant 2 : index
      %c0_23 = arith.constant 0 : index
      %40 = vector.load %arg29[%c2_22, %c0_23] : memref<4x128xf32, #tpu.memory_space<vmem>>, vector<1x128xf32>
      %41 = vector.broadcast %40 : vector<1x128xf32> to vector<128x128xf32>
      %42 = arith.mulf %39, %41 : vector<128x128xf32>
      %c3_24 = arith.constant 3 : index
      %c0_25 = arith.constant 0 : index
      %43 = vector.load %arg29[%c3_24, %c0_25] : memref<4x128xf32, #tpu.memory_space<vmem>>, vector<1x128xf32>
      %44 = vector.broadcast %43 : vector<1x128xf32> to vector<128x128xf32>
      %45 = arith.addf %42, %44 : vector<128x128xf32>
      %cst_26 = arith.constant 0.000000e+00 : f32
      %46 = vector.broadcast %cst_26 : f32 to vector<128x128xf32>
      %47 = arith.maximumf %45, %46 : vector<128x128xf32>
      %48 = arith.truncf %47 : vector<128x128xf32> to vector<128x128xbf16>
      %c0_27 = arith.constant 0 : index
      %c0_28 = arith.constant 0 : index
      %49 = vector.load %arg12[%c0_27, %c0_28] : memref<128x1024xbf16, #tpu.memory_space<vmem>>, vector<128x1024xbf16>
      %cst_29 = arith.constant dense<0.000000e+00> : vector<128x1024xf32>
      %50 = tpu.matmul %48, %49, %cst_29 {dimension_numbers = #tpu.dot_dimension_numbers<[1], [0], [0], [1], [0, 0, 1, 1], [], []>} : vector<128x128xbf16>, vector<128x1024xbf16>, vector<128x1024xf32> -> vector<128x1024xf32>
      %c0_30 = arith.constant 0 : index
      %c0_31 = arith.constant 0 : index
      %51 = vector.load %arg13[%c0_30, %c0_31] : memref<1x1024xf32, #tpu.memory_space<vmem>>, vector<1x1024xf32>
      %52 = vector.broadcast %51 : vector<1x1024xf32> to vector<128x1024xf32>
      %53 = arith.addf %50, %52 : vector<128x1024xf32>
      %cst_32 = arith.constant dense<0.000000e+00> : vector<1024xf32>
      %54 = vector.multi_reduction <add>, %53, %cst_32 [0] : vector<128x1024xf32> to vector<1024xf32>
      %55 = vector.shape_cast %54 : vector<1024xf32> to vector<1x1024xf32>
      %56 = arith.mulf %53, %53 : vector<128x1024xf32>
      %cst_33 = arith.constant dense<0.000000e+00> : vector<1024xf32>
      %57 = vector.multi_reduction <add>, %56, %cst_33 [0] : vector<128x1024xf32> to vector<1024xf32>
      %58 = vector.shape_cast %57 : vector<1024xf32> to vector<1x1024xf32>
      %59 = arith.extui %2 : i1 to i32
      %c0_i32_34 = arith.constant 0 : i32
      %60 = arith.cmpi ne, %59, %c0_i32_34 : i32
      scf.if %60 {
        %cst_43 = arith.constant 0.000000e+00 : f32
        %69 = vector.broadcast %cst_43 : f32 to vector<1x1024xf32>
        %c0_44 = arith.constant 0 : index
        %c0_45 = arith.constant 0 : index
        %70 = vector.load %arg30[%c0_44, %c0_45] : memref<4x1024xf32, #tpu.memory_space<vmem>>, vector<1x1024xf32>
        tpu.vector_store %arg30[%c0_44, %c0_45], %69 {strides = array<i32>} : memref<4x1024xf32, #tpu.memory_space<vmem>>, vector<1x1024xf32>,
        %cst_46 = arith.constant 0.000000e+00 : f32
        %71 = vector.broadcast %cst_46 : f32 to vector<1x1024xf32>
        %c1_47 = arith.constant 1 : index
        %c0_48 = arith.constant 0 : index
        %72 = vector.load %arg30[%c1_47, %c0_48] : memref<4x1024xf32, #tpu.memory_space<vmem>>, vector<1x1024xf32>
        tpu.vector_store %arg30[%c1_47, %c0_48], %71 {strides = array<i32>} : memref<4x1024xf32, #tpu.memory_space<vmem>>, vector<1x1024xf32>,
      } else {
      }
      %c0_35 = arith.constant 0 : index
      %c0_36 = arith.constant 0 : index
      %61 = vector.load %arg30[%c0_35, %c0_36] : memref<4x1024xf32, #tpu.memory_space<vmem>>, vector<1x1024xf32>
      %62 = arith.addf %61, %55 : vector<1x1024xf32>
      %c0_37 = arith.constant 0 : index
      %c0_38 = arith.constant 0 : index
      %63 = vector.load %arg30[%c0_37, %c0_38] : memref<4x1024xf32, #tpu.memory_space<vmem>>, vector<1x1024xf32>
      tpu.vector_store %arg30[%c0_37, %c0_38], %62 {strides = array<i32>} : memref<4x1024xf32, #tpu.memory_space<vmem>>, vector<1x1024xf32>,
      %c1 = arith.constant 1 : index
      %c0_39 = arith.constant 0 : index
      %64 = vector.load %arg30[%c1, %c0_39] : memref<4x1024xf32, #tpu.memory_space<vmem>>, vector<1x1024xf32>
      %65 = arith.addf %64, %58 : vector<1x1024xf32>
      %c1_40 = arith.constant 1 : index
      %c0_41 = arith.constant 0 : index
      %66 = vector.load %arg30[%c1_40, %c0_41] : memref<4x1024xf32, #tpu.memory_space<vmem>>, vector<1x1024xf32>
      tpu.vector_store %arg30[%c1_40, %c0_41], %65 {strides = array<i32>} : memref<4x1024xf32, #tpu.memory_space<vmem>>, vector<1x1024xf32>,
      %67 = arith.extui %5 : i1 to i32
      %c0_i32_42 = arith.constant 0 : i32
      %68 = arith.cmpi ne, %67, %c0_i32_42 : i32
      scf.if %68 {
        %c0_43 = arith.constant 0 : index
        %c0_44 = arith.constant 0 : index
        %69 = vector.load %arg30[%c0_43, %c0_44] : memref<4x1024xf32, #tpu.memory_space<vmem>>, vector<1x1024xf32>
        %cst_45 = arith.constant 9.765625E-4 : f32
        %70 = vector.broadcast %cst_45 : f32 to vector<1x1024xf32>
        %71 = arith.mulf %69, %70 : vector<1x1024xf32>
        %c1_46 = arith.constant 1 : index
        %c0_47 = arith.constant 0 : index
        %72 = vector.load %arg30[%c1_46, %c0_47] : memref<4x1024xf32, #tpu.memory_space<vmem>>, vector<1x1024xf32>
        %cst_48 = arith.constant 9.765625E-4 : f32
        %73 = vector.broadcast %cst_48 : f32 to vector<1x1024xf32>
        %74 = arith.mulf %72, %73 : vector<1x1024xf32>
        %75 = arith.mulf %71, %71 : vector<1x1024xf32>
        %76 = arith.subf %74, %75 : vector<1x1024xf32>
        %c0_49 = arith.constant 0 : index
        %c0_50 = arith.constant 0 : index
        %77 = vector.load %arg14[%c0_49, %c0_50] : memref<1x1024xf32, #tpu.memory_space<vmem>>, vector<1x1024xf32>
        %cst_51 = arith.constant 9.99999974E-6 : f32
        %78 = vector.broadcast %cst_51 : f32 to vector<1x1024xf32>
        %79 = arith.addf %76, %78 : vector<1x1024xf32>
        %80 = math.rsqrt %79 : vector<1x1024xf32>
        %81 = arith.mulf %77, %80 : vector<1x1024xf32>
        %c2_52 = arith.constant 2 : index
        %c0_53 = arith.constant 0 : index
        %82 = vector.load %arg30[%c2_52, %c0_53] : memref<4x1024xf32, #tpu.memory_space<vmem>>, vector<1x1024xf32>
        tpu.vector_store %arg30[%c2_52, %c0_53], %81 {strides = array<i32>} : memref<4x1024xf32, #tpu.memory_space<vmem>>, vector<1x1024xf32>,
        %c0_54 = arith.constant 0 : index
        %c0_55 = arith.constant 0 : index
        %83 = vector.load %arg15[%c0_54, %c0_55] : memref<1x1024xf32, #tpu.memory_space<vmem>>, vector<1x1024xf32>
        %84 = arith.mulf %71, %81 : vector<1x1024xf32>
        %85 = arith.subf %83, %84 : vector<1x1024xf32>
        %c3_56 = arith.constant 3 : index
        %c0_57 = arith.constant 0 : index
        %86 = vector.load %arg30[%c3_56, %c0_57] : memref<4x1024xf32, #tpu.memory_space<vmem>>, vector<1x1024xf32>
        tpu.vector_store %arg30[%c3_56, %c0_57], %85 {strides = array<i32>} : memref<4x1024xf32, #tpu.memory_space<vmem>>, vector<1x1024xf32>,
      } else {
      }
    } else {
    }
    %c3_i32_6 = arith.constant 3 : i32
    %15 = arith.cmpi eq, %arg0, %c3_i32_6 : i32
    %16 = arith.extui %15 : i1 to i32
    %c0_i32_7 = arith.constant 0 : i32
    %17 = arith.cmpi ne, %16, %c0_i32_7 : i32
    scf.if %17 {
      %18 = arith.extui %2 : i1 to i32
      %c0_i32_8 = arith.constant 0 : i32
      %19 = arith.cmpi ne, %18, %c0_i32_8 : i32
      scf.if %19 {
        %cst_46 = arith.constant 0.000000e+00 : f32
        %79 = vector.broadcast %cst_46 : f32 to vector<4x1024xf32>
        %c0_47 = arith.constant 0 : index
        %c0_48 = arith.constant 0 : index
        %80 = vector.load %arg31[%c0_47, %c0_48] : memref<4x1024xf32, #tpu.memory_space<vmem>>, vector<4x1024xf32>
        tpu.vector_store %arg31[%c0_47, %c0_48], %79 {strides = array<i32>} : memref<4x1024xf32, #tpu.memory_space<vmem>>, vector<4x1024xf32>,
      } else {
      }
      %c0 = arith.constant 0 : index
      %c0_9 = arith.constant 0 : index
      %20 = vector.load %arg4[%c0, %c0_9] : memref<64x4xf32, #tpu.memory_space<vmem>>, vector<64x4xf32>
      %c0_10 = arith.constant 0 : index
      %c0_11 = arith.constant 0 : index
      %c0_12 = arith.constant 0 : index
      %21 = vector.load %arg3[%c0_10, %c0_11, %c0_12] : memref<1x4x128xf32, #tpu.memory_space<vmem>>, vector<1x4x128xf32>
      %22 = vector.shape_cast %21 : vector<1x4x128xf32> to vector<4x128xf32>
      %cst = arith.constant dense<0.000000e+00> : vector<64x128xf32>
      %23 = tpu.matmul %20, %22, %cst {dimension_numbers = #tpu.dot_dimension_numbers<[1], [0], [0], [1], [0, 0, 1, 1], [], []>} : vector<64x4xf32>, vector<4x128xf32>, vector<64x128xf32> -> vector<64x128xf32>
      %24 = tpu.transpose %23, [1, 0] : vector<64x128xf32> -> vector<128x64xf32>
      %c0_13 = arith.constant 0 : index
      %c0_14 = arith.constant 0 : index
      %25 = vector.load %arg5[%c0_13, %c0_14] : memref<1x64xf32, #tpu.memory_space<vmem>>, vector<1x64xf32>
      %26 = vector.broadcast %25 : vector<1x64xf32> to vector<128x64xf32>
      %27 = arith.addf %24, %26 : vector<128x64xf32>
      %c2 = arith.constant 2 : index
      %c0_15 = arith.constant 0 : index
      %28 = vector.load %arg28[%c2, %c0_15] : memref<4x64xf32, #tpu.memory_space<vmem>>, vector<1x64xf32>
      %29 = vector.broadcast %28 : vector<1x64xf32> to vector<128x64xf32>
      %30 = arith.mulf %27, %29 : vector<128x64xf32>
      %c3 = arith.constant 3 : index
      %c0_16 = arith.constant 0 : index
      %31 = vector.load %arg28[%c3, %c0_16] : memref<4x64xf32, #tpu.memory_space<vmem>>, vector<1x64xf32>
      %32 = vector.broadcast %31 : vector<1x64xf32> to vector<128x64xf32>
      %33 = arith.addf %30, %32 : vector<128x64xf32>
      %cst_17 = arith.constant 0.000000e+00 : f32
      %34 = vector.broadcast %cst_17 : f32 to vector<128x64xf32>
      %35 = arith.maximumf %33, %34 : vector<128x64xf32>
      %36 = arith.truncf %35 : vector<128x64xf32> to vector<128x64xbf16>
      %c0_18 = arith.constant 0 : index
      %c0_19 = arith.constant 0 : index
      %37 = vector.load %arg8[%c0_18, %c0_19] : memref<64x128xbf16, #tpu.memory_space<vmem>>, vector<64x128xbf16>
      %cst_20 = arith.constant dense<0.000000e+00> : vector<128x128xf32>
      %38 = tpu.matmul %36, %37, %cst_20 {dimension_numbers = #tpu.dot_dimension_numbers<[1], [0], [0], [1], [0, 0, 1, 1], [], []>} : vector<128x64xbf16>, vector<64x128xbf16>, vector<128x128xf32> -> vector<128x128xf32>
      %c0_21 = arith.constant 0 : index
      %c0_22 = arith.constant 0 : index
      %39 = vector.load %arg9[%c0_21, %c0_22] : memref<1x128xf32, #tpu.memory_space<vmem>>, vector<1x128xf32>
      %40 = vector.broadcast %39 : vector<1x128xf32> to vector<128x128xf32>
      %41 = arith.addf %38, %40 : vector<128x128xf32>
      %c2_23 = arith.constant 2 : index
      %c0_24 = arith.constant 0 : index
      %42 = vector.load %arg29[%c2_23, %c0_24] : memref<4x128xf32, #tpu.memory_space<vmem>>, vector<1x128xf32>
      %43 = vector.broadcast %42 : vector<1x128xf32> to vector<128x128xf32>
      %44 = arith.mulf %41, %43 : vector<128x128xf32>
      %c3_25 = arith.constant 3 : index
      %c0_26 = arith.constant 0 : index
      %45 = vector.load %arg29[%c3_25, %c0_26] : memref<4x128xf32, #tpu.memory_space<vmem>>, vector<1x128xf32>
      %46 = vector.broadcast %45 : vector<1x128xf32> to vector<128x128xf32>
      %47 = arith.addf %44, %46 : vector<128x128xf32>
      %cst_27 = arith.constant 0.000000e+00 : f32
      %48 = vector.broadcast %cst_27 : f32 to vector<128x128xf32>
      %49 = arith.maximumf %47, %48 : vector<128x128xf32>
      %50 = arith.truncf %49 : vector<128x128xf32> to vector<128x128xbf16>
      %c0_28 = arith.constant 0 : index
      %c0_29 = arith.constant 0 : index
      %51 = vector.load %arg12[%c0_28, %c0_29] : memref<128x1024xbf16, #tpu.memory_space<vmem>>, vector<128x1024xbf16>
      %cst_30 = arith.constant dense<0.000000e+00> : vector<128x1024xf32>
      %52 = tpu.matmul %50, %51, %cst_30 {dimension_numbers = #tpu.dot_dimension_numbers<[1], [0], [0], [1], [0, 0, 1, 1], [], []>} : vector<128x128xbf16>, vector<128x1024xbf16>, vector<128x1024xf32> -> vector<128x1024xf32>
      %c0_31 = arith.constant 0 : index
      %c0_32 = arith.constant 0 : index
      %53 = vector.load %arg13[%c0_31, %c0_32] : memref<1x1024xf32, #tpu.memory_space<vmem>>, vector<1x1024xf32>
      %54 = vector.broadcast %53 : vector<1x1024xf32> to vector<128x1024xf32>
      %55 = arith.addf %52, %54 : vector<128x1024xf32>
      %c2_33 = arith.constant 2 : index
      %c0_34 = arith.constant 0 : index
      %56 = vector.load %arg30[%c2_33, %c0_34] : memref<4x1024xf32, #tpu.memory_space<vmem>>, vector<1x1024xf32>
      %57 = vector.broadcast %56 : vector<1x1024xf32> to vector<128x1024xf32>
      %58 = arith.mulf %55, %57 : vector<128x1024xf32>
      %c3_35 = arith.constant 3 : index
      %c0_36 = arith.constant 0 : index
      %59 = vector.load %arg30[%c3_35, %c0_36] : memref<4x1024xf32, #tpu.memory_space<vmem>>, vector<1x1024xf32>
      %60 = vector.broadcast %59 : vector<1x1024xf32> to vector<128x1024xf32>
      %61 = arith.addf %58, %60 : vector<128x1024xf32>
      %cst_37 = arith.constant 0.000000e+00 : f32
      %62 = vector.broadcast %cst_37 : f32 to vector<128x1024xf32>
      %63 = arith.maximumf %61, %62 : vector<128x1024xf32>
      %cst_38 = arith.constant dense<0xFF800000> : vector<1024xf32>
      %64 = vector.multi_reduction <maximumf>, %63, %cst_38 [0] : vector<128x1024xf32> to vector<1024xf32>
      %65 = vector.shape_cast %64 : vector<1024xf32> to vector<1x1024xf32>
      %66 = tpu.iota {dimensions = array<i32: 0>} : vector<4x1xi32>
      %67 = vector.broadcast %arg1 : i32 to vector<4x1xi32>
      %68 = arith.cmpi eq, %66, %67 : vector<4x1xi32>
      %c0_39 = arith.constant 0 : index
      %c0_40 = arith.constant 0 : index
      %69 = vector.load %arg31[%c0_39, %c0_40] : memref<4x1024xf32, #tpu.memory_space<vmem>>, vector<4x1024xf32>
      %70 = vector.broadcast %65 : vector<1x1024xf32> to vector<4x1024xf32>
      %71 = arith.maximumf %69, %70 : vector<4x1024xf32>
      %c0_41 = arith.constant 0 : index
      %c0_42 = arith.constant 0 : index
      %72 = vector.load %arg31[%c0_41, %c0_42] : memref<4x1024xf32, #tpu.memory_space<vmem>>, vector<4x1024xf32>
      %73 = vector.shape_cast %68 : vector<4x1xi1> to vector<4x1xi1>
      %74 = vector.broadcast %73 : vector<4x1xi1> to vector<4x1024xi1>
      %75 = arith.select %74, %71, %72 : vector<4x1024xi1>, vector<4x1024xf32>
      %c0_43 = arith.constant 0 : index
      %c0_44 = arith.constant 0 : index
      %76 = vector.load %arg31[%c0_43, %c0_44] : memref<4x1024xf32, #tpu.memory_space<vmem>>, vector<4x1024xf32>
      tpu.vector_store %arg31[%c0_43, %c0_44], %75 {strides = array<i32>} : memref<4x1024xf32, #tpu.memory_space<vmem>>, vector<4x1024xf32>,
      %77 = arith.extui %5 : i1 to i32
      %c0_i32_45 = arith.constant 0 : i32
      %78 = arith.cmpi ne, %77, %c0_i32_45 : i32
      scf.if %78 {
        %c0_46 = arith.constant 0 : index
        %c0_47 = arith.constant 0 : index
        %79 = vector.load %arg31[%c0_46, %c0_47] : memref<4x1024xf32, #tpu.memory_space<vmem>>, vector<4x1024xf32>
        %c0_48 = arith.constant 0 : index
        %c0_49 = arith.constant 0 : index
        %80 = vector.load %arg16[%c0_48, %c0_49] : memref<1024x512xf32, #tpu.memory_space<vmem>>, vector<1024x512xf32>
        %cst_50 = arith.constant dense<0.000000e+00> : vector<4x512xf32>
        %81 = tpu.matmul %79, %80, %cst_50 {dimension_numbers = #tpu.dot_dimension_numbers<[1], [0], [0], [1], [0, 0, 1, 1], [], []>} : vector<4x1024xf32>, vector<1024x512xf32>, vector<4x512xf32> -> vector<4x512xf32>
        %c0_51 = arith.constant 0 : index
        %c0_52 = arith.constant 0 : index
        %82 = vector.load %arg17[%c0_51, %c0_52] : memref<1x512xf32, #tpu.memory_space<vmem>>, vector<1x512xf32>
        %83 = vector.broadcast %82 : vector<1x512xf32> to vector<4x512xf32>
        %84 = arith.addf %81, %83 : vector<4x512xf32>
        %c0_53 = arith.constant 0 : index
        %c0_54 = arith.constant 0 : index
        %85 = vector.load %arg18[%c0_53, %c0_54] : memref<1x512xf32, #tpu.memory_space<vmem>>, vector<1x512xf32>
        %c0_55 = arith.constant 0 : index
        %c0_56 = arith.constant 0 : index
        %86 = vector.load %arg19[%c0_55, %c0_56] : memref<1x512xf32, #tpu.memory_space<vmem>>, vector<1x512xf32>
        %cst_57 = arith.constant dense<0.000000e+00> : vector<512xf32>
        %87 = vector.multi_reduction <add>, %84, %cst_57 [0] : vector<4x512xf32> to vector<512xf32>
        %88 = vector.shape_cast %87 : vector<512xf32> to vector<1x512xf32>
        %cst_58 = arith.constant 4.000000e+00 : f32
        %89 = vector.broadcast %cst_58 : f32 to vector<1x512xf32>
        %90 = arith.divf %88, %89 : vector<1x512xf32>
        %91 = arith.mulf %84, %84 : vector<4x512xf32>
        %cst_59 = arith.constant dense<0.000000e+00> : vector<512xf32>
        %92 = vector.multi_reduction <add>, %91, %cst_59 [0] : vector<4x512xf32> to vector<512xf32>
        %93 = vector.shape_cast %92 : vector<512xf32> to vector<1x512xf32>
        %cst_60 = arith.constant 4.000000e+00 : f32
        %94 = vector.broadcast %cst_60 : f32 to vector<1x512xf32>
        %95 = arith.divf %93, %94 : vector<1x512xf32>
        %96 = arith.mulf %90, %90 : vector<1x512xf32>
        %97 = arith.subf %95, %96 : vector<1x512xf32>
        %98 = vector.broadcast %90 : vector<1x512xf32> to vector<4x512xf32>
        %99 = arith.subf %84, %98 : vector<4x512xf32>
        %100 = vector.broadcast %85 : vector<1x512xf32> to vector<4x512xf32>
        %101 = arith.mulf %100, %99 : vector<4x512xf32>
        %cst_61 = arith.constant 9.99999974E-6 : f32
        %102 = vector.broadcast %cst_61 : f32 to vector<1x512xf32>
        %103 = arith.addf %97, %102 : vector<1x512xf32>
        %104 = math.rsqrt %103 : vector<1x512xf32>
        %105 = vector.broadcast %104 : vector<1x512xf32> to vector<4x512xf32>
        %106 = arith.mulf %101, %105 : vector<4x512xf32>
        %107 = vector.broadcast %86 : vector<1x512xf32> to vector<4x512xf32>
        %108 = arith.addf %106, %107 : vector<4x512xf32>
        %cst_62 = arith.constant 0.000000e+00 : f32
        %109 = vector.broadcast %cst_62 : f32 to vector<4x512xf32>
        %110 = arith.maximumf %108, %109 : vector<4x512xf32>
        %c0_63 = arith.constant 0 : index
        %c0_64 = arith.constant 0 : index
        %111 = vector.load %arg20[%c0_63, %c0_64] : memref<512x256xf32, #tpu.memory_space<vmem>>, vector<512x256xf32>
        %cst_65 = arith.constant dense<0.000000e+00> : vector<4x256xf32>
        %112 = tpu.matmul %110, %111, %cst_65 {dimension_numbers = #tpu.dot_dimension_numbers<[1], [0], [0], [1], [0, 0, 1, 1], [], []>} : vector<4x512xf32>, vector<512x256xf32>, vector<4x256xf32> -> vector<4x256xf32>
        %c0_66 = arith.constant 0 : index
        %c0_67 = arith.constant 0 : index
        %113 = vector.load %arg21[%c0_66, %c0_67] : memref<1x256xf32, #tpu.memory_space<vmem>>, vector<1x256xf32>
        %114 = vector.broadcast %113 : vector<1x256xf32> to vector<4x256xf32>
        %115 = arith.addf %112, %114 : vector<4x256xf32>
        %c0_68 = arith.constant 0 : index
        %c0_69 = arith.constant 0 : index
        %116 = vector.load %arg22[%c0_68, %c0_69] : memref<1x256xf32, #tpu.memory_space<vmem>>, vector<1x256xf32>
        %c0_70 = arith.constant 0 : index
        %c0_71 = arith.constant 0 : index
        %117 = vector.load %arg23[%c0_70, %c0_71] : memref<1x256xf32, #tpu.memory_space<vmem>>, vector<1x256xf32>
        %cst_72 = arith.constant dense<0.000000e+00> : vector<256xf32>
        %118 = vector.multi_reduction <add>, %115, %cst_72 [0] : vector<4x256xf32> to vector<256xf32>
        %119 = vector.shape_cast %118 : vector<256xf32> to vector<1x256xf32>
        %cst_73 = arith.constant 4.000000e+00 : f32
        %120 = vector.broadcast %cst_73 : f32 to vector<1x256xf32>
        %121 = arith.divf %119, %120 : vector<1x256xf32>
        %122 = arith.mulf %115, %115 : vector<4x256xf32>
        %cst_74 = arith.constant dense<0.000000e+00> : vector<256xf32>
        %123 = vector.multi_reduction <add>, %122, %cst_74 [0] : vector<4x256xf32> to vector<256xf32>
        %124 = vector.shape_cast %123 : vector<256xf32> to vector<1x256xf32>
        %cst_75 = arith.constant 4.000000e+00 : f32
        %125 = vector.broadcast %cst_75 : f32 to vector<1x256xf32>
        %126 = arith.divf %124, %125 : vector<1x256xf32>
        %127 = arith.mulf %121, %121 : vector<1x256xf32>
        %128 = arith.subf %126, %127 : vector<1x256xf32>
        %129 = vector.broadcast %121 : vector<1x256xf32> to vector<4x256xf32>
        %130 = arith.subf %115, %129 : vector<4x256xf32>
        %131 = vector.broadcast %116 : vector<1x256xf32> to vector<4x256xf32>
        %132 = arith.mulf %131, %130 : vector<4x256xf32>
        %cst_76 = arith.constant 9.99999974E-6 : f32
        %133 = vector.broadcast %cst_76 : f32 to vector<1x256xf32>
        %134 = arith.addf %128, %133 : vector<1x256xf32>
        %135 = math.rsqrt %134 : vector<1x256xf32>
        %136 = vector.broadcast %135 : vector<1x256xf32> to vector<4x256xf32>
        %137 = arith.mulf %132, %136 : vector<4x256xf32>
        %138 = vector.broadcast %117 : vector<1x256xf32> to vector<4x256xf32>
        %139 = arith.addf %137, %138 : vector<4x256xf32>
        %cst_77 = arith.constant 0.000000e+00 : f32
        %140 = vector.broadcast %cst_77 : f32 to vector<4x256xf32>
        %141 = arith.maximumf %139, %140 : vector<4x256xf32>
        %c0_78 = arith.constant 0 : index
        %c0_79 = arith.constant 0 : index
        %142 = vector.load %arg24[%c0_78, %c0_79] : memref<256x9xf32, #tpu.memory_space<vmem>>, vector<256x9xf32>
        %cst_80 = arith.constant dense<0.000000e+00> : vector<4x9xf32>
        %143 = tpu.matmul %141, %142, %cst_80 {dimension_numbers = #tpu.dot_dimension_numbers<[1], [0], [0], [1], [0, 0, 1, 1], [], []>} : vector<4x256xf32>, vector<256x9xf32>, vector<4x9xf32> -> vector<4x9xf32>
        %c0_81 = arith.constant 0 : index
        %c0_82 = arith.constant 0 : index
        %144 = vector.load %arg25[%c0_81, %c0_82] : memref<1x9xf32, #tpu.memory_space<vmem>>, vector<1x9xf32>
        %145 = vector.broadcast %144 : vector<1x9xf32> to vector<4x9xf32>
        %146 = arith.addf %143, %145 : vector<4x9xf32>
        %c0_83 = arith.constant 0 : index
        %c0_84 = arith.constant 0 : index
        %147 = vector.load %arg26[%c0_83, %c0_84] : memref<1x9xf32, #tpu.memory_space<vmem>>, vector<1x9xf32>
        %148 = vector.broadcast %147 : vector<1x9xf32> to vector<4x9xf32>
        %149 = arith.addf %146, %148 : vector<4x9xf32>
        %c0_85 = arith.constant 0 : index
        %c0_86 = arith.constant 0 : index
        %150 = vector.load %arg27[%c0_85, %c0_86] : memref<4x9xf32, #tpu.memory_space<vmem>>, vector<4x9xf32>
        tpu.vector_store %arg27[%c0_85, %c0_86], %149 {strides = array<i32>} : memref<4x9xf32, #tpu.memory_space<vmem>>, vector<4x9xf32>,
      } else {
      }
    } else {
    }
    return
  }
  func.func @transform_0(%arg0: i32, %arg1: i32, %arg2: i32) -> (i32, i32, i32) {
    %c0_i32 = arith.constant 0 : i32
    %c0_i32_0 = arith.constant 0 : i32
    return %arg1, %c0_i32, %arg2 : i32, i32, i32
  }
  func.func @transform_1(%arg0: i32, %arg1: i32, %arg2: i32) -> (i32, i32) {
    %c0_i32 = arith.constant 0 : i32
    %c0_i32_0 = arith.constant 0 : i32
    %c0_i32_1 = arith.constant 0 : i32
    return %c0_i32, %c0_i32_0 : i32, i32
  }
  func.func @transform_2(%arg0: i32, %arg1: i32, %arg2: i32) -> (i32, i32) {
    %c0_i32 = arith.constant 0 : i32
    %c0_i32_0 = arith.constant 0 : i32
    %c0_i32_1 = arith.constant 0 : i32
    return %c0_i32, %c0_i32_0 : i32, i32
  }
  func.func @transform_3(%arg0: i32, %arg1: i32, %arg2: i32) -> (i32, i32) {
    %c0_i32 = arith.constant 0 : i32
    %c0_i32_0 = arith.constant 0 : i32
    %c0_i32_1 = arith.constant 0 : i32
    return %c0_i32, %c0_i32_0 : i32, i32
  }
  func.func @transform_4(%arg0: i32, %arg1: i32, %arg2: i32) -> (i32, i32) {
    %c0_i32 = arith.constant 0 : i32
    %c0_i32_0 = arith.constant 0 : i32
    %c0_i32_1 = arith.constant 0 : i32
    return %c0_i32, %c0_i32_0 : i32, i32
  }
  func.func @transform_5(%arg0: i32, %arg1: i32, %arg2: i32) -> (i32, i32) {
    %c0_i32 = arith.constant 0 : i32
    %c0_i32_0 = arith.constant 0 : i32
    %c0_i32_1 = arith.constant 0 : i32
    return %c0_i32, %c0_i32_0 : i32, i32
  }
  func.func @transform_6(%arg0: i32, %arg1: i32, %arg2: i32) -> (i32, i32) {
    %c0_i32 = arith.constant 0 : i32
    %c0_i32_0 = arith.constant 0 : i32
    %c0_i32_1 = arith.constant 0 : i32
    return %c0_i32, %c0_i32_0 : i32, i32
  }
  func.func @transform_7(%arg0: i32, %arg1: i32, %arg2: i32) -> (i32, i32) {
    %c0_i32 = arith.constant 0 : i32
    %c0_i32_0 = arith.constant 0 : i32
    %c0_i32_1 = arith.constant 0 : i32
    return %c0_i32, %c0_i32_0 : i32, i32
  }
  func.func @transform_8(%arg0: i32, %arg1: i32, %arg2: i32) -> (i32, i32) {
    %c0_i32 = arith.constant 0 : i32
    %c0_i32_0 = arith.constant 0 : i32
    %c0_i32_1 = arith.constant 0 : i32
    return %c0_i32, %c0_i32_0 : i32, i32
  }
  func.func @transform_9(%arg0: i32, %arg1: i32, %arg2: i32) -> (i32, i32) {
    %c0_i32 = arith.constant 0 : i32
    %c0_i32_0 = arith.constant 0 : i32
    %c0_i32_1 = arith.constant 0 : i32
    return %c0_i32, %c0_i32_0 : i32, i32
  }
  func.func @transform_10(%arg0: i32, %arg1: i32, %arg2: i32) -> (i32, i32) {
    %c0_i32 = arith.constant 0 : i32
    %c0_i32_0 = arith.constant 0 : i32
    %c0_i32_1 = arith.constant 0 : i32
    return %c0_i32, %c0_i32_0 : i32, i32
  }
  func.func @transform_11(%arg0: i32, %arg1: i32, %arg2: i32) -> (i32, i32) {
    %c0_i32 = arith.constant 0 : i32
    %c0_i32_0 = arith.constant 0 : i32
    %c0_i32_1 = arith.constant 0 : i32
    return %c0_i32, %c0_i32_0 : i32, i32
  }
  func.func @transform_12(%arg0: i32, %arg1: i32, %arg2: i32) -> (i32, i32) {
    %c0_i32 = arith.constant 0 : i32
    %c0_i32_0 = arith.constant 0 : i32
    %c0_i32_1 = arith.constant 0 : i32
    return %c0_i32, %c0_i32_0 : i32, i32
  }
  func.func @transform_13(%arg0: i32, %arg1: i32, %arg2: i32) -> (i32, i32) {
    %c0_i32 = arith.constant 0 : i32
    %c0_i32_0 = arith.constant 0 : i32
    %c0_i32_1 = arith.constant 0 : i32
    return %c0_i32, %c0_i32_0 : i32, i32
  }
  func.func @transform_14(%arg0: i32, %arg1: i32, %arg2: i32) -> (i32, i32) {
    %c0_i32 = arith.constant 0 : i32
    %c0_i32_0 = arith.constant 0 : i32
    %c0_i32_1 = arith.constant 0 : i32
    return %c0_i32, %c0_i32_0 : i32, i32
  }
  func.func @transform_15(%arg0: i32, %arg1: i32, %arg2: i32) -> (i32, i32) {
    %c0_i32 = arith.constant 0 : i32
    %c0_i32_0 = arith.constant 0 : i32
    %c0_i32_1 = arith.constant 0 : i32
    return %c0_i32, %c0_i32_0 : i32, i32
  }
  func.func @transform_16(%arg0: i32, %arg1: i32, %arg2: i32) -> (i32, i32) {
    %c0_i32 = arith.constant 0 : i32
    %c0_i32_0 = arith.constant 0 : i32
    %c0_i32_1 = arith.constant 0 : i32
    return %c0_i32, %c0_i32_0 : i32, i32
  }
  func.func @transform_17(%arg0: i32, %arg1: i32, %arg2: i32) -> (i32, i32) {
    %c0_i32 = arith.constant 0 : i32
    %c0_i32_0 = arith.constant 0 : i32
    %c0_i32_1 = arith.constant 0 : i32
    return %c0_i32, %c0_i32_0 : i32, i32
  }
  func.func @transform_18(%arg0: i32, %arg1: i32, %arg2: i32) -> (i32, i32) {
    %c0_i32 = arith.constant 0 : i32
    %c0_i32_0 = arith.constant 0 : i32
    %c0_i32_1 = arith.constant 0 : i32
    return %c0_i32, %c0_i32_0 : i32, i32
  }
  func.func @transform_19(%arg0: i32, %arg1: i32, %arg2: i32) -> (i32, i32) {
    %c0_i32 = arith.constant 0 : i32
    %c0_i32_0 = arith.constant 0 : i32
    %c0_i32_1 = arith.constant 0 : i32
    return %c0_i32, %c0_i32_0 : i32, i32
  }
  func.func @transform_20(%arg0: i32, %arg1: i32, %arg2: i32) -> (i32, i32) {
    %c0_i32 = arith.constant 0 : i32
    %c0_i32_0 = arith.constant 0 : i32
    %c0_i32_1 = arith.constant 0 : i32
    return %c0_i32, %c0_i32_0 : i32, i32
  }
  func.func @transform_21(%arg0: i32, %arg1: i32, %arg2: i32) -> (i32, i32) {
    %c0_i32 = arith.constant 0 : i32
    %c0_i32_0 = arith.constant 0 : i32
    %c0_i32_1 = arith.constant 0 : i32
    return %c0_i32, %c0_i32_0 : i32, i32
  }
  func.func @transform_22(%arg0: i32, %arg1: i32, %arg2: i32) -> (i32, i32) {
    %c0_i32 = arith.constant 0 : i32
    %c0_i32_0 = arith.constant 0 : i32
    %c0_i32_1 = arith.constant 0 : i32
    return %c0_i32, %c0_i32_0 : i32, i32
  }
  func.func @transform_23(%arg0: i32, %arg1: i32, %arg2: i32) -> (i32, i32) {
    %c0_i32 = arith.constant 0 : i32
    %c0_i32_0 = arith.constant 0 : i32
    %c0_i32_1 = arith.constant 0 : i32
    return %c0_i32, %c0_i32_0 : i32, i32
  }
  func.func @transform_24(%arg0: i32, %arg1: i32, %arg2: i32) -> (i32, i32) {
    %c0_i32 = arith.constant 0 : i32
    %c0_i32_0 = arith.constant 0 : i32
    %c0_i32_1 = arith.constant 0 : i32
    return %c0_i32, %c0_i32_0 : i32, i32
  }
}

</mosaic_0001>

<bundles_post_ra>
// kernel: tpu_custom_call.1
= control target key start
LH: loop header
LB: loop body
LE: loop exit
PB: predicated region body
PF: predicated region fallthrough
CT: control target
= control target key end

     0   :  { %s11655_s0 = inlined_call_operand.hbm [shape: f32[4,4,256], index: 0, kind: input, shape index: {}]   ;;  %s11656_s1 = inlined_call_operand.vmem [shape: f32[64,4], index: 1, kind: input, shape index: {}]   ;;  %s11657_s2 = inlined_call_operand.hbm [shape: f32[1,64], index: 2, kind: input, shape index: {}]   ;;  %s11658_s3 = inlined_call_operand.hbm [shape: f32[1,64], index: 3, kind: input, shape index: {}]   ;;  %s11659_s4 = inlined_call_operand.hbm [shape: f32[1,64], index: 4, kind: input, shape index: {}]   ;;  %s11660_s5 = inlined_call_operand.hbm [shape: bf16[64,128], index: 5, kind: input, shape index: {}]   ;;  %s11661_s6 = inlined_call_operand.hbm [shape: f32[1,128], index: 6, kind: input, shape index: {}]   ;;  %s11662_s7 = inlined_call_operand.hbm [shape: f32[1,128], index: 7, kind: input, shape index: {}]   ;;  %s11663_s8 = inlined_call_operand.hbm [shape: f32[1,128], index: 8, kind: input, shape index: {}]   ;;  %s11664_s9 = inlined_call_operand.hbm [shape: bf16[128,1024], index: 9, kind: input, shape index: {}]   ;;  %s11665_s10 = inlined_call_operand.hbm [shape: f32[1,1024], index: 10, kind: input, shape index: {}]   ;;  %s11666_s11 = inlined_call_operand.hbm [shape: f32[1,1024], index: 11, kind: input, shape index: {}]   ;;  %s11667_s12 = inlined_call_operand.hbm [shape: f32[1,1024], index: 12, kind: input, shape index: {}]   ;;  %s11668_s13 = inlined_call_operand.hbm [shape: f32[1024,512], index: 13, kind: input, shape index: {}]   ;;  %s11669_s14 = inlined_call_operand.hbm [shape: f32[1,512], index: 14, kind: input, shape index: {}]   ;;  %s11670_s15 = inlined_call_operand.hbm [shape: f32[1,512], index: 15, kind: input, shape index: {}]   ;;  %s11671_s16 = inlined_call_operand.hbm [shape: f32[1,512], index: 16, kind: input, shape index: {}]   ;;  %s11672_s17 = inlined_call_operand.hbm [shape: f32[512,256], index: 17, kind: input, shape index: {}]   ;;  %s11673_s18 = inlined_call_operand.hbm [shape: f32[1,256], index: 18, kind: input, shape index: {}]   ;;  %s11674_s19 = inlined_call_operand.hbm [shape: f32[1,256], index: 19, kind: input, shape index: {}]   ;;  %s11675_s20 = inlined_call_operand.hbm [shape: f32[1,256], index: 20, kind: input, shape index: {}]   ;;  %s11676_s21 = inlined_call_operand.vmem [shape: f32[256,9], index: 21, kind: input, shape index: {}]   ;;  %s11677_s22 = inlined_call_operand.hbm [shape: f32[1,9], index: 22, kind: input, shape index: {}]   ;;  %s11678_s23 = inlined_call_operand.hbm [shape: f32[1,9], index: 23, kind: input, shape index: {}]   ;;  %s11679_s24 = inlined_call_operand.hbm [shape: f32[4,9], index: 24, kind: output, shape index: {}]  }
   0x1   :  { %11696 = sst [smem:[#allocation65_spill]] %s11655_s0 }
   0x2   :  { %11697 = sst [smem:[#allocation66_spill]] %s11656_s1 }
   0x3   :  { %11698 = sst [smem:[#allocation67_spill]] %s11657_s2 }
   0x4   :  { %11699 = sst [smem:[#allocation68_spill]] %s11658_s3 }
   0x5   :  { %11700 = sst [smem:[#allocation69_spill]] %s11659_s4 }
   0x6   :  { %11701 = sst [smem:[#allocation70_spill]] %s11660_s5 }
   0x7   :  { %11702 = sst [smem:[#allocation71_spill]] %s11661_s6 }
   0x8   :  { %11703 = sst [smem:[#allocation72_spill]] %s11662_s7 }
   0x9   :  { %11704 = sst [smem:[#allocation73_spill]] %s11663_s8 }
   0xa   :  { %11705 = sst [smem:[#allocation74_spill]] %s11664_s9 }
   0xb   :  { %11706 = sst [smem:[#allocation75_spill]] %s11665_s10 }
   0xc   :  { %11707 = sst [smem:[#allocation76_spill]] %s11666_s11 }
   0xd   :  { %11708 = sst [smem:[#allocation77_spill]] %s11667_s12 }
   0xe   :  { %11709 = sst [smem:[#allocation78_spill]] %s11668_s13 }
   0xf   :  { %11710 = sst [smem:[#allocation79_spill]] %s11669_s14 }
  0x10   :  { %11711 = sst [smem:[#allocation80_spill]] %s11676_s21 }
  0x11   :  { %11712 = sst [smem:[#allocation81_spill]] %s11678_s23 }
  0x12   :  { %11713 = sst [smem:[#allocation82_spill]] %s11679_s24 }
  0x13   :  { %29 = vsyncpa [#allocation7], 0 }
  0x14   :  { %31 = vsyncpa [#allocation7 + $0x1], 0 }
  0x15   :  { %32 = vsyncpa [#allocation10], 0 }
  0x16   :  { %33 = vsyncpa [#allocation13], 0 }
  0x17   :  { %34 = vsyncpa [#allocation16], 0 }
  0x18   :  { %35 = vsyncpa [#allocation19], 0 }
  0x19   :  { %36 = vsyncpa [#allocation22], 0 }
  0x1a   :  { %37 = vsyncpa [#allocation25], 0 }
  0x1b   :  { %38 = vsyncpa [#allocation28], 0 }
  0x1c   :  { %39 = vsyncpa [#allocation31], 0 }
  0x1d   :  { %40 = vsyncpa [#allocation34], 0 }
  0x1e   :  { %41 = vsyncpa [#allocation37], 0 }
  0x1f   :  { %42 = vsyncpa [#allocation40], 0 }
  0x20   :  { %43 = vsyncpa [#allocation8], 0  ;;  %s9632_s5 = smov 0   ;;  %s9634_s26 = smov 0  }
  0x21   :  { %s9636_s27 = smov 0   ;;  %s9638_s28 = smov 0  }
  0x22   :  { %s9640_s6 = smov 0   ;;  %s9642_s2 = smov 0  }
  0x23   :  { %s9644_s29 = smov 0   ;;  %s9646_s0 = smov 0  }
  0x24   :  { %s9648_s7 = smov 0   ;;  %s9650_s30 = smov 0  }
  0x25 LB: > { %11714 = sst [smem:[#allocation55_spill]] %s9436_s5  ;;  %s11686_s3 = sadd.s32 4294967295, %s9472_s30   ;;  %s9472_s30 = sphi %s9650_s30, %s49_s30   ;;  %s9468_s7 = sphi %s9648_s7, %s11783_s7   ;;  %s9464_s0 = sphi %s9646_s0, %s11782_s0   ;;  %s9460_s29 = sphi %s9644_s29, %s11781_s29   ;;  %s9456_s2 = sphi %s9642_s2, %s11775_s2   ;;  %s9452_s6 = sphi %s9640_s6, %s11780_s6   ;;  %s9448_s28 = sphi %s9638_s28, %s11779_s28   ;;  %s9444_s27 = sphi %s9636_s27, %s11778_s27   ;;  %s9440_s26 = sphi %s9634_s26, %s11777_s26   ;;  %s9436_s5 = sphi %s9632_s5, %s11773_s5  }
  0x26   : > { %11715 = sst [smem:[#allocation56_spill]] %s9440_s26  ;;  %p7442_p0 = scmp.ge.s32.totalorder %s9472_s30, 1 }
  0x27   : > { %11716 = sst [smem:[#allocation57_spill]] %s9444_s27  ;;  %p9686_p1 = scmp.eq.s32.totalorder %s11686_s3, 0 }
  0x28   : > { %11717 = sst [smem:[#allocation58_spill]] %s9448_s28  ;;  %p605_p2 = scmp.lt.s32.totalorder %s9472_s30, 33 }
  0x29   : > { %11718 = sst [smem:[#allocation59_spill]] %s9452_s6  ;;  %s9475_s23 = smov [#allocation12]  }
  0x2a   : > { %11719 = sst [smem:[#allocation60_spill]] %s9456_s2  ;;  %p9694_p3 = pnand %p7442_p0, %p605_p2 }
  0x2b   : > { %11720 = sst [smem:[#allocation61_spill]] %s9468_s7  ;;  %s9474_s2 = smov [#allocation9]  }
  0x2c   : > { %11721 = sst [smem:[#allocation62_spill]] %s9472_s30  ;;  %p8376_p4 = pneg %p9694_p3 }
  0x2d   : > { %s11722_s25 = scalar_select %p9686_p1, 1, 0 }
  0x2e   : > { %s11724_s1 = sld [smem:[#allocation67_spill]]  ;;  %s622_s28 = sshll.u32 %s9474_s2, 4  ;;  %s623_s28 = int_to_ptr.vmem [resolvable:$true] %s622_s28 }
  0x2f   : > { %11723 = sst [smem:[#allocation63_spill]] %s11722_s25  ;;  %p9705_p5 = pnand %p8376_p4, %p9686_p1 }
  0x30   : > { %s11725_s21 = scalar_select %p9694_p3, 1, 0 }
  0x31   : > { %s11727_s5 = sld [smem:[#allocation69_spill]]  ;;  %s646_s2 = sshll.u32 %s9475_s23, 4  ;;  %s647_s2 = int_to_ptr.vmem [resolvable:$true] %s646_s2 }
  0x32   : > { %11726 = sst [smem:[#allocation64_spill]] %s11725_s21  ;;  %s9476_s27 = smov [#allocation15]  }
  0x33   : > { %s11730_s3 = sld [smem:[#allocation73_spill]]  ;;  %s672_s7 = sshll.u32 %s9476_s27, 4  ;;  %s673_s7 = int_to_ptr.vmem [resolvable:$true] %s672_s7 }
  0x34   : > { %s620_s24 = sshll.u32 %s11724_s1, 4  ;;  %s11729_s1 = sld [smem:[#allocation71_spill]]  ;;  %s621_s24 = int_to_ptr.hbm [resolvable:$true] %s620_s24 }
  0x35   : > { %8379 = dma.hbm_to_vmem [thread:$0]  (!%p9705_p5), %s621_s24, 16, %s623_s28, [#allocation10]  }
  0x36   : > { %s9477_s8 = smov [#allocation18]   ;;  %s11731_s10 = sld [smem:[#allocation75_spill]] }
  0x37   : > { %s644_s26 = sshll.u32 %s11727_s5, 4  ;;  %s696_s23 = sshll.u32 %s9477_s8, 4  ;;  %s645_s26 = int_to_ptr.hbm [resolvable:$true] %s644_s26  ;;  %s697_s23 = int_to_ptr.vmem [resolvable:$true] %s696_s23 }
  0x38   : > { %8385 = dma.hbm_to_vmem [thread:$0]  (!%p9705_p5), %s645_s26, 16, %s647_s2, [#allocation13]  }
  0x39   : > { %s694_s25 = sshll.u32 %s11730_s3, 4  ;;  %s11732_s12 = sld [smem:[#allocation77_spill]]  ;;  %s695_s25 = int_to_ptr.hbm [resolvable:$true] %s694_s25 }
  0x3a   : > { %s670_s21 = sshll.u32 %s11729_s1, 4  ;;  %s9478_s27 = smov [#allocation21]   ;;  %s671_s21 = int_to_ptr.hbm [resolvable:$true] %s670_s21 }
  0x3b   : > { %8391 = dma.hbm_to_vmem [thread:$0]  (!%p9705_p5), %s671_s21, 16, %s673_s7, [#allocation16]  }
  0x3c   : > { %s720_s24 = sshll.u32 %s11731_s10, 4  ;;  %s722_s5 = sshll.u32 %s9478_s27, 4  ;;  %s721_s24 = int_to_ptr.hbm [resolvable:$true] %s720_s24  ;;  %s723_s5 = int_to_ptr.vmem [resolvable:$true] %s722_s5 }
  0x3d   : > { %8397 = dma.hbm_to_vmem [thread:$0]  (!%p9705_p5), %s695_s25, 16, %s697_s23, [#allocation19]  }
  0x3e   : > { %8403 = dma.hbm_to_vmem [thread:$0]  (!%p9705_p5), %s721_s24, 128, %s723_s5, [#allocation22]  }
  0x3f   : > { %s744_s2 = sshll.u32 %s11732_s12, 4  ;;  %s9479_s21 = smov [#allocation24]   ;;  %s745_s2 = int_to_ptr.hbm [resolvable:$true] %s744_s2 }
  0x40   : > { %s746_s7 = sshll.u32 %s9479_s21, 4  ;;  %s11733_s14 = sld [smem:[#allocation79_spill]]  ;;  %s747_s7 = int_to_ptr.vmem [resolvable:$true] %s746_s7 }
  0x41   : > { %8409 = dma.hbm_to_vmem [thread:$0]  (!%p9705_p5), %s745_s2, 128, %s747_s7, [#allocation25]  }
  0x42   : > { %s794_s4 = sshll.u32 %s11671_s16, 4  ;;  %s9480_s1 = smov [#allocation27]   ;;  %s795_s4 = int_to_ptr.hbm [resolvable:$true] %s794_s4 }
  0x43   : > { %s772_s26 = sshll.u32 %s9480_s1, 4  ;;  %s9481_s24 = smov [#allocation30]   ;;  %s773_s26 = int_to_ptr.vmem [resolvable:$true] %s772_s26 }
  0x44   : > { %s796_s28 = sshll.u32 %s9481_s24, 4  ;;  %s820_s21 = sshll.u32 %s11673_s18, 4  ;;  %s797_s28 = int_to_ptr.vmem [resolvable:$true] %s796_s28  ;;  %s821_s21 = int_to_ptr.hbm [resolvable:$true] %s820_s21 }
  0x45   : > { %8421 = dma.hbm_to_vmem [thread:$0]  (!%p9705_p5), %s795_s4, 64, %s797_s28, [#allocation31]  }
  0x46   : > { %s770_s8 = sshll.u32 %s11733_s14, 4  ;;  %s844_s6 = sshll.u32 %s11675_s20, 4  ;;  %s771_s8 = int_to_ptr.hbm [resolvable:$true] %s770_s8  ;;  %s845_s6 = int_to_ptr.hbm [resolvable:$true] %s844_s6 }
  0x47   : > { %8415 = dma.hbm_to_vmem [thread:$0]  (!%p9705_p5), %s771_s8, 64, %s773_s26, [#allocation28]  }
  0x48   : > { %s9482_s3 = smov [#allocation33]   ;;  %s9483_s8 = smov [#allocation36]  }
  0x49   : > { %s822_s25 = sshll.u32 %s9482_s3, 4  ;;  %s846_s23 = sshll.u32 %s9483_s8, 4  ;;  %s823_s25 = int_to_ptr.vmem [resolvable:$true] %s822_s25  ;;  %s847_s23 = int_to_ptr.vmem [resolvable:$true] %s846_s23 }
  0x4a   : > { %8427 = dma.hbm_to_vmem [thread:$0]  (!%p9705_p5), %s821_s21, 32, %s823_s25, [#allocation34]  }
  0x4b   : > { %s11734_s24 = sld [smem:[#allocation68_spill]]  ;;  %s9484_s7 = smov [#allocation11]  }
  0x4c   : > { %8433 = dma.hbm_to_vmem [thread:$0]  (!%p9705_p5), %s845_s6, 32, %s847_s23, [#allocation37]  }
  0x4d   : > { %s11735_s5 = sld [smem:[#allocation70_spill]]  ;;  %s634_s3 = sshll.u32 %s9484_s7, 4  ;;  %s635_s3 = int_to_ptr.vmem [resolvable:$true] %s634_s3 }
  0x4e   : > { %s9485_s21 = smov [#allocation14]   ;;  %s9486_s8 = smov 64  }
  0x4f   : > { %s657_s25 = sshll.u32 %s9485_s21, 4  ;;  %s9487_s1 = smov 4   ;;  %s658_s25 = int_to_ptr.vmem [resolvable:$true] %s657_s25 }
  0x50   : > { %s11736_s26 = sld [smem:[#allocation72_spill]]  ;;  %s9488_s4 = smov [#allocation17]  }
  0x51   : > { %s632_s27 = sshll.u32 %s11734_s24, 4  ;;  %s684_s28 = sshll.u32 %s9488_s4, 4  ;;  %s633_s27 = int_to_ptr.hbm [resolvable:$true] %s632_s27  ;;  %s685_s28 = int_to_ptr.vmem [resolvable:$true] %s684_s28 }
  0x52   : > { %8382 = dma.hbm_to_vmem [thread:$0]  (!%p9705_p5), %s633_s27, 16, %s635_s3, [#allocation10]  }
  0x53   : > { %s655_s2 = sshll.u32 %s11735_s5, 4  ;;  %s11737_s9 = sld [smem:[#allocation74_spill]]  ;;  %s656_s2 = int_to_ptr.hbm [resolvable:$true] %s655_s2 }
  0x54   : > { %8388 = dma.hbm_to_vmem [thread:$0]  (!%p9705_p5), %s656_s2, 512, %s658_s25, [#allocation13], %s9486_s8, %s9486_s8, %s9487_s1  }
  0x55   : > { %s9489_s3 = smov [#allocation20]   ;;  %s9490_s2 = smov 512  }
  0x56   : > { %s682_s24 = sshll.u32 %s11736_s26, 4  ;;  %s707_s21 = sshll.u32 %s9489_s3, 4  ;;  %s683_s24 = int_to_ptr.hbm [resolvable:$true] %s682_s24  ;;  %s708_s21 = int_to_ptr.vmem [resolvable:$true] %s707_s21 }
  0x57   : > { %8394 = dma.hbm_to_vmem [thread:$0]  (!%p9705_p5), %s683_s24, 16, %s685_s28, [#allocation16]  }
  0x58   : > { %s9491_s25 = smov 32   ;;  %s11738_s11 = sld [smem:[#allocation76_spill]] }
  0x59   : > { %s705_s27 = sshll.u32 %s11737_s9, 4  ;;  %s9492_s23 = smov [#allocation23]   ;;  %s706_s27 = int_to_ptr.hbm [resolvable:$true] %s705_s27 }
  0x5a   : > { %8400 = dma.hbm_to_vmem [thread:$0]  (!%p9705_p5), %s706_s27, 8192, %s708_s21, [#allocation19], %s9490_s2, %s9490_s2, %s9491_s25  }
  0x5b   : > { %s734_s26 = sshll.u32 %s9492_s23, 4  ;;  %s11739_s13 = sld [smem:[#allocation78_spill]]  ;;  %s735_s26 = int_to_ptr.vmem [resolvable:$true] %s734_s26 }
  0x5c   : > { %s9493_s5 = smov [#allocation26]   ;;  %s782_s21 = sshll.u32 %s11670_s15, 4  ;;  %s783_s21 = int_to_ptr.hbm [resolvable:$true] %s782_s21 }
  0x5d   : > { %s757_s7 = sshll.u32 %s9493_s5, 4  ;;  %s805_s23 = sshll.u32 %s11672_s17, 4  ;;  %s758_s7 = int_to_ptr.vmem [resolvable:$true] %s757_s7  ;;  %s806_s23 = int_to_ptr.hbm [resolvable:$true] %s805_s23 }
  0x5e   : > { %s732_s6 = sshll.u32 %s11738_s11, 4  ;;  %s9494_s4 = smov [#allocation29]   ;;  %s733_s6 = int_to_ptr.hbm [resolvable:$true] %s732_s6 }
  0x5f   : > { %8406 = dma.hbm_to_vmem [thread:$0]  (!%p9705_p5), %s733_s6, 128, %s735_s26, [#allocation22]  }
  0x60   : > { %s784_s24 = sshll.u32 %s9494_s4, 4  ;;  %s9495_s6 = smov [#allocation32]   ;;  %s785_s24 = int_to_ptr.vmem [resolvable:$true] %s784_s24 }
  0x61   : > { %s755_s28 = sshll.u32 %s11739_s13, 4  ;;  %s807_s26 = sshll.u32 %s9495_s6, 4  ;;  %s756_s28 = int_to_ptr.hbm [resolvable:$true] %s755_s28  ;;  %s808_s26 = int_to_ptr.vmem [resolvable:$true] %s807_s26 }
  0x62   : > { %8412 = dma.hbm_to_vmem [thread:$0]  (!%p9705_p5), %s756_s28, 65536, %s758_s7, [#allocation25], %s9490_s2, %s9490_s2, %s9491_s25  }
  0x63   : > { %8418 = dma.hbm_to_vmem [thread:$0]  (!%p9705_p5), %s783_s21, 64, %s785_s24, [#allocation28]  }
  0x64   : > { %s9496_s5 = smov 256   ;;  %s9497_s3 = smov 16  }
  0x65   : > { %8424 = dma.hbm_to_vmem [thread:$0]  (!%p9705_p5), %s806_s23, 16384, %s808_s26, [#allocation31], %s9496_s5, %s9496_s5, %s9497_s3  }
  0x66   : > { %s832_s28 = sshll.u32 %s11674_s19, 4  ;;  %s9498_s7 = smov [#allocation35]   ;;  %s833_s28 = int_to_ptr.hbm [resolvable:$true] %s832_s28 }
  0x67   : > { %s834_s27 = sshll.u32 %s9498_s7, 4  ;;  %s859_s1 = sshll.u32 %s11677_s22, 4  ;;  %s835_s27 = int_to_ptr.vmem [resolvable:$true] %s834_s27  ;;  %s860_s1 = int_to_ptr.hbm [resolvable:$true] %s859_s1 }
  0x68   : > { %s11740_s4 = sld [smem:[#allocation61_spill]]  ;;  %s9499_s23 = smov [#allocation38]  }
  0x69   : > { %8430 = dma.hbm_to_vmem [thread:$0]  (!%p9705_p5), %s833_s28, 32, %s835_s27, [#allocation34]  }
  0x6a   : > { %s11741_s24 = sld [smem:[#allocation57_spill]]  ;;  %s861_s6 = sshll.u32 %s9499_s23, 4  ;;  %s862_s6 = int_to_ptr.vmem [resolvable:$true] %s861_s6 }
  0x6b   : > { %s11742_s3 = sld [smem:[#allocation81_spill]]  ;;  %s9500_s28 = smov [#allocation39]  }
  0x6c   : > { %s11743_s25 = sld [smem:[#allocation56_spill]]  ;;  %s873_s27 = sshll.u32 %s9500_s28, 4  ;;  %s874_s27 = int_to_ptr.vmem [resolvable:$true] %s873_s27 }
  0x6d   : > { %s11744_s7 = sld [smem:[#allocation62_spill]]  ;;  %s61_s21 = sadd.s32 1, %s9460_s29 }
  0x6e   : > { %8436 = dma.hbm_to_vmem [thread:$0]  (!%p9705_p5), %s860_s1, 16, %s862_s6, [#allocation37]  }
  0x6f   : > { %s11745_s8 = sld [smem:[#allocation55_spill]]  ;;  %p62_p6 = scmp.ge.s32.totalorder %s61_s21, 2 }
  0x70   : > { %s64_s23 = sadd.s32 1, %s9464_s0  ;;  %s68_s26 = sadd.s32 1, %s11740_s4 }
  0x71   : > { %s871_s2 = sshll.u32 %s11742_s3, 4  ;;  %s77_s5 = sadd.s32 1, %s11741_s24  ;;  %s872_s2 = int_to_ptr.hbm [resolvable:$true] %s871_s2 }
  0x72   : > { %8439 = dma.hbm_to_vmem [thread:$0]  (!%p9705_p5), %s872_s2, 16, %s874_s27, [#allocation40]  }
  0x73   : > { %s11785_s21 = smov (%p62_p6, %s61_s21), 0  ;;  %s11787_s23 = smov (!%p62_p6, %s64_s23), %s9464_s0 }
  0x74   : > { %s73_s1 = ssub.s32 %s9460_s29, %s11785_s21  ;;  %p84_p7 = scmp.ne.s32.totalorder %s11741_s24, %s11743_s25 }
  0x75   : > { %p66_p8 = scmp.ge.s32.totalorder %s11787_s23, 4  ;;  %p85_p9 = scmp.eq.s32.totalorder %s11744_s7, 0 }
  0x76   : > { %p90_p10 = scmp.ne.s32.totalorder %s11743_s25, %s11745_s8  ;;  %p8465_p11 = scmp.lt.s32.totalorder %s11744_s7, 32 }
  0x77   : > { %s11789_s23 = smov (%p66_p8, %s11787_s23), 0  ;;  %s11791_s26 = smov (!%p66_p8, %s68_s26), %s11740_s4 }
  0x78   : > { %s72_s30 = ssub.s32 %s9464_s0, %s11789_s23  ;;  %p9828_p12 = por %p85_p9, %p84_p7 }
  0x79   : > { %p70_p13 = scmp.ge.s32.totalorder %s11791_s26, 4  ;;  %s74_s2 = sor.u32 %s73_s1, %s72_s30 }
  0x7a   : > { %p75_p0 = scmp.eq.s32.totalorder %s74_s2, 0  ;;  %p9834_p2 = por %p9686_p1, %p90_p10 }
  0x7b   : > { %s11793_s26 = smov (%p70_p13, %s11791_s26), 0  ;;  %s884_s4 = sand.u32 1, %s11741_s24  }
  0x7c   : > { %s9841_s25 = scalar_select %p75_p0, %s11741_s24, %s77_s5  }
  0x7d   : > { %s7466_s8 = sshll.u32 %s9464_s0, 1  ;;  %s7465_s27 = sshll.u32 %s884_s4, 2 }
  0x7e   : > { %s892_s9 = sadd.s32 %s9460_s29, %s7466_s8  ;;  %s888_s11 = scalar_lea.vmem [#allocation6], %s7465_s27 }
  0x7f   : > { %s7467_s10 = sshll.u32 %s892_s9, 2  ;;  %s898_s12 = sshll.u32 %s888_s11, 4  ;;  %s899_s12 = int_to_ptr.vmem [resolvable:$true] %s898_s12 }
  0x80   : > { %s11749_s1 = sld [smem:[#allocation65_spill]]  ;;  %p8441_p4 = pnand %p8465_p11, %p9828_p12 }
  0x81   : > { %s885_s2 = scalar_lea.sflag [#allocation7], %s884_s4  ;;  %s11751_s24 = sld [smem:[#allocation56_spill]] (!%p9694_p3) }
  0x84   : > { %907 = sbr.rel (%p9694_p3) target bundleno = 4034 (0xfc2), region = 116 }
  0x86   : > { %s894_s30 = scalar_lea.hbm %s11749_s1, %s7467_s10 }
  0x87   : > { %s896_s3 = sshll.u32 %s894_s30, 4  ;;  %s909_s9 = sand.u32 (!%p9694_p3), 1, %s11751_s24   ;;  %s897_s3 = int_to_ptr.hbm [resolvable:$true] %s896_s3 }
  0x88   : > { %8443 = dma.hbm_to_vmem [thread:$0]  (!%p8441_p4), %s897_s3, 64, %s899_s12, %s885_s2  }
  0x89   : > { %s7469_s8 = sshll.u32 %s909_s9, 2  ;;  %s910_s11 = scalar_lea.sflag [#allocation7], %s909_s9 }
  0x8a   : > { %s9856_s27 = scalar_lea.vmem [#allocation6], %s7469_s8 }
  0x8b   : > { %9383 = dma.done.wait (%p9834_p2), %s910_s11, 64  }
  0x8c   : > { %9385 = vsyncadd (%p9834_p2), %s910_s11, 4294967232 }
  0x8d   : > { %9387 = dma.done.wait (%p9686_p1), [#allocation10], 32  }
  0x8e   : > { %9389 = vsyncadd (%p9686_p1), [#allocation10], 4294967264 }
  0x8f   : > { %9391 = dma.done.wait (%p9686_p1), [#allocation13], 528  }
  0x90   : > { %9393 = vsyncadd (%p9686_p1), [#allocation13], 4294966768 }
  0x91   : > { %9395 = dma.done.wait (%p9686_p1), [#allocation16], 32  }
  0x92   : > { %9397 = vsyncadd (%p9686_p1), [#allocation16], 4294967264 }
  0x93   : > { %9399 = dma.done.wait (%p9686_p1), [#allocation19], 8208  }
  0x94   : > { %9401 = vsyncadd (%p9686_p1), [#allocation19], 4294959088 }
  0x95   : > { %9403 = dma.done.wait (%p9686_p1), [#allocation22], 256  }
  0x96   : > { %9405 = vsyncadd (%p9686_p1), [#allocation22], 4294967040 }
  0x97   : > { %9407 = dma.done.wait (%p9686_p1), [#allocation25], 65664  }
  0x98   : > { %9409 = vsyncadd (%p9686_p1), [#allocation25], 4294901632 }
  0x99   : > { %9411 = dma.done.wait (%p9686_p1), [#allocation28], 128  }
  0x9a   : > { %9413 = vsyncadd (%p9686_p1), [#allocation28], 4294967168 }
  0x9b   : > { %9415 = dma.done.wait (%p9686_p1), [#allocation31], 16448  }
  0x9c   : > { %9417 = vsyncadd (%p9686_p1), [#allocation31], 4294950848 }
  0x9d   : > { %9419 = dma.done.wait (%p9686_p1), [#allocation34], 64  }
  0x9e   : > { %9421 = vsyncadd (%p9686_p1), [#allocation34], 4294967232 }
  0x9f   : > { %9423 = dma.done.wait (%p9686_p1), [#allocation37], 48  }
  0xa0   : > { %9425 = vsyncadd (%p9686_p1), [#allocation37], 4294967248 }
  0xa1   : > { %9427 = dma.done.wait (%p9686_p1), [#allocation40], 16  }
  0xa2   : > { %9429 = vsyncadd (%p9686_p1), [#allocation40], 4294967280  ;;  %s11753_s12 = sld [smem:[#allocation59_spill]] }
  0xa3   : > { %s11754_s13 = sld [smem:[#allocation58_spill]] }
  0xa4   : > { %s11757_s6 = sld [smem:[#allocation60_spill]] }
  0xa8   : > { %p1080_p3 = scmp.eq.s32.totalorder %s11753_s12, 0  ;;  %p1084_p6 = scmp.eq.s32.totalorder %s11753_s12, 3 }
  0xa9   : > { %p1081_p5 = scmp.eq.s32.totalorder %s11754_s13, 0  ;;  %p1085_p7 = scmp.eq.s32.totalorder %s11754_s13, 1 }
  0xaa   : > { %p7491_p10 = scmp.ne.s32.totalorder %s11757_s6, 0 }
  0xab   : > { %p9910_p8 = pnand %p1081_p5, %p1080_p3  ;;  %p9914_p9 = pnand %p1085_p7, %p1084_p6 }
  0xac   : > { %1091 = sbr.rel (%p7491_p10) target bundleno = 660 (0x294), region = 208  ;;  %s11758_s1 = sld [smem:[#allocation66_spill]] (!%p7491_p10) }
  0xb1   : > { %v1100_v0 = vld [vmem:[%s9856_s27] sm:$0xf]  ;;  %vm1126_vm0 = vcmask 1043456   ;;  %vm1101_vm1 = vcmask 31744   ;;  %v9952_v18 = vld [vmem:[#allocation9] ss:$0 sm:$0xff] }
  0xb2   : > { %v1092_v1 = vld [vmem:[%s11758_s1] sm:$0xff]  ;;  %7492 = vmatpush.msk.msra.mxu0 %vm1126_vm0, %v1100_v0  ;;  %8259 = vmatpush.msk.msra.mxu1 %vm1126_vm0, %v1100_v0  ;;  %v1094_v2 = vld [vmem:[%s11758_s1 + $0x10] sm:$0xff]  ;;  %v1093_v5 = vld [vmem:[%s11758_s1 + $0x8] sm:$0xff]  ;;  %vm1223_vm2 = vcmask 523264  }
  0xb3   : > { %v1096_v3 = vld [vmem:[%s11758_s1 + $0x20] sm:$0xff]  ;;  %7493 = vmatmul.msk.f32.vlgmr.msra.gmra.mxu0 %vm1101_vm1, %v1092_v1  ;;  %7495 = vmatmul.msk.f32.vlgmr.msra.gmra.mxu1 %vm1101_vm1, %v1094_v2  ;;  %v1098_v4 = vld [vmem:[%s11758_s1 + $0x30] sm:$0xff]  ;;  %v1095_v6 = vld [vmem:[%s11758_s1 + $0x18] sm:$0xff] }
  0xb4   : > { %8260 = vmatpush.msk.msra.mxu2 %vm1126_vm0, %v1100_v0  ;;  %8261 = vmatpush.msk.msra.mxu3 %vm1126_vm0, %v1100_v0  ;;  %v1097_v7 = vld [vmem:[%s11758_s1 + $0x28] sm:$0xff]  ;;  %v1099_v8 = vld [vmem:[%s11758_s1 + $0x38] sm:$0xff] }
  0xb5   : > { %7497 = vmatmul.msk.f32.vlgmr.msra.gmra.mxu2 %vm1101_vm1, %v1096_v3  ;;  %7499 = vmatmul.msk.f32.vlgmr.msra.gmra.mxu3 %vm1101_vm1, %v1098_v4 }
  0xbb   : > { %7494 = vmatmul.msk.f32.gmra.mxu0 %vm1101_vm1, %v1093_v5  ;;  %7496 = vmatmul.msk.f32.gmra.mxu1 %vm1101_vm1, %v1095_v6 }
  0xbd   : > { %7498 = vmatmul.msk.f32.gmra.mxu2 %vm1101_vm1, %v1097_v7  ;;  %7500 = vmatmul.msk.f32.gmra.mxu3 %vm1101_vm1, %v1099_v8 }
 0x130   : > { %v1147_v9 = vpop.f32.mrf.mxu0  ;;  %v1153_v11 = vpop.f32.mrf.mxu1 }
 0x131   : > { %1171 = vxpose.xlu0.b32.start [1/8] (short) %v1147_v9, 128 }
 0x138   : > { %v1150_v10 = vpop.f32.mrf.mxu0  ;;  %v1156_v12 = vpop.f32.mrf.mxu1 }
 0x139   : > { %1172 = vxpose.xlu0.b32.cont [2/8] (short) %v1150_v10, 128  ;;  %v1159_v13 = vpop.f32.mrf.mxu2  ;;  %v1165_v15 = vpop.f32.mrf.mxu3 }
 0x141   : > { %1173 = vxpose.xlu0.b32.cont [3/8] (short) %v1153_v11, 128  ;;  %v1162_v14 = vpop.f32.mrf.mxu2  ;;  %v1168_v16 = vpop.f32.mrf.mxu3 }
 0x149   : > { %1174 = vxpose.xlu0.b32.cont [4/8] (short) %v1156_v12, 128 }
 0x151   : > { %1175 = vxpose.xlu0.b32.cont [5/8] (short) %v1159_v13, 128 }
 0x159   : > { %1176 = vxpose.xlu0.b32.cont [6/8] (short) %v1162_v14, 128 }
 0x161   : > { %1177 = vxpose.xlu0.b32.cont [7/8] (short) %v1165_v15, 128 }
 0x169   : > { %1178 = vxpose.xlu0.b32.end [8/8] (short) %v1168_v16, 128 }
 0x1d5   : > { %v1187_v17 = vpop.trf.xlu0 }
 0x1d6   : > { %v1207_v19 = vadd.f32 %v9952_v18, %v1187_v17 }
 0x1d8   : > { %v1261_v21 = vmul.f32 %v1207_v19, %v1207_v19  ;;  %v1224_v23 = vsel %vm1223_vm2, %v1207_v19, 0.0 }
 0x1da   : > { %v1277_v27 = vsel %vm1223_vm2, %v1261_v21, 0.0 }
 0x1dd   : > { %v1188_v20 = vpop.trf.xlu0 }
 0x1de   : > { %v1208_v22 = vadd.f32 %v9952_v18, %v1188_v20 }
 0x1e0   : > { %v1225_v24 = vsel %vm1223_vm2, %v1208_v22, 0.0  ;;  %v1262_v25 = vmul.f32 %v1208_v22, %v1208_v22 }
 0x1e1   : > { %v1226_v26 = vadd.f32 %v1225_v24, %v1224_v23 }
 0x1e2   : > { %v1278_v28 = vsel %vm1223_vm2, %v1262_v25, 0.0 }
 0x1e3   : > { %v1279_v29 = vadd.f32 %v1278_v28, %v1277_v27 }
 0x1e5   : > { %v1189_v30 = vpop.trf.xlu0 }
 0x1e6   : > { %v1209_v31 = vadd.f32 %v9952_v18, %v1189_v30 }
 0x1e8   : > { %v1227_v32 = vsel %vm1223_vm2, %v1209_v31, 0.0  ;;  %v1263_v33 = vmul.f32 %v1209_v31, %v1209_v31 }
 0x1e9   : > { %v1228_v34 = vadd.f32 %v1227_v32, %v1226_v26 }
 0x1ea   : > { %v1280_v35 = vsel %vm1223_vm2, %v1263_v33, 0.0 }
 0x1eb   : > { %v1281_v36 = vadd.f32 %v1280_v35, %v1279_v29 }
 0x1ed   : > { %v1190_v37 = vpop.trf.xlu0 }
 0x1ee   : > { %v1210_v38 = vadd.f32 %v9952_v18, %v1190_v37 }
 0x1f0   : > { %v1229_v39 = vsel %vm1223_vm2, %v1210_v38, 0.0  ;;  %v1264_v40 = vmul.f32 %v1210_v38, %v1210_v38 }
 0x1f1   : > { %v1230_v41 = vadd.f32 %v1229_v39, %v1228_v34 }
 0x1f2   : > { %v1282_v42 = vsel %vm1223_vm2, %v1264_v40, 0.0 }
 0x1f3   : > { %v1283_v43 = vadd.f32 %v1282_v42, %v1281_v36 }
 0x1f5   : > { %v1191_v44 = vpop.trf.xlu0 }
 0x1f6   : > { %v1211_v45 = vadd.f32 %v9952_v18, %v1191_v44 }
 0x1f8   : > { %v1231_v46 = vsel %vm1223_vm2, %v1211_v45, 0.0  ;;  %v1265_v47 = vmul.f32 %v1211_v45, %v1211_v45 }
 0x1f9   : > { %v1232_v48 = vadd.f32 %v1231_v46, %v1230_v41 }
 0x1fa   : > { %v1284_v49 = vsel %vm1223_vm2, %v1265_v47, 0.0 }
 0x1fb   : > { %v1285_v50 = vadd.f32 %v1284_v49, %v1283_v43 }
 0x1fd   : > { %v1192_v51 = vpop.trf.xlu0 }
 0x1fe   : > { %v1212_v58 = vadd.f32 %v9952_v18, %v1192_v51 }
 0x200   : > { %v1266_v61 = vmul.f32 %v1212_v58, %v1212_v58  ;;  %v1233_v63 = vsel %vm1223_vm2, %v1212_v58, 0.0 }
 0x201   : > { %v1234_v6 = vadd.f32 %v1233_v63, %v1232_v48 }
 0x202   : > { %v1286_v2 = vsel %vm1223_vm2, %v1266_v61, 0.0 }
 0x203   : > { %v1287_v12 = vadd.f32 %v1286_v2, %v1285_v50 }
 0x205   : > { %v1193_v52 = vpop.trf.xlu0 }
 0x206   : > { %v1213_v60 = vadd.f32 %v9952_v18, %v1193_v52 }
 0x208   : > { %v1267_v0 = vmul.f32 %v1213_v60, %v1213_v60  ;;  %v1235_v3 = vsel %vm1223_vm2, %v1213_v60, 0.0 }
 0x209   : > { %v1236_v13 = vadd.f32 %v1235_v3, %v1234_v6 }
 0x20a   : > { %v1288_v8 = vsel %vm1223_vm2, %v1267_v0, 0.0 }
 0x20b   : > { %v1289_v19 = vadd.f32 %v1288_v8, %v1287_v12 }
 0x20d   : > { %v1194_v53 = vpop.trf.xlu0 }
 0x20e   : > { %v1214_v62 = vadd.f32 %v9952_v18, %v1194_v53 }
 0x210   : > { %v1268_v4 = vmul.f32 %v1214_v62, %v1214_v62  ;;  %v1237_v9 = vsel %vm1223_vm2, %v1214_v62, 0.0 }
 0x211   : > { %v1238_v20 = vadd.f32 %v1237_v9, %v1236_v13 }
 0x212   : > { %v1290_v14 = vsel %vm1223_vm2, %v1268_v4, 0.0 }
 0x213   : > { %v1291_v25 = vadd.f32 %v1290_v14, %v1289_v19 }
 0x215   : > { %v1195_v54 = vpop.trf.xlu0 }
 0x216   : > { %v1215_v1 = vadd.f32 %v9952_v18, %v1195_v54 }
 0x218   : > { %v1269_v10 = vmul.f32 %v1215_v1, %v1215_v1  ;;  %v1239_v15 = vsel %vm1223_vm2, %v1215_v1, 0.0 }
 0x219   : > { %v1240_v26 = vadd.f32 %v1239_v15, %v1238_v20 }
 0x21a   : > { %v1292_v21 = vsel %vm1223_vm2, %v1269_v10, 0.0 }
 0x21b   : > { %v1293_v31 = vadd.f32 %v1292_v21, %v1291_v25 }
 0x21d   : > { %v1196_v55 = vpop.trf.xlu0 }
 0x21e   : > { %v1216_v5 = vadd.f32 %v9952_v18, %v1196_v55 }
 0x220   : > { %v1270_v16 = vmul.f32 %v1216_v5, %v1216_v5  ;;  %v1241_v22 = vsel %vm1223_vm2, %v1216_v5, 0.0 }
 0x221   : > { %v1242_v32 = vadd.f32 %v1241_v22, %v1240_v26 }
 0x222   : > { %v1294_v27 = vsel %vm1223_vm2, %v1270_v16, 0.0 }
 0x223   : > { %v1295_v38 = vadd.f32 %v1294_v27, %v1293_v31 }
 0x225   : > { %v1197_v56 = vpop.trf.xlu0 }
 0x226   : > { %v1217_v11 = vadd.f32 %v9952_v18, %v1197_v56 }
 0x228   : > { %v1271_v23 = vmul.f32 %v1217_v11, %v1217_v11  ;;  %v1243_v28 = vsel %vm1223_vm2, %v1217_v11, 0.0 }
 0x229   : > { %v1244_v39 = vadd.f32 %v1243_v28, %v1242_v32 }
 0x22a   : > { %v1296_v34 = vsel %vm1223_vm2, %v1271_v23, 0.0 }
 0x22b   : > { %v1297_v43 = vadd.f32 %v1296_v34, %v1295_v38 }
 0x22d   : > { %v1198_v57 = vpop.trf.xlu0 }
 0x22e   : > { %v1218_v17 = vadd.f32 %v9952_v18, %v1198_v57 }
 0x230   : > { %v1272_v29 = vmul.f32 %v1218_v17, %v1218_v17  ;;  %v1245_v35 = vsel %vm1223_vm2, %v1218_v17, 0.0 }
 0x231   : > { %v1246_v44 = vadd.f32 %v1245_v35, %v1244_v39 }
 0x232   : > { %v1298_v40 = vsel %vm1223_vm2, %v1272_v29, 0.0 }
 0x233   : > { %v1299_v48 = vadd.f32 %v1298_v40, %v1297_v43 }
 0x235   : > { %v1199_v59 = vpop.trf.xlu0 }
 0x236   : > { %v1219_v24 = vadd.f32 %v9952_v18, %v1199_v59 }
 0x238   : > { %v1273_v36 = vmul.f32 %v1219_v24, %v1219_v24  ;;  %v1247_v41 = vsel %vm1223_vm2, %v1219_v24, 0.0 }
 0x239   : > { %v1248_v49 = vadd.f32 %v1247_v41, %v1246_v44 }
 0x23a   : > { %v1300_v45 = vsel %vm1223_vm2, %v1273_v36, 0.0 }
 0x23b   : > { %v1301_v52 = vadd.f32 %v1300_v45, %v1299_v48 }
 0x23d   : > { %v1200_v7 = vpop.trf.xlu0 }
 0x23e   : > { %v1220_v30 = vadd.f32 %v9952_v18, %v1200_v7 }
 0x240   : > { %v1274_v42 = vmul.f32 %v1220_v30, %v1220_v30  ;;  %v1249_v46 = vsel %vm1223_vm2, %v1220_v30, 0.0 }
 0x241   : > { %v1250_v53 = vadd.f32 %v1249_v46, %v1248_v49 }
 0x242   : > { %v1302_v50 = vsel %vm1223_vm2, %v1274_v42, 0.0 }
 0x243   : > { %v1303_v57 = vadd.f32 %v1302_v50, %v1301_v52 }
 0x245   : > { %v1201_v33 = vpop.trf.xlu0 }
 0x246   : > { %v1221_v37 = vadd.f32 %v9952_v18, %v1201_v33 }
 0x248   : > { %v1275_v47 = vmul.f32 %v1221_v37, %v1221_v37  ;;  %v1251_v51 = vsel %vm1223_vm2, %v1221_v37, 0.0 }
 0x249   : > { %v1252_v58 = vadd.f32 %v1251_v51, %v1250_v53 }
 0x24a   : > { %v1304_v55 = vsel %vm1223_vm2, %v1275_v47, 0.0 }
 0x24b   : > { %v1305_v61 = vadd.f32 %v1304_v55, %v1303_v57 }
 0x24d   : > { %v1202_v54 = vpop.trf.xlu0 }
 0x24e   : > { %v1222_v56 = vadd.f32 %v9952_v18, %v1202_v54 }
 0x250   : > { %v1253_v59 = vsel %vm1223_vm2, %v1222_v56, 0.0  ;;  %v1276_v60 = vmul.f32 %v1222_v56, %v1222_v56 }
 0x251   : > { %v1254_v62 = vadd.f32 %v1253_v59, %v1252_v58 }
 0x252   : > { %v1306_v63 = vsel %vm1223_vm2, %v1276_v60, 0.0 }
 0x253   : > { %v1255_v0 = vrot.slane %v1254_v62, 4  ;;  %v1307_v1 = vadd.f32 %v1306_v63, %v1305_v61 }
 0x255   : > { %v1256_v2 = vadd.f32 %v1255_v0, %v1254_v62  ;;  %v1308_v3 = vrot.slane %v1307_v1, 4 }
 0x257   : > { %v1257_v4 = vrot.slane %v1256_v2, 2  ;;  %v1309_v5 = vadd.f32 %v1308_v3, %v1307_v1 }
 0x259   : > { %v1258_v6 = vadd.f32 %v1257_v4, %v1256_v2  ;;  %v1310_v7 = vrot.slane %v1309_v5, 2 }
 0x25b   : > { %v1259_v8 = vrot.slane %v1258_v6, 1  ;;  %v1311_v9 = vadd.f32 %v1310_v7, %v1309_v5  ;;  %1315 = sbr.rel (%p9910_p8) target bundleno = 611 (0x263), region = 212 }
 0x25d   : > { %v1260_v18 = vadd.f32 %v1259_v8, %v1258_v6  ;;  %v1312_v10 = vrot.slane %v1311_v9, 1 }
 0x25f   : > { %v1313_v11 = vadd.f32 %v1312_v10, %v1311_v9 }
 0x260   : > { %vm1316_vm3 = vcmask 516096   ;;  %v9501_v12 = vmov 0.0  }
 0x261   : > { %1317 = vst.msk [vmem:[#allocation2] sm:$0x1] %vm1316_vm3, %v9501_v12 }
 0x262   : > { %1318 = vst.msk [vmem:[#allocation2 + $0x1] sm:$0x1] %vm1316_vm3, %v9501_v12 }
 0x263 PF: > { %vm1321_vm4 = vcmask 516096  }
 0x268   : > { %v1319_v13 = vld [vmem:[#allocation2] sm:$0x1]  ;;  %1327 = sbr.rel (%p9914_p9) target bundleno = 660 (0x294), region = 216 }
 0x269   : > { %v1323_v14 = vld [vmem:[#allocation2 + $0x1] sm:$0x1]  ;;  %v1320_v15 = vadd.f32 %v1319_v13, %v1260_v18 }
 0x26a   : > { %v1324_v16 = vadd.f32 %v1323_v14, %v1313_v11 }
 0x26b   : > { %1322 = vst.msk [vmem:[#allocation2] sm:$0x1] %vm1321_vm4, %v1320_v15 }
 0x26c   : > { %1325 = vst.msk [vmem:[#allocation2 + $0x1] sm:$0x1] %vm1321_vm4, %v1324_v16 }
 0x26d   : > { %v1334_v30 = vld [vmem:[#allocation11] sm:$0x1]  ;;  %v1348_v34 = vld [vmem:[#allocation12] sm:$0x1] }
 0x272   : > { %v1328_v17 = vld [vmem:[#allocation2] sm:$0x1] }
 0x273   : > { %v1330_v19 = vld [vmem:[#allocation2 + $0x1] sm:$0x1]  ;;  %v1329_v20 = vmul.f32 0.0009765625, %v1328_v17 }
 0x274   : > { %v1331_v21 = vmul.f32 0.0009765625, %v1330_v19 }
 0x275   : > { %v1332_v22 = vmul.f32 %v1329_v20, %v1329_v20 }
 0x277   : > { %v1333_v23 = vsub.f32 %v1331_v21, %v1332_v22 }
 0x279   : > { %v1335_v24 = vadd.f32 1e-05, %v1333_v23 }
 0x27b   : > { %8607 = vrsqrt.f32 %v1335_v24  ;;  %vm1342_vm5 = vweird.f32 %v1335_v24 }
 0x281   : > { %v8608_v25 = vpop.eup %8607 }
 0x282   : > { %v1337_v26 = vmul.f32 %v8608_v25, %v1335_v24  ;;  %vm1343_vm6 = vweird.f32 %v8608_v25 }
 0x283   : > { %vm1344_vm7 = vmor %vm1342_vm5, %vm1343_vm6 }
 0x284   : > { %v1338_v27 = vmul.f32 %v8608_v25, %v1337_v26 }
 0x286   : > { %v1339_v28 = vmul.f32 0.5, %v1338_v27 }
 0x288   : > { %v1340_v29 = vsub.f32 1.5, %v1339_v28 }
 0x28a   : > { %v1341_v31 = vmul.f32 %v8608_v25, %v1340_v29 }
 0x28c   : > { %v1345_v32 = vsel %vm1344_vm7, %v8608_v25, %v1341_v31 }
 0x28d   : > { %v1346_v33 = vmul.f32 %v1345_v32, %v1334_v30 }
 0x28f   : > { %1347 = vst.msk [vmem:[#allocation2 + $0x2] sm:$0x1] %vm1321_vm4, %v1346_v33  ;;  %v1349_v35 = vmul.f32 %v1346_v33, %v1329_v20 }
 0x291   : > { %v1350_v36 = vsub.f32 %v1348_v34, %v1349_v35 }
 0x293   : > { %1351 = vst.msk [vmem:[#allocation2 + $0x3] sm:$0x1] %vm1321_vm4, %v1350_v36 }
 0x294 PF: > { %s11759_s1 = sld [smem:[#allocation60_spill]] }
 0x29a   : > { %p7501_p1 = scmp.ne.s32.totalorder %s11759_s1, 1 }
 0x29b   : > { %s11760_s2 = sld [smem:[#allocation66_spill]] (!%p7501_p1) }
 0x29c   : > { %1355 = sbr.rel (%p7501_p1) target bundleno = 1305 (0x519), region = 220 }
 0x2a1   : > { %v1364_v37 = vld [vmem:[%s9856_s27] sm:$0xf]  ;;  %vm1390_vm8 = vcmask 1043456   ;;  %v1356_v38 = vld [vmem:[%s11760_s2] sm:$0xff]  ;;  %vm1365_vm9 = vcmask 31744   ;;  %v1357_v39 = vld [vmem:[%s11760_s2 + $0x8] sm:$0xff] }
 0x2a2   : > { %7502 = vmatpush.msk.msra.mxu0 %vm1390_vm8, %v1364_v37  ;;  %v1358_v40 = vld [vmem:[%s11760_s2 + $0x10] sm:$0xff]  ;;  %v1359_v41 = vld [vmem:[%s11760_s2 + $0x18] sm:$0xff]  ;;  %v1360_v42 = vld [vmem:[%s11760_s2 + $0x20] sm:$0xff]  ;;  %vm1583_vm10 = vcmask 523264  }
 0x2a3   : > { %7503 = vmatmul.msk.f32.vlgmr.msra.gmra.mxu0 %vm1365_vm9, %v1356_v38  ;;  %v1361_v43 = vld [vmem:[%s11760_s2 + $0x28] sm:$0xff]  ;;  %v1362_v44 = vld [vmem:[%s11760_s2 + $0x30] sm:$0xff]  ;;  %v1363_v45 = vld [vmem:[%s11760_s2 + $0x38] sm:$0xff] }
 0x2a4   : > { %v8122_v54 = vld [vmem:[#allocation14 + $0x18] sm:$0xff]  ;;  %v8121_v55 = vld [vmem:[#allocation14 + $0x10] sm:$0xff]  ;;  %v8120_v56 = vld [vmem:[#allocation14 + $0x8] sm:$0xff] }
 0x2a5   : > { %1612 = vmatpush.bf16.msra.mxu1 %v8122_v54  ;;  %8262 = vmatpush.bf16.msra.mxu2 %v8122_v54  ;;  %v8119_v57 = vld [vmem:[#allocation14] sm:$0xff]  ;;  %v10044_v58 = vld [vmem:[#allocation9] ss:$0 sm:$0xff]  ;;  %v10046_v60 = vld [vmem:[#allocation2 + $0x2] ss:$0 sm:$0xff] }
 0x2a6   : > { %8263 = vmatpush.bf16.msra.mxu3 %v8122_v54  ;;  %v10049_v62 = vld [vmem:[#allocation2 + $0x3] ss:$0 sm:$0xff] }
 0x2a9   : > { %1613 = vmatpush.bf16.msra.mxu1 %v8121_v55  ;;  %8264 = vmatpush.bf16.msra.mxu2 %v8121_v55 }
 0x2aa   : > { %8265 = vmatpush.bf16.msra.mxu3 %v8121_v55 }
 0x2ab   : > { %7504 = vmatmul.msk.f32.gmra.mxu0 %vm1365_vm9, %v1357_v39 }
 0x2ad   : > { %1614 = vmatpush.bf16.msra.mxu1 %v8120_v56  ;;  %8266 = vmatpush.bf16.msra.mxu2 %v8120_v56 }
 0x2ae   : > { %8267 = vmatpush.bf16.msra.mxu3 %v8120_v56 }
 0x2b1   : > { %1615 = vmatpush.bf16.msra.mxu1 %v8119_v57  ;;  %8268 = vmatpush.bf16.msra.mxu2 %v8119_v57 }
 0x2b2   : > { %8269 = vmatpush.bf16.msra.mxu3 %v8119_v57 }
 0x2b3   : > { %7505 = vmatmul.msk.f32.gmra.mxu0 %vm1365_vm9, %v1358_v40 }
 0x2bb   : > { %7506 = vmatmul.msk.f32.gmra.mxu0 %vm1365_vm9, %v1359_v41 }
 0x2c3   : > { %7507 = vmatmul.msk.f32.gmra.mxu0 %vm1365_vm9, %v1360_v42 }
 0x2cb   : > { %7508 = vmatmul.msk.f32.gmra.mxu0 %vm1365_vm9, %v1361_v43 }
 0x2d3   : > { %7509 = vmatmul.msk.f32.gmra.mxu0 %vm1365_vm9, %v1362_v44 }
 0x2db   : > { %7510 = vmatmul.msk.f32.gmra.mxu0 %vm1365_vm9, %v1363_v45 }
 0x320   : > { %v1411_v46 = vpop.f32.mrf.mxu0 }
 0x321   : > { %1435 = vxpose.xlu0.b32.start [1/8] (short) %v1411_v46, 128 }
 0x328   : > { %v1414_v47 = vpop.f32.mrf.mxu0 }
 0x329   : > { %1436 = vxpose.xlu0.b32.cont [2/8] (short) %v1414_v47, 128 }
 0x330   : > { %v1417_v48 = vpop.f32.mrf.mxu0 }
 0x331   : > { %1437 = vxpose.xlu0.b32.cont [3/8] (short) %v1417_v48, 128 }
 0x338   : > { %v1420_v49 = vpop.f32.mrf.mxu0 }
 0x339   : > { %1438 = vxpose.xlu0.b32.cont [4/8] (short) %v1420_v49, 128 }
 0x340   : > { %v1423_v50 = vpop.f32.mrf.mxu0 }
 0x341   : > { %1439 = vxpose.xlu0.b32.cont [5/8] (short) %v1423_v50, 128 }
 0x348   : > { %v1426_v51 = vpop.f32.mrf.mxu0 }
 0x349   : > { %1440 = vxpose.xlu0.b32.cont [6/8] (short) %v1426_v51, 128 }
 0x350   : > { %v1429_v52 = vpop.f32.mrf.mxu0 }
 0x351   : > { %1441 = vxpose.xlu0.b32.cont [7/8] (short) %v1429_v52, 128 }
 0x358   : > { %v1432_v53 = vpop.f32.mrf.mxu0 }
 0x359   : > { %1442 = vxpose.xlu0.b32.end [8/8] (short) %v1432_v53, 128 }
 0x3c5   : > { %v1451_v59 = vpop.trf.xlu0 }
 0x3c6   : > { %v1471_v61 = vadd.f32 %v10044_v58, %v1451_v59 }
 0x3c8   : > { %v1489_v63 = vmul.f32 %v10046_v60, %v1471_v61 }
 0x3ca   : > { %v1507_v2 = vadd.f32 %v10049_v62, %v1489_v63 }
 0x3cc   : > { %v1523_v5 = vmax.f32 %v1507_v2, 0.0 }
 0x3cd   : > { %v1452_v0 = vpop.trf.xlu0 }
 0x3ce   : > { %v1472_v1 = vadd.f32 %v10044_v58, %v1452_v0 }
 0x3d0   : > { %v1490_v3 = vmul.f32 %v10046_v60, %v1472_v1 }
 0x3d2   : > { %v1508_v4 = vadd.f32 %v10049_v62, %v1490_v3 }
 0x3d4   : > { %v1524_v6 = vmax.f32 %v1508_v4, 0.0 }
 0x3d5   : > { %v1453_v7 = vpop.trf.xlu0 }
 0x3d6   : > { %v1539_v8 = vpack.c.bf16 %v1524_v6, %v1523_v5  ;;  %v1473_v9 = vadd.f32 %v10044_v58, %v1453_v7 }
 0x3d8   : > { %7527 = vmatmul.msk.bf16.vlgmr.msra.gmra.mxu1 %vm1583_vm10, %v1539_v8  ;;  %v1491_v18 = vmul.f32 %v10046_v60, %v1473_v9 }
 0x3da   : > { %v1509_v12 = vadd.f32 %v10049_v62, %v1491_v18 }
 0x3dc   : > { %v1525_v15 = vmax.f32 %v1509_v12, 0.0 }
 0x3dd   : > { %v1454_v10 = vpop.trf.xlu0 }
 0x3de   : > { %v1474_v11 = vadd.f32 %v10044_v58, %v1454_v10 }
 0x3e0   : > { %v1492_v13 = vmul.f32 %v10046_v60, %v1474_v11 }
 0x3e2   : > { %v1510_v14 = vadd.f32 %v10049_v62, %v1492_v13 }
 0x3e4   : > { %v1526_v16 = vmax.f32 %v1510_v14, 0.0 }
 0x3e5   : > { %v1455_v17 = vpop.trf.xlu0 }
 0x3e6   : > { %v1540_v19 = vpack.c.bf16 %v1526_v16, %v1525_v15  ;;  %v1475_v20 = vadd.f32 %v10044_v58, %v1455_v17 }
 0x3e8   : > { %7528 = vmatmul.msk.bf16.gmra.mxu1 %vm1583_vm10, %v1540_v19  ;;  %v1493_v21 = vmul.f32 %v10046_v60, %v1475_v20 }
 0x3ea   : > { %v1511_v24 = vadd.f32 %v10049_v62, %v1493_v21 }
 0x3ec   : > { %v1527_v27 = vmax.f32 %v1511_v24, 0.0 }
 0x3ed   : > { %v1456_v22 = vpop.trf.xlu0 }
 0x3ee   : > { %v1476_v23 = vadd.f32 %v10044_v58, %v1456_v22 }
 0x3f0   : > { %v1494_v25 = vmul.f32 %v10046_v60, %v1476_v23 }
 0x3f2   : > { %v1512_v26 = vadd.f32 %v10049_v62, %v1494_v25 }
 0x3f4   : > { %v1528_v28 = vmax.f32 %v1512_v26, 0.0 }
 0x3f5   : > { %v1457_v29 = vpop.trf.xlu0 }
 0x3f6   : > { %v1541_v30 = vpack.c.bf16 %v1528_v28, %v1527_v27  ;;  %v1477_v31 = vadd.f32 %v10044_v58, %v1457_v29 }
 0x3f8   : > { %7529 = vmatmul.msk.bf16.gmra.mxu1 %vm1583_vm10, %v1541_v30  ;;  %v1495_v32 = vmul.f32 %v10046_v60, %v1477_v31 }
 0x3fa   : > { %v1513_v35 = vadd.f32 %v10049_v62, %v1495_v32  ;;  %v10106_v32 = vld [vmem:[#allocation15] ss:$0 sm:$0xff] }
 0x3fc   : > { %v1529_v38 = vmax.f32 %v1513_v35, 0.0 }
 0x3fd   : > { %v1458_v33 = vpop.trf.xlu0 }
 0x3fe   : > { %v1478_v34 = vadd.f32 %v10044_v58, %v1458_v33 }
 0x400   : > { %v1496_v36 = vmul.f32 %v10046_v60, %v1478_v34 }
 0x402   : > { %v1514_v37 = vadd.f32 %v10049_v62, %v1496_v36 }
 0x404   : > { %v1530_v39 = vmax.f32 %v1514_v37, 0.0 }
 0x405   : > { %v1459_v40 = vpop.trf.xlu0 }
 0x406   : > { %v1542_v41 = vpack.c.bf16 %v1530_v39, %v1529_v38  ;;  %v1479_v42 = vadd.f32 %v10044_v58, %v1459_v40 }
 0x408   : > { %7530 = vmatmul.msk.bf16.vlgmr.msra.gmra.mxu2 %vm1583_vm10, %v1542_v41  ;;  %v1497_v43 = vmul.f32 %v10046_v60, %v1479_v42 }
 0x40a   : > { %v1515_v46 = vadd.f32 %v10049_v62, %v1497_v43 }
 0x40c   : > { %v1531_v49 = vmax.f32 %v1515_v46, 0.0 }
 0x40d   : > { %v1460_v44 = vpop.trf.xlu0 }
 0x40e   : > { %v1480_v45 = vadd.f32 %v10044_v58, %v1460_v44 }
 0x410   : > { %v1498_v47 = vmul.f32 %v10046_v60, %v1480_v45 }
 0x412   : > { %v1516_v48 = vadd.f32 %v10049_v62, %v1498_v47 }
 0x414   : > { %v1532_v50 = vmax.f32 %v1516_v48, 0.0 }
 0x415   : > { %v1461_v51 = vpop.trf.xlu0 }
 0x416   : > { %v1543_v52 = vpack.c.bf16 %v1532_v50, %v1531_v49  ;;  %v1481_v53 = vadd.f32 %v10044_v58, %v1461_v51 }
 0x418   : > { %7531 = vmatmul.msk.bf16.gmra.mxu2 %vm1583_vm10, %v1543_v52  ;;  %v1499_v54 = vmul.f32 %v10046_v60, %v1481_v53 }
 0x41a   : > { %v1517_v57 = vadd.f32 %v10049_v62, %v1499_v54 }
 0x41c   : > { %v1533_v63 = vmax.f32 %v1517_v57, 0.0 }
 0x41d   : > { %v1462_v55 = vpop.trf.xlu0 }
 0x41e   : > { %v1482_v56 = vadd.f32 %v10044_v58, %v1462_v55 }
 0x420   : > { %v1500_v59 = vmul.f32 %v10046_v60, %v1482_v56 }
 0x422   : > { %v1518_v61 = vadd.f32 %v10049_v62, %v1500_v59 }
 0x424   : > { %v1534_v0 = vmax.f32 %v1518_v61, 0.0 }
 0x425   : > { %v1463_v1 = vpop.trf.xlu0 }
 0x426   : > { %v1544_v2 = vpack.c.bf16 %v1534_v0, %v1533_v63  ;;  %v1483_v3 = vadd.f32 %v10044_v58, %v1463_v1 }
 0x428   : > { %7532 = vmatmul.msk.bf16.gmra.mxu2 %vm1583_vm10, %v1544_v2  ;;  %v1501_v4 = vmul.f32 %v10046_v60, %v1483_v3 }
 0x42a   : > { %v1519_v7 = vadd.f32 %v10049_v62, %v1501_v4 }
 0x42c   : > { %v1535_v18 = vmax.f32 %v1519_v7, 0.0 }
 0x42d   : > { %v1464_v5 = vpop.trf.xlu0 }
 0x42e   : > { %v1484_v6 = vadd.f32 %v10044_v58, %v1464_v5 }
 0x430   : > { %v1502_v8 = vmul.f32 %v10046_v60, %v1484_v6 }
 0x432   : > { %v1520_v9 = vadd.f32 %v10049_v62, %v1502_v8 }
 0x434   : > { %v1536_v10 = vmax.f32 %v1520_v9, 0.0 }
 0x435   : > { %v1465_v11 = vpop.trf.xlu0 }
 0x436   : > { %v1545_v12 = vpack.c.bf16 %v1536_v10, %v1535_v18  ;;  %v1485_v13 = vadd.f32 %v10044_v58, %v1465_v11 }
 0x438   : > { %7533 = vmatmul.msk.bf16.vlgmr.msra.gmra.mxu3 %vm1583_vm10, %v1545_v12  ;;  %v1503_v14 = vmul.f32 %v10046_v60, %v1485_v13 }
 0x43a   : > { %v1521_v17 = vadd.f32 %v10049_v62, %v1503_v14 }
 0x43c   : > { %v1537_v21 = vmax.f32 %v1521_v17, 0.0 }
 0x43d   : > { %v1466_v15 = vpop.trf.xlu0 }
 0x43e   : > { %v1486_v16 = vadd.f32 %v10044_v58, %v1466_v15 }
 0x440   : > { %v1504_v19 = vmul.f32 %v10046_v60, %v1486_v16 }
 0x442   : > { %v1522_v20 = vadd.f32 %v10049_v62, %v1504_v19 }
 0x444   : > { %v1538_v22 = vmax.f32 %v1522_v20, 0.0 }
 0x446   : > { %v1546_v23 = vpack.c.bf16 %v1538_v22, %v1537_v21 }
 0x448   : > { %7534 = vmatmul.msk.bf16.gmra.mxu3 %vm1583_vm10, %v1546_v23 }
 0x455   : > { %v1617_v24 = vpop.f32.mrf.mxu1 }
 0x456   : > { %v1618_v62 = vadd.f32 %v10106_v32, %v1617_v24 }
 0x458   : > { %v1678_v37 = vmul.f32 %v1618_v62, %v1618_v62 }
 0x45d   : > { %v1619_v25 = vpop.f32.mrf.mxu1 }
 0x45e   : > { %v1620_v60 = vadd.f32 %v10106_v32, %v1619_v25 }
 0x460   : > { %v1679_v34 = vmul.f32 %v1620_v60, %v1620_v60  ;;  %v1657_v38 = vadd.f32 %v1620_v60, %v1618_v62 }
 0x462   : > { %v1694_v43 = vadd.f32 %v1679_v34, %v1678_v37 }
 0x465   : > { %v1622_v27 = vpop.f32.mrf.mxu1 }
 0x466   : > { %v1623_v33 = vadd.f32 %v10106_v32, %v1622_v27 }
 0x468   : > { %v1680_v39 = vmul.f32 %v1623_v33, %v1623_v33  ;;  %v1658_v44 = vadd.f32 %v1657_v38, %v1623_v33 }
 0x46a   : > { %v1695_v47 = vadd.f32 %v1694_v43, %v1680_v39 }
 0x46d   : > { %v1624_v29 = vpop.f32.mrf.mxu1 }
 0x46e   : > { %v1625_v35 = vadd.f32 %v10106_v32, %v1624_v29 }
 0x470   : > { %v1681_v45 = vmul.f32 %v1625_v35, %v1625_v35  ;;  %v1659_v48 = vadd.f32 %v1658_v44, %v1625_v35 }
 0x472   : > { %v1696_v51 = vadd.f32 %v1695_v47, %v1681_v45 }
 0x475   : > { %v1627_v31 = vpop.f32.mrf.mxu1 }
 0x476   : > { %v1628_v40 = vadd.f32 %v10106_v32, %v1627_v31 }
 0x478   : > { %v1682_v49 = vmul.f32 %v1628_v40, %v1628_v40  ;;  %v1660_v52 = vadd.f32 %v1659_v48, %v1628_v40 }
 0x47a   : > { %v1697_v55 = vadd.f32 %v1696_v51, %v1682_v49 }
 0x47d   : > { %v1629_v36 = vpop.f32.mrf.mxu1 }
 0x47e   : > { %v1630_v46 = vadd.f32 %v10106_v32, %v1629_v36 }
 0x480   : > { %v1683_v53 = vmul.f32 %v1630_v46, %v1630_v46  ;;  %v1661_v56 = vadd.f32 %v1660_v52, %v1630_v46 }
 0x482   : > { %v1698_v63 = vadd.f32 %v1697_v55, %v1683_v53 }
 0x48b   : > { %v1632_v26 = vpop.f32.mrf.mxu2 }
 0x48c   : > { %v1633_v50 = vadd.f32 %v10106_v32, %v1632_v26 }
 0x48e   : > { %v1684_v57 = vmul.f32 %v1633_v50, %v1633_v50  ;;  %v1662_v0 = vadd.f32 %v1661_v56, %v1633_v50 }
 0x490   : > { %v1699_v4 = vadd.f32 %v1698_v63, %v1684_v57 }
 0x493   : > { %v1634_v28 = vpop.f32.mrf.mxu2 }
 0x494   : > { %v1635_v54 = vadd.f32 %v10106_v32, %v1634_v28 }
 0x496   : > { %v1685_v1 = vmul.f32 %v1635_v54, %v1635_v54  ;;  %v1663_v5 = vadd.f32 %v1662_v0, %v1635_v54 }
 0x498   : > { %v1700_v8 = vadd.f32 %v1699_v4, %v1685_v1 }
 0x49b   : > { %v1637_v30 = vpop.f32.mrf.mxu2 }
 0x49c   : > { %v1638_v59 = vadd.f32 %v10106_v32, %v1637_v30 }
 0x49e   : > { %v1686_v6 = vmul.f32 %v1638_v59, %v1638_v59  ;;  %v1664_v9 = vadd.f32 %v1663_v5, %v1638_v59 }
 0x4a0   : > { %v1701_v11 = vadd.f32 %v1700_v8, %v1686_v6 }
 0x4a3   : > { %v1639_v58 = vpop.f32.mrf.mxu2 }
 0x4a4   : > { %v1640_v2 = vadd.f32 %v10106_v32, %v1639_v58 }
 0x4a6   : > { %v1687_v18 = vmul.f32 %v1640_v2, %v1640_v2  ;;  %v1665_v12 = vadd.f32 %v1664_v9, %v1640_v2 }
 0x4a8   : > { %v1702_v16 = vadd.f32 %v1701_v11, %v1687_v18 }
 0x4ab   : > { %v1642_v41 = vpop.f32.mrf.mxu2 }
 0x4ac   : > { %v1643_v7 = vadd.f32 %v10106_v32, %v1642_v41 }
 0x4ae   : > { %v1688_v13 = vmul.f32 %v1643_v7, %v1643_v7  ;;  %v1666_v17 = vadd.f32 %v1665_v12, %v1643_v7 }
 0x4b0   : > { %v1703_v21 = vadd.f32 %v1702_v16, %v1688_v13 }
 0x4b3   : > { %v1644_v3 = vpop.f32.mrf.mxu2 }
 0x4b4   : > { %v1645_v10 = vadd.f32 %v10106_v32, %v1644_v3 }
 0x4b6   : > { %v1689_v19 = vmul.f32 %v1645_v10, %v1645_v10  ;;  %v1667_v22 = vadd.f32 %v1666_v17, %v1645_v10 }
 0x4b8   : > { %v1704_v25 = vadd.f32 %v1703_v21, %v1689_v19 }
 0x4bb   : > { %v1647_v42 = vpop.f32.mrf.mxu3 }
 0x4bc   : > { %v1648_v14 = vadd.f32 %v10106_v32, %v1647_v42 }
 0x4be   : > { %v1690_v23 = vmul.f32 %v1648_v14, %v1648_v14  ;;  %v1668_v26 = vadd.f32 %v1667_v22, %v1648_v14 }
 0x4c0   : > { %v1705_v28 = vadd.f32 %v1704_v25, %v1690_v23 }
 0x4c3   : > { %v1649_v61 = vpop.f32.mrf.mxu3 }
 0x4c4   : > { %v1650_v20 = vadd.f32 %v10106_v32, %v1649_v61 }
 0x4c6   : > { %v1691_v27 = vmul.f32 %v1650_v20, %v1650_v20  ;;  %v1669_v29 = vadd.f32 %v1668_v26, %v1650_v20 }
 0x4c8   : > { %v1706_v58 = vadd.f32 %v1705_v28, %v1691_v27 }
 0x4cb   : > { %v1652_v15 = vpop.f32.mrf.mxu3 }
 0x4cc   : > { %v1653_v24 = vadd.f32 %v10106_v32, %v1652_v15 }
 0x4ce   : > { %v1692_v30 = vmul.f32 %v1653_v24, %v1653_v24  ;;  %v1670_v60 = vadd.f32 %v1669_v29, %v1653_v24 }
 0x4d0   : > { %v1707_v33 = vadd.f32 %v1706_v58, %v1692_v30 }
 0x4d3   : > { %v1654_v31 = vpop.f32.mrf.mxu3 }
 0x4d4   : > { %v1655_v62 = vadd.f32 %v10106_v32, %v1654_v31 }
 0x4d6   : > { %v1671_v34 = vadd.f32 %v1670_v60, %v1655_v62  ;;  %v1693_v35 = vmul.f32 %v1655_v62, %v1655_v62 }
 0x4d8   : > { %v1672_v36 = vrot.slane %v1671_v34, 4  ;;  %v1708_v37 = vadd.f32 %v1707_v33, %v1693_v35 }
 0x4da   : > { %v1673_v38 = vadd.f32 %v1672_v36, %v1671_v34  ;;  %v1709_v39 = vrot.slane %v1708_v37, 4 }
 0x4dc   : > { %v1674_v40 = vrot.slane %v1673_v38, 2  ;;  %v1710_v41 = vadd.f32 %v1709_v39, %v1708_v37 }
 0x4de   : > { %v1675_v42 = vadd.f32 %v1674_v40, %v1673_v38  ;;  %v1711_v43 = vrot.slane %v1710_v41, 2 }
 0x4e0   : > { %v1676_v44 = vrot.slane %v1675_v42, 1  ;;  %v1712_v45 = vadd.f32 %v1711_v43, %v1710_v41  ;;  %1716 = sbr.rel (%p9910_p8) target bundleno = 1256 (0x4e8), region = 224 }
 0x4e2   : > { %v1677_v46 = vadd.f32 %v1676_v44, %v1675_v42  ;;  %v1713_v47 = vrot.slane %v1712_v45, 1 }
 0x4e4   : > { %v1714_v48 = vadd.f32 %v1713_v47, %v1712_v45 }
 0x4e5   : > { %v9502_v32 = vmov 0.0  }
 0x4e6   : > { %1717 = vst [vmem:[#allocation3] sm:$0x1] %v9502_v32 }
 0x4e7   : > { %1718 = vst [vmem:[#allocation3 + $0x1] sm:$0x1] %v9502_v32 }
 0x4e8 PF:  {}
 0x4ed   : > { %v1719_v49 = vld [vmem:[#allocation3] sm:$0x1]  ;;  %1726 = sbr.rel (%p9914_p9) target bundleno = 1305 (0x519), region = 228 }
 0x4ee   : > { %v1722_v50 = vld [vmem:[#allocation3 + $0x1] sm:$0x1]  ;;  %v1720_v51 = vadd.f32 %v1719_v49, %v1677_v46 }
 0x4ef   : > { %v1723_v52 = vadd.f32 %v1722_v50, %v1714_v48 }
 0x4f0   : > { %1721 = vst [vmem:[#allocation3] sm:$0x1] %v1720_v51 }
 0x4f1   : > { %1724 = vst [vmem:[#allocation3 + $0x1] sm:$0x1] %v1723_v52 }
 0x4f2   : > { %v1733_v4 = vld [vmem:[#allocation17] sm:$0x1]  ;;  %v1747_v8 = vld [vmem:[#allocation18] sm:$0x1] }
 0x4f7   : > { %v1727_v53 = vld [vmem:[#allocation3] sm:$0x1] }
 0x4f8   : > { %v1729_v54 = vld [vmem:[#allocation3 + $0x1] sm:$0x1]  ;;  %v1728_v55 = vmul.f32 0.0009765625, %v1727_v53 }
 0x4f9   : > { %v1730_v56 = vmul.f32 0.0009765625, %v1729_v54 }
 0x4fa   : > { %v1731_v57 = vmul.f32 %v1728_v55, %v1728_v55 }
 0x4fc   : > { %v1732_v59 = vsub.f32 %v1730_v56, %v1731_v57 }
 0x4fe   : > { %v1734_v61 = vadd.f32 1e-05, %v1732_v59 }
 0x500   : > { %8613 = vrsqrt.f32 %v1734_v61  ;;  %vm1741_vm11 = vweird.f32 %v1734_v61 }
 0x506   : > { %v8614_v63 = vpop.eup %8613 }
 0x507   : > { %v1736_v0 = vmul.f32 %v8614_v63, %v1734_v61  ;;  %vm1742_vm12 = vweird.f32 %v8614_v63 }
 0x508   : > { %vm1743_vm13 = vmor %vm1741_vm11, %vm1742_vm12 }
 0x509   : > { %v1737_v1 = vmul.f32 %v8614_v63, %v1736_v0 }
 0x50b   : > { %v1738_v2 = vmul.f32 0.5, %v1737_v1 }
 0x50d   : > { %v1739_v3 = vsub.f32 1.5, %v1738_v2 }
 0x50f   : > { %v1740_v5 = vmul.f32 %v8614_v63, %v1739_v3 }
 0x511   : > { %v1744_v6 = vsel %vm1743_vm13, %v8614_v63, %v1740_v5 }
 0x512   : > { %v1745_v7 = vmul.f32 %v1744_v6, %v1733_v4 }
 0x514   : > { %1746 = vst [vmem:[#allocation3 + $0x2] sm:$0x1] %v1745_v7  ;;  %v1748_v9 = vmul.f32 %v1745_v7, %v1728_v55 }
 0x516   : > { %v1749_v18 = vsub.f32 %v1747_v8, %v1748_v9 }
 0x518   : > { %1750 = vst [vmem:[#allocation3 + $0x3] sm:$0x1] %v1749_v18 }
 0x519 PF: > { %s11761_s2 = sld [smem:[#allocation60_spill]] }
 0x51f   : > { %p7535_p11 = scmp.ne.s32.totalorder %s11761_s2, 2 }
 0x520   : > { %s11762_s9 = sld [smem:[#allocation66_spill]] (!%p7535_p11) }
 0x521   : > { %1754 = sbr.rel (%p7535_p11) target bundleno = 2232 (0x8b8), region = 232 }
 0x526   : > { %v1763_v10 = vld [vmem:[%s9856_s27] sm:$0xf]  ;;  %vm1789_vm14 = vcmask 1043456   ;;  %v1755_v11 = vld [vmem:[%s11762_s9] sm:$0xff]  ;;  %vm1764_vm15 = vcmask 31744   ;;  %v1756_v12 = vld [vmem:[%s11762_s9 + $0x8] sm:$0xff] }
 0x527   : > { %7536 = vmatpush.msk.msra.mxu0 %vm1789_vm14, %v1763_v10  ;;  %v1757_v13 = vld [vmem:[%s11762_s9 + $0x10] sm:$0xff]  ;;  %v1758_v14 = vld [vmem:[%s11762_s9 + $0x18] sm:$0xff]  ;;  %v1759_v15 = vld [vmem:[%s11762_s9 + $0x20] sm:$0xff]  ;;  %vm1982_vm0 = vcmask 523264  }
 0x528   : > { %7537 = vmatmul.msk.f32.vlgmr.msra.gmra.mxu0 %vm1764_vm15, %v1755_v11  ;;  %v1760_v16 = vld [vmem:[%s11762_s9 + $0x28] sm:$0xff]  ;;  %v1761_v17 = vld [vmem:[%s11762_s9 + $0x30] sm:$0xff]  ;;  %v1762_v19 = vld [vmem:[%s11762_s9 + $0x38] sm:$0xff] }
 0x529   : > { %v8126_v28 = vld [vmem:[#allocation14 + $0x18] sm:$0xff]  ;;  %v8125_v29 = vld [vmem:[#allocation14 + $0x10] sm:$0xff]  ;;  %v8124_v30 = vld [vmem:[#allocation14 + $0x8] sm:$0xff] }
 0x52a   : > { %2011 = vmatpush.bf16.msra.mxu1 %v8126_v28  ;;  %8270 = vmatpush.bf16.msra.mxu2 %v8126_v28  ;;  %v8123_v31 = vld [vmem:[#allocation14] sm:$0xff]  ;;  %v10163_v58 = vld [vmem:[#allocation9] ss:$0 sm:$0xff]  ;;  %v10165_v62 = vld [vmem:[#allocation2 + $0x2] ss:$0 sm:$0xff] }
 0x52b   : > { %8271 = vmatpush.bf16.msra.mxu3 %v8126_v28  ;;  %v10168_v34 = vld [vmem:[#allocation2 + $0x3] ss:$0 sm:$0xff] }
 0x52e   : > { %2012 = vmatpush.bf16.msra.mxu1 %v8125_v29  ;;  %8272 = vmatpush.bf16.msra.mxu2 %v8125_v29 }
 0x52f   : > { %8273 = vmatpush.bf16.msra.mxu3 %v8125_v29 }
 0x530   : > { %7538 = vmatmul.msk.f32.gmra.mxu0 %vm1764_vm15, %v1756_v12 }
 0x532   : > { %2013 = vmatpush.bf16.msra.mxu1 %v8124_v30  ;;  %8274 = vmatpush.bf16.msra.mxu2 %v8124_v30 }
 0x533   : > { %8275 = vmatpush.bf16.msra.mxu3 %v8124_v30 }
 0x536   : > { %2014 = vmatpush.bf16.msra.mxu1 %v8123_v31  ;;  %8276 = vmatpush.bf16.msra.mxu2 %v8123_v31 }
 0x537   : > { %8277 = vmatpush.bf16.msra.mxu3 %v8123_v31 }
 0x538   : > { %7539 = vmatmul.msk.f32.gmra.mxu0 %vm1764_vm15, %v1757_v13 }
 0x540   : > { %7540 = vmatmul.msk.f32.gmra.mxu0 %vm1764_vm15, %v1758_v14 }
 0x548   : > { %7541 = vmatmul.msk.f32.gmra.mxu0 %vm1764_vm15, %v1759_v15 }
 0x550   : > { %7542 = vmatmul.msk.f32.gmra.mxu0 %vm1764_vm15, %v1760_v16 }
 0x558   : > { %7543 = vmatmul.msk.f32.gmra.mxu0 %vm1764_vm15, %v1761_v17 }
 0x560   : > { %7544 = vmatmul.msk.f32.gmra.mxu0 %vm1764_vm15, %v1762_v19 }
 0x5a5   : > { %v1810_v20 = vpop.f32.mrf.mxu0 }
 0x5a6   : > { %1834 = vxpose.xlu0.b32.start [1/8] (short) %v1810_v20, 128 }
 0x5ad   : > { %v1813_v21 = vpop.f32.mrf.mxu0 }
 0x5ae   : > { %1835 = vxpose.xlu0.b32.cont [2/8] (short) %v1813_v21, 128 }
 0x5b5   : > { %v1816_v22 = vpop.f32.mrf.mxu0 }
 0x5b6   : > { %1836 = vxpose.xlu0.b32.cont [3/8] (short) %v1816_v22, 128 }
 0x5bd   : > { %v1819_v23 = vpop.f32.mrf.mxu0 }
 0x5be   : > { %1837 = vxpose.xlu0.b32.cont [4/8] (short) %v1819_v23, 128 }
 0x5c5   : > { %v1822_v24 = vpop.f32.mrf.mxu0 }
 0x5c6   : > { %1838 = vxpose.xlu0.b32.cont [5/8] (short) %v1822_v24, 128 }
 0x5cd   : > { %v1825_v25 = vpop.f32.mrf.mxu0 }
 0x5ce   : > { %1839 = vxpose.xlu0.b32.cont [6/8] (short) %v1825_v25, 128  ;;  %v7803_v25 = vld [vmem:[#allocation20 + $0x1c8] sm:$0xf] }
 0x5d5   : > { %v1828_v26 = vpop.f32.mrf.mxu0 }
 0x5d6   : > { %1840 = vxpose.xlu0.b32.cont [7/8] (short) %v1828_v26, 128  ;;  %v8188_v26 = vld [vmem:[#allocation20 + $0x1e4] sm:$0xf0] }
 0x5d7   : > { %v7804_v28 = vor.u32 %v8188_v26, %v7803_v25 }
 0x5d9   : > { %2616 = vmatpush.bf16.msrb.mxu0 %v7804_v28 }
 0x5dd   : > { %v1831_v27 = vpop.f32.mrf.mxu0 }
 0x5de   : > { %1841 = vxpose.xlu0.b32.end [8/8] (short) %v1831_v27, 128 }
 0x64a   : > { %v1850_v60 = vpop.trf.xlu0 }
 0x64b   : > { %v1870_v33 = vadd.f32 %v10163_v58, %v1850_v60  ;;  %v7771_v60 = vld [vmem:[#allocation20 + $0x188] sm:$0xf] }
 0x64d   : > { %v1888_v35 = vmul.f32 %v10165_v62, %v1870_v33  ;;  %v8180_v33 = vld [vmem:[#allocation20 + $0x1a4] sm:$0xf0] }
 0x64f   : > { %v1906_v38 = vadd.f32 %v10168_v34, %v1888_v35 }
 0x651   : > { %v1922_v41 = vmax.f32 %v1906_v38, 0.0 }
 0x652   : > { %v1851_v36 = vpop.trf.xlu0 }
 0x653   : > { %v1871_v37 = vadd.f32 %v10163_v58, %v1851_v36  ;;  %v7772_v36 = vor.u32 %v8180_v33, %v7771_v60  ;;  %v7709_v33 = vld [vmem:[#allocation20 + $0x128] sm:$0xf0] }
 0x655   : > { %v1889_v39 = vmul.f32 %v10165_v62, %v1871_v37  ;;  %2617 = vmatpush.bf16.msrb.mxu0 %v7772_v36 }
 0x657   : > { %v1907_v40 = vadd.f32 %v10168_v34, %v1889_v39 }
 0x659   : > { %v1923_v42 = vmax.f32 %v1907_v40, 0.0 }
 0x65a   : > { %v1852_v43 = vpop.trf.xlu0 }
 0x65b   : > { %v1938_v44 = vpack.c.bf16 %v1923_v42, %v1922_v41  ;;  %v1872_v45 = vadd.f32 %v10163_v58, %v1852_v43  ;;  %v8183_v43 = vld [vmem:[#allocation20 + $0x1c4] sm:$0xf] }
 0x65d   : > { %7561 = vmatmul.msk.bf16.vlgmr.msra.gmra.mxu1 %vm1982_vm0, %v1938_v44  ;;  %v1890_v46 = vmul.f32 %v10165_v62, %v1872_v45  ;;  %v7797_v44 = vld [vmem:[#allocation20 + $0x1e0] sm:$0xf0] }
 0x65f   : > { %v1908_v32 = vadd.f32 %v10168_v34, %v1890_v46  ;;  %v7800_v46 = vor.u32 %v8183_v43, %v7797_v44  ;;  %v7667_v43 = vld [vmem:[#allocation20 + $0xc0] sm:$0xf] }
 0x660   : > { %v8155_v44 = vld [vmem:[#allocation20 + $0xdc] sm:$0xf0] }
 0x661   : > { %v1924_v51 = vmax.f32 %v1908_v32, 0.0  ;;  %v7739_v32 = vld [vmem:[#allocation20 + $0x148] sm:$0xf]  ;;  %2567 = vmatpush.bf16.msrb.mxu3 %v7800_v46 }
 0x662   : > { %v1853_v47 = vpop.trf.xlu0 }
 0x663   : > { %v1873_v48 = vadd.f32 %v10163_v58, %v1853_v47  ;;  %v8175_v47 = vld [vmem:[#allocation20 + $0x184] sm:$0xf] }
 0x665   : > { %v1891_v49 = vmul.f32 %v10165_v62, %v1873_v48  ;;  %v7765_v48 = vld [vmem:[#allocation20 + $0x1a0] sm:$0xf0] }
 0x667   : > { %v1909_v50 = vadd.f32 %v10168_v34, %v1891_v49 }
 0x669   : > { %v1925_v52 = vmax.f32 %v1909_v50, 0.0  ;;  %v8172_v50 = vld [vmem:[#allocation20 + $0x164] sm:$0xf0] }
 0x66a   : > { %v1854_v53 = vpop.trf.xlu0 }
 0x66b   : > { %v1939_v54 = vpack.c.bf16 %v1925_v52, %v1924_v51  ;;  %v1874_v55 = vadd.f32 %v10163_v58, %v1854_v53  ;;  %v8184_v51 = vld [vmem:[#allocation20 + $0x1cc] sm:$0xf]  ;;  %v7768_v53 = vor.u32 %v8175_v47, %v7765_v48  ;;  %v7668_v47 = vor.u32 %v8155_v44, %v7667_v43  ;;  %v8186_v44 = vld [vmem:[#allocation20 + $0x1dc] sm:$0xf] }
 0x66c   : > { %v7805_v52 = vld [vmem:[#allocation20 + $0x1e8] sm:$0xf0] }
 0x66d   : > { %7562 = vmatmul.msk.bf16.gmra.mxu1 %vm1982_vm0, %v1939_v54  ;;  %v1892_v56 = vmul.f32 %v10165_v62, %v1874_v55  ;;  %v7740_v54 = vor.u32 %v8172_v50, %v7739_v32  ;;  %v7808_v55 = vor.u32 %v8184_v51, %v7805_v52  ;;  %2568 = vmatpush.bf16.msrb.mxu3 %v7768_v53  ;;  %v7677_v48 = vld [vmem:[#allocation20 + $0xe8] sm:$0xf0]  ;;  %v7637_v50 = vld [vmem:[#allocation20 + $0xa0] sm:$0xf0]  ;;  %v7643_v51 = vld [vmem:[#allocation20 + $0x88] sm:$0xf] }
 0x66e   : > { %v8148_v53 = vld [vmem:[#allocation20 + $0xa4] sm:$0xf0] }
 0x66f   : > { %v1910_v61 = vadd.f32 %v10168_v34, %v1892_v56  ;;  %v7795_v56 = vld [vmem:[#allocation20 + $0x1c0] sm:$0xf]  ;;  %2618 = vmatpush.bf16.msrb.mxu0 %v7740_v54  ;;  %2665 = vmatpush.bf16.msrb.mxu1 %v7808_v55 }
 0x670   : > { %v7635_v54 = vld [vmem:[#allocation20 + $0x80] sm:$0xf] }
 0x671   : > { %v1926_v1 = vmax.f32 %v1910_v61, 0.0  ;;  %v8147_v55 = vld [vmem:[#allocation20 + $0x9c] sm:$0xf0] }
 0x672   : > { %v1855_v57 = vpop.trf.xlu0 }
 0x673   : > { %v1875_v59 = vadd.f32 %v10163_v58, %v1855_v57  ;;  %v8187_v57 = vld [vmem:[#allocation20 + $0x1dc] sm:$0xf0] }
 0x674   : > { %v7796_v61 = vor.u32 %v8187_v57, %v7795_v56  ;;  %v7644_v57 = vor.u32 %v8148_v53, %v7643_v51 }
 0x675   : > { %v1893_v63 = vmul.f32 %v10165_v62, %v1875_v59 }
 0x676   : > { %2518 = vmatpush.bf16.msrb.mxu2 %v7796_v61  ;;  %v8144_v61 = vld [vmem:[#allocation20 + $0x8c] sm:$0xf] }
 0x677   : > { %v1911_v0 = vadd.f32 %v10168_v34, %v1893_v63  ;;  %v8167_v63 = vld [vmem:[#allocation20 + $0x144] sm:$0xf] }
 0x679   : > { %v1927_v2 = vmax.f32 %v1911_v0, 0.0  ;;  %v7733_v0 = vld [vmem:[#allocation20 + $0x160] sm:$0xf0] }
 0x67a   : > { %v1856_v3 = vpop.trf.xlu0 }
 0x67b   : > { %v1940_v4 = vpack.c.bf16 %v1927_v2, %v1926_v1  ;;  %v1876_v5 = vadd.f32 %v10163_v58, %v1856_v3  ;;  %v8176_v1 = vld [vmem:[#allocation20 + $0x18c] sm:$0xf]  ;;  %v7707_v3 = vld [vmem:[#allocation20 + $0x108] sm:$0xf] }
 0x67c   : > { %v7773_v2 = vld [vmem:[#allocation20 + $0x1a8] sm:$0xf0] }
 0x67d   : > { %7563 = vmatmul.msk.bf16.gmra.mxu1 %vm1982_vm0, %v1940_v4  ;;  %v1894_v6 = vmul.f32 %v10165_v62, %v1876_v5  ;;  %v8164_v4 = vld [vmem:[#allocation20 + $0x124] sm:$0xf0]  ;;  %v7776_v5 = vor.u32 %v8176_v1, %v7773_v2 }
 0x67f   : > { %v1912_v9 = vadd.f32 %v10168_v34, %v1894_v6  ;;  %v7708_v6 = vor.u32 %v8164_v4, %v7707_v3  ;;  %2666 = vmatpush.bf16.msrb.mxu1 %v7776_v5  ;;  %v7603_v3 = vld [vmem:[#allocation20 + $0x40] sm:$0xf]  ;;  %v8135_v5 = vld [vmem:[#allocation20 + $0x44] sm:$0xf] }
 0x680   : > { %v8139_v4 = vld [vmem:[#allocation20 + $0x5c] sm:$0xf0] }
 0x681   : > { %v1928_v11 = vmax.f32 %v1912_v9, 0.0  ;;  %v7736_v9 = vor.u32 %v8167_v63, %v7733_v0  ;;  %2619 = vmatpush.bf16.msrb.mxu0 %v7708_v6  ;;  %v7645_v63 = vld [vmem:[#allocation20 + $0xa8] sm:$0xf0]  ;;  %v7604_v6 = vor.u32 %v8139_v4, %v7603_v3 }
 0x682   : > { %v1857_v7 = vpop.trf.xlu0  ;;  %v7648_v1 = vor.u32 %v8144_v61, %v7645_v63  ;;  %v8177_v61 = vld [vmem:[#allocation20 + $0x194] sm:$0xf] }
 0x683   : > { %v1877_v8 = vadd.f32 %v10163_v58, %v1857_v7  ;;  %v7763_v7 = vld [vmem:[#allocation20 + $0x180] sm:$0xf]  ;;  %2569 = vmatpush.bf16.msrb.mxu3 %v7736_v9  ;;  %v8140_v9 = vld [vmem:[#allocation20 + $0x64] sm:$0xf0] }
 0x685   : > { %v1895_v18 = vmul.f32 %v10165_v62, %v1877_v8  ;;  %v8179_v8 = vld [vmem:[#allocation20 + $0x19c] sm:$0xf0] }
 0x687   : > { %v1913_v10 = vadd.f32 %v10168_v34, %v1895_v18  ;;  %v7764_v18 = vor.u32 %v8179_v8, %v7763_v7  ;;  %v7605_v7 = vld [vmem:[#allocation20 + $0x60] sm:$0xf0]  ;;  %v7611_v8 = vld [vmem:[#allocation20 + $0x48] sm:$0xf] }
 0x689   : > { %v1929_v12 = vmax.f32 %v1913_v10, 0.0  ;;  %v8159_v10 = vld [vmem:[#allocation20 + $0x104] sm:$0xf]  ;;  %2519 = vmatpush.bf16.msrb.mxu2 %v7764_v18 }
 0x68a   : > { %v1858_v13 = vpop.trf.xlu0 }
 0x68b   : > { %v1941_v14 = vpack.c.bf16 %v1929_v12, %v1928_v11  ;;  %v1878_v15 = vadd.f32 %v10163_v58, %v1858_v13  ;;  %v8168_v11 = vld [vmem:[#allocation20 + $0x14c] sm:$0xf] }
 0x68c   : > { %v7741_v12 = vld [vmem:[#allocation20 + $0x168] sm:$0xf0] }
 0x68d   : > { %7564 = vmatmul.msk.bf16.vlgmr.msra.gmra.mxu2 %vm1982_vm0, %v1941_v14  ;;  %v1896_v16 = vmul.f32 %v10165_v62, %v1878_v15  ;;  %v7701_v14 = vld [vmem:[#allocation20 + $0x120] sm:$0xf0]  ;;  %v7731_v15 = vld [vmem:[#allocation20 + $0x140] sm:$0xf] }
 0x68e   : > { %v7704_v25 = vor.u32 %v8159_v10, %v7701_v14  ;;  %v7613_v14 = vld [vmem:[#allocation20 + $0x68] sm:$0xf0] }
 0x68f   : > { %v1914_v20 = vadd.f32 %v10168_v34, %v1896_v16  ;;  %v8171_v16 = vld [vmem:[#allocation20 + $0x15c] sm:$0xf0] }
 0x690   : > { %2570 = vmatpush.bf16.msrb.mxu3 %v7704_v25 }
 0x691   : > { %v1930_v23 = vmax.f32 %v1914_v20, 0.0  ;;  %v7675_v20 = vld [vmem:[#allocation20 + $0xc8] sm:$0xf] }
 0x692   : > { %v1859_v17 = vpop.trf.xlu0 }
 0x693   : > { %v1879_v19 = vadd.f32 %v10163_v58, %v1859_v17 }
 0x695   : > { %v1897_v21 = vmul.f32 %v10165_v62, %v1879_v19  ;;  %v7744_v19 = vor.u32 %v8168_v11, %v7741_v12  ;;  %v7608_v11 = vor.u32 %v8135_v5, %v7605_v7  ;;  %v7612_v12 = vor.u32 %v8140_v9, %v7611_v8  ;;  %v7789_v7 = vld [vmem:[#allocation20 + $0x1b8] sm:$0xf0] }
 0x697   : > { %v1915_v22 = vadd.f32 %v10168_v34, %v1897_v21  ;;  %v8156_v21 = vld [vmem:[#allocation20 + $0xe4] sm:$0xf0]  ;;  %2667 = vmatpush.bf16.msrb.mxu1 %v7744_v19  ;;  %v8127_v19 = vld [vmem:[#allocation20 + $0x4] sm:$0xf] }
 0x699   : > { %v1931_v24 = vmax.f32 %v1915_v22, 0.0 }
 0x69a   : > { %v1860_v27 = vpop.trf.xlu0 }
 0x69b   : > { %v1942_v29 = vpack.c.bf16 %v1931_v24, %v1930_v23  ;;  %v1880_v30 = vadd.f32 %v10163_v58, %v1860_v27  ;;  %v7732_v23 = vor.u32 %v8171_v16, %v7731_v15  ;;  %v7676_v24 = vor.u32 %v8156_v21, %v7675_v20  ;;  %v7571_v16 = vld [vmem:[#allocation20] sm:$0xf]  ;;  %v7573_v21 = vld [vmem:[#allocation20 + $0x20] sm:$0xf0] }
 0x69c   : > { %v7576_v25 = vor.u32 %v8127_v19, %v7573_v21 }
 0x69d   : > { %7565 = vmatmul.msk.bf16.gmra.mxu2 %vm1982_vm0, %v1942_v29  ;;  %v1898_v31 = vmul.f32 %v10165_v62, %v1880_v30  ;;  %2620 = vmatpush.bf16.msrb.mxu0 %v7676_v24  ;;  %v7699_v29 = vld [vmem:[#allocation20 + $0x100] sm:$0xf] }
 0x69e   : > { %2520 = vmatpush.bf16.msrb.mxu2 %v7732_v23  ;;  %v8163_v30 = vld [vmem:[#allocation20 + $0x11c] sm:$0xf0]  ;;  %v8132_v23 = vld [vmem:[#allocation20 + $0x24] sm:$0xf0] }
 0x69f   : > { %v1916_v38 = vadd.f32 %v10168_v34, %v1898_v31  ;;  %v8160_v31 = vld [vmem:[#allocation20 + $0x10c] sm:$0xf]  ;;  %v7700_v60 = vor.u32 %v8163_v30, %v7699_v29 }
 0x6a1   : > { %v1932_v41 = vmax.f32 %v1916_v38, 0.0  ;;  %2621 = vmatpush.bf16.msrb.mxu0 %v7644_v57  ;;  %v7779_v57 = vld [vmem:[#allocation20 + $0x190] sm:$0xf] }
 0x6a2   : > { %v1861_v35 = vpop.trf.xlu0  ;;  %2521 = vmatpush.bf16.msrb.mxu2 %v7700_v60  ;;  %v7811_v60 = vld [vmem:[#allocation20 + $0x1d0] sm:$0xf] }
 0x6a3   : > { %v1881_v37 = vadd.f32 %v10163_v58, %v1861_v35 }
 0x6a5   : > { %v1899_v39 = vmul.f32 %v10165_v62, %v1881_v37  ;;  %v7712_v37 = vor.u32 %v8160_v31, %v7709_v33  ;;  %2622 = vmatpush.bf16.msrb.mxu0 %v7612_v12  ;;  %v8189_v33 = vld [vmem:[#allocation20 + $0x1ec] sm:$0xf0] }
 0x6a6   : > { %2522 = vmatpush.bf16.msrb.mxu2 %v7668_v47 }
 0x6a7   : > { %v1917_v40 = vadd.f32 %v10168_v34, %v1899_v39  ;;  %2668 = vmatpush.bf16.msrb.mxu1 %v7712_v37  ;;  %v7813_v37 = vld [vmem:[#allocation20 + $0x1f0] sm:$0xf0] }
 0x6a9   : > { %v1933_v42 = vmax.f32 %v1917_v40, 0.0  ;;  %v8151_v40 = vld [vmem:[#allocation20 + $0xc4] sm:$0xf] }
 0x6aa   : > { %v1862_v45 = vpop.trf.xlu0 }
 0x6ab   : > { %v1943_v49 = vpack.c.bf16 %v1933_v42, %v1932_v41  ;;  %v1882_v59 = vadd.f32 %v10163_v58, %v1862_v45  ;;  %v7669_v41 = vld [vmem:[#allocation20 + $0xe0] sm:$0xf0]  ;;  %v8152_v45 = vld [vmem:[#allocation20 + $0xcc] sm:$0xf] }
 0x6ac   : > { %v7672_v42 = vor.u32 %v8151_v40, %v7669_v41  ;;  %v7680_v32 = vor.u32 %v8152_v45, %v7677_v48  ;;  %v10228_v41 = vld [vmem:[#allocation3 + $0x2] ss:$0 sm:$0xff]  ;;  %v7821_v45 = vld [vmem:[#allocation20 + $0x1f8] sm:$0xf0]  ;;  %v10231_v48 = vld [vmem:[#allocation3 + $0x3] ss:$0 sm:$0xff] }
 0x6ad   : > { %7566 = vmatmul.msk.bf16.vlgmr.msra.gmra.mxu3 %vm1982_vm0, %v1943_v49  ;;  %v1900_v13 = vmul.f32 %v10165_v62, %v1882_v59  ;;  %v8143_v49 = vld [vmem:[#allocation20 + $0x84] sm:$0xf]  ;;  %v7636_v59 = vor.u32 %v8147_v55, %v7635_v54 }
 0x6ae   : > { %2571 = vmatpush.bf16.msrb.mxu3 %v7672_v42  ;;  %2669 = vmatpush.bf16.msrb.mxu1 %v7680_v32  ;;  %v7640_v52 = vor.u32 %v8143_v49, %v7637_v50 }
 0x6af   : > { %v1918_v26 = vadd.f32 %v10168_v34, %v1900_v13  ;;  %2523 = vmatpush.bf16.msrb.mxu2 %v7636_v59  ;;  %v8136_v13 = vld [vmem:[#allocation20 + $0x4c] sm:$0xf]  ;;  %v8181_v59 = vld [vmem:[#allocation20 + $0x1ac] sm:$0xf0] }
 0x6b0   : > { %v7616_v15 = vor.u32 %v8136_v13, %v7613_v14  ;;  %v7780_v63 = vor.u32 %v8181_v59, %v7779_v57  ;;  %v7747_v14 = vld [vmem:[#allocation20 + $0x150] sm:$0xf] }
 0x6b1   : > { %v1934_v35 = vmax.f32 %v1918_v26, 0.0  ;;  %v7683_v57 = vld [vmem:[#allocation20 + $0xd0] sm:$0xf] }
 0x6b2   : > { %v1863_v17 = vpop.trf.xlu0  ;;  %2572 = vmatpush.bf16.msrb.mxu3 %v7640_v52  ;;  %2670 = vmatpush.bf16.msrb.mxu1 %v7648_v1  ;;  %v7787_v1 = vld [vmem:[#allocation20 + $0x198] sm:$0xf]  ;;  %v8157_v59 = vld [vmem:[#allocation20 + $0xec] sm:$0xf0] }
 0x6b3   : > { %v1883_v22 = vadd.f32 %v10163_v58, %v1863_v17  ;;  %2524 = vmatpush.bf16.msrb.mxu2 %v7604_v6  ;;  %v8131_v17 = vld [vmem:[#allocation20 + $0x1c] sm:$0xf0]  ;;  %v8178_v6 = vld [vmem:[#allocation20 + $0x19c] sm:$0xf] }
 0x6b4   : > { %v7572_v20 = vor.u32 %v8131_v17, %v7571_v16  ;;  %v7792_v8 = vor.u32 %v8178_v6, %v7789_v7  ;;  %v7749_v17 = vld [vmem:[#allocation20 + $0x170] sm:$0xf0] }
 0x6b5   : > { %v1901_v27 = vmul.f32 %v10165_v62, %v1883_v22  ;;  %v7579_v22 = vld [vmem:[#allocation20 + $0x8] sm:$0xf] }
 0x6b6   : > { %2573 = vmatpush.bf16.msrb.mxu3 %v7608_v11  ;;  %2671 = vmatpush.bf16.msrb.mxu1 %v7616_v15  ;;  %v7580_v26 = vor.u32 %v8132_v23, %v7579_v22  ;;  %v8173_v15 = vld [vmem:[#allocation20 + $0x16c] sm:$0xf0] }
 0x6b7   : > { %v1919_v28 = vadd.f32 %v10168_v34, %v1901_v27  ;;  %v8128_v27 = vld [vmem:[#allocation20 + $0xc] sm:$0xf]  ;;  %2525 = vmatpush.bf16.msrb.mxu2 %v7572_v20  ;;  %v7748_v16 = vor.u32 %v8173_v15, %v7747_v14  ;;  %v7693_v14 = vld [vmem:[#allocation20 + $0xf8] sm:$0xf0] }
 0x6b8   : > { %2623 = vmatpush.bf16.msrb.mxu0 %v7580_v26  ;;  %v8174_v26 = vld [vmem:[#allocation20 + $0x174] sm:$0xf0] }
 0x6b9   : > { %v1935_v36 = vmax.f32 %v1919_v28, 0.0  ;;  %v7581_v28 = vld [vmem:[#allocation20 + $0x28] sm:$0xf0] }
 0x6ba   : > { %v1864_v38 = vpop.trf.xlu0  ;;  %v7584_v29 = vor.u32 %v8128_v27, %v7581_v28  ;;  %2574 = vmatpush.bf16.msrb.mxu3 %v7576_v25  ;;  %v7755_v25 = vld [vmem:[#allocation20 + $0x158] sm:$0xf] }
 0x6bb   : > { %v1944_v39 = vpack.c.bf16 %v1935_v36, %v1934_v35  ;;  %v1884_v46 = vadd.f32 %v10163_v58, %v1864_v38  ;;  %v8185_v35 = vld [vmem:[#allocation20 + $0x1d4] sm:$0xf]  ;;  %v7812_v36 = vor.u32 %v8189_v33, %v7811_v60  ;;  %v7819_v38 = vld [vmem:[#allocation20 + $0x1d8] sm:$0xf]  ;;  %v7756_v28 = vor.u32 %v8174_v26, %v7755_v25 }
 0x6bc   : > { %2672 = vmatpush.bf16.msrb.mxu1 %v7584_v29  ;;  %v7816_v42 = vor.u32 %v8185_v35, %v7813_v37  ;;  %v8170_v29 = vld [vmem:[#allocation20 + $0x15c] sm:$0xf]  ;;  %v7715_v37 = vld [vmem:[#allocation20 + $0x110] sm:$0xf] }
 0x6bd   : > { %7567 = vmatmul.msk.bf16.gmra.mxu3 %vm1982_vm0, %v1944_v39  ;;  %v1902_v56 = vmul.f32 %v10165_v62, %v1884_v46  ;;  %v8190_v39 = vld [vmem:[#allocation20 + $0x1f4] sm:$0xf0]  ;;  %2714 = vmatpush.bf16.msra.mxu2 %v7812_v36  ;;  %v7824_v46 = vor.u32 %v8186_v44, %v7821_v45 }
 0x6be   : > { %v7820_v43 = vor.u32 %v8190_v39, %v7819_v38  ;;  %2763 = vmatpush.bf16.msra.mxu3 %v7816_v42  ;;  %v8165_v38 = vld [vmem:[#allocation20 + $0x12c] sm:$0xf0]  ;;  %v8161_v39 = vld [vmem:[#allocation20 + $0x114] sm:$0xf] }
 0x6bf   : > { %v1920_v18 = vadd.f32 %v10168_v34, %v1902_v56  ;;  %v7717_v42 = vld [vmem:[#allocation20 + $0x130] sm:$0xf0] }
 0x6c0   : > { %2812 = vmatpush.bf16.msra.mxu0 %v7820_v43  ;;  %2861 = vmatpush.bf16.msra.mxu1 %v7824_v46  ;;  %v7720_v45 = vor.u32 %v8161_v39, %v7717_v42 }
 0x6c1   : > { %v1936_v24 = vmax.f32 %v1920_v18, 0.0  ;;  %2715 = vmatpush.bf16.msra.mxu2 %v7780_v63  ;;  %v7684_v63 = vor.u32 %v8157_v59, %v7683_v57 }
 0x6c2   : > { %v1865_v0 = vpop.trf.xlu0 }
 0x6c3   : > { %v1885_v2 = vadd.f32 %v10163_v58, %v1865_v0  ;;  %v7781_v0 = vld [vmem:[#allocation20 + $0x1b0] sm:$0xf0] }
 0x6c4   : > { %v7784_v4 = vor.u32 %v8177_v61, %v7781_v0  ;;  %2862 = vmatpush.bf16.msra.mxu1 %v7792_v8  ;;  %v8153_v0 = vld [vmem:[#allocation20 + $0xd4] sm:$0xf] }
 0x6c5   : > { %v1903_v10 = vmul.f32 %v10165_v62, %v1885_v2  ;;  %v8182_v2 = vld [vmem:[#allocation20 + $0x1b4] sm:$0xf0]  ;;  %2716 = vmatpush.bf16.msra.mxu2 %v7748_v16 }
 0x6c6   : > { %v7788_v5 = vor.u32 %v8182_v2, %v7787_v1  ;;  %2764 = vmatpush.bf16.msra.mxu3 %v7784_v4  ;;  %v7685_v1 = vld [vmem:[#allocation20 + $0xf0] sm:$0xf0] }
 0x6c7   : > { %v1921_v58 = vadd.f32 %v10168_v34, %v1903_v10  ;;  %v10225_v34 = vld [vmem:[#allocation15] ss:$0 sm:$0xff] }
 0x6c8   : > { %2813 = vmatpush.bf16.msra.mxu0 %v7788_v5 }
 0x6c9   : > { %v1937_v62 = vmax.f32 %v1921_v58, 0.0  ;;  %v8169_v58 = vld [vmem:[#allocation20 + $0x154] sm:$0xf] }
 0x6ca   : > { %v7752_v21 = vor.u32 %v8169_v58, %v7749_v17  ;;  %v7651_v17 = vld [vmem:[#allocation20 + $0x90] sm:$0xf] }
 0x6cb   : > { %v1945_v30 = vpack.c.bf16 %v1937_v62, %v1936_v24 }
 0x6cc   : > { %2765 = vmatpush.bf16.msra.mxu3 %v7752_v21  ;;  %2814 = vmatpush.bf16.msra.mxu0 %v7756_v28 }
 0x6cd   : > { %7568 = vmatmul.msk.bf16.gmra.mxu3 %vm1982_vm0, %v1945_v30  ;;  %v7757_v30 = vld [vmem:[#allocation20 + $0x178] sm:$0xf0] }
 0x6ce   : > { %v7760_v60 = vor.u32 %v8170_v29, %v7757_v30 }
 0x6d0   : > { %2863 = vmatpush.bf16.msra.mxu1 %v7760_v60  ;;  %2766 = vmatpush.bf16.msra.mxu3 %v7720_v45 }
 0x6da   : > { %v2016_v31 = vpop.f32.mrf.mxu1 }
 0x6db   : > { %v2017_v40 = vadd.f32 %v10225_v34, %v2016_v31 }
 0x6dd   : > { %v2058_v47 = vmul.f32 %v10228_v41, %v2017_v40  ;;  %v7716_v40 = vor.u32 %v8165_v38, %v7715_v37  ;;  %v7661_v38 = vld [vmem:[#allocation20 + $0xb8] sm:$0xf0] }
 0x6df   : > { %v2076_v50 = vadd.f32 %v10231_v48, %v2058_v47  ;;  %2717 = vmatpush.bf16.msra.mxu2 %v7716_v40 }
 0x6e1   : > { %v2092_v53 = vmax.f32 %v2076_v50, 0.0  ;;  %v8162_v50 = vld [vmem:[#allocation20 + $0x11c] sm:$0xf] }
 0x6e2   : > { %v2018_v32 = vpop.f32.mrf.mxu1 }
 0x6e3   : > { %v2019_v49 = vadd.f32 %v10225_v34, %v2018_v32  ;;  %v7723_v32 = vld [vmem:[#allocation20 + $0x118] sm:$0xf]  ;;  %2718 = vmatpush.bf16.msra.mxu2 %v7684_v63 }
 0x6e4   : > { %v7627_v63 = vld [vmem:[#allocation20 + $0x58] sm:$0xf] }
 0x6e5   : > { %v2059_v51 = vmul.f32 %v10228_v41, %v2019_v49  ;;  %v8166_v49 = vld [vmem:[#allocation20 + $0x134] sm:$0xf0] }
 0x6e7   : > { %v2077_v52 = vadd.f32 %v10231_v48, %v2059_v51  ;;  %v7724_v51 = vor.u32 %v8166_v49, %v7723_v32  ;;  %v8137_v32 = vld [vmem:[#allocation20 + $0x54] sm:$0xf] }
 0x6e8   : > { %v7621_v49 = vld [vmem:[#allocation20 + $0x70] sm:$0xf0] }
 0x6e9   : > { %v2093_v54 = vmax.f32 %v2077_v52, 0.0  ;;  %v7725_v52 = vld [vmem:[#allocation20 + $0x138] sm:$0xf0]  ;;  %2815 = vmatpush.bf16.msra.mxu0 %v7724_v51  ;;  %v7624_v51 = vor.u32 %v8137_v32, %v7621_v49 }
 0x6ea   : > { %v2021_v55 = vpop.f32.mrf.mxu1 }
 0x6eb   : > { %v10237_v56 = vpack.c.bf16 %v2093_v54, %v2092_v53  ;;  %v2022_v3 = vadd.f32 %v10225_v34, %v2021_v55  ;;  %v7728_v54 = vor.u32 %v8162_v50, %v7725_v52 }
 0x6ed   : > { %2526 = vmatmul.bf16.vlgmr.msrb.gmra.mxu2 %v10237_v56  ;;  %2575 = vmatmul.bf16.vlgmr.msrb.gmra.mxu3 %v10237_v56  ;;  %v2060_v9 = vmul.f32 %v10228_v41, %v2022_v3  ;;  %v7688_v3 = vor.u32 %v8153_v0, %v7685_v1  ;;  %v8142_v0 = vld [vmem:[#allocation20 + $0x74] sm:$0xf0]  ;;  %v8138_v1 = vld [vmem:[#allocation20 + $0x5c] sm:$0xf] }
 0x6ee   : > { %2624 = vmatmul.bf16.vlgmr.msrb.gmra.mxu0 %v10237_v56  ;;  %2673 = vmatmul.bf16.vlgmr.msrb.gmra.mxu1 %v10237_v56 }
 0x6ef   : > { %v2078_v11 = vadd.f32 %v10231_v48, %v2060_v9  ;;  %2864 = vmatpush.bf16.msra.mxu1 %v7728_v54  ;;  %2767 = vmatpush.bf16.msra.mxu3 %v7688_v3  ;;  %v7629_v3 = vld [vmem:[#allocation20 + $0x78] sm:$0xf0] }
 0x6f1   : > { %v2094_v19 = vmax.f32 %v2078_v11, 0.0  ;;  %v8158_v11 = vld [vmem:[#allocation20 + $0xf4] sm:$0xf0] }
 0x6f2   : > { %v2023_v18 = vpop.f32.mrf.mxu1 }
 0x6f3   : > { %v2024_v10 = vadd.f32 %v10225_v34, %v2023_v18 }
 0x6f5   : > { %v2061_v12 = vmul.f32 %v10228_v41, %v2024_v10  ;;  %v7691_v10 = vld [vmem:[#allocation20 + $0xd8] sm:$0xf] }
 0x6f7   : > { %v2079_v13 = vadd.f32 %v10231_v48, %v2061_v12  ;;  %v8154_v12 = vld [vmem:[#allocation20 + $0xdc] sm:$0xf] }
 0x6f8   : > { %v7696_v58 = vor.u32 %v8154_v12, %v7693_v14  ;;  %v8134_v12 = vld [vmem:[#allocation20 + $0x34] sm:$0xf0] }
 0x6f9   : > { %v2095_v20 = vmax.f32 %v2079_v13, 0.0  ;;  %v7692_v13 = vor.u32 %v8158_v11, %v7691_v10  ;;  %v7589_v10 = vld [vmem:[#allocation20 + $0x30] sm:$0xf0]  ;;  %v7595_v11 = vld [vmem:[#allocation20 + $0x18] sm:$0xf] }
 0x6fa   : > { %v2026_v22 = vpop.f32.mrf.mxu1  ;;  %2865 = vmatpush.bf16.msra.mxu1 %v7696_v58  ;;  %v7596_v14 = vor.u32 %v8134_v12, %v7595_v11  ;;  %v7597_v58 = vld [vmem:[#allocation20 + $0x38] sm:$0xf0] }
 0x6fb   : > { %v10249_v23 = vpack.c.bf16 %v2095_v20, %v2094_v19  ;;  %v2027_v24 = vadd.f32 %v10225_v34, %v2026_v22  ;;  %2816 = vmatpush.bf16.msra.mxu0 %v7692_v13  ;;  %v8149_v19 = vld [vmem:[#allocation20 + $0xac] sm:$0xf0]  ;;  %v8145_v22 = vld [vmem:[#allocation20 + $0x94] sm:$0xf] }
 0x6fc   : > { %v7652_v21 = vor.u32 %v8149_v19, %v7651_v17 }
 0x6fd   : > { %2531 = vmatmul.bf16.gmra.mxu2 %v10249_v23  ;;  %2580 = vmatmul.bf16.gmra.mxu3 %v10249_v23  ;;  %v2062_v62 = vmul.f32 %v10228_v41, %v2027_v24  ;;  %v7653_v24 = vld [vmem:[#allocation20 + $0xb0] sm:$0xf0] }
 0x6fe   : > { %2629 = vmatmul.bf16.gmra.mxu0 %v10249_v23  ;;  %2678 = vmatmul.bf16.gmra.mxu1 %v10249_v23  ;;  %v7656_v25 = vor.u32 %v8145_v22, %v7653_v24 }
 0x6ff   : > { %v2080_v33 = vadd.f32 %v10231_v48, %v2062_v62  ;;  %2719 = vmatpush.bf16.msra.mxu2 %v7652_v21 }
 0x700   : > { %2768 = vmatpush.bf16.msra.mxu3 %v7656_v25 }
 0x701   : > { %v2096_v43 = vmax.f32 %v2080_v33, 0.0  ;;  %v7659_v33 = vld [vmem:[#allocation20 + $0x98] sm:$0xf] }
 0x702   : > { %v2028_v27 = vpop.f32.mrf.mxu1 }
 0x703   : > { %v2029_v31 = vadd.f32 %v10225_v34, %v2028_v27 }
 0x704   : > { %2769 = vmatpush.bf16.msra.mxu3 %v7624_v51 }
 0x705   : > { %v2063_v35 = vmul.f32 %v10228_v41, %v2029_v31 }
 0x707   : > { %v2081_v36 = vadd.f32 %v10231_v48, %v2063_v35  ;;  %v8150_v35 = vld [vmem:[#allocation20 + $0xb4] sm:$0xf0] }
 0x708   : > { %v7660_v37 = vor.u32 %v8150_v35, %v7659_v33 }
 0x709   : > { %v2097_v44 = vmax.f32 %v2081_v36, 0.0  ;;  %v8146_v36 = vld [vmem:[#allocation20 + $0x9c] sm:$0xf] }
 0x70a   : > { %v7664_v40 = vor.u32 %v8146_v36, %v7661_v38  ;;  %2817 = vmatpush.bf16.msra.mxu0 %v7660_v37 }
 0x70b   : > { %v10261_v46 = vpack.c.bf16 %v2097_v44, %v2096_v43  ;;  %v7619_v43 = vld [vmem:[#allocation20 + $0x50] sm:$0xf] }
 0x70c   : > { %2866 = vmatpush.bf16.msra.mxu1 %v7664_v40  ;;  %v8141_v44 = vld [vmem:[#allocation20 + $0x6c] sm:$0xf0] }
 0x70d   : > { %2536 = vmatmul.bf16.gmra.mxu2 %v10261_v46  ;;  %2585 = vmatmul.bf16.gmra.mxu3 %v10261_v46 }
 0x70e   : > { %2634 = vmatmul.bf16.gmra.mxu0 %v10261_v46  ;;  %2683 = vmatmul.bf16.gmra.mxu1 %v10261_v46 }
 0x710   : > { %v2031_v47 = vpop.f32.mrf.mxu2 }
 0x711   : > { %v2032_v53 = vadd.f32 %v10225_v34, %v2031_v47  ;;  %v7620_v47 = vor.u32 %v8141_v44, %v7619_v43 }
 0x713   : > { %v2064_v55 = vmul.f32 %v10228_v41, %v2032_v53  ;;  %2720 = vmatpush.bf16.msra.mxu2 %v7620_v47 }
 0x715   : > { %v2082_v4 = vadd.f32 %v10231_v48, %v2064_v55 }
 0x717   : > { %v2098_v7 = vmax.f32 %v2082_v4, 0.0 }
 0x718   : > { %v2033_v61 = vpop.f32.mrf.mxu2 }
 0x719   : > { %v2034_v2 = vadd.f32 %v10225_v34, %v2033_v61 }
 0x71b   : > { %v2065_v5 = vmul.f32 %v10228_v41, %v2034_v2  ;;  %v7628_v2 = vor.u32 %v8142_v0, %v7627_v63 }
 0x71d   : > { %v2083_v6 = vadd.f32 %v10231_v48, %v2065_v5  ;;  %v7632_v5 = vor.u32 %v8138_v1, %v7629_v3  ;;  %2818 = vmatpush.bf16.msra.mxu0 %v7628_v2 }
 0x71f   : > { %v2099_v8 = vmax.f32 %v2083_v6, 0.0  ;;  %v7587_v6 = vld [vmem:[#allocation20 + $0x10] sm:$0xf]  ;;  %2867 = vmatpush.bf16.msra.mxu1 %v7632_v5 }
 0x720   : > { %v2036_v9 = vpop.f32.mrf.mxu2 }
 0x721   : > { %v10273_v18 = vpack.c.bf16 %v2099_v8, %v2098_v7  ;;  %v2037_v15 = vadd.f32 %v10225_v34, %v2036_v9  ;;  %v8133_v7 = vld [vmem:[#allocation20 + $0x2c] sm:$0xf0]  ;;  %v8129_v8 = vld [vmem:[#allocation20 + $0x14] sm:$0xf]  ;;  %2819 = vmatpush.bf16.msra.mxu0 %v7596_v14 }
 0x722   : > { %v7588_v9 = vor.u32 %v8133_v7, %v7587_v6  ;;  %v7592_v13 = vor.u32 %v8129_v8, %v7589_v10 }
 0x723   : > { %2541 = vmatmul.bf16.gmra.mxu2 %v10273_v18  ;;  %2590 = vmatmul.bf16.gmra.mxu3 %v10273_v18  ;;  %v2066_v16 = vmul.f32 %v10228_v41, %v2037_v15  ;;  %v8130_v15 = vld [vmem:[#allocation20 + $0x1c] sm:$0xf] }
 0x724   : > { %2639 = vmatmul.bf16.gmra.mxu0 %v10273_v18  ;;  %2688 = vmatmul.bf16.gmra.mxu1 %v10273_v18  ;;  %v7600_v17 = vor.u32 %v8130_v15, %v7597_v58 }
 0x725   : > { %v2084_v26 = vadd.f32 %v10231_v48, %v2066_v16  ;;  %2721 = vmatpush.bf16.msra.mxu2 %v7588_v9  ;;  %2770 = vmatpush.bf16.msra.mxu3 %v7592_v13 }
 0x726   : > { %2868 = vmatpush.bf16.msra.mxu1 %v7600_v17 }
 0x727   : > { %v2100_v29 = vmax.f32 %v2084_v26, 0.0 }
 0x728   : > { %v2038_v20 = vpop.f32.mrf.mxu2 }
 0x729   : > { %v2039_v62 = vadd.f32 %v10225_v34, %v2038_v20 }
 0x72b   : > { %v2067_v27 = vmul.f32 %v10228_v41, %v2039_v62 }
 0x72d   : > { %v2085_v28 = vadd.f32 %v10231_v48, %v2067_v27 }
 0x72f   : > { %v2101_v30 = vmax.f32 %v2085_v28, 0.0 }
 0x730   : > { %v2041_v31 = vpop.f32.mrf.mxu3 }
 0x731   : > { %v10285_v60 = vpack.c.bf16 %v2101_v30, %v2100_v29  ;;  %v2042_v39 = vadd.f32 %v10225_v34, %v2041_v31 }
 0x733   : > { %2546 = vmatmul.bf16.gmra.mxu2 %v10285_v60  ;;  %2595 = vmatmul.bf16.gmra.mxu3 %v10285_v60  ;;  %v2068_v42 = vmul.f32 %v10228_v41, %v2042_v39 }
 0x734   : > { %2644 = vmatmul.bf16.gmra.mxu0 %v10285_v60  ;;  %2693 = vmatmul.bf16.gmra.mxu1 %v10285_v60 }
 0x735   : > { %v2086_v52 = vadd.f32 %v10231_v48, %v2068_v42  ;;  %v10327_v42 = vld [vmem:[#allocation21] sm:$0xff] }
 0x736   : > { %v10333_v44 = vperm.slane %v10327_v42, 3  ;;  %v10339_v47 = vperm.slane %v10327_v42, 1 }
 0x737   : > { %v2102_v55 = vmax.f32 %v2086_v52, 0.0 }
 0x738   : > { %v2043_v45 = vpop.f32.mrf.mxu3 }
 0x739   : > { %v2044_v50 = vadd.f32 %v10225_v34, %v2043_v45  ;;  %v10336_v45 = vperm.slane %v10327_v42, 0 }
 0x73b   : > { %v2069_v53 = vmul.f32 %v10228_v41, %v2044_v50 }
 0x73d   : > { %v2087_v54 = vadd.f32 %v10231_v48, %v2069_v53 }
 0x73f   : > { %v2103_v57 = vmax.f32 %v2087_v54, 0.0 }
 0x740   : > { %v2046_v59 = vpop.f32.mrf.mxu3 }
 0x741   : > { %v10297_v61 = vpack.c.bf16 %v2103_v57, %v2102_v55  ;;  %v2047_v4 = vadd.f32 %v10225_v34, %v2046_v59 }
 0x743   : > { %2551 = vmatmul.bf16.gmra.mxu2 %v10297_v61  ;;  %2600 = vmatmul.bf16.gmra.mxu3 %v10297_v61  ;;  %v2070_v16 = vmul.f32 %v10228_v41, %v2047_v4 }
 0x744   : > { %2649 = vmatmul.bf16.gmra.mxu0 %v10297_v61  ;;  %2698 = vmatmul.bf16.gmra.mxu1 %v10297_v61 }
 0x745   : > { %v2088_v21 = vadd.f32 %v10231_v48, %v2070_v16 }
 0x747   : > { %v2104_v62 = vmax.f32 %v2088_v21, 0.0 }
 0x748   : > { %v2048_v19 = vpop.f32.mrf.mxu3 }
 0x749   : > { %v2049_v20 = vadd.f32 %v10225_v34, %v2048_v19 }
 0x74b   : > { %v2071_v22 = vmul.f32 %v10228_v41, %v2049_v20 }
 0x74d   : > { %v2089_v24 = vadd.f32 %v10231_v48, %v2071_v22 }
 0x74f   : > { %v2105_v25 = vmax.f32 %v2089_v24, 0.0 }
 0x750   : > { %v2051_v26 = vpop.f32.mrf.mxu3 }
 0x751   : > { %v10309_v27 = vpack.c.bf16 %v2105_v25, %v2104_v62  ;;  %v2052_v28 = vadd.f32 %v10225_v34, %v2051_v26 }
 0x753   : > { %2556 = vmatmul.bf16.gmra.mxu2 %v10309_v27  ;;  %2605 = vmatmul.bf16.gmra.mxu3 %v10309_v27  ;;  %v2072_v29 = vmul.f32 %v10228_v41, %v2052_v28 }
 0x754   : > { %2654 = vmatmul.bf16.gmra.mxu0 %v10309_v27  ;;  %2703 = vmatmul.bf16.gmra.mxu1 %v10309_v27 }
 0x755   : > { %v2090_v33 = vadd.f32 %v10231_v48, %v2072_v29 }
 0x757   : > { %v2106_v37 = vmax.f32 %v2090_v33, 0.0 }
 0x758   : > { %v2053_v30 = vpop.f32.mrf.mxu3 }
 0x759   : > { %v2054_v31 = vadd.f32 %v10225_v34, %v2053_v30 }
 0x75b   : > { %v2073_v35 = vmul.f32 %v10228_v41, %v2054_v31 }
 0x75d   : > { %v2091_v36 = vadd.f32 %v10231_v48, %v2073_v35  ;;  %v10330_v48 = vperm.slane %v10327_v42, 2 }
 0x75f   : > { %v2107_v38 = vmax.f32 %v2091_v36, 0.0 }
 0x761   : > { %v10321_v39 = vpack.c.bf16 %v2107_v38, %v2106_v37 }
 0x763   : > { %2561 = vmatmul.bf16.gmra.mxu2 %v10321_v39  ;;  %2610 = vmatmul.bf16.gmra.mxu3 %v10321_v39 }
 0x764   : > { %2659 = vmatmul.bf16.gmra.mxu0 %v10321_v39  ;;  %2708 = vmatmul.bf16.gmra.mxu1 %v10321_v39 }
 0x76b   : > { %v2625_v40 = vpop.f32.mrf.mxu0  ;;  %v2674_v34 = vpop.f32.mrf.mxu1 }
 0x76c   : > { %v2626_v52 = vadd.f32 %v2625_v40, %v10330_v48  ;;  %v2675_v53 = vadd.f32 %v2674_v34, %v10333_v44 }
 0x76e   : > { %v3080_v2 = vmul.f32 %v2626_v52, %v2626_v52  ;;  %v3081_v3 = vmul.f32 %v2675_v53, %v2675_v53 }
 0x770   : > { %v2527_v43 = vpop.f32.mrf.mxu2  ;;  %v2576_v41 = vpop.f32.mrf.mxu3 }
 0x771   : > { %v2528_v54 = vadd.f32 %v2527_v43, %v10336_v45  ;;  %v2577_v55 = vadd.f32 %v2576_v41, %v10339_v47 }
 0x773   : > { %v2627_v32 = vpop.f32.mrf.mxu0  ;;  %v2676_v49 = vpop.f32.mrf.mxu1  ;;  %2722 = vmatmul.bf16.vlgmr.msra.gmra.mxu2 %v10237_v56  ;;  %2771 = vmatmul.bf16.vlgmr.msra.gmra.mxu3 %v10237_v56  ;;  %v3078_v4 = vmul.f32 %v2528_v54, %v2528_v54  ;;  %v3079_v5 = vmul.f32 %v2577_v55, %v2577_v55 }
 0x774   : > { %2820 = vmatmul.bf16.vlgmr.msra.gmra.mxu0 %v10237_v56  ;;  %2869 = vmatmul.bf16.vlgmr.msra.gmra.mxu1 %v10237_v56  ;;  %v2628_v50 = vadd.f32 %v2627_v32, %v10330_v48  ;;  %v2677_v51 = vadd.f32 %v2676_v49, %v10333_v44 }
 0x776   : > { %v3088_v63 = vmul.f32 %v2628_v50, %v2628_v50  ;;  %v3089_v0 = vmul.f32 %v2677_v51, %v2677_v51  ;;  %v2952_v12 = vadd.f32 %v2628_v50, %v2626_v52  ;;  %v2973_v13 = vadd.f32 %v2677_v51, %v2675_v53 }
 0x778   : > { %v2529_v57 = vpop.f32.mrf.mxu2  ;;  %v2578_v59 = vpop.f32.mrf.mxu3  ;;  %v3248_v58 = vadd.f32 %v3088_v63, %v3080_v2  ;;  %v3269_v16 = vadd.f32 %v3089_v0, %v3081_v3 }
 0x779   : > { %v2530_v1 = vadd.f32 %v2529_v57, %v10336_v45  ;;  %v2579_v56 = vadd.f32 %v2578_v59, %v10339_v47 }
 0x77b   : > { %v2910_v6 = vadd.f32 %v2530_v1, %v2528_v54  ;;  %v3086_v7 = vmul.f32 %v2530_v1, %v2530_v1  ;;  %v2931_v8 = vadd.f32 %v2579_v56, %v2577_v55  ;;  %v3087_v9 = vmul.f32 %v2579_v56, %v2579_v56  ;;  %v2630_v10 = vpop.f32.mrf.mxu0  ;;  %v2679_v11 = vpop.f32.mrf.mxu1 }
 0x77c   : > { %v2631_v14 = vadd.f32 %v2630_v10, %v10330_v48  ;;  %v2680_v15 = vadd.f32 %v2679_v11, %v10333_v44 }
 0x77d   : > { %v3206_v17 = vadd.f32 %v3086_v7, %v3078_v4  ;;  %v3227_v19 = vadd.f32 %v3087_v9, %v3079_v5 }
 0x77e   : > { %v2953_v20 = vadd.f32 %v2952_v12, %v2631_v14  ;;  %v3096_v21 = vmul.f32 %v2631_v14, %v2631_v14  ;;  %v2974_v22 = vadd.f32 %v2973_v13, %v2680_v15  ;;  %v3097_v24 = vmul.f32 %v2680_v15, %v2680_v15 }
 0x780   : > { %v3249_v62 = vadd.f32 %v3248_v58, %v3096_v21  ;;  %v3270_v25 = vadd.f32 %v3269_v16, %v3097_v24  ;;  %v2532_v26 = vpop.f32.mrf.mxu2  ;;  %v2581_v28 = vpop.f32.mrf.mxu3 }
 0x781   : > { %v2533_v29 = vadd.f32 %v2532_v26, %v10336_v45  ;;  %v2582_v30 = vadd.f32 %v2581_v28, %v10339_v47 }
 0x783   : > { %v2911_v31 = vadd.f32 %v2910_v6, %v2533_v29  ;;  %v3094_v33 = vmul.f32 %v2533_v29, %v2533_v29  ;;  %v2932_v35 = vadd.f32 %v2931_v8, %v2582_v30  ;;  %v3095_v36 = vmul.f32 %v2582_v30, %v2582_v30  ;;  %v2632_v37 = vpop.f32.mrf.mxu0  ;;  %v2681_v38 = vpop.f32.mrf.mxu1  ;;  %2727 = vmatmul.bf16.gmra.mxu2 %v10249_v23 }
 0x784   : > { %2776 = vmatmul.bf16.gmra.mxu3 %v10249_v23  ;;  %2825 = vmatmul.bf16.gmra.mxu0 %v10249_v23  ;;  %v2633_v43 = vadd.f32 %v2632_v37, %v10330_v48  ;;  %v2682_v41 = vadd.f32 %v2681_v38, %v10333_v44 }
 0x785   : > { %v3207_v40 = vadd.f32 %v3206_v17, %v3094_v33  ;;  %v3228_v34 = vadd.f32 %v3227_v19, %v3095_v36  ;;  %2874 = vmatmul.bf16.gmra.mxu1 %v10249_v23 }
 0x786   : > { %v3104_v50 = vmul.f32 %v2633_v43, %v2633_v43  ;;  %v3105_v51 = vmul.f32 %v2682_v41, %v2682_v41  ;;  %v2954_v1 = vadd.f32 %v2953_v20, %v2633_v43  ;;  %v2975_v56 = vadd.f32 %v2974_v22, %v2682_v41 }
 0x788   : > { %v2534_v32 = vpop.f32.mrf.mxu2  ;;  %v2583_v49 = vpop.f32.mrf.mxu3  ;;  %v3250_v3 = vadd.f32 %v3249_v62, %v3104_v50  ;;  %v3271_v4 = vadd.f32 %v3270_v25, %v3105_v51 }
 0x789   : > { %v2535_v52 = vadd.f32 %v2534_v32, %v10336_v45  ;;  %v2584_v53 = vadd.f32 %v2583_v49, %v10339_v47 }
 0x78b   : > { %v2912_v54 = vadd.f32 %v2911_v31, %v2535_v52  ;;  %v3102_v55 = vmul.f32 %v2535_v52, %v2535_v52  ;;  %v2933_v57 = vadd.f32 %v2932_v35, %v2584_v53  ;;  %v3103_v59 = vmul.f32 %v2584_v53, %v2584_v53  ;;  %v2635_v63 = vpop.f32.mrf.mxu0  ;;  %v2684_v0 = vpop.f32.mrf.mxu1 }
 0x78c   : > { %v2636_v2 = vadd.f32 %v2635_v63, %v10330_v48  ;;  %v2685_v23 = vadd.f32 %v2684_v0, %v10333_v44 }
 0x78d   : > { %v3208_v5 = vadd.f32 %v3207_v40, %v3102_v55  ;;  %v3229_v6 = vadd.f32 %v3228_v34, %v3103_v59 }
 0x78e   : > { %v2955_v7 = vadd.f32 %v2954_v1, %v2636_v2  ;;  %v3112_v8 = vmul.f32 %v2636_v2, %v2636_v2  ;;  %v2976_v9 = vadd.f32 %v2975_v56, %v2685_v23  ;;  %v3113_v10 = vmul.f32 %v2685_v23, %v2685_v23 }
 0x790   : > { %v3251_v11 = vadd.f32 %v3250_v3, %v3112_v8  ;;  %v3272_v12 = vadd.f32 %v3271_v4, %v3113_v10  ;;  %v2537_v13 = vpop.f32.mrf.mxu2  ;;  %v2586_v14 = vpop.f32.mrf.mxu3 }
 0x791   : > { %v2538_v15 = vadd.f32 %v2537_v13, %v10336_v45  ;;  %v2587_v58 = vadd.f32 %v2586_v14, %v10339_v47 }
 0x793   : > { %v2913_v16 = vadd.f32 %v2912_v54, %v2538_v15  ;;  %v3110_v17 = vmul.f32 %v2538_v15, %v2538_v15  ;;  %v2934_v19 = vadd.f32 %v2933_v57, %v2587_v58  ;;  %v3111_v20 = vmul.f32 %v2587_v58, %v2587_v58  ;;  %2732 = vmatmul.bf16.gmra.mxu2 %v10261_v46  ;;  %v2637_v24 = vpop.f32.mrf.mxu0  ;;  %v2686_v62 = vpop.f32.mrf.mxu1 }
 0x794   : > { %2781 = vmatmul.bf16.gmra.mxu3 %v10261_v46  ;;  %2830 = vmatmul.bf16.gmra.mxu0 %v10261_v46  ;;  %v2638_v30 = vadd.f32 %v2637_v24, %v10330_v48  ;;  %v2687_v31 = vadd.f32 %v2686_v62, %v10333_v44 }
 0x795   : > { %v3209_v21 = vadd.f32 %v3208_v5, %v3110_v17  ;;  %v3230_v22 = vadd.f32 %v3229_v6, %v3111_v20  ;;  %2879 = vmatmul.bf16.gmra.mxu1 %v10261_v46 }
 0x796   : > { %v3120_v34 = vmul.f32 %v2638_v30, %v2638_v30  ;;  %v3121_v46 = vmul.f32 %v2687_v31, %v2687_v31  ;;  %v2956_v32 = vadd.f32 %v2955_v7, %v2638_v30  ;;  %v2977_v49 = vadd.f32 %v2976_v9, %v2687_v31 }
 0x798   : > { %v2539_v25 = vpop.f32.mrf.mxu2  ;;  %v2588_v26 = vpop.f32.mrf.mxu3  ;;  %v3252_v52 = vadd.f32 %v3251_v11, %v3120_v34  ;;  %v3273_v53 = vadd.f32 %v3272_v12, %v3121_v46 }
 0x799   : > { %v2540_v28 = vadd.f32 %v2539_v25, %v10336_v45  ;;  %v2589_v29 = vadd.f32 %v2588_v26, %v10339_v47 }
 0x79b   : > { %v2914_v33 = vadd.f32 %v2913_v16, %v2540_v28  ;;  %v3118_v35 = vmul.f32 %v2540_v28, %v2540_v28  ;;  %v2935_v36 = vadd.f32 %v2934_v19, %v2589_v29  ;;  %v3119_v37 = vmul.f32 %v2589_v29, %v2589_v29 }
 0x79d   : > { %v3210_v38 = vadd.f32 %v3209_v21, %v3118_v35  ;;  %v3231_v40 = vadd.f32 %v3230_v22, %v3119_v37 }
 0x7a1   : > { %v2640_v43 = vpop.f32.mrf.mxu0  ;;  %v2689_v41 = vpop.f32.mrf.mxu1 }
 0x7a2   : > { %v2641_v50 = vadd.f32 %v2640_v43, %v10330_v48  ;;  %v2690_v51 = vadd.f32 %v2689_v41, %v10333_v44 }
 0x7a3   : > { %2737 = vmatmul.bf16.gmra.mxu2 %v10273_v18 }
 0x7a4   : > { %v2957_v54 = vadd.f32 %v2956_v32, %v2641_v50  ;;  %v3128_v55 = vmul.f32 %v2641_v50, %v2641_v50  ;;  %v2978_v57 = vadd.f32 %v2977_v49, %v2690_v51  ;;  %v3129_v59 = vmul.f32 %v2690_v51, %v2690_v51  ;;  %2786 = vmatmul.bf16.gmra.mxu3 %v10273_v18 }
 0x7a5   : > { %2835 = vmatmul.bf16.gmra.mxu0 %v10273_v18  ;;  %2884 = vmatmul.bf16.gmra.mxu1 %v10273_v18 }
 0x7a6   : > { %v3253_v63 = vadd.f32 %v3252_v52, %v3128_v55  ;;  %v3274_v0 = vadd.f32 %v3273_v53, %v3129_v59  ;;  %v2542_v1 = vpop.f32.mrf.mxu2  ;;  %v2591_v56 = vpop.f32.mrf.mxu3 }
 0x7a7   : > { %v2543_v2 = vadd.f32 %v2542_v1, %v10336_v45  ;;  %v2592_v23 = vadd.f32 %v2591_v56, %v10339_v47 }
 0x7a9   : > { %v2915_v3 = vadd.f32 %v2914_v33, %v2543_v2  ;;  %v3126_v4 = vmul.f32 %v2543_v2, %v2543_v2  ;;  %v2936_v5 = vadd.f32 %v2935_v36, %v2592_v23  ;;  %v3127_v6 = vmul.f32 %v2592_v23, %v2592_v23  ;;  %v2642_v7 = vpop.f32.mrf.mxu0  ;;  %v2691_v8 = vpop.f32.mrf.mxu1 }
 0x7aa   : > { %v2643_v9 = vadd.f32 %v2642_v7, %v10330_v48  ;;  %v2692_v10 = vadd.f32 %v2691_v8, %v10333_v44 }
 0x7ab   : > { %v3211_v11 = vadd.f32 %v3210_v38, %v3126_v4  ;;  %v3232_v18 = vadd.f32 %v3231_v40, %v3127_v6 }
 0x7ac   : > { %v2958_v12 = vadd.f32 %v2957_v54, %v2643_v9  ;;  %v3136_v13 = vmul.f32 %v2643_v9, %v2643_v9  ;;  %v2979_v14 = vadd.f32 %v2978_v57, %v2692_v10  ;;  %v3137_v15 = vmul.f32 %v2692_v10, %v2692_v10 }
 0x7ae   : > { %v3254_v58 = vadd.f32 %v3253_v63, %v3136_v13  ;;  %v3275_v16 = vadd.f32 %v3274_v0, %v3137_v15  ;;  %v2544_v17 = vpop.f32.mrf.mxu2  ;;  %v2593_v19 = vpop.f32.mrf.mxu3 }
 0x7af   : > { %v2545_v20 = vadd.f32 %v2544_v17, %v10336_v45  ;;  %v2594_v21 = vadd.f32 %v2593_v19, %v10339_v47 }
 0x7b1   : > { %v2916_v22 = vadd.f32 %v2915_v3, %v2545_v20  ;;  %v3134_v24 = vmul.f32 %v2545_v20, %v2545_v20  ;;  %v2937_v62 = vadd.f32 %v2936_v5, %v2594_v21  ;;  %v3135_v25 = vmul.f32 %v2594_v21, %v2594_v21  ;;  %v2645_v26 = vpop.f32.mrf.mxu0  ;;  %v2694_v28 = vpop.f32.mrf.mxu1 }
 0x7b2   : > { %v2646_v29 = vadd.f32 %v2645_v26, %v10330_v48  ;;  %v2695_v30 = vadd.f32 %v2694_v28, %v10333_v44 }
 0x7b3   : > { %v3212_v31 = vadd.f32 %v3211_v11, %v3134_v24  ;;  %v3233_v33 = vadd.f32 %v3232_v18, %v3135_v25  ;;  %2742 = vmatmul.bf16.gmra.mxu2 %v10285_v60 }
 0x7b4   : > { %v2959_v35 = vadd.f32 %v2958_v12, %v2646_v29  ;;  %v3144_v36 = vmul.f32 %v2646_v29, %v2646_v29  ;;  %v2980_v37 = vadd.f32 %v2979_v14, %v2695_v30  ;;  %v3145_v38 = vmul.f32 %v2695_v30, %v2695_v30  ;;  %2791 = vmatmul.bf16.gmra.mxu3 %v10285_v60 }
 0x7b5   : > { %2840 = vmatmul.bf16.gmra.mxu0 %v10285_v60  ;;  %2889 = vmatmul.bf16.gmra.mxu1 %v10285_v60 }
 0x7b6   : > { %v3255_v40 = vadd.f32 %v3254_v58, %v3144_v36  ;;  %v3276_v34 = vadd.f32 %v3275_v16, %v3145_v38  ;;  %v2547_v46 = vpop.f32.mrf.mxu2  ;;  %v2596_v43 = vpop.f32.mrf.mxu3 }
 0x7b7   : > { %v2548_v41 = vadd.f32 %v2547_v46, %v10336_v45  ;;  %v2597_v32 = vadd.f32 %v2596_v43, %v10339_v47 }
 0x7b9   : > { %v2917_v49 = vadd.f32 %v2916_v22, %v2548_v41  ;;  %v3142_v50 = vmul.f32 %v2548_v41, %v2548_v41  ;;  %v2938_v51 = vadd.f32 %v2937_v62, %v2597_v32  ;;  %v3143_v52 = vmul.f32 %v2597_v32, %v2597_v32  ;;  %v2647_v53 = vpop.f32.mrf.mxu0  ;;  %v2696_v54 = vpop.f32.mrf.mxu1 }
 0x7ba   : > { %v2648_v55 = vadd.f32 %v2647_v53, %v10330_v48  ;;  %v2697_v57 = vadd.f32 %v2696_v54, %v10333_v44 }
 0x7bb   : > { %v3213_v59 = vadd.f32 %v3212_v31, %v3142_v50  ;;  %v3234_v60 = vadd.f32 %v3233_v33, %v3143_v52 }
 0x7bc   : > { %v2960_v63 = vadd.f32 %v2959_v35, %v2648_v55  ;;  %v3152_v0 = vmul.f32 %v2648_v55, %v2648_v55  ;;  %v2981_v1 = vadd.f32 %v2980_v37, %v2697_v57  ;;  %v3153_v56 = vmul.f32 %v2697_v57, %v2697_v57 }
 0x7be   : > { %v3256_v2 = vadd.f32 %v3255_v40, %v3152_v0  ;;  %v3277_v23 = vadd.f32 %v3276_v34, %v3153_v56  ;;  %v2549_v3 = vpop.f32.mrf.mxu2  ;;  %v2598_v4 = vpop.f32.mrf.mxu3 }
 0x7bf   : > { %v2550_v5 = vadd.f32 %v2549_v3, %v10336_v45  ;;  %v2599_v6 = vadd.f32 %v2598_v4, %v10339_v47 }
 0x7c1   : > { %v2918_v7 = vadd.f32 %v2917_v49, %v2550_v5  ;;  %v3150_v8 = vmul.f32 %v2550_v5, %v2550_v5  ;;  %v2939_v9 = vadd.f32 %v2938_v51, %v2599_v6  ;;  %v3151_v10 = vmul.f32 %v2599_v6, %v2599_v6  ;;  %v2650_v11 = vpop.f32.mrf.mxu0  ;;  %v2699_v18 = vpop.f32.mrf.mxu1 }
 0x7c2   : > { %v2651_v12 = vadd.f32 %v2650_v11, %v10330_v48  ;;  %v2700_v13 = vadd.f32 %v2699_v18, %v10333_v44 }
 0x7c3   : > { %v3214_v14 = vadd.f32 %v3213_v59, %v3150_v8  ;;  %v3235_v15 = vadd.f32 %v3234_v60, %v3151_v10  ;;  %2747 = vmatmul.bf16.gmra.mxu2 %v10297_v61 }
 0x7c4   : > { %v2961_v58 = vadd.f32 %v2960_v63, %v2651_v12  ;;  %v3160_v16 = vmul.f32 %v2651_v12, %v2651_v12  ;;  %v2982_v17 = vadd.f32 %v2981_v1, %v2700_v13  ;;  %v3161_v19 = vmul.f32 %v2700_v13, %v2700_v13  ;;  %2796 = vmatmul.bf16.gmra.mxu3 %v10297_v61 }
 0x7c5   : > { %2845 = vmatmul.bf16.gmra.mxu0 %v10297_v61  ;;  %2894 = vmatmul.bf16.gmra.mxu1 %v10297_v61 }
 0x7c6   : > { %v3257_v20 = vadd.f32 %v3256_v2, %v3160_v16  ;;  %v3278_v21 = vadd.f32 %v3277_v23, %v3161_v19  ;;  %v2552_v22 = vpop.f32.mrf.mxu2  ;;  %v2601_v24 = vpop.f32.mrf.mxu3 }
 0x7c7   : > { %v2553_v62 = vadd.f32 %v2552_v22, %v10336_v45  ;;  %v2602_v25 = vadd.f32 %v2601_v24, %v10339_v47 }
 0x7c9   : > { %v2919_v26 = vadd.f32 %v2918_v7, %v2553_v62  ;;  %v3158_v28 = vmul.f32 %v2553_v62, %v2553_v62  ;;  %v2940_v29 = vadd.f32 %v2939_v9, %v2602_v25  ;;  %v3159_v30 = vmul.f32 %v2602_v25, %v2602_v25  ;;  %v2652_v31 = vpop.f32.mrf.mxu0  ;;  %v2701_v33 = vpop.f32.mrf.mxu1 }
 0x7ca   : > { %v2653_v35 = vadd.f32 %v2652_v31, %v10330_v48  ;;  %v2702_v36 = vadd.f32 %v2701_v33, %v10333_v44 }
 0x7cb   : > { %v3215_v37 = vadd.f32 %v3214_v14, %v3158_v28  ;;  %v3236_v61 = vadd.f32 %v3235_v15, %v3159_v30 }
 0x7cc   : > { %v2962_v38 = vadd.f32 %v2961_v58, %v2653_v35  ;;  %v3168_v40 = vmul.f32 %v2653_v35, %v2653_v35  ;;  %v2983_v34 = vadd.f32 %v2982_v17, %v2702_v36  ;;  %v3169_v46 = vmul.f32 %v2702_v36, %v2702_v36 }
 0x7ce   : > { %v3258_v43 = vadd.f32 %v3257_v20, %v3168_v40  ;;  %v3279_v41 = vadd.f32 %v3278_v21, %v3169_v46  ;;  %v2554_v32 = vpop.f32.mrf.mxu2  ;;  %v2603_v49 = vpop.f32.mrf.mxu3 }
 0x7cf   : > { %v2555_v50 = vadd.f32 %v2554_v32, %v10336_v45  ;;  %v2604_v51 = vadd.f32 %v2603_v49, %v10339_v47 }
 0x7d1   : > { %v2920_v52 = vadd.f32 %v2919_v26, %v2555_v50  ;;  %v3166_v53 = vmul.f32 %v2555_v50, %v2555_v50  ;;  %v2941_v54 = vadd.f32 %v2940_v29, %v2604_v51  ;;  %v3167_v55 = vmul.f32 %v2604_v51, %v2604_v51  ;;  %v2655_v57 = vpop.f32.mrf.mxu0  ;;  %v2704_v59 = vpop.f32.mrf.mxu1 }
 0x7d2   : > { %v2656_v60 = vadd.f32 %v2655_v57, %v10330_v48  ;;  %v2705_v63 = vadd.f32 %v2704_v59, %v10333_v44 }
 0x7d3   : > { %v3216_v0 = vadd.f32 %v3215_v37, %v3166_v53  ;;  %v3237_v1 = vadd.f32 %v3236_v61, %v3167_v55  ;;  %2752 = vmatmul.bf16.gmra.mxu2 %v10309_v27 }
 0x7d4   : > { %v2963_v56 = vadd.f32 %v2962_v38, %v2656_v60  ;;  %v3176_v2 = vmul.f32 %v2656_v60, %v2656_v60  ;;  %v2984_v23 = vadd.f32 %v2983_v34, %v2705_v63  ;;  %v3177_v3 = vmul.f32 %v2705_v63, %v2705_v63  ;;  %2801 = vmatmul.bf16.gmra.mxu3 %v10309_v27 }
 0x7d5   : > { %2850 = vmatmul.bf16.gmra.mxu0 %v10309_v27  ;;  %2899 = vmatmul.bf16.gmra.mxu1 %v10309_v27 }
 0x7d6   : > { %v3259_v4 = vadd.f32 %v3258_v43, %v3176_v2  ;;  %v3280_v5 = vadd.f32 %v3279_v41, %v3177_v3  ;;  %v2557_v6 = vpop.f32.mrf.mxu2  ;;  %v2606_v7 = vpop.f32.mrf.mxu3 }
 0x7d7   : > { %v2558_v8 = vadd.f32 %v2557_v6, %v10336_v45  ;;  %v2607_v9 = vadd.f32 %v2606_v7, %v10339_v47  ;;  %v10439_v6 = vperm.slane %v10327_v42, 7 }
 0x7d9   : > { %v2921_v10 = vadd.f32 %v2920_v52, %v2558_v8  ;;  %v3174_v11 = vmul.f32 %v2558_v8, %v2558_v8  ;;  %v2942_v18 = vadd.f32 %v2941_v54, %v2607_v9  ;;  %v3175_v12 = vmul.f32 %v2607_v9, %v2607_v9  ;;  %v2657_v13 = vpop.f32.mrf.mxu0  ;;  %v2706_v14 = vpop.f32.mrf.mxu1 }
 0x7da   : > { %v2658_v15 = vadd.f32 %v2657_v13, %v10330_v48  ;;  %v2707_v58 = vadd.f32 %v2706_v14, %v10333_v44  ;;  %v10447_v13 = vperm.slane %v10327_v42, 5 }
 0x7db   : > { %v3217_v16 = vadd.f32 %v3216_v0, %v3174_v11  ;;  %v3238_v27 = vadd.f32 %v3237_v1, %v3175_v12  ;;  %v10444_v12 = vperm.slane %v10327_v42, 4 }
 0x7dc   : > { %v2964_v17 = vadd.f32 %v2963_v56, %v2658_v15  ;;  %v3184_v19 = vmul.f32 %v2658_v15, %v2658_v15  ;;  %v2985_v20 = vadd.f32 %v2984_v23, %v2707_v58  ;;  %v3185_v21 = vmul.f32 %v2707_v58, %v2707_v58 }
 0x7de   : > { %v3260_v22 = vadd.f32 %v3259_v4, %v3184_v19  ;;  %v3281_v24 = vadd.f32 %v3280_v5, %v3185_v21  ;;  %v2559_v62 = vpop.f32.mrf.mxu2  ;;  %v2608_v25 = vpop.f32.mrf.mxu3  ;;  %v10436_v5 = vperm.slane %v10327_v42, 6 }
 0x7df   : > { %v2560_v26 = vadd.f32 %v2559_v62, %v10336_v45  ;;  %v2609_v28 = vadd.f32 %v2608_v25, %v10339_v47 }
 0x7e1   : > { %v2922_v29 = vadd.f32 %v2921_v10, %v2560_v26  ;;  %v3182_v30 = vmul.f32 %v2560_v26, %v2560_v26  ;;  %v2943_v31 = vadd.f32 %v2942_v18, %v2609_v28  ;;  %v3183_v33 = vmul.f32 %v2609_v28, %v2609_v28  ;;  %v2660_v35 = vpop.f32.mrf.mxu0  ;;  %v2709_v36 = vpop.f32.mrf.mxu1 }
 0x7e2   : > { %v2661_v37 = vadd.f32 %v2660_v35, %v10330_v48  ;;  %v2710_v61 = vadd.f32 %v2709_v36, %v10333_v44 }
 0x7e3   : > { %v3218_v38 = vadd.f32 %v3217_v16, %v3182_v30  ;;  %v3239_v40 = vadd.f32 %v3238_v27, %v3183_v33  ;;  %2757 = vmatmul.bf16.gmra.mxu2 %v10321_v39 }
 0x7e4   : > { %v2965_v34 = vadd.f32 %v2964_v17, %v2661_v37  ;;  %v3192_v46 = vmul.f32 %v2661_v37, %v2661_v37  ;;  %v2986_v43 = vadd.f32 %v2985_v20, %v2710_v61  ;;  %v3193_v41 = vmul.f32 %v2710_v61, %v2710_v61  ;;  %2806 = vmatmul.bf16.gmra.mxu3 %v10321_v39 }
 0x7e5   : > { %2855 = vmatmul.bf16.gmra.mxu0 %v10321_v39  ;;  %2904 = vmatmul.bf16.gmra.mxu1 %v10321_v39 }
 0x7e6   : > { %v3261_v32 = vadd.f32 %v3260_v22, %v3192_v46  ;;  %v3282_v49 = vadd.f32 %v3281_v24, %v3193_v41  ;;  %v2562_v50 = vpop.f32.mrf.mxu2  ;;  %v2611_v51 = vpop.f32.mrf.mxu3 }
 0x7e7   : > { %v2563_v52 = vadd.f32 %v2562_v50, %v10336_v45  ;;  %v2612_v53 = vadd.f32 %v2611_v51, %v10339_v47 }
 0x7e9   : > { %v2923_v54 = vadd.f32 %v2922_v29, %v2563_v52  ;;  %v3190_v55 = vmul.f32 %v2563_v52, %v2563_v52  ;;  %v2944_v57 = vadd.f32 %v2943_v31, %v2612_v53  ;;  %v3191_v59 = vmul.f32 %v2612_v53, %v2612_v53  ;;  %v2662_v60 = vpop.f32.mrf.mxu0  ;;  %v2711_v63 = vpop.f32.mrf.mxu1 }
 0x7ea   : > { %v2663_v0 = vadd.f32 %v2662_v60, %v10330_v48  ;;  %v2712_v1 = vadd.f32 %v2711_v63, %v10333_v44 }
 0x7eb   : > { %v3219_v56 = vadd.f32 %v3218_v38, %v3190_v55  ;;  %v3240_v39 = vadd.f32 %v3239_v40, %v3191_v59 }
 0x7ec   : > { %v2966_v2 = vadd.f32 %v2965_v34, %v2663_v0  ;;  %v3200_v23 = vmul.f32 %v2663_v0, %v2663_v0  ;;  %v2987_v3 = vadd.f32 %v2986_v43, %v2712_v1  ;;  %v3201_v4 = vmul.f32 %v2712_v1, %v2712_v1 }
 0x7ee   : > { %v2967_v7 = vrot.slane %v2966_v2, 4  ;;  %v3262_v8 = vadd.f32 %v3261_v32, %v3200_v23  ;;  %v2988_v9 = vrot.slane %v2987_v3, 4  ;;  %v3283_v10 = vadd.f32 %v3282_v49, %v3201_v4  ;;  %v2564_v11 = vpop.f32.mrf.mxu2  ;;  %v2613_v48 = vpop.f32.mrf.mxu3 }
 0x7ef   : > { %v2565_v44 = vadd.f32 %v2564_v11, %v10336_v45  ;;  %v2614_v18 = vadd.f32 %v2613_v48, %v10339_v47 }
 0x7f0   : > { %v2968_v14 = vadd.f32 %v2967_v7, %v2966_v2  ;;  %v3263_v15 = vrot.slane %v3262_v8, 4  ;;  %v2989_v58 = vadd.f32 %v2988_v9, %v2987_v3  ;;  %v3284_v16 = vrot.slane %v3283_v10, 4 }
 0x7f1   : > { %v2924_v27 = vadd.f32 %v2923_v54, %v2565_v44  ;;  %v3198_v17 = vmul.f32 %v2565_v44, %v2565_v44  ;;  %v2945_v19 = vadd.f32 %v2944_v57, %v2614_v18  ;;  %v3199_v20 = vmul.f32 %v2614_v18, %v2614_v18  ;;  %v2821_v21 = vpop.f32.mrf.mxu0  ;;  %v2870_v22 = vpop.f32.mrf.mxu1 }
 0x7f2   : > { %v2969_v24 = vrot.slane %v2968_v14, 2  ;;  %v3264_v45 = vadd.f32 %v3263_v15, %v3262_v8  ;;  %v2990_v62 = vrot.slane %v2989_v58, 2  ;;  %v3285_v47 = vadd.f32 %v3284_v16, %v3283_v10 }
 0x7f3   : > { %v2925_v25 = vrot.slane %v2924_v27, 4  ;;  %v3220_v26 = vadd.f32 %v3219_v56, %v3198_v17  ;;  %v2946_v28 = vrot.slane %v2945_v19, 4  ;;  %v3241_v29 = vadd.f32 %v3240_v39, %v3199_v20 }
 0x7f4   : > { %v2970_v42 = vadd.f32 %v2969_v24, %v2968_v14  ;;  %v3265_v30 = vrot.slane %v3264_v45, 2  ;;  %v2991_v31 = vadd.f32 %v2990_v62, %v2989_v58  ;;  %v3286_v33 = vrot.slane %v3285_v47, 2 }
 0x7f5   : > { %v2926_v35 = vadd.f32 %v2925_v25, %v2924_v27  ;;  %v3221_v36 = vrot.slane %v3220_v26, 4  ;;  %v2947_v37 = vadd.f32 %v2946_v28, %v2945_v19  ;;  %v3242_v61 = vrot.slane %v3241_v29, 4 }
 0x7f6   : > { %v2971_v38 = vrot.slane %v2970_v42, 1  ;;  %v3266_v40 = vadd.f32 %v3265_v30, %v3264_v45  ;;  %v2992_v34 = vrot.slane %v2991_v31, 1  ;;  %v3287_v46 = vadd.f32 %v3286_v33, %v3285_v47  ;;  %v2723_v43 = vpop.f32.mrf.mxu2  ;;  %v2772_v41 = vpop.f32.mrf.mxu3 }
 0x7f7   : > { %v2927_v32 = vrot.slane %v2926_v35, 2  ;;  %v3222_v49 = vadd.f32 %v3221_v36, %v3220_v26  ;;  %v2948_v50 = vrot.slane %v2947_v37, 2  ;;  %v3243_v51 = vadd.f32 %v3242_v61, %v3241_v29 }
 0x7f8   : > { %v10449_v52 = vadd.f32 %v2971_v38, %v2970_v42  ;;  %v3267_v53 = vrot.slane %v3266_v40, 1  ;;  %v10451_v54 = vadd.f32 %v2992_v34, %v2991_v31  ;;  %v3288_v55 = vrot.slane %v3287_v46, 1 }
 0x7f9   : > { %v2928_v57 = vadd.f32 %v2927_v32, %v2926_v35  ;;  %v3223_v59 = vrot.slane %v3222_v49, 2  ;;  %v2949_v60 = vadd.f32 %v2948_v50, %v2947_v37  ;;  %v3244_v63 = vrot.slane %v3243_v51, 2  ;;  %v2823_v0 = vpop.f32.mrf.mxu0  ;;  %v2872_v1 = vpop.f32.mrf.mxu1 }
 0x7fa   : > { %v10453_v56 = vadd.f32 %v3267_v53, %v3266_v40  ;;  %v10455_v39 = vadd.f32 %v3288_v55, %v3287_v46  ;;  %v2822_v2 = vadd.f32 %v2821_v21, %v10436_v5  ;;  %v2871_v23 = vadd.f32 %v2870_v22, %v10439_v6 }
 0x7fb   : > { %v2929_v3 = vrot.slane %v2928_v57, 1  ;;  %v3224_v4 = vadd.f32 %v3223_v59, %v3222_v49  ;;  %v2950_v7 = vrot.slane %v2949_v60, 1  ;;  %v3245_v8 = vadd.f32 %v3244_v63, %v3243_v51 }
 0x7fc   : > { %v3084_v9 = vmul.f32 %v2822_v2, %v2822_v2  ;;  %v3085_v10 = vmul.f32 %v2871_v23, %v2871_v23  ;;  %v2724_v11 = vadd.f32 %v2723_v43, %v10444_v12  ;;  %v2773_v48 = vadd.f32 %v2772_v41, %v10447_v13 }
 0x7fd   : > { %v10461_v44 = vadd.f32 %v2929_v3, %v2928_v57  ;;  %v3225_v18 = vrot.slane %v3224_v4, 1  ;;  %v10463_v14 = vadd.f32 %v2950_v7, %v2949_v60  ;;  %v3246_v15 = vrot.slane %v3245_v8, 1 }
 0x7fe   : > { %v3082_v58 = vmul.f32 %v2724_v11, %v2724_v11  ;;  %v3083_v16 = vmul.f32 %v2773_v48, %v2773_v48  ;;  %v2824_v27 = vadd.f32 %v2823_v0, %v10436_v5  ;;  %v2873_v17 = vadd.f32 %v2872_v1, %v10439_v6  ;;  %v2725_v19 = vpop.f32.mrf.mxu2  ;;  %v2774_v20 = vpop.f32.mrf.mxu3 }
 0x7ff   : > { %v10467_v21 = vadd.f32 %v3225_v18, %v3224_v4  ;;  %v10469_v22 = vadd.f32 %v3246_v15, %v3245_v8  ;;  %v2726_v24 = vadd.f32 %v2725_v19, %v10444_v12  ;;  %v2775_v45 = vadd.f32 %v2774_v20, %v10447_v13 }
 0x800   : > { %v3036_v62 = vadd.f32 %v2824_v27, %v2822_v2  ;;  %v3092_v47 = vmul.f32 %v2824_v27, %v2824_v27  ;;  %v3057_v25 = vadd.f32 %v2873_v17, %v2871_v23  ;;  %v3093_v26 = vmul.f32 %v2873_v17, %v2873_v17 }
 0x801   : > { %v2994_v28 = vadd.f32 %v2726_v24, %v2724_v11  ;;  %v3090_v29 = vmul.f32 %v2726_v24, %v2726_v24  ;;  %v3015_v42 = vadd.f32 %v2775_v45, %v2773_v48  ;;  %v3091_v30 = vmul.f32 %v2775_v45, %v2775_v45  ;;  %v2826_v31 = vpop.f32.mrf.mxu0 }
 0x802   : > { %v3332_v33 = vadd.f32 %v3092_v47, %v3084_v9  ;;  %v3353_v35 = vadd.f32 %v3093_v26, %v3085_v10  ;;  %v2827_v36 = vadd.f32 %v2826_v31, %v10436_v5  ;;  %v2875_v37 = vpop.f32.mrf.mxu1 }
 0x803   : > { %v3290_v61 = vadd.f32 %v3090_v29, %v3082_v58  ;;  %v3311_v38 = vadd.f32 %v3091_v30, %v3083_v16  ;;  %v2876_v40 = vadd.f32 %v2875_v37, %v10439_v6 }
 0x804   : > { %v3037_v34 = vadd.f32 %v3036_v62, %v2827_v36  ;;  %v3100_v46 = vmul.f32 %v2827_v36, %v2827_v36 }
 0x805   : > { %v3058_v43 = vadd.f32 %v3057_v25, %v2876_v40  ;;  %v3101_v41 = vmul.f32 %v2876_v40, %v2876_v40 }
 0x806   : > { %v3333_v32 = vadd.f32 %v3332_v33, %v3100_v46  ;;  %v2728_v49 = vpop.f32.mrf.mxu2 }
 0x807   : > { %v3354_v50 = vadd.f32 %v3353_v35, %v3101_v41  ;;  %v2729_v51 = vadd.f32 %v2728_v49, %v10444_v12  ;;  %v2777_v53 = vpop.f32.mrf.mxu3 }
 0x808   : > { %v2778_v55 = vadd.f32 %v2777_v53, %v10447_v13 }
 0x809   : > { %v2995_v57 = vadd.f32 %v2994_v28, %v2729_v51  ;;  %v3098_v59 = vmul.f32 %v2729_v51, %v2729_v51  ;;  %v2828_v60 = vpop.f32.mrf.mxu0 }
 0x80a   : > { %v3016_v63 = vadd.f32 %v3015_v42, %v2778_v55  ;;  %v3099_v0 = vmul.f32 %v2778_v55, %v2778_v55  ;;  %v2829_v1 = vadd.f32 %v2828_v60, %v10436_v5  ;;  %v2877_v2 = vpop.f32.mrf.mxu1 }
 0x80b   : > { %v3291_v23 = vadd.f32 %v3290_v61, %v3098_v59  ;;  %v2878_v3 = vadd.f32 %v2877_v2, %v10439_v6 }
 0x80c   : > { %v3312_v4 = vadd.f32 %v3311_v38, %v3099_v0  ;;  %v3038_v7 = vadd.f32 %v3037_v34, %v2829_v1  ;;  %v3108_v8 = vmul.f32 %v2829_v1, %v2829_v1 }
 0x80d   : > { %v3059_v9 = vadd.f32 %v3058_v43, %v2878_v3  ;;  %v3109_v10 = vmul.f32 %v2878_v3, %v2878_v3 }
 0x80e   : > { %v3334_v11 = vadd.f32 %v3333_v32, %v3108_v8  ;;  %v2730_v48 = vpop.f32.mrf.mxu2 }
 0x80f   : > { %v3355_v18 = vadd.f32 %v3354_v50, %v3109_v10  ;;  %v2731_v15 = vadd.f32 %v2730_v48, %v10444_v12  ;;  %v2779_v58 = vpop.f32.mrf.mxu3 }
 0x810   : > { %v2780_v16 = vadd.f32 %v2779_v58, %v10447_v13 }
 0x811   : > { %v2996_v27 = vadd.f32 %v2995_v57, %v2731_v15  ;;  %v3106_v17 = vmul.f32 %v2731_v15, %v2731_v15  ;;  %v2831_v19 = vpop.f32.mrf.mxu0 }
 0x812   : > { %v3017_v20 = vadd.f32 %v3016_v63, %v2780_v16  ;;  %v3107_v24 = vmul.f32 %v2780_v16, %v2780_v16  ;;  %v2832_v45 = vadd.f32 %v2831_v19, %v10436_v5  ;;  %v2880_v62 = vpop.f32.mrf.mxu1 }
 0x813   : > { %v3292_v47 = vadd.f32 %v3291_v23, %v3106_v17  ;;  %v2881_v25 = vadd.f32 %v2880_v62, %v10439_v6 }
 0x814   : > { %v3313_v26 = vadd.f32 %v3312_v4, %v3107_v24  ;;  %v3039_v28 = vadd.f32 %v3038_v7, %v2832_v45  ;;  %v3116_v29 = vmul.f32 %v2832_v45, %v2832_v45 }
 0x815   : > { %v3060_v42 = vadd.f32 %v3059_v9, %v2881_v25  ;;  %v3117_v30 = vmul.f32 %v2881_v25, %v2881_v25 }
 0x816   : > { %v3335_v31 = vadd.f32 %v3334_v11, %v3116_v29  ;;  %v2733_v33 = vpop.f32.mrf.mxu2 }
 0x817   : > { %v3356_v35 = vadd.f32 %v3355_v18, %v3117_v30  ;;  %v2734_v36 = vadd.f32 %v2733_v33, %v10444_v12  ;;  %v2782_v37 = vpop.f32.mrf.mxu3 }
 0x818   : > { %v2783_v61 = vadd.f32 %v2782_v37, %v10447_v13 }
 0x819   : > { %v2997_v38 = vadd.f32 %v2996_v27, %v2734_v36  ;;  %v3114_v40 = vmul.f32 %v2734_v36, %v2734_v36  ;;  %v2833_v34 = vpop.f32.mrf.mxu0 }
 0x81a   : > { %v3018_v46 = vadd.f32 %v3017_v20, %v2783_v61  ;;  %v3115_v43 = vmul.f32 %v2783_v61, %v2783_v61  ;;  %v2882_v41 = vpop.f32.mrf.mxu1  ;;  %v2834_v11 = vadd.f32 %v2833_v34, %v10436_v5 }
 0x81b   : > { %v3293_v32 = vadd.f32 %v3292_v47, %v3114_v40  ;;  %v2883_v48 = vadd.f32 %v2882_v41, %v10439_v6 }
 0x81c   : > { %v3314_v49 = vadd.f32 %v3313_v26, %v3115_v43  ;;  %v3124_v27 = vmul.f32 %v2834_v11, %v2834_v11  ;;  %v3040_v29 = vadd.f32 %v3039_v28, %v2834_v11 }
 0x81d   : > { %v3125_v17 = vmul.f32 %v2883_v48, %v2883_v48  ;;  %v3061_v30 = vadd.f32 %v3060_v42, %v2883_v48 }
 0x81e   : > { %v2735_v50 = vpop.f32.mrf.mxu2  ;;  %v3336_v37 = vadd.f32 %v3335_v31, %v3124_v27 }
 0x81f   : > { %v2784_v51 = vpop.f32.mrf.mxu3  ;;  %v2736_v58 = vadd.f32 %v2735_v50, %v10444_v12  ;;  %v3357_v61 = vadd.f32 %v3356_v35, %v3125_v17 }
 0x820   : > { %v2785_v16 = vadd.f32 %v2784_v51, %v10447_v13 }
 0x821   : > { %v3122_v25 = vmul.f32 %v2736_v58, %v2736_v58  ;;  %v2998_v50 = vadd.f32 %v2997_v38, %v2736_v58 }
 0x822   : > { %v2836_v53 = vpop.f32.mrf.mxu0  ;;  %v2885_v55 = vpop.f32.mrf.mxu1  ;;  %v3123_v26 = vmul.f32 %v2785_v16, %v2785_v16  ;;  %v3019_v51 = vadd.f32 %v3018_v46, %v2785_v16 }
 0x823   : > { %v2837_v19 = vadd.f32 %v2836_v53, %v10436_v5  ;;  %v2886_v20 = vadd.f32 %v2885_v55, %v10439_v6 }
 0x825   : > { %v3132_v40 = vmul.f32 %v2837_v19, %v2837_v19  ;;  %v3133_v34 = vmul.f32 %v2886_v20, %v2886_v20 }
 0x826   : > { %v2738_v57 = vpop.f32.mrf.mxu2 }
 0x827   : > { %v2787_v59 = vpop.f32.mrf.mxu3  ;;  %v2739_v45 = vadd.f32 %v2738_v57, %v10444_v12  ;;  %v3294_v57 = vadd.f32 %v3293_v32, %v3122_v25  ;;  %v3337_v11 = vadd.f32 %v3336_v37, %v3132_v40  ;;  %v3358_v48 = vadd.f32 %v3357_v61, %v3133_v34 }
 0x828   : > { %v2788_v62 = vadd.f32 %v2787_v59, %v10447_v13  ;;  %v3315_v59 = vadd.f32 %v3314_v49, %v3123_v26 }
 0x829   : > { %v3130_v53 = vmul.f32 %v2739_v45, %v2739_v45  ;;  %v2999_v46 = vadd.f32 %v2998_v50, %v2739_v45 }
 0x82a   : > { %v2838_v60 = vpop.f32.mrf.mxu0  ;;  %v2887_v63 = vpop.f32.mrf.mxu1  ;;  %v3131_v55 = vmul.f32 %v2788_v62, %v2788_v62  ;;  %v3020_v16 = vadd.f32 %v3019_v51, %v2788_v62 }
 0x82b   : > { %v2839_v33 = vadd.f32 %v2838_v60, %v10436_v5  ;;  %v2888_v36 = vadd.f32 %v2887_v63, %v10439_v6  ;;  %v3041_v60 = vadd.f32 %v3040_v29, %v2837_v19  ;;  %v3062_v63 = vadd.f32 %v3061_v30, %v2886_v20 }
 0x82c   : > { %v3295_v58 = vadd.f32 %v3294_v57, %v3130_v53  ;;  %v3316_v32 = vadd.f32 %v3315_v59, %v3131_v55 }
 0x82d   : > { %v3140_v31 = vmul.f32 %v2839_v33, %v2839_v33  ;;  %v3141_v35 = vmul.f32 %v2888_v36, %v2888_v36  ;;  %v3042_v20 = vadd.f32 %v3041_v60, %v2839_v33  ;;  %v3063_v29 = vadd.f32 %v3062_v63, %v2888_v36 }
 0x82e   : > { %v2740_v0 = vpop.f32.mrf.mxu2 }
 0x82f   : > { %v2789_v1 = vpop.f32.mrf.mxu3  ;;  %v2741_v28 = vadd.f32 %v2740_v0, %v10444_v12  ;;  %v3338_v26 = vadd.f32 %v3337_v11, %v3140_v31  ;;  %v3359_v30 = vadd.f32 %v3358_v48, %v3141_v35 }
 0x830   : > { %v2790_v42 = vadd.f32 %v2789_v1, %v10447_v13 }
 0x831   : > { %v3138_v25 = vmul.f32 %v2741_v28, %v2741_v28  ;;  %v3000_v40 = vadd.f32 %v2999_v46, %v2741_v28 }
 0x832   : > { %v2841_v2 = vpop.f32.mrf.mxu0  ;;  %v2890_v23 = vpop.f32.mrf.mxu1  ;;  %v3139_v0 = vmul.f32 %v2790_v42, %v2790_v42  ;;  %v3021_v34 = vadd.f32 %v3020_v16, %v2790_v42 }
 0x833   : > { %v2842_v27 = vadd.f32 %v2841_v2, %v10436_v5  ;;  %v2891_v17 = vadd.f32 %v2890_v23, %v10439_v6 }
 0x834   : > { %v3317_v33 = vadd.f32 %v3316_v32, %v3139_v0 }
 0x835   : > { %v3148_v37 = vmul.f32 %v2842_v27, %v2842_v27  ;;  %v3149_v2 = vmul.f32 %v2891_v17, %v2891_v17  ;;  %v3043_v53 = vadd.f32 %v3042_v20, %v2842_v27  ;;  %v3064_v55 = vadd.f32 %v3063_v29, %v2891_v17 }
 0x836   : > { %v2743_v3 = vpop.f32.mrf.mxu2 }
 0x837   : > { %v2792_v4 = vpop.f32.mrf.mxu3  ;;  %v2744_v1 = vadd.f32 %v2743_v3, %v10444_v12  ;;  %v3339_v57 = vadd.f32 %v3338_v26, %v3148_v37  ;;  %v3360_v59 = vadd.f32 %v3359_v30, %v3149_v2 }
 0x838   : > { %v2793_v19 = vadd.f32 %v2792_v4, %v10447_v13  ;;  %v3296_v4 = vadd.f32 %v3295_v58, %v3138_v25 }
 0x839   : > { %v3146_v36 = vmul.f32 %v2744_v1, %v2744_v1  ;;  %v3001_v60 = vadd.f32 %v3000_v40, %v2744_v1 }
 0x83a   : > { %v2843_v7 = vpop.f32.mrf.mxu0  ;;  %v2892_v8 = vpop.f32.mrf.mxu1  ;;  %v3147_v51 = vmul.f32 %v2793_v19, %v2793_v19  ;;  %v3022_v63 = vadd.f32 %v3021_v34, %v2793_v19 }
 0x83b   : > { %v2844_v23 = vadd.f32 %v2843_v7, %v10436_v5  ;;  %v2893_v45 = vadd.f32 %v2892_v8, %v10439_v6  ;;  %v3297_v11 = vadd.f32 %v3296_v4, %v3146_v36 }
 0x83c   : > { %v3318_v48 = vadd.f32 %v3317_v33, %v3147_v51 }
 0x83d   : > { %v3156_v28 = vmul.f32 %v2844_v23, %v2844_v23  ;;  %v3157_v42 = vmul.f32 %v2893_v45, %v2893_v45  ;;  %v3044_v17 = vadd.f32 %v3043_v53, %v2844_v23 }
 0x83e   : > { %v10485_v9 = vpop.f32.mrf.mxu2 }
 0x83f   : > { %v10487_v10 = vpop.f32.mrf.mxu3  ;;  %v2746_v50 = vadd.f32 %v10485_v9, %v10444_v12  ;;  %v3340_v16 = vadd.f32 %v3339_v57, %v3156_v28  ;;  %v3361_v32 = vadd.f32 %v3360_v59, %v3157_v42 }
 0x840   : > { %v2795_v3 = vadd.f32 %v10487_v10, %v10447_v13 }
 0x841   : > { %v3154_v10 = vmul.f32 %v2746_v50, %v2746_v50  ;;  %v3002_v20 = vadd.f32 %v3001_v60, %v2746_v50 }
 0x842   : > { %v10491_v18 = vpop.f32.mrf.mxu0  ;;  %v10493_v15 = vpop.f32.mrf.mxu1  ;;  %v3155_v31 = vmul.f32 %v2795_v3, %v2795_v3 }
 0x843   : > { %v2847_v7 = vadd.f32 %v10491_v18, %v10436_v5  ;;  %v2896_v8 = vadd.f32 %v10493_v15, %v10439_v6  ;;  %v3065_v15 = vadd.f32 %v3064_v55, %v2893_v45  ;;  %v3298_v26 = vadd.f32 %v3297_v11, %v3154_v10 }
 0x844   : > { %v3319_v29 = vadd.f32 %v3318_v48, %v3155_v31 }
 0x845   : > { %v3164_v46 = vmul.f32 %v2847_v7, %v2847_v7  ;;  %v3165_v58 = vmul.f32 %v2896_v8, %v2896_v8  ;;  %v3045_v23 = vadd.f32 %v3044_v17, %v2847_v7  ;;  %v3066_v40 = vadd.f32 %v3065_v15, %v2896_v8 }
 0x846   : > { %v10499_v24 = vpop.f32.mrf.mxu2 }
 0x847   : > { %v10503_v47 = vpop.f32.mrf.mxu3  ;;  %v2749_v27 = vadd.f32 %v10499_v24, %v10444_v12  ;;  %v3023_v24 = vadd.f32 %v3022_v63, %v2795_v3  ;;  %v3341_v45 = vadd.f32 %v3340_v16, %v3164_v46  ;;  %v3362_v34 = vadd.f32 %v3361_v32, %v3165_v58 }
 0x848   : > { %v2798_v18 = vadd.f32 %v10503_v47, %v10447_v13 }
 0x849   : > { %v3162_v30 = vmul.f32 %v2749_v27, %v2749_v27  ;;  %v3003_v36 = vadd.f32 %v3002_v20, %v2749_v27 }
 0x84a   : > { %v10507_v43 = vpop.f32.mrf.mxu0  ;;  %v10509_v41 = vpop.f32.mrf.mxu1  ;;  %v3163_v47 = vmul.f32 %v2798_v18, %v2798_v18  ;;  %v3024_v3 = vadd.f32 %v3023_v24, %v2798_v18 }
 0x84b   : > { %v2849_v25 = vadd.f32 %v10507_v43, %v10436_v5  ;;  %v2898_v0 = vadd.f32 %v10509_v41, %v10439_v6  ;;  %v3299_v55 = vadd.f32 %v3298_v26, %v3162_v30 }
 0x84d   : > { %v3172_v43 = vmul.f32 %v2849_v25, %v2849_v25  ;;  %v3173_v4 = vmul.f32 %v2898_v0, %v2898_v0  ;;  %v3046_v8 = vadd.f32 %v3045_v23, %v2849_v25  ;;  %v3067_v59 = vadd.f32 %v3066_v40, %v2898_v0 }
 0x84e   : > { %v2750_v38 = vpop.f32.mrf.mxu2 }
 0x84f   : > { %v2799_v49 = vpop.f32.mrf.mxu3  ;;  %v2751_v37 = vadd.f32 %v2750_v38, %v10444_v12  ;;  %v3342_v42 = vadd.f32 %v3341_v45, %v3172_v43 }
 0x850   : > { %v2800_v2 = vadd.f32 %v2799_v49, %v10447_v13  ;;  %v3320_v49 = vadd.f32 %v3319_v29, %v3163_v47 }
 0x851   : > { %v3170_v7 = vmul.f32 %v2751_v37, %v2751_v37 }
 0x852   : > { %v2851_v61 = vpop.f32.mrf.mxu0  ;;  %v2900_v62 = vpop.f32.mrf.mxu1  ;;  %v3171_v57 = vmul.f32 %v2800_v2, %v2800_v2  ;;  %v3025_v11 = vadd.f32 %v3024_v3, %v2800_v2 }
 0x853   : > { %v2852_v41 = vadd.f32 %v2851_v61, %v10436_v5  ;;  %v2901_v33 = vadd.f32 %v2900_v62, %v10439_v6  ;;  %v3363_v62 = vadd.f32 %v3362_v34, %v3173_v4  ;;  %v3300_v27 = vadd.f32 %v3299_v55, %v3170_v7 }
 0x854   : > { %v3321_v18 = vadd.f32 %v3320_v49, %v3171_v57 }
 0x855   : > { %v3180_v60 = vmul.f32 %v2852_v41, %v2852_v41  ;;  %v3181_v63 = vmul.f32 %v2901_v33, %v2901_v33  ;;  %v3047_v46 = vadd.f32 %v3046_v8, %v2852_v41  ;;  %v3068_v58 = vadd.f32 %v3067_v59, %v2901_v33 }
 0x856   : > { %v2753_v9 = vpop.f32.mrf.mxu2 }
 0x857   : > { %v2802_v35 = vpop.f32.mrf.mxu3  ;;  %v2754_v51 = vadd.f32 %v2753_v9, %v10444_v12  ;;  %v3004_v9 = vadd.f32 %v3003_v36, %v2751_v37  ;;  %v3343_v25 = vadd.f32 %v3342_v42, %v3180_v60  ;;  %v3364_v0 = vadd.f32 %v3363_v62, %v3181_v63 }
 0x858   : > { %v2803_v53 = vadd.f32 %v2802_v35, %v10447_v13 }
 0x859   : > { %v3178_v35 = vmul.f32 %v2754_v51, %v2754_v51  ;;  %v3005_v26 = vadd.f32 %v3004_v9, %v2754_v51 }
 0x85a   : > { %v2853_v1 = vpop.f32.mrf.mxu0  ;;  %v2902_v19 = vpop.f32.mrf.mxu1  ;;  %v3179_v48 = vmul.f32 %v2803_v53, %v2803_v53  ;;  %v3026_v29 = vadd.f32 %v3025_v11, %v2803_v53 }
 0x85b   : > { %v2854_v28 = vadd.f32 %v2853_v1, %v10436_v5  ;;  %v2903_v61 = vadd.f32 %v2902_v19, %v10439_v6  ;;  %v3301_v24 = vadd.f32 %v3300_v27, %v3178_v35 }
 0x85c   : > { %v3322_v30 = vadd.f32 %v3321_v18, %v3179_v48 }
 0x85d   : > { %v3188_v16 = vmul.f32 %v2854_v28, %v2854_v28  ;;  %v3189_v32 = vmul.f32 %v2903_v61, %v2903_v61  ;;  %v3048_v40 = vadd.f32 %v3047_v46, %v2854_v28  ;;  %v3069_v43 = vadd.f32 %v3068_v58, %v2903_v61 }
 0x85e   : > { %v2755_v50 = vpop.f32.mrf.mxu2 }
 0x85f   : > { %v2804_v38 = vpop.f32.mrf.mxu3  ;;  %v2756_v1 = vadd.f32 %v2755_v50, %v10444_v12  ;;  %v3344_v34 = vadd.f32 %v3343_v25, %v3188_v16  ;;  %v3365_v4 = vadd.f32 %v3364_v0, %v3189_v32 }
 0x860   : > { %v2805_v19 = vadd.f32 %v2804_v38, %v10447_v13 }
 0x861   : > { %v3006_v41 = vadd.f32 %v3005_v26, %v2756_v1  ;;  %v3186_v33 = vmul.f32 %v2756_v1, %v2756_v1 }
 0x862   : > { %v2856_v10 = vpop.f32.mrf.mxu0  ;;  %v2905_v31 = vpop.f32.mrf.mxu1  ;;  %v3027_v50 = vadd.f32 %v3026_v29, %v2805_v19  ;;  %v3187_v36 = vmul.f32 %v2805_v19, %v2805_v19 }
 0x863   : > { %v2857_v17 = vadd.f32 %v2856_v10, %v10436_v5  ;;  %v2906_v15 = vadd.f32 %v2905_v31, %v10439_v6  ;;  %v3302_v60 = vadd.f32 %v3301_v24, %v3186_v33 }
 0x864   : > { %v3323_v63 = vadd.f32 %v3322_v30, %v3187_v36 }
 0x865   : > { %v3196_v37 = vmul.f32 %v2857_v17, %v2857_v17  ;;  %v3197_v2 = vmul.f32 %v2906_v15, %v2906_v15  ;;  %v3049_v38 = vadd.f32 %v3048_v40, %v2857_v17  ;;  %v3070_v53 = vadd.f32 %v3069_v43, %v2906_v15 }
 0x866   : > { %v2758_v20 = vpop.f32.mrf.mxu2 }
 0x867   : > { %v2807_v47 = vpop.f32.mrf.mxu3  ;;  %v2759_v23 = vadd.f32 %v2758_v20, %v10444_v12  ;;  %v3345_v7 = vadd.f32 %v3344_v34, %v3196_v37  ;;  %v3366_v57 = vadd.f32 %v3365_v4, %v3197_v2 }
 0x868   : > { %v2808_v45 = vadd.f32 %v2807_v47, %v10447_v13 }
 0x869   : > { %v3194_v8 = vmul.f32 %v2759_v23, %v2759_v23  ;;  %v3007_v10 = vadd.f32 %v3006_v41, %v2759_v23 }
 0x86a   : > { %v2858_v3 = vpop.f32.mrf.mxu0  ;;  %v2907_v51 = vpop.f32.mrf.mxu1  ;;  %v3195_v59 = vmul.f32 %v2808_v45, %v2808_v45  ;;  %v3028_v31 = vadd.f32 %v3027_v50, %v2808_v45 }
 0x86b   : > { %v2859_v55 = vadd.f32 %v2858_v3, %v10436_v5  ;;  %v2908_v49 = vadd.f32 %v2907_v51, %v10439_v6  ;;  %v3303_v18 = vadd.f32 %v3302_v60, %v3194_v8 }
 0x86c   : > { %v3324_v6 = vadd.f32 %v3323_v63, %v3195_v59 }
 0x86d   : > { %v3050_v28 = vadd.f32 %v3049_v38, %v2859_v55  ;;  %v3204_v42 = vmul.f32 %v2859_v55, %v2859_v55  ;;  %v3071_v61 = vadd.f32 %v3070_v53, %v2908_v49  ;;  %v3205_v62 = vmul.f32 %v2908_v49, %v2908_v49 }
 0x86e   : > { %v2760_v9 = vpop.f32.mrf.mxu2 }
 0x86f   : > { %v3051_v11 = vrot.slane %v3050_v28, 4  ;;  %v3346_v35 = vadd.f32 %v3345_v7, %v3204_v42  ;;  %v3072_v48 = vrot.slane %v3071_v61, 4  ;;  %v3367_v27 = vadd.f32 %v3366_v57, %v3205_v62  ;;  %v2809_v5 = vpop.f32.mrf.mxu3 }
 0x870   : > { %v2761_v17 = vadd.f32 %v2760_v9, %v10444_v12  ;;  %v2810_v15 = vadd.f32 %v2809_v5, %v10447_v13 }
 0x871   : > { %v3052_v46 = vadd.f32 %v3051_v11, %v3050_v28  ;;  %v3347_v58 = vrot.slane %v3346_v35, 4  ;;  %v3073_v16 = vadd.f32 %v3072_v48, %v3071_v61  ;;  %v3368_v32 = vrot.slane %v3367_v27, 4 }
 0x872   : > { %v3008_v25 = vadd.f32 %v3007_v10, %v2761_v17  ;;  %v3202_v0 = vmul.f32 %v2761_v17, %v2761_v17  ;;  %v3029_v1 = vadd.f32 %v3028_v31, %v2810_v15  ;;  %v3203_v19 = vmul.f32 %v2810_v15, %v2810_v15 }
 0x873   : > { %v3053_v20 = vrot.slane %v3052_v46, 2  ;;  %v3348_v26 = vadd.f32 %v3347_v58, %v3346_v35  ;;  %v3074_v24 = vrot.slane %v3073_v16, 2  ;;  %v3369_v29 = vadd.f32 %v3368_v32, %v3367_v27 }
 0x874   : > { %v3009_v30 = vrot.slane %v3008_v25, 4  ;;  %v3304_v47 = vadd.f32 %v3303_v18, %v3202_v0  ;;  %v3030_v37 = vrot.slane %v3029_v1, 4  ;;  %v3325_v2 = vadd.f32 %v3324_v6, %v3203_v19 }
 0x875   : > { %v3054_v23 = vadd.f32 %v3053_v20, %v3052_v46  ;;  %v3349_v12 = vrot.slane %v3348_v26, 2  ;;  %v3075_v45 = vadd.f32 %v3074_v24, %v3073_v16  ;;  %v3370_v13 = vrot.slane %v3369_v29, 2 }
 0x876   : > { %v3010_v40 = vadd.f32 %v3009_v30, %v3008_v25  ;;  %v3305_v34 = vrot.slane %v3304_v47, 4  ;;  %v3031_v43 = vadd.f32 %v3030_v37, %v3029_v1  ;;  %v3326_v4 = vrot.slane %v3325_v2, 4 }
 0x877   : > { %v3055_v41 = vrot.slane %v3054_v23, 1  ;;  %v3350_v33 = vadd.f32 %v3349_v12, %v3348_v26  ;;  %v3076_v50 = vrot.slane %v3075_v45, 1  ;;  %v3371_v36 = vadd.f32 %v3370_v13, %v3369_v29 }
 0x878   : > { %v3011_v3 = vrot.slane %v3010_v40, 2  ;;  %v3306_v51 = vadd.f32 %v3305_v34, %v3304_v47  ;;  %v3032_v38 = vrot.slane %v3031_v43, 2  ;;  %v3327_v53 = vadd.f32 %v3326_v4, %v3325_v2 }
 0x879   : > { %v3056_v55 = vadd.f32 %v3055_v41, %v3054_v23  ;;  %v3351_v49 = vrot.slane %v3350_v33, 1  ;;  %v3077_v7 = vadd.f32 %v3076_v50, %v3075_v45  ;;  %v3372_v57 = vrot.slane %v3371_v36, 1 }
 0x87a   : > { %v3012_v8 = vadd.f32 %v3011_v3, %v3010_v40  ;;  %v3307_v59 = vrot.slane %v3306_v51, 2  ;;  %v3033_v28 = vadd.f32 %v3032_v38, %v3031_v43  ;;  %v3328_v42 = vrot.slane %v3327_v53, 2 }
 0x87b   : > { %v3352_v61 = vadd.f32 %v3351_v49, %v3350_v33  ;;  %v3373_v62 = vadd.f32 %v3372_v57, %v3371_v36 }
 0x87c   : > { %v3013_v60 = vrot.slane %v3012_v8, 1  ;;  %v3308_v63 = vadd.f32 %v3307_v59, %v3306_v51  ;;  %v3034_v10 = vrot.slane %v3033_v28, 1  ;;  %v3329_v31 = vadd.f32 %v3328_v42, %v3327_v53  ;;  %3375 = sbr.rel (%p9910_p8) target bundleno = 2180 (0x884), region = 236 }
 0x87e   : > { %v3014_v9 = vadd.f32 %v3013_v60, %v3012_v8  ;;  %v3309_v11 = vrot.slane %v3308_v63, 1  ;;  %v3035_v35 = vadd.f32 %v3034_v10, %v3033_v28  ;;  %v3330_v48 = vrot.slane %v3329_v31, 1 }
 0x880   : > { %v3310_v27 = vadd.f32 %v3309_v11, %v3308_v63  ;;  %v3331_v5 = vadd.f32 %v3330_v48, %v3329_v31 }
 0x881   : > { %v9503_v18 = vmov 0.0  }
 0x882   : > { %3376 = vst [vmem:[#allocation4] ss:$4 sm:$0xff] %v9503_v18 }
 0x883   : > { %3378 = vst [vmem:[#allocation4 + $0x1] ss:$4 sm:$0xff] %v9503_v18 }
 0x884 PF: > { %v3388_v6 = vrot.slane %v10463_v14, 7  ;;  %v3389_v17 = vrot.slane %v10449_v52, 6  ;;  %v3390_v15 = vrot.slane %v10451_v54, 5  ;;  %v3391_v46 = vrot.slane %v3014_v9, 4 }
 0x885   : > { %v3392_v58 = vrot.slane %v3035_v35, 3  ;;  %v3393_v16 = vrot.slane %v3056_v55, 2  ;;  %v3394_v32 = vrot.slane %v3077_v7, 1  ;;  %vm3395_vm1 = vcmask 1040384  }
 0x886   : > { %v3396_v25 = vsel %vm3395_vm1, %v10461_v44, %v3388_v6  ;;  %vm3397_vm2 = vcmask 1042434   ;;  %vm3399_vm3 = vcmask 1041408   ;;  %vm3401_vm4 = vcmask 1044484  }
 0x887   : > { %v3398_v0 = vsel %vm3397_vm2, %v3389_v17, %v3390_v15  ;;  %v3402_v1 = vsel %vm3401_vm4, %v3391_v46, %v3392_v58  ;;  %vm3403_vm5 = vcmask 1046534   ;;  %vm3405_vm6 = vcmask 1045508  }
 0x888   : > { %v3400_v54 = vsel %vm3399_vm3, %v3396_v25, %v3398_v0  ;;  %v3404_v14 = vsel %vm3403_vm5, %v3393_v16, %v3394_v32  ;;  %v3421_v19 = vrot.slane %v10469_v22, 7  ;;  %v3422_v20 = vrot.slane %v10453_v56, 6 }
 0x889   : > { %v3379_v52 = vld [vmem:[#allocation4] ss:$4 sm:$0xff]  ;;  %v3406_v44 = vsel %vm3405_vm6, %v3402_v1, %v3404_v14  ;;  %v3423_v26 = vrot.slane %v10455_v39, 5  ;;  %v3424_v24 = vrot.slane %v3310_v27, 4  ;;  %v3425_v29 = vrot.slane %v3331_v5, 3 }
 0x88a   : > { %v3407_v30 = vsel %vm1789_vm14, %v3400_v54, %v3406_v44  ;;  %v3426_v47 = vrot.slane %v3352_v61, 2  ;;  %v3427_v37 = vrot.slane %v3373_v62, 1  ;;  %v3428_v2 = vsel %vm3395_vm1, %v10467_v21, %v3421_v19  ;;  %v3412_v45 = vld [vmem:[#allocation4 + $0x1] ss:$4 sm:$0xff] }
 0x88b   : > { %v3409_v23 = vadd.f32 %v3407_v30, %v3379_v52  ;;  %v3429_v12 = vsel %vm3397_vm2, %v3422_v20, %v3423_v26  ;;  %v3431_v22 = vsel %vm3401_vm4, %v3424_v24, %v3425_v29 }
 0x88c   : > { %v3430_v56 = vsel %vm3399_vm3, %v3428_v2, %v3429_v12  ;;  %v3432_v13 = vsel %vm3403_vm5, %v3426_v47, %v3427_v37 }
 0x88d   : > { %3410 = vst [vmem:[#allocation4] ss:$4 sm:$0xff] %v3409_v23  ;;  %v3433_v39 = vsel %vm3405_vm6, %v3431_v22, %v3432_v13  ;;  %3439 = sbr.rel (%p9914_p9) target bundleno = 2232 (0x8b8), region = 240 }
 0x88e   : > { %v3434_v40 = vsel %vm1789_vm14, %v3430_v56, %v3433_v39 }
 0x88f   : > { %v3436_v34 = vadd.f32 %v3434_v40, %v3412_v45 }
 0x891   : > { %3437 = vst [vmem:[#allocation4 + $0x1] ss:$4 sm:$0xff] %v3436_v34 }
 0x892   : > { %v3446_v49 = vld [vmem:[#allocation23] sm:$0xff]  ;;  %v3461_v59 = vld [vmem:[#allocation24] sm:$0xff] }
 0x894   : > { %v3440_v21 = vld [vmem:[#allocation4] ss:$4 sm:$0xff] }
 0x895   : > { %v3441_v4 = vmul.f32 0.0009765625, %v3440_v21 }
 0x897   : > { %v3444_v33 = vmul.f32 %v3441_v4, %v3441_v4 }
 0x898   : > { %v3442_v43 = vld [vmem:[#allocation4 + $0x1] ss:$4 sm:$0xff] }
 0x899   : > { %v3443_v41 = vmul.f32 0.0009765625, %v3442_v43 }
 0x89b   : > { %v3445_v50 = vsub.f32 %v3443_v41, %v3444_v33 }
 0x89d   : > { %v3447_v36 = vadd.f32 1e-05, %v3445_v50 }
 0x89f   : > { %8621 = vrsqrt.f32 %v3447_v36  ;;  %vm3454_vm7 = vweird.f32 %v3447_v36 }
 0x8a5   : > { %v8622_v3 = vpop.eup %8621 }
 0x8a6   : > { %v3449_v51 = vmul.f32 %v8622_v3, %v3447_v36  ;;  %vm3455_vm8 = vweird.f32 %v8622_v3 }
 0x8a7   : > { %vm3456_vm9 = vmor %vm3454_vm7, %vm3455_vm8 }
 0x8a8   : > { %v3450_v38 = vmul.f32 %v8622_v3, %v3449_v51 }
 0x8aa   : > { %v3451_v53 = vmul.f32 0.5, %v3450_v38 }
 0x8ac   : > { %v3452_v55 = vsub.f32 1.5, %v3451_v53 }
 0x8ae   : > { %v3453_v7 = vmul.f32 %v8622_v3, %v3452_v55 }
 0x8b0   : > { %v3457_v57 = vsel %vm3456_vm9, %v8622_v3, %v3453_v7 }
 0x8b1   : > { %v3458_v8 = vmul.f32 %v3457_v57, %v3446_v49 }
 0x8b3   : > { %3460 = vst [vmem:[#allocation4 + $0x2] ss:$4 sm:$0xff] %v3458_v8  ;;  %v3462_v28 = vmul.f32 %v3458_v8, %v3441_v4 }
 0x8b5   : > { %v3463_v42 = vsub.f32 %v3461_v59, %v3462_v28 }
 0x8b7   : > { %3465 = vst [vmem:[#allocation4 + $0x3] ss:$4 sm:$0xff] %v3463_v42 }
 0x8b8 PF: > { %s11763_s9 = sld [smem:[#allocation60_spill]] }
 0x8be   : > { %p7825_p12 = scmp.ne.s32.totalorder %s11763_s9, 3 }
 0x8c0   : > { %3469 = sbr.rel (%p7825_p12) target bundleno = 4022 (0xfb6), region = 244 }
 0x8c5   : > { %3471 = sbr.rel (%p9910_p8) target bundleno = 2255 (0x8cf), region = 248 }
 0x8ca   : > { %v9504_v61 = vmov 0.0  }
 0x8cb   : > { %3472 = vst [vmem:[#allocation5 + $0x10] sm:$0xff] %v9504_v61 }
 0x8cc   : > { %3473 = vst [vmem:[#allocation5] sm:$0xff] %v9504_v61 }
 0x8cd   : > { %3474 = vst [vmem:[#allocation5 + $0x18] sm:$0xff] %v9504_v61 }
 0x8ce   : > { %3475 = vst [vmem:[#allocation5 + $0x8] sm:$0xff] %v9504_v61 }
 0x8cf PF: > { %v3484_v62 = vld [vmem:[%s9856_s27] sm:$0xf]  ;;  %vm3510_vm10 = vcmask 1043456   ;;  %s11764_s10 = sld [smem:[#allocation66_spill]]  ;;  %vm3485_vm11 = vcmask 31744   ;;  %v8192_v25 = vld [vmem:[#allocation14 + $0x8] sm:$0xff] }
 0x8d0   : > { %7826 = vmatpush.msk.msra.mxu0 %vm3510_vm10, %v3484_v62  ;;  %v8194_v16 = vld [vmem:[#allocation14 + $0x18] sm:$0xff]  ;;  %v8193_v32 = vld [vmem:[#allocation14 + $0x10] sm:$0xff]  ;;  %v8191_v0 = vld [vmem:[#allocation14] sm:$0xff]  ;;  %vm3703_vm12 = vcmask 523264   ;;  %s11765_s8 = sld [smem:[#allocation59_spill]] }
 0x8d1   : > { %3732 = vmatpush.bf16.msra.mxu1 %v8194_v16  ;;  %8278 = vmatpush.bf16.msra.mxu2 %v8194_v16  ;;  %v10616_v1 = vld [vmem:[#allocation9] ss:$0 sm:$0xff]  ;;  %v10618_v54 = vld [vmem:[#allocation2 + $0x2] ss:$0 sm:$0xff]  ;;  %v10621_v19 = vld [vmem:[#allocation2 + $0x3] ss:$0 sm:$0xff] }
 0x8d2   : > { %8279 = vmatpush.bf16.msra.mxu3 %v8194_v16 }
 0x8d5   : > { %v3476_v60 = vld [vmem:[%s11764_s10] sm:$0xff]  ;;  %v3477_v63 = vld [vmem:[%s11764_s10 + $0x8] sm:$0xff]  ;;  %v3478_v10 = vld [vmem:[%s11764_s10 + $0x10] sm:$0xff]  ;;  %3733 = vmatpush.bf16.msra.mxu1 %v8193_v32  ;;  %8280 = vmatpush.bf16.msra.mxu2 %v8193_v32 }
 0x8d6   : > { %7827 = vmatmul.msk.f32.vlgmr.msra.gmra.mxu0 %vm3485_vm11, %v3476_v60  ;;  %v3479_v31 = vld [vmem:[%s11764_s10 + $0x18] sm:$0xff]  ;;  %v3480_v9 = vld [vmem:[%s11764_s10 + $0x20] sm:$0xff]  ;;  %v3481_v11 = vld [vmem:[%s11764_s10 + $0x28] sm:$0xff]  ;;  %8281 = vmatpush.bf16.msra.mxu3 %v8193_v32 }
 0x8d7   : > { %v3482_v35 = vld [vmem:[%s11764_s10 + $0x30] sm:$0xff]  ;;  %v3483_v48 = vld [vmem:[%s11764_s10 + $0x38] sm:$0xff]  ;;  %v8093_v32 = vld [vmem:[#allocation20 + $0x1c8] sm:$0xf]  ;;  %s11768_s10 = sld [smem:[#allocation80_spill]] (!%p9914_p9) }
 0x8d9   : > { %3734 = vmatpush.bf16.msra.mxu1 %v8192_v25  ;;  %8282 = vmatpush.bf16.msra.mxu2 %v8192_v25 }
 0x8da   : > { %8283 = vmatpush.bf16.msra.mxu3 %v8192_v25  ;;  %v8256_v25 = vld [vmem:[#allocation20 + $0x1e4] sm:$0xf0] }
 0x8dd   : > { %3735 = vmatpush.bf16.msra.mxu1 %v8191_v0  ;;  %8284 = vmatpush.bf16.msra.mxu2 %v8191_v0 }
 0x8de   : > { %7828 = vmatmul.msk.f32.gmra.mxu0 %vm3485_vm11, %v3477_v63  ;;  %8285 = vmatpush.bf16.msra.mxu3 %v8191_v0 }
 0x8e6   : > { %7829 = vmatmul.msk.f32.gmra.mxu0 %vm3485_vm11, %v3478_v10 }
 0x8ee   : > { %7830 = vmatmul.msk.f32.gmra.mxu0 %vm3485_vm11, %v3479_v31 }
 0x8f6   : > { %7831 = vmatmul.msk.f32.gmra.mxu0 %vm3485_vm11, %v3480_v9 }
 0x8fe   : > { %7832 = vmatmul.msk.f32.gmra.mxu0 %vm3485_vm11, %v3481_v11 }
 0x906   : > { %7833 = vmatmul.msk.f32.gmra.mxu0 %vm3485_vm11, %v3482_v35 }
 0x90e   : > { %7834 = vmatmul.msk.f32.gmra.mxu0 %vm3485_vm11, %v3483_v48 }
 0x953   : > { %v3531_v27 = vpop.f32.mrf.mxu0 }
 0x954   : > { %3555 = vxpose.xlu0.b32.start [1/8] (short) %v3531_v27, 128 }
 0x95b   : > { %v3534_v5 = vpop.f32.mrf.mxu0 }
 0x95c   : > { %3556 = vxpose.xlu0.b32.cont [2/8] (short) %v3534_v5, 128 }
 0x963   : > { %v3537_v18 = vpop.f32.mrf.mxu0 }
 0x964   : > { %3557 = vxpose.xlu0.b32.cont [3/8] (short) %v3537_v18, 128 }
 0x96b   : > { %v3540_v6 = vpop.f32.mrf.mxu0 }
 0x96c   : > { %3558 = vxpose.xlu0.b32.cont [4/8] (short) %v3540_v6, 128 }
 0x973   : > { %v3543_v17 = vpop.f32.mrf.mxu0 }
 0x974   : > { %3559 = vxpose.xlu0.b32.cont [5/8] (short) %v3543_v17, 128 }
 0x97b   : > { %v3546_v15 = vpop.f32.mrf.mxu0 }
 0x97c   : > { %3560 = vxpose.xlu0.b32.cont [6/8] (short) %v3546_v15, 128 }
 0x983   : > { %v3549_v46 = vpop.f32.mrf.mxu0 }
 0x984   : > { %3561 = vxpose.xlu0.b32.cont [7/8] (short) %v3549_v46, 128 }
 0x98b   : > { %v3552_v58 = vpop.f32.mrf.mxu0 }
 0x98c   : > { %3562 = vxpose.xlu0.b32.end [8/8] (short) %v3552_v58, 128 }
 0x9f8   : > { %v3571_v52 = vpop.trf.xlu0 }
 0x9f9   : > { %v3591_v14 = vadd.f32 %v10616_v1, %v3571_v52  ;;  %v8094_v52 = vor.u32 %v8256_v25, %v8093_v32  ;;  %v7999_v25 = vld [vmem:[#allocation20 + $0x128] sm:$0xf0] }
 0x9fb   : > { %v3609_v20 = vmul.f32 %v10618_v54, %v3591_v14  ;;  %4337 = vmatpush.bf16.msrb.mxu0 %v8094_v52 }
 0x9fd   : > { %v3627_v24 = vadd.f32 %v10621_v19, %v3609_v20 }
 0x9ff   : > { %v3643_v47 = vmax.f32 %v3627_v24, 0.0 }
 0xa00   : > { %v3572_v44 = vpop.trf.xlu0 }
 0xa01   : > { %v3592_v26 = vadd.f32 %v10616_v1, %v3572_v44 }
 0xa03   : > { %v3610_v29 = vmul.f32 %v10618_v54, %v3592_v26 }
 0xa05   : > { %v3628_v30 = vadd.f32 %v10621_v19, %v3610_v29 }
 0xa07   : > { %v3644_v37 = vmax.f32 %v3628_v30, 0.0  ;;  %v8251_v30 = vld [vmem:[#allocation20 + $0x1c4] sm:$0xf] }
 0xa08   : > { %v3573_v2 = vpop.trf.xlu0 }
 0xa09   : > { %v3659_v23 = vpack.c.bf16 %v3644_v37, %v3643_v47  ;;  %v3593_v12 = vadd.f32 %v10616_v1, %v3573_v2  ;;  %v8087_v47 = vld [vmem:[#allocation20 + $0x1e0] sm:$0xf0] }
 0xa0a   : > { %v8090_v2 = vor.u32 %v8251_v30, %v8087_v47  ;;  %v7965_v30 = vld [vmem:[#allocation20 + $0xc8] sm:$0xf] }
 0xa0b   : > { %7851 = vmatmul.msk.bf16.vlgmr.msra.gmra.mxu1 %vm3703_vm12, %v3659_v23  ;;  %v3611_v22 = vmul.f32 %v10618_v54, %v3593_v12  ;;  %v8061_v23 = vld [vmem:[#allocation20 + $0x188] sm:$0xf] }
 0xa0c   : > { %v8248_v12 = vld [vmem:[#allocation20 + $0x1a4] sm:$0xf0]  ;;  %4288 = vmatpush.bf16.msrb.mxu3 %v8090_v2 }
 0xa0d   : > { %v3629_v13 = vadd.f32 %v10621_v19, %v3611_v22  ;;  %v8243_v22 = vld [vmem:[#allocation20 + $0x184] sm:$0xf]  ;;  %v8224_v47 = vld [vmem:[#allocation20 + $0xe4] sm:$0xf0] }
 0xa0f   : > { %v3645_v34 = vmax.f32 %v3629_v13, 0.0  ;;  %v8055_v13 = vld [vmem:[#allocation20 + $0x1a0] sm:$0xf0] }
 0xa10   : > { %v3574_v45 = vpop.trf.xlu0 }
 0xa11   : > { %v3594_v56 = vadd.f32 %v10616_v1, %v3574_v45 }
 0xa13   : > { %v3612_v39 = vmul.f32 %v10618_v54, %v3594_v56  ;;  %v8062_v56 = vor.u32 %v8248_v12, %v8061_v23  ;;  %v7966_v23 = vor.u32 %v8224_v47, %v7965_v30  ;;  %v8223_v12 = vld [vmem:[#allocation20 + $0xdc] sm:$0xf0]  ;;  %v10681_v47 = vld [vmem:[#allocation3 + $0x2] ss:$0 sm:$0xff] }
 0xa15   : > { %v3630_v40 = vadd.f32 %v10621_v19, %v3612_v39  ;;  %v8252_v39 = vld [vmem:[#allocation20 + $0x1cc] sm:$0xf]  ;;  %4338 = vmatpush.bf16.msrb.mxu0 %v8062_v56 }
 0xa16   : > { %v7967_v56 = vld [vmem:[#allocation20 + $0xe8] sm:$0xf0] }
 0xa17   : > { %v3646_v21 = vmax.f32 %v3630_v40, 0.0  ;;  %v8095_v40 = vld [vmem:[#allocation20 + $0x1e8] sm:$0xf0] }
 0xa18   : > { %v3575_v43 = vpop.trf.xlu0 }
 0xa19   : > { %v3660_v4 = vpack.c.bf16 %v3646_v21, %v3645_v34  ;;  %v3595_v41 = vadd.f32 %v10616_v1, %v3575_v43  ;;  %v8058_v34 = vor.u32 %v8243_v22, %v8055_v13  ;;  %v8098_v21 = vor.u32 %v8252_v39, %v8095_v40  ;;  %v8029_v43 = vld [vmem:[#allocation20 + $0x148] sm:$0xf]  ;;  %v8220_v22 = vld [vmem:[#allocation20 + $0xcc] sm:$0xf]  ;;  %v8211_v39 = vld [vmem:[#allocation20 + $0x84] sm:$0xf] }
 0xa1a   : > { %v7970_v13 = vor.u32 %v8220_v22, %v7967_v56  ;;  %v7927_v40 = vld [vmem:[#allocation20 + $0xa0] sm:$0xf0]  ;;  %v8109_v22 = vld [vmem:[#allocation20 + $0x1d8] sm:$0xf] }
 0xa1b   : > { %7852 = vmatmul.msk.bf16.gmra.mxu1 %vm3703_vm12, %v3660_v4  ;;  %v3613_v33 = vmul.f32 %v10618_v54, %v3595_v41  ;;  %v8240_v4 = vld [vmem:[#allocation20 + $0x164] sm:$0xf0]  ;;  %v8085_v41 = vld [vmem:[#allocation20 + $0x1c0] sm:$0xf]  ;;  %4289 = vmatpush.bf16.msrb.mxu3 %v8058_v34 }
 0xa1c   : > { %4386 = vmatpush.bf16.msrb.mxu1 %v8098_v21  ;;  %v7925_v34 = vld [vmem:[#allocation20 + $0x80] sm:$0xf]  ;;  %v7930_v21 = vor.u32 %v8211_v39, %v7927_v40 }
 0xa1d   : > { %v3631_v3 = vadd.f32 %v10621_v19, %v3613_v33 }
 0xa1f   : > { %v3647_v53 = vmax.f32 %v3631_v3, 0.0  ;;  %v8235_v3 = vld [vmem:[#allocation20 + $0x144] sm:$0xf] }
 0xa20   : > { %v3576_v50 = vpop.trf.xlu0 }
 0xa21   : > { %v3596_v36 = vadd.f32 %v10616_v1, %v3576_v50  ;;  %v8030_v50 = vor.u32 %v8240_v4, %v8029_v43  ;;  %v8215_v43 = vld [vmem:[#allocation20 + $0x9c] sm:$0xf0]  ;;  %v7933_v4 = vld [vmem:[#allocation20 + $0x88] sm:$0xf] }
 0xa23   : > { %v3614_v51 = vmul.f32 %v10618_v54, %v3596_v36  ;;  %v8255_v36 = vld [vmem:[#allocation20 + $0x1dc] sm:$0xf0]  ;;  %4339 = vmatpush.bf16.msrb.mxu0 %v8030_v50  ;;  %v7926_v50 = vor.u32 %v8215_v43, %v7925_v34 }
 0xa25   : > { %v3632_v38 = vadd.f32 %v10621_v19, %v3614_v51  ;;  %v8023_v51 = vld [vmem:[#allocation20 + $0x160] sm:$0xf0] }
 0xa27   : > { %v3648_v55 = vmax.f32 %v3632_v38, 0.0  ;;  %v8086_v38 = vor.u32 %v8255_v36, %v8085_v41  ;;  %v8216_v41 = vld [vmem:[#allocation20 + $0xa4] sm:$0xf0] }
 0xa28   : > { %v3577_v49 = vpop.trf.xlu0  ;;  %v7934_v36 = vor.u32 %v8216_v41, %v7933_v4 }
 0xa29   : > { %v3661_v7 = vpack.c.bf16 %v3648_v55, %v3647_v53  ;;  %v3597_v57 = vadd.f32 %v10616_v1, %v3577_v49  ;;  %v8244_v53 = vld [vmem:[#allocation20 + $0x18c] sm:$0xf]  ;;  %v8053_v49 = vld [vmem:[#allocation20 + $0x180] sm:$0xf]  ;;  %4239 = vmatpush.bf16.msrb.mxu2 %v8086_v38 }
 0xa2a   : > { %v8063_v55 = vld [vmem:[#allocation20 + $0x1a8] sm:$0xf0] }
 0xa2b   : > { %7853 = vmatmul.msk.bf16.gmra.mxu1 %vm3703_vm12, %v3661_v7  ;;  %v3615_v8 = vmul.f32 %v10618_v54, %v3597_v57  ;;  %v8066_v7 = vor.u32 %v8244_v53, %v8063_v55  ;;  %v8247_v57 = vld [vmem:[#allocation20 + $0x19c] sm:$0xf0] }
 0xa2d   : > { %v3633_v42 = vadd.f32 %v10621_v19, %v3615_v8  ;;  %v7997_v8 = vld [vmem:[#allocation20 + $0x108] sm:$0xf]  ;;  %4387 = vmatpush.bf16.msrb.mxu1 %v8066_v7  ;;  %v8207_v7 = vld [vmem:[#allocation20 + $0x5c] sm:$0xf0] }
 0xa2f   : > { %v3649_v60 = vmax.f32 %v3633_v42, 0.0  ;;  %v8054_v42 = vor.u32 %v8247_v57, %v8053_v49  ;;  %v7893_v49 = vld [vmem:[#allocation20 + $0x40] sm:$0xf]  ;;  %v8203_v57 = vld [vmem:[#allocation20 + $0x44] sm:$0xf] }
 0xa30   : > { %v3578_v59 = vpop.trf.xlu0 }
 0xa31   : > { %v3598_v28 = vadd.f32 %v10616_v1, %v3578_v59  ;;  %v8232_v59 = vld [vmem:[#allocation20 + $0x124] sm:$0xf0]  ;;  %4240 = vmatpush.bf16.msrb.mxu2 %v8054_v42 }
 0xa32   : > { %v8208_v42 = vld [vmem:[#allocation20 + $0x64] sm:$0xf0] }
 0xa33   : > { %v3616_v61 = vmul.f32 %v10618_v54, %v3598_v28  ;;  %v8026_v28 = vor.u32 %v8235_v3, %v8023_v51  ;;  %v8212_v3 = vld [vmem:[#allocation20 + $0x8c] sm:$0xf] }
 0xa34   : > { %v7935_v51 = vld [vmem:[#allocation20 + $0xa8] sm:$0xf0] }
 0xa35   : > { %v3634_v62 = vadd.f32 %v10621_v19, %v3616_v61  ;;  %v8227_v61 = vld [vmem:[#allocation20 + $0x104] sm:$0xf]  ;;  %4290 = vmatpush.bf16.msrb.mxu3 %v8026_v28  ;;  %v7938_v53 = vor.u32 %v8212_v3, %v7935_v51  ;;  %v7901_v28 = vld [vmem:[#allocation20 + $0x48] sm:$0xf]  ;;  %v8069_v3 = vld [vmem:[#allocation20 + $0x190] sm:$0xf] }
 0xa37   : > { %v3650_v63 = vmax.f32 %v3634_v62, 0.0  ;;  %v8236_v62 = vld [vmem:[#allocation20 + $0x14c] sm:$0xf] }
 0xa38   : > { %v3579_v10 = vpop.trf.xlu0 }
 0xa39   : > { %v3662_v31 = vpack.c.bf16 %v3650_v63, %v3649_v60  ;;  %v3599_v9 = vadd.f32 %v10616_v1, %v3579_v10  ;;  %v7998_v63 = vor.u32 %v8232_v59, %v7997_v8  ;;  %v7991_v10 = vld [vmem:[#allocation20 + $0x120] sm:$0xf0]  ;;  %v7894_v8 = vor.u32 %v8207_v7, %v7893_v49 }
 0xa3a   : > { %v7895_v59 = vld [vmem:[#allocation20 + $0x60] sm:$0xf0] }
 0xa3b   : > { %7854 = vmatmul.msk.bf16.vlgmr.msra.gmra.mxu2 %vm3703_vm12, %v3662_v31  ;;  %v3617_v11 = vmul.f32 %v10618_v54, %v3599_v9  ;;  %v8031_v31 = vld [vmem:[#allocation20 + $0x168] sm:$0xf0]  ;;  %v8021_v9 = vld [vmem:[#allocation20 + $0x140] sm:$0xf]  ;;  %4340 = vmatpush.bf16.msrb.mxu0 %v7998_v63  ;;  %v7902_v63 = vor.u32 %v8208_v42, %v7901_v28 }
 0xa3d   : > { %v3635_v27 = vadd.f32 %v10621_v19, %v3617_v11 }
 0xa3f   : > { %v3651_v6 = vmax.f32 %v3635_v27, 0.0  ;;  %4341 = vmatpush.bf16.msrb.mxu0 %v7966_v23 }
 0xa40   : > { %v3580_v35 = vpop.trf.xlu0 }
 0xa41   : > { %v3600_v48 = vadd.f32 %v10616_v1, %v3580_v35  ;;  %v8034_v35 = vor.u32 %v8236_v62, %v8031_v31  ;;  %v7903_v31 = vld [vmem:[#allocation20 + $0x68] sm:$0xf0] }
 0xa43   : > { %v3618_v5 = vmul.f32 %v10618_v54, %v3600_v48  ;;  %v8239_v48 = vld [vmem:[#allocation20 + $0x15c] sm:$0xf0]  ;;  %4388 = vmatpush.bf16.msrb.mxu1 %v8034_v35  ;;  %4342 = vmatpush.bf16.msrb.mxu0 %v7934_v36  ;;  %v8071_v36 = vld [vmem:[#allocation20 + $0x1b0] sm:$0xf0] }
 0xa44   : > { %v8199_v35 = vld [vmem:[#allocation20 + $0x1c] sm:$0xf0] }
 0xa45   : > { %v3636_v18 = vadd.f32 %v10621_v19, %v3618_v5  ;;  %v7994_v5 = vor.u32 %v8227_v61, %v7991_v10  ;;  %v8204_v10 = vld [vmem:[#allocation20 + $0x4c] sm:$0xf] }
 0xa47   : > { %v3652_v17 = vmax.f32 %v3636_v18, 0.0  ;;  %v8022_v18 = vor.u32 %v8239_v48, %v8021_v9  ;;  %4291 = vmatpush.bf16.msrb.mxu3 %v7994_v5  ;;  %v7906_v9 = vor.u32 %v8204_v10, %v7903_v31  ;;  %4343 = vmatpush.bf16.msrb.mxu0 %v7902_v63  ;;  %v8195_v48 = vld [vmem:[#allocation20 + $0x4] sm:$0xf]  ;;  %v8237_v31 = vld [vmem:[#allocation20 + $0x154] sm:$0xf] }
 0xa48   : > { %v3581_v15 = vpop.trf.xlu0  ;;  %v7863_v5 = vld [vmem:[#allocation20 + $0x20] sm:$0xf0] }
 0xa49   : > { %v3663_v46 = vpack.c.bf16 %v3652_v17, %v3651_v6  ;;  %v3601_v58 = vadd.f32 %v10616_v1, %v3581_v15  ;;  %4241 = vmatpush.bf16.msrb.mxu2 %v8022_v18  ;;  %v7869_v18 = vld [vmem:[#allocation20 + $0x8] sm:$0xf] }
 0xa4b   : > { %7855 = vmatmul.msk.bf16.gmra.mxu2 %vm3703_vm12, %v3663_v46  ;;  %v3619_v16 = vmul.f32 %v10618_v54, %v3601_v58  ;;  %v7989_v46 = vld [vmem:[#allocation20 + $0x100] sm:$0xf] }
 0xa4c   : > { %v8231_v58 = vld [vmem:[#allocation20 + $0x11c] sm:$0xf0] }
 0xa4d   : > { %v3637_v20 = vadd.f32 %v10621_v19, %v3619_v16  ;;  %v8228_v16 = vld [vmem:[#allocation20 + $0x10c] sm:$0xf]  ;;  %v7990_v32 = vor.u32 %v8231_v58, %v7989_v46 }
 0xa4e   : > { %v8196_v58 = vld [vmem:[#allocation20 + $0xc] sm:$0xf] }
 0xa4f   : > { %v3653_v24 = vmax.f32 %v3637_v20, 0.0  ;;  %4242 = vmatpush.bf16.msrb.mxu2 %v7990_v32 }
 0xa50   : > { %v3582_v0 = vpop.trf.xlu0 }
 0xa51   : > { %v3602_v14 = vadd.f32 %v10616_v1, %v3582_v0 }
 0xa53   : > { %v3620_v44 = vmul.f32 %v10618_v54, %v3602_v14  ;;  %v8002_v14 = vor.u32 %v8228_v16, %v7999_v25  ;;  %v7871_v16 = vld [vmem:[#allocation20 + $0x28] sm:$0xf0] }
 0xa54   : > { %v7874_v32 = vor.u32 %v8196_v58, %v7871_v16 }
 0xa55   : > { %v3638_v26 = vadd.f32 %v10621_v19, %v3620_v44  ;;  %4389 = vmatpush.bf16.msrb.mxu1 %v8002_v14  ;;  %v8103_v14 = vld [vmem:[#allocation20 + $0x1f0] sm:$0xf0] }
 0xa57   : > { %v3654_v29 = vmax.f32 %v3638_v26, 0.0  ;;  %v8219_v26 = vld [vmem:[#allocation20 + $0xc4] sm:$0xf] }
 0xa58   : > { %v3583_v37 = vpop.trf.xlu0 }
 0xa59   : > { %v3664_v45 = vpack.c.bf16 %v3654_v29, %v3653_v24  ;;  %v3603_v33 = vadd.f32 %v10616_v1, %v3583_v37  ;;  %v7959_v24 = vld [vmem:[#allocation20 + $0xe0] sm:$0xf0]  ;;  %v7957_v37 = vld [vmem:[#allocation20 + $0xc0] sm:$0xf]  ;;  %4390 = vmatpush.bf16.msrb.mxu1 %v7970_v13 }
 0xa5a   : > { %v7962_v29 = vor.u32 %v8219_v26, %v7959_v24  ;;  %v8257_v26 = vld [vmem:[#allocation20 + $0x1ec] sm:$0xf0]  ;;  %v8254_v24 = vld [vmem:[#allocation20 + $0x1dc] sm:$0xf] }
 0xa5b   : > { %7856 = vmatmul.msk.bf16.vlgmr.msra.gmra.mxu3 %vm3703_vm12, %v3664_v45  ;;  %v3621_v60 = vmul.f32 %v10618_v54, %v3603_v33  ;;  %v7958_v45 = vor.u32 %v8223_v12, %v7957_v37  ;;  %v10684_v12 = vld [vmem:[#allocation3 + $0x3] ss:$0 sm:$0xff] }
 0xa5c   : > { %4292 = vmatpush.bf16.msrb.mxu3 %v7962_v29  ;;  %v8111_v29 = vld [vmem:[#allocation20 + $0x1f8] sm:$0xf0] }
 0xa5d   : > { %v3639_v6 = vadd.f32 %v10621_v19, %v3621_v60  ;;  %4243 = vmatpush.bf16.msrb.mxu2 %v7958_v45  ;;  %4391 = vmatpush.bf16.msrb.mxu1 %v7938_v53  ;;  %v7898_v60 = vor.u32 %v8203_v57, %v7895_v59  ;;  %v8258_v45 = vld [vmem:[#allocation20 + $0x1f4] sm:$0xf0]  ;;  %v8246_v53 = vld [vmem:[#allocation20 + $0x19c] sm:$0xf] }
 0xa5e   : > { %v8110_v13 = vor.u32 %v8258_v45, %v8109_v22  ;;  %v8250_v59 = vld [vmem:[#allocation20 + $0x1b4] sm:$0xf0] }
 0xa5f   : > { %v3655_v0 = vmax.f32 %v3639_v6, 0.0  ;;  %v8200_v6 = vld [vmem:[#allocation20 + $0x24] sm:$0xf0] }
 0xa60   : > { %v3584_v11 = vpop.trf.xlu0  ;;  %4293 = vmatpush.bf16.msrb.mxu3 %v7930_v21  ;;  %v7870_v46 = vor.u32 %v8200_v6, %v7869_v18 }
 0xa61   : > { %v3604_v27 = vadd.f32 %v10616_v1, %v3584_v11  ;;  %4244 = vmatpush.bf16.msrb.mxu2 %v7926_v50  ;;  %v7861_v11 = vld [vmem:[#allocation20] sm:$0xf]  ;;  %4392 = vmatpush.bf16.msrb.mxu1 %v7906_v9  ;;  %v8245_v50 = vld [vmem:[#allocation20 + $0x194] sm:$0xf] }
 0xa62   : > { %4344 = vmatpush.bf16.msrb.mxu0 %v7870_v46  ;;  %v8074_v51 = vor.u32 %v8245_v50, %v8071_v36  ;;  %v8039_v9 = vld [vmem:[#allocation20 + $0x170] sm:$0xf0]  ;;  %v8047_v46 = vld [vmem:[#allocation20 + $0x178] sm:$0xf0] }
 0xa63   : > { %v3622_v17 = vmul.f32 %v10618_v54, %v3604_v27  ;;  %v7862_v27 = vor.u32 %v8199_v35, %v7861_v11  ;;  %v8042_v11 = vor.u32 %v8237_v31, %v8039_v9  ;;  %v8241_v35 = vld [vmem:[#allocation20 + $0x16c] sm:$0xf0]  ;;  %v8221_v50 = vld [vmem:[#allocation20 + $0xd4] sm:$0xf]  ;;  %v8226_v31 = vld [vmem:[#allocation20 + $0xf4] sm:$0xf0] }
 0xa64   : > { %4294 = vmatpush.bf16.msrb.mxu3 %v7898_v60  ;;  %v7975_v36 = vld [vmem:[#allocation20 + $0xf0] sm:$0xf0] }
 0xa65   : > { %v3640_v15 = vadd.f32 %v10621_v19, %v3622_v17  ;;  %4245 = vmatpush.bf16.msrb.mxu2 %v7894_v8  ;;  %4393 = vmatpush.bf16.msrb.mxu1 %v7874_v32  ;;  %v8077_v8 = vld [vmem:[#allocation20 + $0x198] sm:$0xf] }
 0xa66   : > { %4533 = vmatpush.bf16.msra.mxu0 %v8110_v13  ;;  %v8078_v28 = vor.u32 %v8250_v59, %v8077_v8  ;;  %v8045_v32 = vld [vmem:[#allocation20 + $0x158] sm:$0xf]  ;;  %v8230_v13 = vld [vmem:[#allocation20 + $0x11c] sm:$0xf] }
 0xa67   : > { %v3656_v52 = vmax.f32 %v3640_v15, 0.0  ;;  %v7866_v15 = vor.u32 %v8195_v48, %v7863_v5 }
 0xa68   : > { %v3585_v20 = vpop.trf.xlu0 }
 0xa69   : > { %v3665_v44 = vpack.c.bf16 %v3656_v52, %v3655_v0  ;;  %v3605_v2 = vadd.f32 %v10616_v1, %v3585_v20  ;;  %4295 = vmatpush.bf16.msrb.mxu3 %v7866_v15  ;;  %4246 = vmatpush.bf16.msrb.mxu2 %v7862_v27  ;;  %v8253_v52 = vld [vmem:[#allocation20 + $0x1d4] sm:$0xf]  ;;  %v8101_v20 = vld [vmem:[#allocation20 + $0x1d0] sm:$0xf]  ;;  %v8238_v15 = vld [vmem:[#allocation20 + $0x15c] sm:$0xf] }
 0xa6a   : > { %v8102_v37 = vor.u32 %v8257_v26, %v8101_v20  ;;  %4534 = vmatpush.bf16.msra.mxu0 %v8078_v28  ;;  %v8050_v16 = vor.u32 %v8238_v15, %v8047_v46  ;;  %v8229_v26 = vld [vmem:[#allocation20 + $0x114] sm:$0xf] }
 0xa6b   : > { %7857 = vmatmul.msk.bf16.gmra.mxu3 %vm3703_vm12, %v3665_v44  ;;  %v3623_v33 = vmul.f32 %v10618_v54, %v3605_v2  ;;  %v8106_v44 = vor.u32 %v8253_v52, %v8103_v14  ;;  %v8114_v2 = vor.u32 %v8254_v24, %v8111_v29  ;;  %v8007_v24 = vld [vmem:[#allocation20 + $0x130] sm:$0xf0]  ;;  %v8005_v29 = vld [vmem:[#allocation20 + $0x110] sm:$0xf] }
 0xa6d   : > { %v3641_v61 = vadd.f32 %v10621_v19, %v3623_v33  ;;  %4484 = vmatpush.bf16.msra.mxu3 %v8106_v44  ;;  %4435 = vmatpush.bf16.msra.mxu2 %v8102_v37  ;;  %v8233_v37 = vld [vmem:[#allocation20 + $0x12c] sm:$0xf0] }
 0xa6e   : > { %4582 = vmatpush.bf16.msra.mxu1 %v8114_v2  ;;  %v8006_v22 = vor.u32 %v8233_v37, %v8005_v29 }
 0xa6f   : > { %v3657_v17 = vmax.f32 %v3641_v61, 0.0 }
 0xa70   : > { %v3586_v38 = vpop.trf.xlu0 }
 0xa71   : > { %v3606_v55 = vadd.f32 %v10616_v1, %v3586_v38  ;;  %v8249_v38 = vld [vmem:[#allocation20 + $0x1ac] sm:$0xf0]  ;;  %4485 = vmatpush.bf16.msra.mxu3 %v8074_v51  ;;  %v7978_v51 = vor.u32 %v8221_v50, %v7975_v36 }
 0xa72   : > { %v8070_v7 = vor.u32 %v8249_v38, %v8069_v3  ;;  %v7973_v38 = vld [vmem:[#allocation20 + $0xd0] sm:$0xf] }
 0xa73   : > { %v3624_v62 = vmul.f32 %v10618_v54, %v3606_v55  ;;  %v8079_v55 = vld [vmem:[#allocation20 + $0x1b8] sm:$0xf0] }
 0xa74   : > { %v8082_v57 = vor.u32 %v8246_v53, %v8079_v55  ;;  %4436 = vmatpush.bf16.msra.mxu2 %v8070_v7  ;;  %v8225_v53 = vld [vmem:[#allocation20 + $0xec] sm:$0xf0] }
 0xa75   : > { %v3642_v1 = vadd.f32 %v10621_v19, %v3624_v62  ;;  %v10678_v19 = vld [vmem:[#allocation15] ss:$0 sm:$0xff]  ;;  %4486 = vmatpush.bf16.msra.mxu3 %v8042_v11 }
 0xa76   : > { %4583 = vmatpush.bf16.msra.mxu1 %v8082_v57 }
 0xa77   : > { %v3658_v54 = vmax.f32 %v3642_v1, 0.0  ;;  %v8037_v1 = vld [vmem:[#allocation20 + $0x150] sm:$0xf] }
 0xa78   : > { %v8038_v5 = vor.u32 %v8241_v35, %v8037_v1  ;;  %v8213_v35 = vld [vmem:[#allocation20 + $0x94] sm:$0xf] }
 0xa79   : > { %v3666_v25 = vpack.c.bf16 %v3658_v54, %v3657_v17 }
 0xa7a   : > { %4437 = vmatpush.bf16.msra.mxu2 %v8038_v5  ;;  %4584 = vmatpush.bf16.msra.mxu1 %v8050_v16 }
 0xa7b   : > { %7858 = vmatmul.msk.bf16.gmra.mxu3 %vm3703_vm12, %v3666_v25  ;;  %v8242_v25 = vld [vmem:[#allocation20 + $0x174] sm:$0xf0] }
 0xa7c   : > { %v8046_v52 = vor.u32 %v8242_v25, %v8045_v32 }
 0xa7e   : > { %4535 = vmatpush.bf16.msra.mxu0 %v8046_v52  ;;  %4438 = vmatpush.bf16.msra.mxu2 %v8006_v22 }
 0xa88   : > { %v3737_v0 = vpop.f32.mrf.mxu1 }
 0xa89   : > { %v3738_v30 = vadd.f32 %v10678_v19, %v3737_v0 }
 0xa8b   : > { %v3779_v23 = vmul.f32 %v10681_v47, %v3738_v30  ;;  %v8010_v30 = vor.u32 %v8229_v26, %v8007_v24  ;;  %v8218_v24 = vld [vmem:[#allocation20 + $0xb4] sm:$0xf0] }
 0xa8d   : > { %v3797_v40 = vadd.f32 %v10684_v12, %v3779_v23  ;;  %4487 = vmatpush.bf16.msra.mxu3 %v8010_v30 }
 0xa8f   : > { %v3813_v43 = vmax.f32 %v3797_v40, 0.0  ;;  %v8013_v40 = vld [vmem:[#allocation20 + $0x118] sm:$0xf] }
 0xa90   : > { %v3739_v56 = vpop.f32.mrf.mxu1 }
 0xa91   : > { %v3740_v39 = vadd.f32 %v10678_v19, %v3739_v56  ;;  %4488 = vmatpush.bf16.msra.mxu3 %v7978_v51  ;;  %v8206_v51 = vld [vmem:[#allocation20 + $0x5c] sm:$0xf] }
 0xa93   : > { %v3780_v34 = vmul.f32 %v10681_v47, %v3740_v39  ;;  %v8015_v39 = vld [vmem:[#allocation20 + $0x138] sm:$0xf0] }
 0xa95   : > { %v3798_v21 = vadd.f32 %v10684_v12, %v3780_v34  ;;  %v8018_v34 = vor.u32 %v8230_v13, %v8015_v39  ;;  %v7909_v13 = vld [vmem:[#allocation20 + $0x50] sm:$0xf] }
 0xa96   : > { %v8209_v39 = vld [vmem:[#allocation20 + $0x6c] sm:$0xf0] }
 0xa97   : > { %v3814_v4 = vmax.f32 %v3798_v21, 0.0  ;;  %v8234_v21 = vld [vmem:[#allocation20 + $0x134] sm:$0xf0]  ;;  %4585 = vmatpush.bf16.msra.mxu1 %v8018_v34  ;;  %v7910_v34 = vor.u32 %v8209_v39, %v7909_v13 }
 0xa98   : > { %v3742_v41 = vpop.f32.mrf.mxu1 }
 0xa99   : > { %v10690_v33 = vpack.c.bf16 %v3814_v4, %v3813_v43  ;;  %v3743_v49 = vadd.f32 %v10678_v19, %v3742_v41  ;;  %v8014_v4 = vor.u32 %v8234_v21, %v8013_v40 }
 0xa9b   : > { %4247 = vmatmul.bf16.vlgmr.msrb.gmra.mxu2 %v10690_v33  ;;  %4296 = vmatmul.bf16.vlgmr.msrb.gmra.mxu3 %v10690_v33  ;;  %v3781_v42 = vmul.f32 %v10681_v47, %v3743_v49  ;;  %v7974_v49 = vor.u32 %v8225_v53, %v7973_v38  ;;  %v7919_v38 = vld [vmem:[#allocation20 + $0x78] sm:$0xf0]  ;;  %v7917_v53 = vld [vmem:[#allocation20 + $0x58] sm:$0xf] }
 0xa9c   : > { %4345 = vmatmul.bf16.vlgmr.msrb.gmra.mxu0 %v10690_v33  ;;  %4394 = vmatmul.bf16.vlgmr.msrb.gmra.mxu1 %v10690_v33 }
 0xa9d   : > { %v3799_v60 = vadd.f32 %v10684_v12, %v3781_v42  ;;  %4536 = vmatpush.bf16.msra.mxu0 %v8014_v4  ;;  %4439 = vmatpush.bf16.msra.mxu2 %v7974_v49  ;;  %v8210_v49 = vld [vmem:[#allocation20 + $0x74] sm:$0xf0] }
 0xa9f   : > { %v3815_v48 = vmax.f32 %v3799_v60, 0.0  ;;  %v7983_v60 = vld [vmem:[#allocation20 + $0xf8] sm:$0xf0] }
 0xaa0   : > { %v3744_v61 = vpop.f32.mrf.mxu1 }
 0xaa1   : > { %v3745_v62 = vadd.f32 %v10678_v19, %v3744_v61 }
 0xaa3   : > { %v3782_v63 = vmul.f32 %v10681_v47, %v3745_v62  ;;  %v8222_v62 = vld [vmem:[#allocation20 + $0xdc] sm:$0xf] }
 0xaa5   : > { %v3800_v10 = vadd.f32 %v10684_v12, %v3782_v63  ;;  %v7981_v63 = vld [vmem:[#allocation20 + $0xd8] sm:$0xf] }
 0xaa6   : > { %v7982_v1 = vor.u32 %v8226_v31, %v7981_v63  ;;  %v7887_v63 = vld [vmem:[#allocation20 + $0x38] sm:$0xf0] }
 0xaa7   : > { %v3816_v27 = vmax.f32 %v3800_v10, 0.0  ;;  %v7986_v10 = vor.u32 %v8222_v62, %v7983_v60  ;;  %v8201_v62 = vld [vmem:[#allocation20 + $0x2c] sm:$0xf0]  ;;  %v8198_v60 = vld [vmem:[#allocation20 + $0x1c] sm:$0xf] }
 0xaa8   : > { %v3747_v18 = vpop.f32.mrf.mxu1  ;;  %4537 = vmatpush.bf16.msra.mxu0 %v7982_v1  ;;  %v7890_v31 = vor.u32 %v8198_v60, %v7887_v63 }
 0xaa9   : > { %v10702_v6 = vpack.c.bf16 %v3816_v27, %v3815_v48  ;;  %v3748_v17 = vadd.f32 %v10678_v19, %v3747_v18  ;;  %4586 = vmatpush.bf16.msra.mxu1 %v7986_v10  ;;  %v7943_v48 = vld [vmem:[#allocation20 + $0xb0] sm:$0xf0]  ;;  %v7941_v18 = vld [vmem:[#allocation20 + $0x90] sm:$0xf] }
 0xaaa   : > { %v7946_v5 = vor.u32 %v8213_v35, %v7943_v48 }
 0xaab   : > { %4252 = vmatmul.bf16.gmra.mxu2 %v10702_v6  ;;  %4301 = vmatmul.bf16.gmra.mxu3 %v10702_v6  ;;  %v3783_v54 = vmul.f32 %v10681_v47, %v3748_v17  ;;  %v8217_v17 = vld [vmem:[#allocation20 + $0xac] sm:$0xf0] }
 0xaac   : > { %4350 = vmatmul.bf16.gmra.mxu0 %v10702_v6  ;;  %4399 = vmatmul.bf16.gmra.mxu1 %v10702_v6  ;;  %v7942_v15 = vor.u32 %v8217_v17, %v7941_v18  ;;  %v8202_v18 = vld [vmem:[#allocation20 + $0x34] sm:$0xf0] }
 0xaad   : > { %v3801_v14 = vadd.f32 %v10684_v12, %v3783_v54  ;;  %4489 = vmatpush.bf16.msra.mxu3 %v7946_v5  ;;  %v7885_v5 = vld [vmem:[#allocation20 + $0x18] sm:$0xf] }
 0xaae   : > { %4440 = vmatpush.bf16.msra.mxu2 %v7942_v15  ;;  %v7886_v15 = vor.u32 %v8202_v18, %v7885_v5 }
 0xaaf   : > { %v3817_v2 = vmax.f32 %v3801_v14, 0.0  ;;  %v8214_v14 = vld [vmem:[#allocation20 + $0x9c] sm:$0xf] }
 0xab0   : > { %v3749_v58 = vpop.f32.mrf.mxu1 }
 0xab1   : > { %v3750_v0 = vadd.f32 %v10678_v19, %v3749_v58 }
 0xab2   : > { %4441 = vmatpush.bf16.msra.mxu2 %v7910_v34 }
 0xab3   : > { %v3784_v20 = vmul.f32 %v10681_v47, %v3750_v0 }
 0xab5   : > { %v3802_v44 = vadd.f32 %v10684_v12, %v3784_v20  ;;  %v7951_v20 = vld [vmem:[#allocation20 + $0xb8] sm:$0xf0] }
 0xab6   : > { %v7954_v26 = vor.u32 %v8214_v14, %v7951_v20 }
 0xab7   : > { %v3818_v23 = vmax.f32 %v3802_v44, 0.0  ;;  %v7949_v44 = vld [vmem:[#allocation20 + $0x98] sm:$0xf] }
 0xab8   : > { %v7950_v30 = vor.u32 %v8218_v24, %v7949_v44  ;;  %4587 = vmatpush.bf16.msra.mxu1 %v7954_v26 }
 0xab9   : > { %v10714_v45 = vpack.c.bf16 %v3818_v23, %v3817_v2  ;;  %v8205_v2 = vld [vmem:[#allocation20 + $0x54] sm:$0xf] }
 0xaba   : > { %4538 = vmatpush.bf16.msra.mxu0 %v7950_v30  ;;  %v7911_v23 = vld [vmem:[#allocation20 + $0x70] sm:$0xf0]  ;;  %v10780_v30 = vld [vmem:[#allocation21] sm:$0xff] }
 0xabb   : > { %4257 = vmatmul.bf16.gmra.mxu2 %v10714_v45  ;;  %4306 = vmatmul.bf16.gmra.mxu3 %v10714_v45  ;;  %v10797_v13 = vperm.slane %v10780_v30, 1  ;;  %v10800_v39 = vperm.slane %v10780_v30, 3 }
 0xabc   : > { %4355 = vmatmul.bf16.gmra.mxu0 %v10714_v45  ;;  %4404 = vmatmul.bf16.gmra.mxu1 %v10714_v45 }
 0xabe   : > { %v3752_v56 = vpop.f32.mrf.mxu2 }
 0xabf   : > { %v3753_v43 = vadd.f32 %v10678_v19, %v3752_v56  ;;  %v7914_v56 = vor.u32 %v8205_v2, %v7911_v23 }
 0xac1   : > { %v3785_v41 = vmul.f32 %v10681_v47, %v3753_v43  ;;  %4490 = vmatpush.bf16.msra.mxu3 %v7914_v56  ;;  %v10794_v56 = vperm.slane %v10780_v30, 0 }
 0xac3   : > { %v3803_v7 = vadd.f32 %v10684_v12, %v3785_v41 }
 0xac5   : > { %v3819_v59 = vmax.f32 %v3803_v7, 0.0 }
 0xac6   : > { %v3754_v3 = vpop.f32.mrf.mxu2 }
 0xac7   : > { %v3755_v55 = vadd.f32 %v10678_v19, %v3754_v3 }
 0xac9   : > { %v3786_v57 = vmul.f32 %v10681_v47, %v3755_v55  ;;  %v7922_v55 = vor.u32 %v8206_v51, %v7919_v38 }
 0xacb   : > { %v3804_v8 = vadd.f32 %v10684_v12, %v3786_v57  ;;  %v7918_v57 = vor.u32 %v8210_v49, %v7917_v53  ;;  %4588 = vmatpush.bf16.msra.mxu1 %v7922_v55 }
 0xacd   : > { %v3820_v28 = vmax.f32 %v3804_v8, 0.0  ;;  %v8197_v8 = vld [vmem:[#allocation20 + $0x14] sm:$0xf]  ;;  %4539 = vmatpush.bf16.msra.mxu0 %v7918_v57 }
 0xace   : > { %v3757_v42 = vpop.f32.mrf.mxu2 }
 0xacf   : > { %v10726_v61 = vpack.c.bf16 %v3820_v28, %v3819_v59  ;;  %v3758_v9 = vadd.f32 %v10678_v19, %v3757_v42  ;;  %v7879_v59 = vld [vmem:[#allocation20 + $0x30] sm:$0xf0]  ;;  %v7877_v28 = vld [vmem:[#allocation20 + $0x10] sm:$0xf]  ;;  %4589 = vmatpush.bf16.msra.mxu1 %v7890_v31 }
 0xad0   : > { %v7882_v42 = vor.u32 %v8197_v8, %v7879_v59  ;;  %v7878_v10 = vor.u32 %v8201_v62, %v7877_v28 }
 0xad1   : > { %4262 = vmatmul.bf16.gmra.mxu2 %v10726_v61  ;;  %4311 = vmatmul.bf16.gmra.mxu3 %v10726_v61  ;;  %v3787_v11 = vmul.f32 %v10681_v47, %v3758_v9 }
 0xad2   : > { %4360 = vmatmul.bf16.gmra.mxu0 %v10726_v61  ;;  %4409 = vmatmul.bf16.gmra.mxu1 %v10726_v61 }
 0xad3   : > { %v3805_v46 = vadd.f32 %v10684_v12, %v3787_v11  ;;  %4491 = vmatpush.bf16.msra.mxu3 %v7882_v42  ;;  %4442 = vmatpush.bf16.msra.mxu2 %v7878_v10 }
 0xad4   : > { %4540 = vmatpush.bf16.msra.mxu0 %v7886_v15 }
 0xad5   : > { %v3821_v32 = vmax.f32 %v3805_v46, 0.0 }
 0xad6   : > { %v3759_v27 = vpop.f32.mrf.mxu2 }
 0xad7   : > { %v3760_v54 = vadd.f32 %v10678_v19, %v3759_v27 }
 0xad9   : > { %v3788_v58 = vmul.f32 %v10681_v47, %v3760_v54 }
 0xadb   : > { %v3806_v16 = vadd.f32 %v10684_v12, %v3788_v58 }
 0xadd   : > { %v3822_v25 = vmax.f32 %v3806_v16, 0.0 }
 0xade   : > { %v3762_v0 = vpop.f32.mrf.mxu3 }
 0xadf   : > { %v10738_v52 = vpack.c.bf16 %v3822_v25, %v3821_v32  ;;  %v3763_v29 = vadd.f32 %v10678_v19, %v3762_v0 }
 0xae1   : > { %4267 = vmatmul.bf16.gmra.mxu2 %v10738_v52  ;;  %4316 = vmatmul.bf16.gmra.mxu3 %v10738_v52  ;;  %v3789_v37 = vmul.f32 %v10681_v47, %v3763_v29 }
 0xae2   : > { %4365 = vmatmul.bf16.gmra.mxu0 %v10738_v52  ;;  %4414 = vmatmul.bf16.gmra.mxu1 %v10738_v52 }
 0xae3   : > { %v3807_v21 = vadd.f32 %v10684_v12, %v3789_v37  ;;  %v10785_v37 = vld [vmem:[#allocation4 + $0x2] ss:$4 sm:$0xff] }
 0xae4   : > { %v10789_v23 = vperm.slane %v10785_v37, 2  ;;  %v10818_v55 = vperm.slane %v10785_v37, 3 }
 0xae5   : > { %v3823_v41 = vmax.f32 %v3807_v21, 0.0 }
 0xae6   : > { %v3764_v22 = vpop.f32.mrf.mxu3 }
 0xae7   : > { %v3765_v40 = vadd.f32 %v10678_v19, %v3764_v22  ;;  %v10791_v22 = vld [vmem:[#allocation4 + $0x3] ss:$4 sm:$0xff] }
 0xae8   : > { %v10829_v42 = vperm.slane %v10791_v22, 0  ;;  %v10833_v60 = vperm.slane %v10791_v22, 1 }
 0xae9   : > { %v3790_v43 = vmul.f32 %v10681_v47, %v3765_v40 }
 0xaeb   : > { %v3808_v4 = vadd.f32 %v10684_v12, %v3790_v43  ;;  %v10804_v43 = vperm.slane %v10791_v22, 2 }
 0xaed   : > { %v3824_v50 = vmax.f32 %v3808_v4, 0.0 }
 0xaee   : > { %v3767_v36 = vpop.f32.mrf.mxu3 }
 0xaef   : > { %v10750_v3 = vpack.c.bf16 %v3824_v50, %v3823_v41  ;;  %v3768_v7 = vadd.f32 %v10678_v19, %v3767_v36  ;;  %v10808_v41 = vperm.slane %v10785_v37, 0  ;;  %v10812_v36 = vperm.slane %v10785_v37, 1 }
 0xaf1   : > { %4272 = vmatmul.bf16.gmra.mxu2 %v10750_v3  ;;  %4321 = vmatmul.bf16.gmra.mxu3 %v10750_v3  ;;  %v3791_v9 = vmul.f32 %v10681_v47, %v3768_v7 }
 0xaf2   : > { %4370 = vmatmul.bf16.gmra.mxu0 %v10750_v3  ;;  %4419 = vmatmul.bf16.gmra.mxu1 %v10750_v3 }
 0xaf3   : > { %v3809_v35 = vadd.f32 %v10684_v12, %v3791_v9 }
 0xaf5   : > { %v3825_v17 = vmax.f32 %v3809_v35, 0.0 }
 0xaf6   : > { %v3769_v1 = vpop.f32.mrf.mxu3 }
 0xaf7   : > { %v3770_v11 = vadd.f32 %v10678_v19, %v3769_v1 }
 0xaf9   : > { %v3792_v48 = vmul.f32 %v10681_v47, %v3770_v11 }
 0xafb   : > { %v3810_v27 = vadd.f32 %v10684_v12, %v3792_v48 }
 0xafd   : > { %v3826_v54 = vmax.f32 %v3810_v27, 0.0 }
 0xafe   : > { %v3772_v46 = vpop.f32.mrf.mxu3 }
 0xaff   : > { %v10762_v58 = vpack.c.bf16 %v3826_v54, %v3825_v17  ;;  %v3773_v16 = vadd.f32 %v10678_v19, %v3772_v46 }
 0xb01   : > { %4277 = vmatmul.bf16.gmra.mxu2 %v10762_v58  ;;  %4326 = vmatmul.bf16.gmra.mxu3 %v10762_v58  ;;  %v3793_v32 = vmul.f32 %v10681_v47, %v3773_v16 }
 0xb02   : > { %4375 = vmatmul.bf16.gmra.mxu0 %v10762_v58  ;;  %4424 = vmatmul.bf16.gmra.mxu1 %v10762_v58 }
 0xb03   : > { %v3811_v14 = vadd.f32 %v10684_v12, %v3793_v32 }
 0xb05   : > { %v3827_v26 = vmax.f32 %v3811_v14, 0.0 }
 0xb06   : > { %v3774_v25 = vpop.f32.mrf.mxu3 }
 0xb07   : > { %v3775_v0 = vadd.f32 %v10678_v19, %v3774_v25  ;;  %v10783_v19 = vperm.slane %v10780_v30, 2 }
 0xb09   : > { %v3794_v20 = vmul.f32 %v10681_v47, %v3775_v0 }
 0xb0b   : > { %v3812_v44 = vadd.f32 %v10684_v12, %v3794_v20 }
 0xb0d   : > { %v3828_v24 = vmax.f32 %v3812_v44, 0.0 }
 0xb0f   : > { %v10774_v29 = vpack.c.bf16 %v3828_v24, %v3827_v26 }
 0xb11   : > { %4282 = vmatmul.bf16.gmra.mxu2 %v10774_v29  ;;  %4331 = vmatmul.bf16.gmra.mxu3 %v10774_v29 }
 0xb12   : > { %4380 = vmatmul.bf16.gmra.mxu0 %v10774_v29  ;;  %4429 = vmatmul.bf16.gmra.mxu1 %v10774_v29 }
 0xb19   : > { %v4346_v47 = vpop.f32.mrf.mxu0  ;;  %v4395_v12 = vpop.f32.mrf.mxu1 }
 0xb1a   : > { %v4347_v2 = vadd.f32 %v4346_v47, %v10783_v19  ;;  %v4396_v53 = vadd.f32 %v4395_v12, %v10800_v39 }
 0xb1c   : > { %v4652_v21 = vmul.f32 %v10789_v23, %v4347_v2  ;;  %v4653_v63 = vmul.f32 %v10818_v55, %v4396_v53 }
 0xb1e   : > { %v4248_v40 = vpop.f32.mrf.mxu2  ;;  %v4297_v34 = vpop.f32.mrf.mxu3  ;;  %v4799_v57 = vadd.f32 %v10804_v43, %v4652_v21 }
 0xb1f   : > { %v4249_v4 = vadd.f32 %v4248_v40, %v10794_v56  ;;  %v4298_v50 = vadd.f32 %v4297_v34, %v10797_v13 }
 0xb20   : > { %v4927_v35 = vmax.f32 %v4799_v57, 0.0 }
 0xb21   : > { %v4348_v51 = vpop.f32.mrf.mxu0  ;;  %v4397_v38 = vpop.f32.mrf.mxu1  ;;  %4443 = vmatmul.bf16.vlgmr.msra.gmra.mxu2 %v10690_v33  ;;  %4492 = vmatmul.bf16.vlgmr.msra.gmra.mxu3 %v10690_v33  ;;  %v4650_v28 = vmul.f32 %v10808_v41, %v4249_v4  ;;  %v4651_v62 = vmul.f32 %v10812_v36, %v4298_v50 }
 0xb22   : > { %v4349_v49 = vadd.f32 %v4348_v51, %v10783_v19  ;;  %v4398_v7 = vadd.f32 %v4397_v38, %v10800_v39  ;;  %4541 = vmatmul.bf16.vlgmr.msra.gmra.mxu0 %v10690_v33  ;;  %4590 = vmatmul.bf16.vlgmr.msra.gmra.mxu1 %v10690_v33  ;;  %v10837_v33 = vperm.slane %v10791_v22, 3 }
 0xb23   : > { %v4797_v5 = vadd.f32 %v10829_v42, %v4650_v28  ;;  %v4798_v18 = vadd.f32 %v10833_v60, %v4651_v62 }
 0xb24   : > { %v4660_v8 = vmul.f32 %v10789_v23, %v4349_v49  ;;  %v4661_v59 = vmul.f32 %v10818_v55, %v4398_v7  ;;  %v4800_v16 = vadd.f32 %v10837_v33, %v4653_v63 }
 0xb25   : > { %v4925_v47 = vmax.f32 %v4797_v5, 0.0  ;;  %v4926_v12 = vmax.f32 %v4798_v18, 0.0 }
 0xb26   : > { %v4807_v10 = vadd.f32 %v10804_v43, %v4660_v8  ;;  %v4250_v31 = vpop.f32.mrf.mxu2  ;;  %v4299_v9 = vpop.f32.mrf.mxu3  ;;  %v4808_v27 = vadd.f32 %v10837_v33, %v4661_v59  ;;  %v4928_v34 = vmax.f32 %v4800_v16, 0.0 }
 0xb27   : > { %v4251_v1 = vadd.f32 %v4250_v31, %v10794_v56  ;;  %v4300_v11 = vadd.f32 %v4299_v9, %v10797_v13 }
 0xb28   : > { %v4935_v48 = vmax.f32 %v4807_v10, 0.0  ;;  %v4936_v44 = vmax.f32 %v4808_v27, 0.0 }
 0xb29   : > { %v4658_v17 = vmul.f32 %v10808_v41, %v4251_v1  ;;  %v4659_v54 = vmul.f32 %v10812_v36, %v4300_v11  ;;  %v4351_v15 = vpop.f32.mrf.mxu0  ;;  %v4400_v46 = vpop.f32.mrf.mxu1 }
 0xb2a   : > { %v5095_v32 = vmax.f32 %v4927_v35, %v4935_v48  ;;  %v4352_v25 = vadd.f32 %v4351_v15, %v10783_v19  ;;  %v4401_v0 = vadd.f32 %v4400_v46, %v10800_v39  ;;  %v5116_v57 = vmax.f32 %v4928_v34, %v4936_v44 }
 0xb2b   : > { %v4805_v14 = vadd.f32 %v10829_v42, %v4658_v17  ;;  %v4806_v20 = vadd.f32 %v10833_v60, %v4659_v54 }
 0xb2c   : > { %v4668_v26 = vmul.f32 %v10789_v23, %v4352_v25  ;;  %v4669_v24 = vmul.f32 %v10818_v55, %v4401_v0 }
 0xb2d   : > { %v4933_v2 = vmax.f32 %v4805_v14, 0.0  ;;  %v4934_v40 = vmax.f32 %v4806_v20, 0.0 }
 0xb2e   : > { %v4815_v21 = vadd.f32 %v10804_v43, %v4668_v26  ;;  %v4816_v4 = vadd.f32 %v10837_v33, %v4669_v24  ;;  %v4253_v50 = vpop.f32.mrf.mxu2  ;;  %v4302_v51 = vpop.f32.mrf.mxu3 }
 0xb2f   : > { %v5053_v38 = vmax.f32 %v4925_v47, %v4933_v2  ;;  %v5074_v53 = vmax.f32 %v4926_v12, %v4934_v40  ;;  %v4254_v49 = vadd.f32 %v4253_v50, %v10794_v56  ;;  %v4303_v7 = vadd.f32 %v4302_v51, %v10797_v13 }
 0xb30   : > { %v4943_v8 = vmax.f32 %v4815_v21, 0.0  ;;  %v4944_v59 = vmax.f32 %v4816_v4, 0.0 }
 0xb31   : > { %v4666_v28 = vmul.f32 %v10808_v41, %v4254_v49  ;;  %v4667_v62 = vmul.f32 %v10812_v36, %v4303_v7  ;;  %v4353_v63 = vpop.f32.mrf.mxu0  ;;  %v4402_v10 = vpop.f32.mrf.mxu1  ;;  %4448 = vmatmul.bf16.gmra.mxu2 %v10702_v6  ;;  %4497 = vmatmul.bf16.gmra.mxu3 %v10702_v6 }
 0xb32   : > { %v5096_v31 = vmax.f32 %v5095_v32, %v4943_v8  ;;  %v5117_v9 = vmax.f32 %v5116_v57, %v4944_v59  ;;  %v4354_v1 = vadd.f32 %v4353_v63, %v10783_v19  ;;  %v4403_v11 = vadd.f32 %v4402_v10, %v10800_v39  ;;  %4546 = vmatmul.bf16.gmra.mxu0 %v10702_v6 }
 0xb33   : > { %v4813_v35 = vadd.f32 %v10829_v42, %v4666_v28  ;;  %v4814_v48 = vadd.f32 %v10833_v60, %v4667_v62  ;;  %4595 = vmatmul.bf16.gmra.mxu1 %v10702_v6 }
 0xb34   : > { %v4676_v27 = vmul.f32 %v10789_v23, %v4354_v1  ;;  %v4677_v5 = vmul.f32 %v10818_v55, %v4403_v11 }
 0xb35   : > { %v4941_v18 = vmax.f32 %v4813_v35, 0.0  ;;  %v4942_v17 = vmax.f32 %v4814_v48, 0.0 }
 0xb36   : > { %v4823_v54 = vadd.f32 %v10804_v43, %v4676_v27  ;;  %v4255_v15 = vpop.f32.mrf.mxu2  ;;  %v4304_v46 = vpop.f32.mrf.mxu3  ;;  %v4824_v20 = vadd.f32 %v10837_v33, %v4677_v5 }
 0xb37   : > { %v5054_v16 = vmax.f32 %v5053_v38, %v4941_v18  ;;  %v5075_v32 = vmax.f32 %v5074_v53, %v4942_v17  ;;  %v4256_v25 = vadd.f32 %v4255_v15, %v10794_v56  ;;  %v4305_v0 = vadd.f32 %v4304_v46, %v10797_v13 }
 0xb38   : > { %v4951_v14 = vmax.f32 %v4823_v54, 0.0  ;;  %v4952_v21 = vmax.f32 %v4824_v20, 0.0 }
 0xb39   : > { %v4674_v6 = vmul.f32 %v10808_v41, %v4256_v25  ;;  %v4675_v44 = vmul.f32 %v10812_v36, %v4305_v0  ;;  %v4356_v26 = vpop.f32.mrf.mxu0  ;;  %v4405_v24 = vpop.f32.mrf.mxu1 }
 0xb3a   : > { %v5097_v47 = vmax.f32 %v5096_v31, %v4951_v14  ;;  %v4357_v12 = vadd.f32 %v4356_v26, %v10783_v19  ;;  %v4406_v2 = vadd.f32 %v4405_v24, %v10800_v39  ;;  %v5118_v63 = vmax.f32 %v5117_v9, %v4952_v21 }
 0xb3b   : > { %v4821_v40 = vadd.f32 %v10829_v42, %v4674_v6  ;;  %v4822_v34 = vadd.f32 %v10833_v60, %v4675_v44 }
 0xb3c   : > { %v4684_v4 = vmul.f32 %v10789_v23, %v4357_v12  ;;  %v4685_v50 = vmul.f32 %v10818_v55, %v4406_v2 }
 0xb3d   : > { %v4949_v51 = vmax.f32 %v4821_v40, 0.0  ;;  %v4950_v38 = vmax.f32 %v4822_v34, 0.0 }
 0xb3e   : > { %v4831_v53 = vadd.f32 %v10804_v43, %v4684_v4  ;;  %v4832_v49 = vadd.f32 %v10837_v33, %v4685_v50  ;;  %v4258_v7 = vpop.f32.mrf.mxu2  ;;  %v4307_v57 = vpop.f32.mrf.mxu3 }
 0xb3f   : > { %v5055_v8 = vmax.f32 %v5054_v16, %v4949_v51  ;;  %v5076_v59 = vmax.f32 %v5075_v32, %v4950_v38  ;;  %v4259_v28 = vadd.f32 %v4258_v7, %v10794_v56  ;;  %v4308_v62 = vadd.f32 %v4307_v57, %v10797_v13 }
 0xb40   : > { %v4959_v10 = vmax.f32 %v4831_v53, 0.0  ;;  %v4960_v31 = vmax.f32 %v4832_v49, 0.0 }
 0xb41   : > { %v4682_v1 = vmul.f32 %v10808_v41, %v4259_v28  ;;  %v4683_v11 = vmul.f32 %v10812_v36, %v4308_v62  ;;  %4453 = vmatmul.bf16.gmra.mxu2 %v10714_v45  ;;  %4502 = vmatmul.bf16.gmra.mxu3 %v10714_v45  ;;  %v4358_v15 = vpop.f32.mrf.mxu0  ;;  %v4407_v46 = vpop.f32.mrf.mxu1 }
 0xb42   : > { %v10890_v35 = vmax.f32 %v5097_v47, %v4959_v10  ;;  %v10892_v48 = vmax.f32 %v5118_v63, %v4960_v31  ;;  %4551 = vmatmul.bf16.gmra.mxu0 %v10714_v45  ;;  %v4359_v12 = vadd.f32 %v4358_v15, %v10783_v19 }
 0xb43   : > { %v4829_v27 = vadd.f32 %v10829_v42, %v4682_v1  ;;  %v4830_v9 = vadd.f32 %v10833_v60, %v4683_v11  ;;  %4600 = vmatmul.bf16.gmra.mxu1 %v10714_v45 }
 0xb44   : > { %v4692_v51 = vmul.f32 %v10789_v23, %v4359_v12 }
 0xb45   : > { %v4957_v5 = vmax.f32 %v4829_v27, 0.0  ;;  %v4958_v18 = vmax.f32 %v4830_v9, 0.0 }
 0xb46   : > { %v4260_v16 = vpop.f32.mrf.mxu2  ;;  %v4309_v32 = vpop.f32.mrf.mxu3  ;;  %v4839_v10 = vadd.f32 %v10804_v43, %v4692_v51 }
 0xb47   : > { %v10898_v17 = vmax.f32 %v5055_v8, %v4957_v5  ;;  %v10900_v54 = vmax.f32 %v5076_v59, %v4958_v18  ;;  %v4261_v2 = vadd.f32 %v4260_v16, %v10794_v56  ;;  %v4310_v21 = vadd.f32 %v4309_v32, %v10797_v13 }
 0xb49   : > { %v4690_v49 = vmul.f32 %v10808_v41, %v4261_v2  ;;  %v4691_v8 = vmul.f32 %v10812_v36, %v4310_v21 }
 0xb4b   : > { %v4837_v1 = vadd.f32 %v10829_v42, %v4690_v49  ;;  %v4838_v18 = vadd.f32 %v10833_v60, %v4691_v8 }
 0xb4d   : > { %v4965_v12 = vmax.f32 %v4837_v1, 0.0  ;;  %v4966_v21 = vmax.f32 %v4838_v18, 0.0 }
 0xb4f   : > { %v4361_v25 = vpop.f32.mrf.mxu0  ;;  %v4410_v0 = vpop.f32.mrf.mxu1 }
 0xb50   : > { %v4362_v4 = vadd.f32 %v4361_v25, %v10783_v19  ;;  %v4411_v50 = vadd.f32 %v4410_v0, %v10800_v39 }
 0xb51   : > { %4458 = vmatmul.bf16.gmra.mxu2 %v10726_v61  ;;  %4507 = vmatmul.bf16.gmra.mxu3 %v10726_v61 }
 0xb52   : > { %4556 = vmatmul.bf16.gmra.mxu0 %v10726_v61  ;;  %v4700_v62 = vmul.f32 %v10789_v23, %v4362_v4  ;;  %v4701_v63 = vmul.f32 %v10818_v55, %v4411_v50 }
 0xb53   : > { %4605 = vmatmul.bf16.gmra.mxu1 %v10726_v61  ;;  %v4408_v61 = vadd.f32 %v4407_v46, %v10800_v39 }
 0xb54   : > { %v4263_v45 = vpop.f32.mrf.mxu2  ;;  %v4312_v14 = vpop.f32.mrf.mxu3  ;;  %v4847_v32 = vadd.f32 %v10804_v43, %v4700_v62  ;;  %v4848_v25 = vadd.f32 %v10837_v33, %v4701_v63 }
 0xb55   : > { %v4264_v7 = vadd.f32 %v4263_v45, %v10794_v56  ;;  %v4313_v57 = vadd.f32 %v4312_v14, %v10797_v13  ;;  %v4967_v45 = vmax.f32 %v4839_v10, 0.0 }
 0xb56   : > { %v4976_v51 = vmax.f32 %v4848_v25, 0.0 }
 0xb57   : > { %v4363_v20 = vpop.f32.mrf.mxu0  ;;  %v4412_v6 = vpop.f32.mrf.mxu1  ;;  %v4698_v11 = vmul.f32 %v10808_v41, %v4264_v7  ;;  %v4699_v27 = vmul.f32 %v10812_v36, %v4313_v57  ;;  %v5099_v7 = vmax.f32 %v10890_v35, %v4967_v45 }
 0xb58   : > { %v4364_v59 = vadd.f32 %v4363_v20, %v10783_v19  ;;  %v4413_v28 = vadd.f32 %v4412_v6, %v10800_v39 }
 0xb59   : > { %v4846_v2 = vadd.f32 %v10833_v60, %v4699_v27 }
 0xb5a   : > { %v4708_v15 = vmul.f32 %v10789_v23, %v4364_v59  ;;  %v4709_v46 = vmul.f32 %v10818_v55, %v4413_v28  ;;  %v5057_v59 = vmax.f32 %v10898_v17, %v4965_v12 }
 0xb5b   : > { %v4974_v62 = vmax.f32 %v4846_v2, 0.0 }
 0xb5c   : > { %v4265_v44 = vpop.f32.mrf.mxu2  ;;  %v4314_v26 = vpop.f32.mrf.mxu3  ;;  %v4855_v4 = vadd.f32 %v10804_v43, %v4708_v15 }
 0xb5d   : > { %v4266_v16 = vadd.f32 %v4265_v44, %v10794_v56  ;;  %v4315_v0 = vadd.f32 %v4314_v26, %v10797_v13  ;;  %v4856_v44 = vadd.f32 %v10837_v33, %v4709_v46  ;;  %v4975_v26 = vmax.f32 %v4847_v32, 0.0 }
 0xb5e   : > { %v4983_v1 = vmax.f32 %v4855_v4, 0.0 }
 0xb5f   : > { %v4366_v24 = vpop.f32.mrf.mxu0  ;;  %v4415_v47 = vpop.f32.mrf.mxu1  ;;  %v4706_v50 = vmul.f32 %v10808_v41, %v4266_v16  ;;  %v5100_v27 = vmax.f32 %v5099_v7, %v4975_v26 }
 0xb60   : > { %v4367_v49 = vadd.f32 %v4366_v24, %v10783_v19  ;;  %v4416_v57 = vadd.f32 %v4415_v47, %v10800_v39  ;;  %v4984_v24 = vmax.f32 %v4856_v44, 0.0 }
 0xb61   : > { %4463 = vmatmul.bf16.gmra.mxu2 %v10738_v52  ;;  %4512 = vmatmul.bf16.gmra.mxu3 %v10738_v52  ;;  %v5101_v45 = vmax.f32 %v5100_v27, %v4983_v1 }
 0xb62   : > { %4561 = vmatmul.bf16.gmra.mxu0 %v10738_v52 }
 0xb63   : > { %4610 = vmatmul.bf16.gmra.mxu1 %v10738_v52  ;;  %v4693_v52 = vmul.f32 %v10818_v55, %v4408_v61  ;;  %v4845_v61 = vadd.f32 %v10829_v42, %v4698_v11  ;;  %v4853_v11 = vadd.f32 %v10829_v42, %v4706_v50 }
 0xb64   : > { %v10913_v40 = vpop.f32.mrf.mxu2  ;;  %v10915_v34 = vpop.f32.mrf.mxu3 }
 0xb65   : > { %v4840_v31 = vadd.f32 %v10837_v33, %v4693_v52  ;;  %v4707_v52 = vmul.f32 %v10812_v36, %v4315_v0  ;;  %v4973_v28 = vmax.f32 %v4845_v61, 0.0  ;;  %v4269_v17 = vadd.f32 %v10913_v40, %v10794_v56 }
 0xb66   : > { %v4318_v18 = vadd.f32 %v10915_v34, %v10797_v13  ;;  %v4981_v12 = vmax.f32 %v4853_v11, 0.0 }
 0xb67   : > { %v10921_v38 = vpop.f32.mrf.mxu0  ;;  %v10923_v53 = vpop.f32.mrf.mxu1  ;;  %v4968_v6 = vmax.f32 %v4840_v31, 0.0  ;;  %v5078_v31 = vmax.f32 %v10900_v54, %v4966_v21  ;;  %v4854_v47 = vadd.f32 %v10833_v60, %v4707_v52  ;;  %v5058_v16 = vmax.f32 %v5057_v59, %v4973_v28 }
 0xb68   : > { %v4369_v54 = vadd.f32 %v10921_v38, %v10783_v19  ;;  %v4418_v25 = vadd.f32 %v10923_v53, %v10800_v39  ;;  %v4714_v4 = vmul.f32 %v10808_v41, %v4269_v17  ;;  %v4715_v53 = vmul.f32 %v10812_v36, %v4318_v18 }
 0xb69   : > { %v5120_v8 = vmax.f32 %v10892_v48, %v4968_v6  ;;  %v4717_v48 = vmul.f32 %v10818_v55, %v4416_v57  ;;  %v5079_v32 = vmax.f32 %v5078_v31, %v4974_v62  ;;  %v4982_v61 = vmax.f32 %v4854_v47, 0.0 }
 0xb6a   : > { %v4725_v44 = vmul.f32 %v10818_v55, %v4418_v25  ;;  %v5059_v52 = vmax.f32 %v5058_v16, %v4981_v12 }
 0xb6b   : > { %v5121_v35 = vmax.f32 %v5120_v8, %v4976_v51  ;;  %v4864_v21 = vadd.f32 %v10837_v33, %v4717_v48  ;;  %v5080_v57 = vmax.f32 %v5079_v32, %v4982_v61 }
 0xb6c   : > { %v4270_v9 = vpop.f32.mrf.mxu2  ;;  %v4319_v5 = vpop.f32.mrf.mxu3  ;;  %v4872_v11 = vadd.f32 %v10837_v33, %v4725_v44 }
 0xb6d   : > { %v4271_v0 = vadd.f32 %v4270_v9, %v10794_v56  ;;  %v5122_v6 = vmax.f32 %v5121_v35, %v4984_v24  ;;  %v4320_v40 = vadd.f32 %v4319_v5, %v10797_v13  ;;  %v4724_v9 = vmul.f32 %v10789_v23, %v4369_v54 }
 0xb6e   : > { %v4992_v62 = vmax.f32 %v4864_v21, 0.0 }
 0xb6f   : > { %v4371_v14 = vpop.f32.mrf.mxu0  ;;  %v4420_v20 = vpop.f32.mrf.mxu1  ;;  %v4722_v50 = vmul.f32 %v10808_v41, %v4271_v0  ;;  %v4871_v31 = vadd.f32 %v10804_v43, %v4724_v9 }
 0xb70   : > { %v4372_v2 = vadd.f32 %v4371_v14, %v10783_v19  ;;  %v4421_v38 = vadd.f32 %v4420_v20, %v10800_v39  ;;  %v4723_v20 = vmul.f32 %v10812_v36, %v4320_v40  ;;  %v5123_v32 = vmax.f32 %v5122_v6, %v4992_v62 }
 0xb71   : > { %4468 = vmatmul.bf16.gmra.mxu2 %v10750_v3  ;;  %4517 = vmatmul.bf16.gmra.mxu3 %v10750_v3  ;;  %v4869_v27 = vadd.f32 %v10829_v42, %v4722_v50  ;;  %v4999_v12 = vmax.f32 %v4871_v31, 0.0  ;;  %v5000_v40 = vmax.f32 %v4872_v11, 0.0 }
 0xb72   : > { %4566 = vmatmul.bf16.gmra.mxu0 %v10750_v3  ;;  %v4732_v59 = vmul.f32 %v10789_v23, %v4372_v2  ;;  %v4733_v28 = vmul.f32 %v10818_v55, %v4421_v38 }
 0xb73   : > { %4615 = vmatmul.bf16.gmra.mxu1 %v10750_v3  ;;  %v4716_v3 = vmul.f32 %v10789_v23, %v4367_v49  ;;  %v4997_v21 = vmax.f32 %v4869_v27, 0.0 }
 0xb74   : > { %v4273_v63 = vpop.f32.mrf.mxu2  ;;  %v4322_v10 = vpop.f32.mrf.mxu3  ;;  %v4879_v18 = vadd.f32 %v10804_v43, %v4732_v59  ;;  %v4880_v54 = vadd.f32 %v10837_v33, %v4733_v28 }
 0xb75   : > { %v4863_v34 = vadd.f32 %v10804_v43, %v4716_v3  ;;  %v4274_v5 = vadd.f32 %v4273_v63, %v10794_v56  ;;  %v4323_v26 = vadd.f32 %v4322_v10, %v10797_v13  ;;  %v4861_v63 = vadd.f32 %v10829_v42, %v4714_v4 }
 0xb76   : > { %v4862_v10 = vadd.f32 %v10833_v60, %v4715_v53  ;;  %v4870_v3 = vadd.f32 %v10833_v60, %v4723_v20  ;;  %v5008_v6 = vmax.f32 %v4880_v54, 0.0 }
 0xb77   : > { %v4373_v15 = vpop.f32.mrf.mxu0  ;;  %v4422_v46 = vpop.f32.mrf.mxu1  ;;  %v4991_v8 = vmax.f32 %v4863_v34, 0.0  ;;  %v4730_v35 = vmul.f32 %v10808_v41, %v4274_v5  ;;  %v4731_v47 = vmul.f32 %v10812_v36, %v4323_v26  ;;  %v4989_v25 = vmax.f32 %v4861_v63, 0.0 }
 0xb78   : > { %v4374_v49 = vadd.f32 %v4373_v15, %v10783_v19  ;;  %v4423_v7 = vadd.f32 %v4422_v46, %v10800_v39  ;;  %v4990_v0 = vmax.f32 %v4862_v10, 0.0  ;;  %v4998_v4 = vmax.f32 %v4870_v3, 0.0 }
 0xb79   : > { %v5102_v16 = vmax.f32 %v5101_v45, %v4991_v8  ;;  %v4877_v61 = vadd.f32 %v10829_v42, %v4730_v35  ;;  %v4878_v34 = vadd.f32 %v10833_v60, %v4731_v47  ;;  %v5007_v45 = vmax.f32 %v4879_v18, 0.0 }
 0xb7a   : > { %v4740_v48 = vmul.f32 %v10789_v23, %v4374_v49  ;;  %v4741_v17 = vmul.f32 %v10818_v55, %v4423_v7  ;;  %v5060_v50 = vmax.f32 %v5059_v52, %v4989_v25  ;;  %v5081_v5 = vmax.f32 %v5080_v57, %v4990_v0 }
 0xb7b   : > { %v5103_v49 = vmax.f32 %v5102_v16, %v4999_v12  ;;  %v5124_v7 = vmax.f32 %v5123_v32, %v5000_v40  ;;  %v5005_v8 = vmax.f32 %v4877_v61, 0.0  ;;  %v5006_v59 = vmax.f32 %v4878_v34, 0.0 }
 0xb7c   : > { %v4275_v51 = vpop.f32.mrf.mxu2  ;;  %v4324_v14 = vpop.f32.mrf.mxu3  ;;  %v4887_v53 = vadd.f32 %v10804_v43, %v4740_v48  ;;  %v4888_v9 = vadd.f32 %v10837_v33, %v4741_v17  ;;  %v5061_v28 = vmax.f32 %v5060_v50, %v4997_v21  ;;  %v5082_v62 = vmax.f32 %v5081_v5, %v4998_v4 }
 0xb7d   : > { %v4276_v15 = vadd.f32 %v4275_v51, %v10794_v56  ;;  %v4325_v46 = vadd.f32 %v4324_v14, %v10797_v13  ;;  %v5104_v31 = vmax.f32 %v5103_v49, %v5007_v45  ;;  %v5125_v11 = vmax.f32 %v5124_v7, %v5008_v6 }
 0xb7e   : > { %v5015_v63 = vmax.f32 %v4887_v53, 0.0  ;;  %v5016_v10 = vmax.f32 %v4888_v9, 0.0  ;;  %v5062_v47 = vmax.f32 %v5061_v28, %v5005_v8  ;;  %v5083_v3 = vmax.f32 %v5082_v62, %v5006_v59 }
 0xb7f   : > { %v4376_v1 = vpop.f32.mrf.mxu0  ;;  %v4425_v24 = vpop.f32.mrf.mxu1  ;;  %v4738_v44 = vmul.f32 %v10808_v41, %v4276_v15  ;;  %v11027_v16 = vperm.slane %v10780_v30, 6  ;;  %v11030_v32 = vperm.slane %v10780_v30, 7  ;;  %v11033_v12 = vperm.slane %v10785_v37, 6 }
 0xb80   : > { %v4377_v26 = vadd.f32 %v4376_v1, %v10783_v19  ;;  %v4426_v51 = vadd.f32 %v4425_v24, %v10800_v39  ;;  %v5105_v15 = vmax.f32 %v5104_v31, %v5015_v63  ;;  %v11036_v40 = vperm.slane %v10785_v37, 7 }
 0xb81   : > { %4473 = vmatmul.bf16.gmra.mxu2 %v10762_v58  ;;  %4522 = vmatmul.bf16.gmra.mxu3 %v10762_v58  ;;  %v4885_v27 = vadd.f32 %v10829_v42, %v4738_v44  ;;  %v11051_v50 = vperm.slane %v10791_v22, 6  ;;  %v11054_v5 = vperm.slane %v10791_v22, 7  ;;  %v11065_v31 = vperm.slane %v10780_v30, 4 }
 0xb82   : > { %4571 = vmatmul.bf16.gmra.mxu0 %v10762_v58  ;;  %v4748_v57 = vmul.f32 %v10789_v23, %v4377_v26  ;;  %v4749_v1 = vmul.f32 %v10818_v55, %v4426_v51 }
 0xb83   : > { %4620 = vmatmul.bf16.gmra.mxu1 %v10762_v58  ;;  %v4739_v58 = vmul.f32 %v10812_v36, %v4325_v46  ;;  %v5126_v46 = vmax.f32 %v5125_v11, %v5016_v10  ;;  %v5013_v25 = vmax.f32 %v4885_v27, 0.0  ;;  %v11068_v11 = vperm.slane %v10780_v30, 5 }
 0xb84   : > { %v4278_v2 = vpop.f32.mrf.mxu2  ;;  %v4327_v38 = vpop.f32.mrf.mxu3  ;;  %v4895_v61 = vadd.f32 %v10804_v43, %v4748_v57  ;;  %v4896_v34 = vadd.f32 %v10837_v33, %v4749_v1 }
 0xb85   : > { %v4886_v52 = vadd.f32 %v10833_v60, %v4739_v58  ;;  %v4279_v24 = vadd.f32 %v4278_v2, %v10794_v56  ;;  %v4328_v35 = vadd.f32 %v4327_v38, %v10797_v13  ;;  %v5063_v26 = vmax.f32 %v5062_v47, %v5013_v25 }
 0xb86   : > { %v5023_v49 = vmax.f32 %v4895_v61, 0.0  ;;  %v5024_v7 = vmax.f32 %v4896_v34, 0.0  ;;  %v11080_v47 = vperm.slane %v10785_v37, 5 }
 0xb87   : > { %v4378_v14 = vpop.f32.mrf.mxu0  ;;  %v4427_v20 = vpop.f32.mrf.mxu1  ;;  %v5014_v0 = vmax.f32 %v4886_v52, 0.0  ;;  %v4746_v2 = vmul.f32 %v10808_v41, %v4279_v24  ;;  %v4747_v38 = vmul.f32 %v10812_v36, %v4328_v35  ;;  %v11077_v35 = vperm.slane %v10785_v37, 4 }
 0xb88   : > { %v4379_v48 = vadd.f32 %v4378_v14, %v10783_v19  ;;  %v4428_v17 = vadd.f32 %v4427_v20, %v10800_v39 }
 0xb89   : > { %v5084_v51 = vmax.f32 %v5083_v3, %v5014_v0  ;;  %v4893_v8 = vadd.f32 %v10829_v42, %v4746_v2  ;;  %v4894_v59 = vadd.f32 %v10833_v60, %v4747_v38  ;;  %v5106_v2 = vmax.f32 %v5105_v15, %v5023_v49 }
 0xb8a   : > { %v4756_v53 = vmul.f32 %v10789_v23, %v4379_v48  ;;  %v4757_v9 = vmul.f32 %v10818_v55, %v4428_v17  ;;  %v5127_v38 = vmax.f32 %v5126_v46, %v5024_v7 }
 0xb8b   : > { %v5021_v30 = vmax.f32 %v4893_v8, 0.0  ;;  %v5022_v3 = vmax.f32 %v4894_v59, 0.0 }
 0xb8c   : > { %v4280_v18 = vpop.f32.mrf.mxu2  ;;  %v4329_v54 = vpop.f32.mrf.mxu3  ;;  %v4903_v28 = vadd.f32 %v10804_v43, %v4756_v53  ;;  %v4904_v62 = vadd.f32 %v10837_v33, %v4757_v9 }
 0xb8d   : > { %v4281_v44 = vadd.f32 %v4280_v18, %v10794_v56  ;;  %v4330_v58 = vadd.f32 %v4329_v54, %v10797_v13 }
 0xb8e   : > { %v5031_v25 = vmax.f32 %v4903_v28, 0.0  ;;  %v5032_v0 = vmax.f32 %v4904_v62, 0.0 }
 0xb8f   : > { %v4381_v21 = vpop.f32.mrf.mxu0  ;;  %v4430_v4 = vpop.f32.mrf.mxu1  ;;  %v4754_v27 = vmul.f32 %v10808_v41, %v4281_v44  ;;  %v4755_v52 = vmul.f32 %v10812_v36, %v4330_v58  ;;  %v5085_v44 = vmax.f32 %v5084_v51, %v5022_v3 }
 0xb90   : > { %v4382_v45 = vadd.f32 %v4381_v21, %v10783_v19  ;;  %v4431_v6 = vadd.f32 %v4430_v4, %v10800_v39 }
 0xb91   : > { %4478 = vmatmul.bf16.gmra.mxu2 %v10774_v29  ;;  %4527 = vmatmul.bf16.gmra.mxu3 %v10774_v29  ;;  %v4901_v21 = vadd.f32 %v10829_v42, %v4754_v27  ;;  %v4902_v37 = vadd.f32 %v10833_v60, %v4755_v52 }
 0xb92   : > { %v4764_v14 = vmul.f32 %v10789_v23, %v4382_v45  ;;  %v4765_v20 = vmul.f32 %v10818_v55, %v4431_v6  ;;  %4576 = vmatmul.bf16.gmra.mxu0 %v10774_v29  ;;  %v5064_v6 = vmax.f32 %v5063_v26, %v5021_v30 }
 0xb93   : > { %4625 = vmatmul.bf16.gmra.mxu1 %v10774_v29  ;;  %v5029_v7 = vmax.f32 %v4901_v21, 0.0  ;;  %v5030_v8 = vmax.f32 %v4902_v37, 0.0 }
 0xb94   : > { %v4283_v63 = vpop.f32.mrf.mxu2  ;;  %v4332_v10 = vpop.f32.mrf.mxu3  ;;  %v4911_v1 = vadd.f32 %v10804_v43, %v4764_v14  ;;  %v4912_v24 = vadd.f32 %v10837_v33, %v4765_v20  ;;  %v5107_v14 = vmax.f32 %v5106_v2, %v5031_v25 }
 0xb95   : > { %v4284_v57 = vadd.f32 %v4283_v63, %v10794_v56  ;;  %v4333_v29 = vadd.f32 %v4332_v10, %v10797_v13 }
 0xb96   : > { %v5039_v4 = vmax.f32 %v4911_v1, 0.0  ;;  %v5040_v53 = vmax.f32 %v4912_v24, 0.0  ;;  %v5065_v1 = vmax.f32 %v5064_v6, %v5029_v7  ;;  %v11112_v6 = vperm.slane %v10791_v22, 5 }
 0xb97   : > { %v4762_v48 = vmul.f32 %v10808_v41, %v4284_v57  ;;  %v4763_v17 = vmul.f32 %v10812_v36, %v4333_v29  ;;  %v4383_v18 = vpop.f32.mrf.mxu0  ;;  %v4432_v54 = vpop.f32.mrf.mxu1 }
 0xb98   : > { %v4384_v61 = vadd.f32 %v4383_v18, %v10783_v19  ;;  %v4433_v34 = vadd.f32 %v4432_v54, %v10800_v39  ;;  %v5128_v39 = vmax.f32 %v5127_v38, %v5032_v0  ;;  %v5108_v26 = vmax.f32 %v5107_v14, %v5039_v4 }
 0xb99   : > { %v4909_v58 = vadd.f32 %v10829_v42, %v4762_v48  ;;  %v4910_v19 = vadd.f32 %v10833_v60, %v4763_v17  ;;  %v11106_v38 = vperm.slane %v10791_v22, 4 }
 0xb9a   : > { %v4772_v9 = vmul.f32 %v10789_v23, %v4384_v61  ;;  %v4773_v45 = vmul.f32 %v10818_v55, %v4433_v34  ;;  %v5129_v51 = vmax.f32 %v5128_v39, %v5040_v53 }
 0xb9b   : > { %v5037_v62 = vmax.f32 %v4909_v58, 0.0  ;;  %v5038_v63 = vmax.f32 %v4910_v19, 0.0 }
 0xb9c   : > { %v4919_v15 = vadd.f32 %v10804_v43, %v4772_v9  ;;  %v4920_v46 = vadd.f32 %v10837_v33, %v4773_v45  ;;  %v4285_v20 = vpop.f32.mrf.mxu2  ;;  %v4334_v49 = vpop.f32.mrf.mxu3 }
 0xb9d   : > { %v4286_v23 = vadd.f32 %v4285_v20, %v10794_v56  ;;  %v4335_v55 = vadd.f32 %v4334_v49, %v10797_v13  ;;  %v5086_v13 = vmax.f32 %v5085_v44, %v5030_v8  ;;  %v5066_v17 = vmax.f32 %v5065_v1, %v5037_v62 }
 0xb9e   : > { %v5047_v59 = vmax.f32 %v4919_v15, 0.0  ;;  %v5048_v28 = vmax.f32 %v4920_v46, 0.0 }
 0xb9f   : > { %v4770_v10 = vmul.f32 %v10808_v41, %v4286_v23  ;;  %v4771_v43 = vmul.f32 %v10812_v36, %v4335_v55  ;;  %v4542_v27 = vpop.f32.mrf.mxu0  ;;  %v4591_v33 = vpop.f32.mrf.mxu1  ;;  %v5087_v18 = vmax.f32 %v5086_v13, %v5038_v63 }
 0xba0   : > { %v5109_v52 = vmax.f32 %v5108_v26, %v5047_v59  ;;  %v5130_v57 = vmax.f32 %v5129_v51, %v5048_v28  ;;  %v4543_v29 = vadd.f32 %v4542_v27, %v11027_v16  ;;  %v4592_v56 = vadd.f32 %v4591_v33, %v11030_v32 }
 0xba1   : > { %v4917_v24 = vadd.f32 %v10829_v42, %v4770_v10  ;;  %v4918_v30 = vadd.f32 %v10833_v60, %v4771_v43 }
 0xba2   : > { %v5110_v3 = vrot.slane %v5109_v52, 4  ;;  %v5131_v48 = vrot.slane %v5130_v57, 4  ;;  %v4656_v41 = vmul.f32 %v11033_v12, %v4543_v29  ;;  %v4657_v36 = vmul.f32 %v11036_v40, %v4592_v56 }
 0xba3   : > { %v5045_v54 = vmax.f32 %v4917_v24, 0.0  ;;  %v5046_v25 = vmax.f32 %v4918_v30, 0.0 }
 0xba4   : > { %v5111_v0 = vmax.f32 %v5109_v52, %v5110_v3  ;;  %v5132_v61 = vmax.f32 %v5130_v57, %v5131_v48  ;;  %v4803_v34 = vadd.f32 %v11051_v50, %v4656_v41  ;;  %v4444_v2 = vpop.f32.mrf.mxu2  ;;  %v4493_v42 = vpop.f32.mrf.mxu3  ;;  %v4804_v45 = vadd.f32 %v11054_v5, %v4657_v36  ;;  %v5226_v3 = vld [vmem:[#allocation5] sm:$0xff] }
 0xba5   : > { %v5067_v60 = vmax.f32 %v5066_v17, %v5045_v54  ;;  %v5088_v21 = vmax.f32 %v5087_v18, %v5046_v25  ;;  %v4445_v37 = vadd.f32 %v4444_v2, %v11065_v31  ;;  %v4494_v4 = vadd.f32 %v4493_v42, %v11068_v11 }
 0xba6   : > { %v5112_v53 = vrot.slane %v5111_v0, 2  ;;  %v5133_v9 = vrot.slane %v5132_v61, 2  ;;  %v4931_v55 = vmax.f32 %v4803_v34, 0.0  ;;  %v4932_v63 = vmax.f32 %v4804_v45, 0.0 }
 0xba7   : > { %v5068_v44 = vrot.slane %v5067_v60, 4  ;;  %v5089_v58 = vrot.slane %v5088_v21, 4  ;;  %v4654_v19 = vmul.f32 %v11077_v35, %v4445_v37  ;;  %v4655_v14 = vmul.f32 %v11080_v47, %v4494_v4  ;;  %v4544_v39 = vpop.f32.mrf.mxu0  ;;  %v4593_v15 = vpop.f32.mrf.mxu1 }
 0xba8   : > { %v5113_v46 = vmax.f32 %v5111_v0, %v5112_v53  ;;  %v5134_v20 = vmax.f32 %v5132_v61, %v5133_v9  ;;  %v4545_v49 = vadd.f32 %v4544_v39, %v11027_v16  ;;  %v4594_v7 = vadd.f32 %v4593_v15, %v11030_v32 }
 0xba9   : > { %v5069_v8 = vmax.f32 %v5067_v60, %v5068_v44  ;;  %v5090_v23 = vmax.f32 %v5088_v21, %v5089_v58  ;;  %v4801_v10 = vadd.f32 %v11106_v38, %v4654_v19  ;;  %v4802_v27 = vadd.f32 %v11112_v6, %v4655_v14  ;;  %v5225_v58 = vld [vmem:[#allocation5 + $0x10] sm:$0xff] }
 0xbaa   : > { %v5114_v26 = vrot.slane %v5113_v46, 1  ;;  %v5135_v22 = vrot.slane %v5134_v20, 1  ;;  %v4664_v51 = vmul.f32 %v11033_v12, %v4545_v49  ;;  %v4665_v59 = vmul.f32 %v11036_v40, %v4594_v7 }
 0xbab   : > { %v5070_v28 = vrot.slane %v5069_v8, 2  ;;  %v5091_v62 = vrot.slane %v5090_v23, 2  ;;  %v4929_v14 = vmax.f32 %v4801_v10, 0.0  ;;  %v4930_v15 = vmax.f32 %v4802_v27, 0.0 }
 0xbac   : > { %v5136_v43 = vmax.f32 %v5134_v20, %v5135_v22  ;;  %v4811_v33 = vadd.f32 %v11051_v50, %v4664_v51  ;;  %v4812_v52 = vadd.f32 %v11054_v5, %v4665_v59  ;;  %v4446_v57 = vpop.f32.mrf.mxu2  ;;  %v4495_v29 = vpop.f32.mrf.mxu3  ;;  %v5115_v30 = vmax.f32 %v5113_v46, %v5114_v26 }
 0xbad   : > { %v5071_v56 = vmax.f32 %v5069_v8, %v5070_v28  ;;  %v5092_v1 = vmax.f32 %v5090_v23, %v5091_v62  ;;  %v4447_v13 = vadd.f32 %v4446_v57, %v11065_v31  ;;  %v4496_v24 = vadd.f32 %v4495_v29, %v11068_v11 }
 0xbae   : > { %v5238_v48 = vrot.slane %v5136_v43, 4  ;;  %v4939_v41 = vmax.f32 %v4811_v33, 0.0  ;;  %v4940_v36 = vmax.f32 %v4812_v52, 0.0 }
 0xbaf   : > { %v5072_v17 = vrot.slane %v5071_v56, 1  ;;  %v5093_v18 = vrot.slane %v5092_v1, 1  ;;  %v4662_v54 = vmul.f32 %v11077_v35, %v4447_v13  ;;  %v4663_v25 = vmul.f32 %v11080_v47, %v4496_v24  ;;  %v4547_v0 = vpop.f32.mrf.mxu0 }
 0xbb0   : > { %v5242_v61 = vsel %vm3510_vm10, %v5115_v30, %v5238_v48  ;;  %v5179_v34 = vmax.f32 %v4931_v55, %v4939_v41  ;;  %v5200_v2 = vmax.f32 %v4932_v63, %v4940_v36  ;;  %v4548_v42 = vadd.f32 %v4547_v0, %v11027_v16  ;;  %v4596_v60 = vpop.f32.mrf.mxu1 }
 0xbb1   : > { %v5250_v21 = vmax.f32 %v5226_v3, %v5242_v61  ;;  %v5094_v37 = vmax.f32 %v5092_v1, %v5093_v18  ;;  %v4809_v4 = vadd.f32 %v11106_v38, %v4662_v54  ;;  %v4810_v53 = vadd.f32 %v11112_v6, %v4663_v25 }
 0xbb2   : > { %v4672_v9 = vmul.f32 %v11033_v12, %v4548_v42  ;;  %v4597_v45 = vadd.f32 %v4596_v60, %v11030_v32  ;;  %v5073_v44 = vmax.f32 %v5071_v56, %v5072_v17  ;;  %v5221_v63 = vlaneseq }
 0xbb3   : > { %5261 = vst [vmem:[#allocation1 + $0x10] ss:$2 sm:$0xff] %v5250_v21  ;;  %v5237_v19 = vrot.slane %v5094_v37, 4  ;;  %v4937_v39 = vmax.f32 %v4809_v4, 0.0  ;;  %v4938_v46 = vmax.f32 %v4810_v53, 0.0  ;;  %v5223_v25 = vstv %s11765_s8 }
 0xbb4   : > { %v4819_v20 = vadd.f32 %v11051_v50, %v4672_v9  ;;  %v4673_v49 = vmul.f32 %v11036_v40, %v4597_v45  ;;  %v4449_v7 = vpop.f32.mrf.mxu2  ;;  %v4498_v8 = vpop.f32.mrf.mxu3  ;;  %v5222_v36 = vshrl.u32 %v5221_v63, 7 }
 0xbb5   : > { %v5241_v23 = vsel %vm3510_vm10, %v5073_v44, %v5237_v19  ;;  %v5137_v55 = vmax.f32 %v4929_v14, %v4937_v39  ;;  %v4450_v26 = vadd.f32 %v4449_v7, %v11065_v31  ;;  %v4499_v22 = vadd.f32 %v4498_v8, %v11068_v11 }
 0xbb6   : > { %v5249_v51 = vmax.f32 %v5225_v58, %v5241_v23  ;;  %v5158_v59 = vmax.f32 %v4930_v15, %v4938_v46  ;;  %v4947_v28 = vmax.f32 %v4819_v20, 0.0  ;;  %v4820_v62 = vadd.f32 %v11054_v5, %v4673_v49 }
 0xbb7   : > { %v4670_v10 = vmul.f32 %v11077_v35, %v4450_v26  ;;  %v4671_v43 = vmul.f32 %v11080_v47, %v4499_v22  ;;  %v4549_v27 = vpop.f32.mrf.mxu0  ;;  %vm11153_vm13 = vcmp.eq.s32.totalorder %v5222_v36, %v5223_v25 }
 0xbb8   : > { %5259 = vst [vmem:[#allocation1] ss:$2 sm:$0xff] %v5249_v51  ;;  %v5180_v33 = vmax.f32 %v5179_v34, %v4947_v28  ;;  %v4948_v52 = vmax.f32 %v4820_v62, 0.0  ;;  %v4550_v57 = vadd.f32 %v4549_v27, %v11027_v16  ;;  %v4598_v29 = vpop.f32.mrf.mxu1 }
 0xbb9   : > { %v4817_v56 = vadd.f32 %v11106_v38, %v4670_v10  ;;  %v4818_v1 = vadd.f32 %v11112_v6, %v4671_v43  ;;  %v4599_v13 = vadd.f32 %v4598_v29, %v11030_v32 }
 0xbba   : > { %v5268_v24 = vld.sshfl [vmem:[#allocation1 + $0x10] sm:$0xff pattern:$0x75316420]  ;;  %v5269_v30 = vld.sshfl [vmem:[#allocation1 + $0x18] sm:$0xff pattern:$0x75316420]  ;;  %v5201_v48 = vmax.f32 %v5200_v2, %v4948_v52  ;;  %v4680_v41 = vmul.f32 %v11033_v12, %v4550_v57 }
 0xbbb   : > { %5288 = vst [vmem:[#allocation1 + $0x10] ss:$2 sm:$0xff] %v5226_v3  ;;  %v4945_v17 = vmax.f32 %v4817_v56, 0.0  ;;  %v4946_v18 = vmax.f32 %v4818_v1, 0.0  ;;  %v4681_v54 = vmul.f32 %v11036_v40, %v4599_v13 }
 0xbbc   : > { %v4827_v0 = vadd.f32 %v11051_v50, %v4680_v41  ;;  %v4451_v61 = vpop.f32.mrf.mxu2  ;;  %v4500_v34 = vpop.f32.mrf.mxu3 }
 0xbbd   : > { %v5138_v42 = vmax.f32 %v5137_v55, %v4945_v17  ;;  %v5159_v60 = vmax.f32 %v5158_v59, %v4946_v18  ;;  %v4828_v21 = vadd.f32 %v11054_v5, %v4681_v54  ;;  %v4452_v37 = vadd.f32 %v4451_v61, %v11065_v31 }
 0xbbe   : > { %v4955_v2 = vmax.f32 %v4827_v0, 0.0  ;;  %v4501_v4 = vadd.f32 %v4500_v34, %v11068_v11 }
 0xbbf   : > { %v5266_v53 = vld.sshfl [vmem:[#allocation1] sm:$0xff pattern:$0x75316420]  ;;  %v5267_v9 = vld.sshfl [vmem:[#allocation1 + $0x8] sm:$0xff pattern:$0x75316420]  ;;  %v4678_v45 = vmul.f32 %v11077_v35, %v4452_v37  ;;  %v4552_v44 = vpop.f32.mrf.mxu0 }
 0xbc0   : > { %5286 = vst [vmem:[#allocation1] ss:$2 sm:$0xff] %v5225_v58  ;;  %v5181_v19 = vmax.f32 %v5180_v33, %v4955_v2  ;;  %v4956_v14 = vmax.f32 %v4828_v21, 0.0  ;;  %v4679_v39 = vmul.f32 %v11080_v47, %v4501_v4  ;;  %v4553_v15 = vadd.f32 %v4552_v44, %v11027_v16  ;;  %v4601_v46 = vpop.f32.mrf.mxu1 }
 0xbc1   : > { %v4825_v20 = vadd.f32 %v11106_v38, %v4678_v45  ;;  %v4602_v49 = vadd.f32 %v4601_v46, %v11030_v32 }
 0xbc2   : > { %v5295_v7 = vld.sshfl [vmem:[#allocation1 + $0x10] sm:$0xff pattern:$0x75316420]  ;;  %v5296_v8 = vld.sshfl [vmem:[#allocation1 + $0x18] sm:$0xff pattern:$0x75316420]  ;;  %v5202_v23 = vmax.f32 %v5201_v48, %v4956_v14  ;;  %v4826_v55 = vadd.f32 %v11112_v6, %v4679_v39  ;;  %v4688_v26 = vmul.f32 %v11033_v12, %v4553_v15 }
 0xbc3   : > { %v5312_v58 = vsel %vm11153_vm13, %v5269_v30, %v5296_v8  ;;  %v4953_v22 = vmax.f32 %v4825_v20, 0.0  ;;  %v4689_v51 = vmul.f32 %v11036_v40, %v4602_v49  ;;  %v5311_v59 = vsel %vm11153_vm13, %v5268_v24, %v5295_v7 }
 0xbc4   : > { %v5326_v28 = vrot.slane %v5312_v58, 4  ;;  %v4954_v62 = vmax.f32 %v4826_v55, 0.0  ;;  %v4835_v63 = vadd.f32 %v11051_v50, %v4688_v26  ;;  %v4454_v10 = vpop.f32.mrf.mxu2  ;;  %v4503_v43 = vpop.f32.mrf.mxu3 }
 0xbc5   : > { %v5139_v27 = vmax.f32 %v5138_v42, %v4953_v22  ;;  %v4836_v33 = vadd.f32 %v11054_v5, %v4689_v51  ;;  %v4455_v52 = vadd.f32 %v4454_v10, %v11065_v31  ;;  %v4504_v57 = vadd.f32 %v4503_v43, %v11068_v11 }
 0xbc6   : > { %v5330_v29 = vsel %vm3510_vm10, %v5311_v59, %v5326_v28  ;;  %v5160_v56 = vmax.f32 %v5159_v60, %v4954_v62  ;;  %v4963_v1 = vmax.f32 %v4835_v63, 0.0 }
 0xbc7   : > { %5338 = vst [vmem:[#allocation5] sm:$0xff] %v5330_v29  ;;  %v4964_v13 = vmax.f32 %v4836_v33, 0.0  ;;  %v4686_v24 = vmul.f32 %v11077_v35, %v4455_v52  ;;  %v4687_v30 = vmul.f32 %v11080_v47, %v4504_v57  ;;  %v4554_v48 = vpop.f32.mrf.mxu0  ;;  %v5293_v41 = vld.sshfl [vmem:[#allocation1] sm:$0xff pattern:$0x75316420] }
 0xbc8   : > { %v5294_v36 = vld.sshfl [vmem:[#allocation1 + $0x8] sm:$0xff pattern:$0x75316420]  ;;  %v11176_v17 = vmax.f32 %v5181_v19, %v4963_v1  ;;  %v4603_v18 = vpop.f32.mrf.mxu1  ;;  %v5309_v42 = vsel %vm11153_vm13, %v5266_v53, %v5293_v41  ;;  %v4555_v8 = vadd.f32 %v4554_v48, %v11027_v16 }
 0xbc9   : > { %v5310_v54 = vsel %vm11153_vm13, %v5267_v9, %v5294_v36  ;;  %v11180_v25 = vmax.f32 %v5202_v23, %v4964_v13  ;;  %v4833_v0 = vadd.f32 %v11106_v38, %v4686_v24  ;;  %v4834_v61 = vadd.f32 %v11112_v6, %v4687_v30 }
 0xbca   : > { %v5325_v34 = vrot.slane %v5310_v54, 4  ;;  %v4604_v23 = vadd.f32 %v4603_v18, %v11030_v32  ;;  %v4696_v58 = vmul.f32 %v11033_v12, %v4555_v8 }
 0xbcb   : > { %v4961_v60 = vmax.f32 %v4833_v0, 0.0  ;;  %v4962_v21 = vmax.f32 %v4834_v61, 0.0 }
 0xbcc   : > { %v5329_v37 = vsel %vm3510_vm10, %v5309_v42, %v5325_v34  ;;  %v4456_v2 = vpop.f32.mrf.mxu2  ;;  %v4505_v4 = vpop.f32.mrf.mxu3  ;;  %v4697_v51 = vmul.f32 %v11036_v40, %v4604_v23 }
 0xbcd   : > { %5337 = vst [vmem:[#allocation5 + $0x10] sm:$0xff] %v5329_v37  ;;  %v11187_v45 = vmax.f32 %v5139_v27, %v4961_v60  ;;  %v11189_v9 = vmax.f32 %v5160_v56, %v4962_v21  ;;  %v4457_v59 = vadd.f32 %v4456_v2, %v11065_v31  ;;  %v4506_v28 = vadd.f32 %v4505_v4, %v11068_v11 }
 0xbce   : > { %v4843_v27 = vadd.f32 %v11051_v50, %v4696_v58  ;;  %v4844_v33 = vadd.f32 %v11054_v5, %v4697_v51 }
 0xbcf   : > { %v4557_v44 = vpop.f32.mrf.mxu0  ;;  %v4694_v52 = vmul.f32 %v11077_v35, %v4457_v59  ;;  %v4695_v57 = vmul.f32 %v11080_v47, %v4506_v28 }
 0xbd0   : > { %v4606_v19 = vpop.f32.mrf.mxu1  ;;  %v4558_v63 = vadd.f32 %v4557_v44, %v11027_v16  ;;  %v4971_v41 = vmax.f32 %v4843_v27, 0.0  ;;  %v4972_v54 = vmax.f32 %v4844_v33, 0.0 }
 0xbd1   : > { %v4607_v10 = vadd.f32 %v4606_v19, %v11030_v32  ;;  %v4841_v0 = vadd.f32 %v11106_v38, %v4694_v52  ;;  %v4842_v61 = vadd.f32 %v11112_v6, %v4695_v57 }
 0xbd2   : > { %v4704_v1 = vmul.f32 %v11033_v12, %v4558_v63  ;;  %v5183_v19 = vmax.f32 %v11176_v17, %v4971_v41 }
 0xbd3   : > { %v4705_v13 = vmul.f32 %v11036_v40, %v4607_v10 }
 0xbd4   : > { %v4459_v14 = vpop.f32.mrf.mxu2  ;;  %v4508_v39 = vpop.f32.mrf.mxu3  ;;  %v4851_v60 = vadd.f32 %v11051_v50, %v4704_v1 }
 0xbd5   : > { %v4460_v43 = vadd.f32 %v4459_v14, %v11065_v31  ;;  %v4509_v30 = vadd.f32 %v4508_v39, %v11068_v11  ;;  %v4852_v21 = vadd.f32 %v11054_v5, %v4705_v13  ;;  %v5204_v39 = vmax.f32 %v11180_v25, %v4972_v54 }
 0xbd6   : > { %v4979_v58 = vmax.f32 %v4851_v60, 0.0 }
 0xbd7   : > { %v4559_v15 = vpop.f32.mrf.mxu0  ;;  %v4702_v24 = vmul.f32 %v11077_v35, %v4460_v43  ;;  %v4703_v2 = vmul.f32 %v11080_v47, %v4509_v30  ;;  %v4980_v51 = vmax.f32 %v4852_v21, 0.0 }
 0xbd8   : > { %v4608_v46 = vpop.f32.mrf.mxu1  ;;  %v4560_v48 = vadd.f32 %v4559_v15, %v11027_v16  ;;  %v4969_v15 = vmax.f32 %v4841_v0, 0.0 }
 0xbd9   : > { %v4609_v36 = vadd.f32 %v4608_v46, %v11030_v32  ;;  %v4849_v37 = vadd.f32 %v11106_v38, %v4702_v24  ;;  %v4970_v46 = vmax.f32 %v4842_v61, 0.0  ;;  %v5184_v24 = vmax.f32 %v5183_v19, %v4979_v58 }
 0xbda   : > { %v4712_v4 = vmul.f32 %v11033_v12, %v4560_v48  ;;  %v5205_v30 = vmax.f32 %v5204_v39, %v4980_v51 }
 0xbdb   : > { %v4713_v14 = vmul.f32 %v11036_v40, %v4609_v36  ;;  %v4977_v63 = vmax.f32 %v4849_v37, 0.0 }
 0xbdc   : > { %v4461_v20 = vpop.f32.mrf.mxu2  ;;  %v4510_v49 = vpop.f32.mrf.mxu3  ;;  %v4859_v17 = vadd.f32 %v11051_v50, %v4712_v4 }
 0xbdd   : > { %v4462_v34 = vadd.f32 %v4461_v20, %v11065_v31  ;;  %v4511_v44 = vadd.f32 %v4510_v49, %v11068_v11  ;;  %v4850_v49 = vadd.f32 %v11112_v6, %v4703_v2  ;;  %v4860_v25 = vadd.f32 %v11054_v5, %v4713_v14 }
 0xbde   : > { %v4987_v36 = vmax.f32 %v4859_v17, 0.0 }
 0xbdf   : > { %v4562_v53 = vpop.f32.mrf.mxu0  ;;  %v4710_v20 = vmul.f32 %v11077_v35, %v4462_v34  ;;  %v4711_v10 = vmul.f32 %v11080_v47, %v4511_v44  ;;  %v4988_v54 = vmax.f32 %v4860_v25, 0.0 }
 0xbe0   : > { %v4611_v7 = vpop.f32.mrf.mxu1  ;;  %v4563_v59 = vadd.f32 %v4562_v53, %v11027_v16  ;;  %v5141_v53 = vmax.f32 %v11187_v45, %v4969_v15  ;;  %v5185_v39 = vmax.f32 %v5184_v24, %v4987_v36 }
 0xbe1   : > { %v4612_v28 = vadd.f32 %v4611_v7, %v11030_v32  ;;  %v5162_v7 = vmax.f32 %v11189_v9, %v4970_v46  ;;  %v4857_v57 = vadd.f32 %v11106_v38, %v4710_v20  ;;  %v5206_v20 = vmax.f32 %v5205_v30, %v4988_v54 }
 0xbe2   : > { %v4720_v48 = vmul.f32 %v11033_v12, %v4563_v59  ;;  %v5142_v41 = vmax.f32 %v5141_v53, %v4977_v63 }
 0xbe4   : > { %v4464_v55 = vpop.f32.mrf.mxu2  ;;  %v4513_v26 = vpop.f32.mrf.mxu3  ;;  %v4867_v2 = vadd.f32 %v11051_v50, %v4720_v48 }
 0xbe5   : > { %v4465_v43 = vadd.f32 %v4464_v55, %v11065_v31  ;;  %v4514_v27 = vadd.f32 %v4513_v26, %v11068_v11  ;;  %v4721_v55 = vmul.f32 %v11036_v40, %v4612_v28  ;;  %v4978_v26 = vmax.f32 %v4850_v49, 0.0 }
 0xbe6   : > { %v4995_v49 = vmax.f32 %v4867_v2, 0.0 }
 0xbe7   : > { %v4564_v22 = vpop.f32.mrf.mxu0  ;;  %v4718_v45 = vmul.f32 %v11077_v35, %v4465_v43  ;;  %v4719_v9 = vmul.f32 %v11080_v47, %v4514_v27  ;;  %v4868_v4 = vadd.f32 %v11054_v5, %v4721_v55  ;;  %v5163_v14 = vmax.f32 %v5162_v7, %v4978_v26 }
 0xbe8   : > { %v4613_v62 = vpop.f32.mrf.mxu1  ;;  %v4565_v33 = vadd.f32 %v4564_v22, %v11027_v16  ;;  %v4858_v22 = vadd.f32 %v11112_v6, %v4711_v10  ;;  %v5186_v36 = vmax.f32 %v5185_v39, %v4995_v49 }
 0xbe9   : > { %v4614_v1 = vadd.f32 %v4613_v62, %v11030_v32  ;;  %v4985_v62 = vmax.f32 %v4857_v57, 0.0  ;;  %v4996_v17 = vmax.f32 %v4868_v4, 0.0 }
 0xbea   : > { %v4728_v0 = vmul.f32 %v11033_v12, %v4565_v33  ;;  %v4986_v15 = vmax.f32 %v4858_v22, 0.0 }
 0xbeb   : > { %v4729_v61 = vmul.f32 %v11036_v40, %v4614_v1  ;;  %v5143_v59 = vmax.f32 %v5142_v41, %v4985_v62  ;;  %v5207_v22 = vmax.f32 %v5206_v20, %v4996_v17 }
 0xbec   : > { %v4466_v29 = vpop.f32.mrf.mxu2  ;;  %v4515_v56 = vpop.f32.mrf.mxu3  ;;  %v4875_v58 = vadd.f32 %v11051_v50, %v4728_v0  ;;  %v5164_v25 = vmax.f32 %v5163_v14, %v4986_v15 }
 0xbed   : > { %v4467_v34 = vadd.f32 %v4466_v29, %v11065_v31  ;;  %v4516_v60 = vadd.f32 %v4515_v56, %v11068_v11  ;;  %v4865_v29 = vadd.f32 %v11106_v38, %v4718_v45  ;;  %v4866_v56 = vadd.f32 %v11112_v6, %v4719_v9 }
 0xbee   : > { %v4876_v28 = vadd.f32 %v11054_v5, %v4729_v61  ;;  %v5003_v57 = vmax.f32 %v4875_v58, 0.0 }
 0xbef   : > { %v4567_v18 = vpop.f32.mrf.mxu0  ;;  %v4993_v53 = vmax.f32 %v4865_v29, 0.0  ;;  %v4994_v7 = vmax.f32 %v4866_v56, 0.0 }
 0xbf0   : > { %v4616_v42 = vpop.f32.mrf.mxu1  ;;  %v4568_v44 = vadd.f32 %v4567_v18, %v11027_v16  ;;  %v4726_v18 = vmul.f32 %v11077_v35, %v4467_v34  ;;  %v5004_v24 = vmax.f32 %v4876_v28, 0.0  ;;  %v5187_v61 = vmax.f32 %v5186_v36, %v5003_v57 }
 0xbf1   : > { %v4617_v19 = vadd.f32 %v4616_v42, %v11030_v32  ;;  %v4727_v42 = vmul.f32 %v11080_v47, %v4516_v60  ;;  %v5144_v0 = vmax.f32 %v5143_v59, %v4993_v53  ;;  %v5165_v62 = vmax.f32 %v5164_v25, %v4994_v7 }
 0xbf2   : > { %v4873_v30 = vadd.f32 %v11106_v38, %v4726_v18 }
 0xbf3   : > { %v4737_v10 = vmul.f32 %v11036_v40, %v4617_v19  ;;  %v4874_v48 = vadd.f32 %v11112_v6, %v4727_v42 }
 0xbf4   : > { %v4469_v8 = vpop.f32.mrf.mxu2  ;;  %v4518_v23 = vpop.f32.mrf.mxu3  ;;  %v5001_v2 = vmax.f32 %v4873_v30, 0.0 }
 0xbf5   : > { %v4470_v46 = vadd.f32 %v4469_v8, %v11065_v31  ;;  %v4736_v8 = vmul.f32 %v11033_v12, %v4568_v44  ;;  %v4519_v27 = vadd.f32 %v4518_v23, %v11068_v11  ;;  %v5002_v4 = vmax.f32 %v4874_v48, 0.0 }
 0xbf6   : > { %v5145_v42 = vmax.f32 %v5144_v0, %v5001_v2 }
 0xbf7   : > { %v4569_v52 = vpop.f32.mrf.mxu0  ;;  %v4734_v43 = vmul.f32 %v11077_v35, %v4470_v46  ;;  %v4883_v23 = vadd.f32 %v11051_v50, %v4736_v8  ;;  %v4735_v45 = vmul.f32 %v11080_v47, %v4519_v27  ;;  %v5166_v49 = vmax.f32 %v5165_v62, %v5002_v4 }
 0xbf8   : > { %v4618_v13 = vpop.f32.mrf.mxu1  ;;  %v4570_v33 = vadd.f32 %v4569_v52, %v11027_v16  ;;  %v4884_v52 = vadd.f32 %v11054_v5, %v4737_v10 }
 0xbf9   : > { %v4619_v1 = vadd.f32 %v4618_v13, %v11030_v32  ;;  %v4881_v54 = vadd.f32 %v11106_v38, %v4734_v43  ;;  %v5011_v14 = vmax.f32 %v4883_v23, 0.0 }
 0xbfa   : > { %v4744_v13 = vmul.f32 %v11033_v12, %v4570_v33  ;;  %v5012_v39 = vmax.f32 %v4884_v52, 0.0 }
 0xbfb   : > { %v4745_v34 = vmul.f32 %v11036_v40, %v4619_v1  ;;  %v5009_v20 = vmax.f32 %v4881_v54, 0.0  ;;  %v5188_v10 = vmax.f32 %v5187_v61, %v5011_v14 }
 0xbfc   : > { %v4471_v21 = vpop.f32.mrf.mxu2  ;;  %v4520_v37 = vpop.f32.mrf.mxu3  ;;  %v4891_v29 = vadd.f32 %v11051_v50, %v4744_v13 }
 0xbfd   : > { %v4472_v55 = vadd.f32 %v4471_v21, %v11065_v31  ;;  %v4521_v9 = vadd.f32 %v4520_v37, %v11068_v11  ;;  %v5208_v21 = vmax.f32 %v5207_v22, %v5004_v24  ;;  %v4882_v37 = vadd.f32 %v11112_v6, %v4735_v45 }
 0xbfe   : > { %v4892_v58 = vadd.f32 %v11054_v5, %v4745_v34  ;;  %v5146_v33 = vmax.f32 %v5145_v42, %v5009_v20  ;;  %v5019_v7 = vmax.f32 %v4891_v29, 0.0 }
 0xbff   : > { %v4572_v51 = vpop.f32.mrf.mxu0  ;;  %v4742_v44 = vmul.f32 %v11077_v35, %v4472_v55  ;;  %v4743_v56 = vmul.f32 %v11080_v47, %v4521_v9  ;;  %v5209_v25 = vmax.f32 %v5208_v21, %v5012_v39  ;;  %v5010_v53 = vmax.f32 %v4882_v37, 0.0 }
 0xc00   : > { %v4621_v63 = vpop.f32.mrf.mxu1  ;;  %v4573_v15 = vadd.f32 %v4572_v51, %v11027_v16  ;;  %v5020_v1 = vmax.f32 %v4892_v58, 0.0  ;;  %v5189_v0 = vmax.f32 %v5188_v10, %v5019_v7 }
 0xc01   : > { %v4622_v46 = vadd.f32 %v4621_v63, %v11030_v32  ;;  %v4889_v51 = vadd.f32 %v11106_v38, %v4742_v44  ;;  %v4890_v57 = vadd.f32 %v11112_v6, %v4743_v56  ;;  %v5167_v9 = vmax.f32 %v5166_v49, %v5010_v53 }
 0xc02   : > { %v4752_v43 = vmul.f32 %v11033_v12, %v4573_v15  ;;  %v5210_v4 = vmax.f32 %v5209_v25, %v5020_v1 }
 0xc03   : > { %v4753_v27 = vmul.f32 %v11036_v40, %v4622_v46  ;;  %v5018_v62 = vmax.f32 %v4890_v57, 0.0 }
 0xc04   : > { %v4474_v41 = vpop.f32.mrf.mxu2  ;;  %v4523_v26 = vpop.f32.mrf.mxu3  ;;  %v4899_v52 = vadd.f32 %v11051_v50, %v4752_v43 }
 0xc05   : > { %v4475_v59 = vadd.f32 %v4474_v41, %v11065_v31  ;;  %v4524_v28 = vadd.f32 %v4523_v26, %v11068_v11  ;;  %v5017_v41 = vmax.f32 %v4889_v51, 0.0  ;;  %v4900_v54 = vadd.f32 %v11054_v5, %v4753_v27 }
 0xc06   : > { %v5027_v46 = vmax.f32 %v4899_v52, 0.0  ;;  %v5168_v56 = vmax.f32 %v5167_v9, %v5018_v62 }
 0xc07   : > { %v4574_v60 = vpop.f32.mrf.mxu0  ;;  %v4750_v24 = vmul.f32 %v11077_v35, %v4475_v59  ;;  %v4751_v30 = vmul.f32 %v11080_v47, %v4524_v28  ;;  %v5147_v44 = vmax.f32 %v5146_v33, %v5017_v41  ;;  %v5028_v20 = vmax.f32 %v4900_v54, 0.0 }
 0xc08   : > { %v4623_v19 = vpop.f32.mrf.mxu1  ;;  %v4575_v18 = vadd.f32 %v4574_v60, %v11027_v16  ;;  %v5190_v27 = vmax.f32 %v5189_v0, %v5027_v46 }
 0xc09   : > { %v4624_v63 = vadd.f32 %v4623_v19, %v11030_v32  ;;  %v4897_v34 = vadd.f32 %v11106_v38, %v4750_v24  ;;  %v4898_v60 = vadd.f32 %v11112_v6, %v4751_v30  ;;  %v5211_v33 = vmax.f32 %v5210_v4, %v5028_v20 }
 0xc0a   : > { %v4760_v48 = vmul.f32 %v11033_v12, %v4575_v18 }
 0xc0b   : > { %v4761_v26 = vmul.f32 %v11036_v40, %v4624_v63  ;;  %v5025_v18 = vmax.f32 %v4897_v34, 0.0  ;;  %v5026_v42 = vmax.f32 %v4898_v60, 0.0 }
 0xc0c   : > { %v4476_v17 = vpop.f32.mrf.mxu2  ;;  %v4525_v8 = vpop.f32.mrf.mxu3  ;;  %v4907_v21 = vadd.f32 %v11051_v50, %v4760_v48 }
 0xc0d   : > { %v4477_v36 = vadd.f32 %v4476_v17, %v11065_v31  ;;  %v4526_v45 = vadd.f32 %v4525_v8, %v11068_v11  ;;  %v4908_v19 = vadd.f32 %v11054_v5, %v4761_v26  ;;  %v5148_v48 = vmax.f32 %v5147_v44, %v5025_v18 }
 0xc0e   : > { %v5035_v49 = vmax.f32 %v4907_v21, 0.0 }
 0xc0f   : > { %v4577_v55 = vpop.f32.mrf.mxu0  ;;  %v4758_v14 = vmul.f32 %v11077_v35, %v4477_v36  ;;  %v4759_v37 = vmul.f32 %v11080_v47, %v4526_v45  ;;  %v5036_v17 = vmax.f32 %v4908_v19, 0.0 }
 0xc10   : > { %v4578_v22 = vadd.f32 %v4577_v55, %v11027_v16  ;;  %v4626_v23 = vpop.f32.mrf.mxu1  ;;  %v5169_v55 = vmax.f32 %v5168_v56, %v5026_v42 }
 0xc11   : > { %v4627_v13 = vadd.f32 %v4626_v23, %v11030_v32  ;;  %v4905_v8 = vadd.f32 %v11106_v38, %v4758_v14  ;;  %v4906_v53 = vadd.f32 %v11112_v6, %v4759_v37  ;;  %v5212_v36 = vmax.f32 %v5211_v33, %v5036_v17 }
 0xc12   : > { %v4768_v61 = vmul.f32 %v11033_v12, %v4578_v22 }
 0xc13   : > { %v4769_v2 = vmul.f32 %v11036_v40, %v4627_v13  ;;  %v5033_v22 = vmax.f32 %v4905_v8, 0.0 }
 0xc14   : > { %v4479_v39 = vpop.f32.mrf.mxu2  ;;  %v4528_v15 = vpop.f32.mrf.mxu3  ;;  %v4915_v58 = vadd.f32 %v11051_v50, %v4768_v61 }
 0xc15   : > { %v4480_v29 = vadd.f32 %v4479_v39, %v11065_v31  ;;  %v4916_v59 = vadd.f32 %v11054_v5, %v4769_v2  ;;  %v4529_v28 = vadd.f32 %v4528_v15, %v11068_v11 }
 0xc16   : > { %v5043_v57 = vmax.f32 %v4915_v58, 0.0 }
 0xc17   : > { %v4766_v51 = vmul.f32 %v11077_v35, %v4480_v29  ;;  %v4579_v63 = vpop.f32.mrf.mxu0  ;;  %v4767_v10 = vmul.f32 %v11080_v47, %v4529_v28  ;;  %v5044_v1 = vmax.f32 %v4916_v59, 0.0 }
 0xc18   : > { %v4580_v25 = vadd.f32 %v4579_v63, %v11027_v16  ;;  %v4628_v43 = vpop.f32.mrf.mxu1  ;;  %v5191_v16 = vmax.f32 %v5190_v27, %v5035_v49 }
 0xc19   : > { %v4629_v7 = vadd.f32 %v4628_v43, %v11030_v32  ;;  %v4913_v24 = vadd.f32 %v11106_v38, %v4766_v51  ;;  %v4914_v41 = vadd.f32 %v11112_v6, %v4767_v10  ;;  %v5034_v32 = vmax.f32 %v4906_v53, 0.0  ;;  %v5228_v43 = vld [vmem:[#allocation5 + $0x8] sm:$0xff] }
 0xc1a   : > { %v4776_v30 = vmul.f32 %v11033_v12, %v4580_v25  ;;  %v5192_v9 = vmax.f32 %v5191_v16, %v5043_v57  ;;  %v5213_v0 = vmax.f32 %v5212_v36, %v5044_v1 }
 0xc1b   : > { %v4777_v26 = vmul.f32 %v11036_v40, %v4629_v7  ;;  %v5041_v62 = vmax.f32 %v4913_v24, 0.0  ;;  %v5042_v34 = vmax.f32 %v4914_v41, 0.0  ;;  %v5170_v4 = vmax.f32 %v5169_v55, %v5034_v32 }
 0xc1c   : > { %v4923_v23 = vadd.f32 %v11051_v50, %v4776_v30  ;;  %v4481_v52 = vpop.f32.mrf.mxu2  ;;  %v4530_v54 = vpop.f32.mrf.mxu3  ;;  %v5149_v50 = vmax.f32 %v5148_v48, %v5033_v22  ;;  %v5227_v30 = vld [vmem:[#allocation5 + $0x18] sm:$0xff] }
 0xc1d   : > { %v4924_v45 = vadd.f32 %v11054_v5, %v4777_v26  ;;  %v4482_v13 = vadd.f32 %v4481_v52, %v11065_v31  ;;  %v4531_v12 = vadd.f32 %v4530_v54, %v11068_v11  ;;  %v5171_v14 = vmax.f32 %v5170_v4, %v5042_v34 }
 0xc1e   : > { %v5051_v61 = vmax.f32 %v4923_v23, 0.0  ;;  %v5150_v19 = vmax.f32 %v5149_v50, %v5041_v62 }
 0xc1f   : > { %v5052_v40 = vmax.f32 %v4924_v45, 0.0  ;;  %v4774_v60 = vmul.f32 %v11077_v35, %v4482_v13  ;;  %v4775_v21 = vmul.f32 %v11080_v47, %v4531_v12 }
 0xc20   : > { %v5193_v2 = vmax.f32 %v5192_v9, %v5051_v61 }
 0xc21   : > { %v5214_v44 = vmax.f32 %v5213_v0, %v5052_v40  ;;  %v4921_v5 = vadd.f32 %v11106_v38, %v4774_v60  ;;  %v4922_v31 = vadd.f32 %v11112_v6, %v4775_v21 }
 0xc22   : > { %v5194_v11 = vrot.slane %v5193_v2, 4 }
 0xc23   : > { %v5215_v39 = vrot.slane %v5214_v44, 4  ;;  %v5049_v15 = vmax.f32 %v4921_v5, 0.0  ;;  %v5050_v46 = vmax.f32 %v4922_v31, 0.0 }
 0xc24   : > { %v5195_v20 = vmax.f32 %v5193_v2, %v5194_v11 }
 0xc25   : > { %v5216_v37 = vmax.f32 %v5214_v44, %v5215_v39  ;;  %v5151_v29 = vmax.f32 %v5150_v19, %v5049_v15  ;;  %v5172_v35 = vmax.f32 %v5171_v14, %v5050_v46 }
 0xc26   : > { %v5196_v56 = vrot.slane %v5195_v20, 2 }
 0xc27   : > { %v5217_v47 = vrot.slane %v5216_v37, 2  ;;  %v5152_v58 = vrot.slane %v5151_v29, 4  ;;  %v5173_v59 = vrot.slane %v5172_v35, 4 }
 0xc28   : > { %v5197_v28 = vmax.f32 %v5195_v20, %v5196_v56 }
 0xc29   : > { %v5218_v18 = vmax.f32 %v5216_v37, %v5217_v47  ;;  %v5153_v42 = vmax.f32 %v5151_v29, %v5152_v58  ;;  %v5174_v38 = vmax.f32 %v5172_v35, %v5173_v59 }
 0xc2a   : > { %v5198_v49 = vrot.slane %v5197_v28, 1 }
 0xc2b   : > { %v5219_v6 = vrot.slane %v5218_v18, 1  ;;  %v5154_v51 = vrot.slane %v5153_v42, 2  ;;  %v5175_v63 = vrot.slane %v5174_v38, 2 }
 0xc2c   : > { %v5199_v25 = vmax.f32 %v5197_v28, %v5198_v49 }
 0xc2d   : > { %v5220_v17 = vmax.f32 %v5218_v18, %v5219_v6  ;;  %v5155_v8 = vmax.f32 %v5153_v42, %v5154_v51  ;;  %v5176_v10 = vmax.f32 %v5174_v38, %v5175_v63 }
 0xc2f   : > { %v5240_v27 = vrot.slane %v5220_v17, 4  ;;  %v5156_v33 = vrot.slane %v5155_v8, 1  ;;  %v5177_v53 = vrot.slane %v5176_v10, 1 }
 0xc31   : > { %v5244_v7 = vsel %vm3510_vm10, %v5199_v25, %v5240_v27  ;;  %v5178_v57 = vmax.f32 %v5176_v10, %v5177_v53  ;;  %v5157_v24 = vmax.f32 %v5155_v8, %v5156_v33 }
 0xc32   : > { %v5252_v1 = vmax.f32 %v5228_v43, %v5244_v7 }
 0xc33   : > { %v5239_v48 = vrot.slane %v5178_v57, 4 }
 0xc34   : > { %5265 = vst [vmem:[#allocation1 + $0x30] ss:$2 sm:$0xff] %v5252_v1 }
 0xc35   : > { %v5243_v55 = vsel %vm3510_vm10, %v5157_v24, %v5239_v48 }
 0xc36   : > { %v5251_v41 = vmax.f32 %v5227_v30, %v5243_v55 }
 0xc38   : > { %5263 = vst [vmem:[#allocation1 + $0x20] ss:$2 sm:$0xff] %v5251_v41 }
 0xc3b   : > { %v5272_v26 = vld.sshfl [vmem:[#allocation1 + $0x30] sm:$0xff pattern:$0x75316420]  ;;  %v5273_v16 = vld.sshfl [vmem:[#allocation1 + $0x38] sm:$0xff pattern:$0x75316420] }
 0xc3c   : > { %5292 = vst [vmem:[#allocation1 + $0x30] ss:$2 sm:$0xff] %v5228_v43 }
 0xc3f   : > { %v5270_v36 = vld.sshfl [vmem:[#allocation1 + $0x20] sm:$0xff pattern:$0x75316420]  ;;  %v5271_v22 = vld.sshfl [vmem:[#allocation1 + $0x28] sm:$0xff pattern:$0x75316420] }
 0xc40   : > { %5290 = vst [vmem:[#allocation1 + $0x20] ss:$2 sm:$0xff] %v5227_v30 }
 0xc43   : > { %v5299_v23 = vld.sshfl [vmem:[#allocation1 + $0x30] sm:$0xff pattern:$0x75316420]  ;;  %v5300_v52 = vld.sshfl [vmem:[#allocation1 + $0x38] sm:$0xff pattern:$0x75316420] }
 0xc44   : > { %v5316_v54 = vsel %vm11153_vm13, %v5273_v16, %v5300_v52  ;;  %v5315_v45 = vsel %vm11153_vm13, %v5272_v26, %v5299_v23 }
 0xc45   : > { %v5328_v32 = vrot.slane %v5316_v54, 4 }
 0xc47   : > { %v5332_v13 = vsel %vm3510_vm10, %v5315_v45, %v5328_v32  ;;  %v5297_v12 = vld.sshfl [vmem:[#allocation1 + $0x20] sm:$0xff pattern:$0x75316420]  ;;  %v5298_v9 = vld.sshfl [vmem:[#allocation1 + $0x28] sm:$0xff pattern:$0x75316420] }
 0xc48   : > { %5340 = vst [vmem:[#allocation5 + $0x8] sm:$0xff] %v5332_v13  ;;  %v5314_v0 = vsel %vm11153_vm13, %v5271_v22, %v5298_v9  ;;  %v5313_v61 = vsel %vm11153_vm13, %v5270_v36, %v5297_v12  ;;  %5342 = sbr.rel (%p9914_p9) target bundleno = 4022 (0xfb6), region = 252 }
 0xc49   : > { %v5327_v62 = vrot.slane %v5314_v0, 4 }
 0xc4b   : > { %v5331_v34 = vsel %vm3510_vm10, %v5313_v61, %v5327_v62 }
 0xc4c   : > { %5339 = vst [vmem:[#allocation5 + $0x18] sm:$0xff] %v5331_v34 }
 0xc4d   : > { %v5407_v40 = vld [vmem:[#allocation26 + $0x1e0] sm:$0xff] }
 0xc4e   : > { %v5535_v60 = vld [vmem:[#allocation26 + $0x5e0] sm:$0xff]  ;;  %5896 = vmatpush.msra.mxu0 %v5407_v40 }
 0xc4f   : > { %v5403_v21 = vld [vmem:[#allocation26 + $0x1c0] sm:$0xff]  ;;  %5936 = vmatpush.msra.mxu2 %v5535_v60 }
 0xc50   : > { %v5531_v50 = vld [vmem:[#allocation26 + $0x5c0] sm:$0xff]  ;;  %5897 = vmatpush.msra.mxu0 %v5403_v21 }
 0xc51   : > { %v5599_v2 = vld [vmem:[#allocation26 + $0x7e0] sm:$0xff]  ;;  %5937 = vmatpush.msra.mxu2 %v5531_v50 }
 0xc52   : > { %v5471_v4 = vld [vmem:[#allocation26 + $0x3e0] sm:$0xff]  ;;  %5956 = vmatpush.msra.mxu3 %v5599_v2 }
 0xc53   : > { %5916 = vmatpush.msra.mxu1 %v5471_v4  ;;  %v5399_v44 = vld [vmem:[#allocation26 + $0x1a0] sm:$0xff] }
 0xc54   : > { %v5527_v5 = vld [vmem:[#allocation26 + $0x5a0] sm:$0xff]  ;;  %5898 = vmatpush.msra.mxu0 %v5399_v44 }
 0xc55   : > { %v5595_v3 = vld [vmem:[#allocation26 + $0x7c0] sm:$0xff]  ;;  %5938 = vmatpush.msra.mxu2 %v5527_v5 }
 0xc56   : > { %v5467_v31 = vld [vmem:[#allocation26 + $0x3c0] sm:$0xff]  ;;  %5957 = vmatpush.msra.mxu3 %v5595_v3 }
 0xc57   : > { %v5395_v19 = vld [vmem:[#allocation26 + $0x180] sm:$0xff]  ;;  %5917 = vmatpush.msra.mxu1 %v5467_v31 }
 0xc58   : > { %v5523_v11 = vld [vmem:[#allocation26 + $0x580] sm:$0xff]  ;;  %5899 = vmatpush.msra.mxu0 %v5395_v19 }
 0xc59   : > { %v5591_v14 = vld [vmem:[#allocation26 + $0x7a0] sm:$0xff]  ;;  %5939 = vmatpush.msra.mxu2 %v5523_v11 }
 0xc5a   : > { %v5463_v39 = vld [vmem:[#allocation26 + $0x3a0] sm:$0xff]  ;;  %5958 = vmatpush.msra.mxu3 %v5591_v14 }
 0xc5b   : > { %v5587_v15 = vld [vmem:[#allocation26 + $0x780] sm:$0xff]  ;;  %5918 = vmatpush.msra.mxu1 %v5463_v39 }
 0xc5c   : > { %v5459_v46 = vld [vmem:[#allocation26 + $0x380] sm:$0xff]  ;;  %5959 = vmatpush.msra.mxu3 %v5587_v15  ;;  %v5344_v15 = vld [vmem:[#allocation5] sm:$0xff] }
 0xc5d   : > { %v5391_v20 = vld [vmem:[#allocation26 + $0x160] sm:$0xff]  ;;  %5919 = vmatpush.msra.mxu1 %v5459_v46  ;;  %5875 = vst [vmem:[#allocation1 + $0x10] ss:$2 sm:$0xff] %v5344_v15  ;;  %v5532_v15 = vld [vmem:[#allocation26 + $0x5c8] sm:$0xff] }
 0xc5e   : > { %v5519_v37 = vld [vmem:[#allocation26 + $0x560] sm:$0xff]  ;;  %5900 = vmatpush.msra.mxu0 %v5391_v20 }
 0xc5f   : > { %v5583_v29 = vld [vmem:[#allocation26 + $0x760] sm:$0xff]  ;;  %5940 = vmatpush.msra.mxu2 %v5519_v37 }
 0xc60   : > { %v5455_v35 = vld [vmem:[#allocation26 + $0x360] sm:$0xff]  ;;  %5960 = vmatpush.msra.mxu3 %v5583_v29 }
 0xc61   : > { %v5387_v56 = vld [vmem:[#allocation26 + $0x140] sm:$0xff]  ;;  %5920 = vmatpush.msra.mxu1 %v5455_v35 }
 0xc62   : > { %v5515_v47 = vld [vmem:[#allocation26 + $0x540] sm:$0xff]  ;;  %5901 = vmatpush.msra.mxu0 %v5387_v56 }
 0xc63   : > { %v5579_v58 = vld [vmem:[#allocation26 + $0x740] sm:$0xff]  ;;  %5941 = vmatpush.msra.mxu2 %v5515_v47 }
 0xc64   : > { %v5451_v59 = vld [vmem:[#allocation26 + $0x340] sm:$0xff]  ;;  %5961 = vmatpush.msra.mxu3 %v5579_v58 }
 0xc65   : > { %v5383_v28 = vld [vmem:[#allocation26 + $0x120] sm:$0xff]  ;;  %5921 = vmatpush.msra.mxu1 %v5451_v59 }
 0xc66   : > { %v5511_v18 = vld [vmem:[#allocation26 + $0x520] sm:$0xff]  ;;  %5902 = vmatpush.msra.mxu0 %v5383_v28 }
 0xc67   : > { %v5575_v42 = vld [vmem:[#allocation26 + $0x720] sm:$0xff]  ;;  %5942 = vmatpush.msra.mxu2 %v5511_v18 }
 0xc68   : > { %v5447_v38 = vld [vmem:[#allocation26 + $0x320] sm:$0xff]  ;;  %5962 = vmatpush.msra.mxu3 %v5575_v42 }
 0xc69   : > { %v5379_v49 = vld [vmem:[#allocation26 + $0x100] sm:$0xff]  ;;  %5922 = vmatpush.msra.mxu1 %v5447_v38 }
 0xc6a   : > { %v5507_v6 = vld [vmem:[#allocation26 + $0x500] sm:$0xff]  ;;  %5903 = vmatpush.msra.mxu0 %v5379_v49 }
 0xc6b   : > { %v5571_v51 = vld [vmem:[#allocation26 + $0x700] sm:$0xff]  ;;  %5943 = vmatpush.msra.mxu2 %v5507_v6 }
 0xc6c   : > { %v5443_v63 = vld [vmem:[#allocation26 + $0x300] sm:$0xff]  ;;  %5963 = vmatpush.msra.mxu3 %v5571_v51 }
 0xc6d   : > { %v5375_v17 = vld [vmem:[#allocation26 + $0xe0] sm:$0xff]  ;;  %5923 = vmatpush.msra.mxu1 %v5443_v63 }
 0xc6e   : > { %v5503_v8 = vld [vmem:[#allocation26 + $0x4e0] sm:$0xff]  ;;  %5904 = vmatpush.msra.mxu0 %v5375_v17 }
 0xc6f   : > { %v5567_v10 = vld [vmem:[#allocation26 + $0x6e0] sm:$0xff]  ;;  %5944 = vmatpush.msra.mxu2 %v5503_v8 }
 0xc70   : > { %v5439_v25 = vld [vmem:[#allocation26 + $0x2e0] sm:$0xff]  ;;  %5964 = vmatpush.msra.mxu3 %v5567_v10 }
 0xc71   : > { %v5371_v43 = vld [vmem:[#allocation26 + $0xc0] sm:$0xff]  ;;  %5924 = vmatpush.msra.mxu1 %v5439_v25  ;;  %v5345_v25 = vld [vmem:[#allocation5 + $0x18] sm:$0xff] }
 0xc72   : > { %v5499_v27 = vld [vmem:[#allocation26 + $0x4c0] sm:$0xff]  ;;  %5905 = vmatpush.msra.mxu0 %v5371_v43  ;;  %5877 = vst [vmem:[#allocation1 + $0x20] ss:$2 sm:$0xff] %v5345_v25  ;;  %v5512_v25 = vld [vmem:[#allocation26 + $0x528] sm:$0xff] }
 0xc73   : > { %v5563_v33 = vld [vmem:[#allocation26 + $0x6c0] sm:$0xff]  ;;  %5945 = vmatpush.msra.mxu2 %v5499_v27 }
 0xc74   : > { %v5435_v53 = vld [vmem:[#allocation26 + $0x2c0] sm:$0xff]  ;;  %5965 = vmatpush.msra.mxu3 %v5563_v33 }
 0xc75   : > { %v5367_v7 = vld [vmem:[#allocation26 + $0xa0] sm:$0xff]  ;;  %5925 = vmatpush.msra.mxu1 %v5435_v53 }
 0xc76   : > { %v5495_v57 = vld [vmem:[#allocation26 + $0x4a0] sm:$0xff]  ;;  %5906 = vmatpush.msra.mxu0 %v5367_v7 }
 0xc77   : > { %v5559_v1 = vld [vmem:[#allocation26 + $0x6a0] sm:$0xff]  ;;  %5946 = vmatpush.msra.mxu2 %v5495_v57 }
 0xc78   : > { %v5431_v24 = vld [vmem:[#allocation26 + $0x2a0] sm:$0xff]  ;;  %5966 = vmatpush.msra.mxu3 %v5559_v1 }
 0xc79   : > { %v5363_v30 = vld [vmem:[#allocation26 + $0x80] sm:$0xff]  ;;  %5926 = vmatpush.msra.mxu1 %v5431_v24 }
 0xc7a   : > { %v5491_v48 = vld [vmem:[#allocation26 + $0x480] sm:$0xff]  ;;  %5907 = vmatpush.msra.mxu0 %v5363_v30 }
 0xc7b   : > { %v5555_v55 = vld [vmem:[#allocation26 + $0x680] sm:$0xff]  ;;  %5947 = vmatpush.msra.mxu2 %v5491_v48 }
 0xc7c   : > { %v5427_v41 = vld [vmem:[#allocation26 + $0x280] sm:$0xff]  ;;  %5967 = vmatpush.msra.mxu3 %v5555_v55 }
 0xc7d   : > { %v5359_v26 = vld [vmem:[#allocation26 + $0x60] sm:$0xff]  ;;  %5927 = vmatpush.msra.mxu1 %v5427_v41 }
 0xc7e   : > { %v5487_v16 = vld [vmem:[#allocation26 + $0x460] sm:$0xff]  ;;  %5908 = vmatpush.msra.mxu0 %v5359_v26 }
 0xc7f   : > { %v5551_v36 = vld [vmem:[#allocation26 + $0x660] sm:$0xff]  ;;  %5948 = vmatpush.msra.mxu2 %v5487_v16  ;;  %v11341_v16 = vld.sshfl [vmem:[#allocation1 + $0x10] sm:$0xff pattern:$0x75316420] }
 0xc80   : > { %v5423_v22 = vld [vmem:[#allocation26 + $0x260] sm:$0xff]  ;;  %5968 = vmatpush.msra.mxu3 %v5551_v36 }
 0xc81   : > { %v5355_v23 = vld [vmem:[#allocation26 + $0x40] sm:$0xff]  ;;  %5928 = vmatpush.msra.mxu1 %v5423_v22 }
 0xc82   : > { %v5483_v52 = vld [vmem:[#allocation26 + $0x440] sm:$0xff]  ;;  %5909 = vmatpush.msra.mxu0 %v5355_v23 }
 0xc83   : > { %v5547_v54 = vld [vmem:[#allocation26 + $0x640] sm:$0xff]  ;;  %5949 = vmatpush.msra.mxu2 %v5483_v52 }
 0xc84   : > { %v5419_v32 = vld [vmem:[#allocation26 + $0x240] sm:$0xff]  ;;  %5969 = vmatpush.msra.mxu3 %v5547_v54 }
 0xc85   : > { %v5351_v45 = vld [vmem:[#allocation26 + $0x20] sm:$0xff]  ;;  %5929 = vmatpush.msra.mxu1 %v5419_v32 }
 0xc86   : > { %v5479_v13 = vld [vmem:[#allocation26 + $0x420] sm:$0xff]  ;;  %5910 = vmatpush.msra.mxu0 %v5351_v45 }
 0xc87   : > { %v5543_v12 = vld [vmem:[#allocation26 + $0x620] sm:$0xff]  ;;  %5950 = vmatpush.msra.mxu2 %v5479_v13 }
 0xc88   : > { %v5415_v9 = vld [vmem:[#allocation26 + $0x220] sm:$0xff]  ;;  %5970 = vmatpush.msra.mxu3 %v5543_v12 }
 0xc89   : > { %v5347_v0 = vld [vmem:[#allocation26] sm:$0xff]  ;;  %5930 = vmatpush.msra.mxu1 %v5415_v9 }
 0xc8a   : > { %v5475_v62 = vld [vmem:[#allocation26 + $0x400] sm:$0xff]  ;;  %5911 = vmatpush.msra.mxu0 %v5347_v0 }
 0xc8b   : > { %v5663_v61 = vld [vmem:[#allocation26 + $0x9e0] sm:$0xff]  ;;  %5951 = vmatpush.msra.mxu2 %v5475_v62 }
 0xc8c   : > { %v5791_v34 = vld [vmem:[#allocation26 + $0xde0] sm:$0xff]  ;;  %5976 = vmatpush.msrb.mxu0 %v5663_v61  ;;  %5952 = vmatmul.f32.vlgmr.msra.gmra.mxu2 %v11341_v16 }
 0xc8d   : > { %v5539_v40 = vld [vmem:[#allocation26 + $0x600] sm:$0xff]  ;;  %6016 = vmatpush.msrb.mxu2 %v5791_v34 }
 0xc8e   : > { %v5411_v60 = vld [vmem:[#allocation26 + $0x200] sm:$0xff]  ;;  %5971 = vmatpush.msra.mxu3 %v5539_v40 }
 0xc8f   : > { %v5659_v21 = vld [vmem:[#allocation26 + $0x9c0] sm:$0xff]  ;;  %5931 = vmatpush.msra.mxu1 %v5411_v60 }
 0xc90   : > { %v5787_v50 = vld [vmem:[#allocation26 + $0xdc0] sm:$0xff]  ;;  %5977 = vmatpush.msrb.mxu0 %v5659_v21 }
 0xc91   : > { %v5855_v2 = vld [vmem:[#allocation26 + $0xfe0] sm:$0xff]  ;;  %6017 = vmatpush.msrb.mxu2 %v5787_v50 }
 0xc92   : > { %v5727_v4 = vld [vmem:[#allocation26 + $0xbe0] sm:$0xff]  ;;  %6036 = vmatpush.msrb.mxu3 %v5855_v2 }
 0xc93   : > { %v5655_v44 = vld [vmem:[#allocation26 + $0x9a0] sm:$0xff]  ;;  %5996 = vmatpush.msrb.mxu1 %v5727_v4 }
 0xc94   : > { %v5783_v5 = vld [vmem:[#allocation26 + $0xda0] sm:$0xff]  ;;  %5978 = vmatpush.msrb.mxu0 %v5655_v44 }
 0xc95   : > { %v5851_v3 = vld [vmem:[#allocation26 + $0xfc0] sm:$0xff]  ;;  %6018 = vmatpush.msrb.mxu2 %v5783_v5  ;;  %v5408_v5 = vld [vmem:[#allocation26 + $0x1e8] sm:$0xff] }
 0xc96   : > { %v5723_v31 = vld [vmem:[#allocation26 + $0xbc0] sm:$0xff]  ;;  %6037 = vmatpush.msrb.mxu3 %v5851_v3  ;;  %v5536_v3 = vld [vmem:[#allocation26 + $0x5e8] sm:$0xff] }
 0xc97   : > { %v5651_v19 = vld [vmem:[#allocation26 + $0x980] sm:$0xff]  ;;  %5997 = vmatpush.msrb.mxu1 %v5723_v31 }
 0xc98   : > { %v5779_v11 = vld [vmem:[#allocation26 + $0xd80] sm:$0xff]  ;;  %5979 = vmatpush.msrb.mxu0 %v5651_v19 }
 0xc99   : > { %v5847_v14 = vld [vmem:[#allocation26 + $0xfa0] sm:$0xff]  ;;  %6019 = vmatpush.msrb.mxu2 %v5779_v11 }
 0xc9a   : > { %v5719_v39 = vld [vmem:[#allocation26 + $0xba0] sm:$0xff]  ;;  %6038 = vmatpush.msrb.mxu3 %v5847_v14 }
 0xc9b   : > { %v5647_v46 = vld [vmem:[#allocation26 + $0x960] sm:$0xff]  ;;  %5998 = vmatpush.msrb.mxu1 %v5719_v39  ;;  %v5404_v39 = vld [vmem:[#allocation26 + $0x1c8] sm:$0xff] }
 0xc9c   : > { %v5775_v20 = vld [vmem:[#allocation26 + $0xd60] sm:$0xff]  ;;  %5980 = vmatpush.msrb.mxu0 %v5647_v46  ;;  %v5600_v46 = vld [vmem:[#allocation26 + $0x7e8] sm:$0xff] }
 0xc9d   : > { %v5843_v37 = vld [vmem:[#allocation26 + $0xf80] sm:$0xff]  ;;  %6020 = vmatpush.msrb.mxu2 %v5775_v20  ;;  %v5472_v20 = vld [vmem:[#allocation26 + $0x3e8] sm:$0xff] }
 0xc9e   : > { %v5715_v29 = vld [vmem:[#allocation26 + $0xb80] sm:$0xff]  ;;  %6039 = vmatpush.msrb.mxu3 %v5843_v37  ;;  %v5400_v37 = vld [vmem:[#allocation26 + $0x1a8] sm:$0xff] }
 0xc9f   : > { %v5343_v35 = vld [vmem:[#allocation5 + $0x10] sm:$0xff]  ;;  %5999 = vmatpush.msrb.mxu1 %v5715_v29  ;;  %v5346_v49 = vld [vmem:[#allocation5 + $0x8] sm:$0xff]  ;;  %v11362_v29 = vld.sshfl [vmem:[#allocation1 + $0x28] sm:$0xff pattern:$0x75316420] }
 0xca0   : > { %v5643_v56 = vld [vmem:[#allocation26 + $0x940] sm:$0xff]  ;;  %5873 = vst [vmem:[#allocation1] ss:$2 sm:$0xff] %v5343_v35  ;;  %v5528_v35 = vld [vmem:[#allocation26 + $0x5a8] sm:$0xff] }
 0xca1   : > { %v5771_v47 = vld [vmem:[#allocation26 + $0xd40] sm:$0xff]  ;;  %5981 = vmatpush.msrb.mxu0 %v5643_v56  ;;  %5879 = vst [vmem:[#allocation1 + $0x30] ss:$2 sm:$0xff] %v5346_v49  ;;  %v5596_v56 = vld [vmem:[#allocation26 + $0x7c8] sm:$0xff] }
 0xca2   : > { %v5839_v58 = vld [vmem:[#allocation26 + $0xf60] sm:$0xff]  ;;  %6021 = vmatpush.msrb.mxu2 %v5771_v47  ;;  %v5468_v47 = vld [vmem:[#allocation26 + $0x3c8] sm:$0xff] }
 0xca3   : > { %v5711_v59 = vld [vmem:[#allocation26 + $0xb60] sm:$0xff]  ;;  %6040 = vmatpush.msrb.mxu3 %v5839_v58  ;;  %v5396_v58 = vld [vmem:[#allocation26 + $0x188] sm:$0xff] }
 0xca4   : > { %v5639_v28 = vld [vmem:[#allocation26 + $0x920] sm:$0xff]  ;;  %6000 = vmatpush.msrb.mxu1 %v5711_v59  ;;  %v5524_v59 = vld [vmem:[#allocation26 + $0x588] sm:$0xff] }
 0xca5   : > { %v5767_v18 = vld [vmem:[#allocation26 + $0xd20] sm:$0xff]  ;;  %5982 = vmatpush.msrb.mxu0 %v5639_v28  ;;  %v5592_v28 = vld [vmem:[#allocation26 + $0x7a8] sm:$0xff] }
 0xca6   : > { %v5835_v42 = vld [vmem:[#allocation26 + $0xf40] sm:$0xff]  ;;  %6022 = vmatpush.msrb.mxu2 %v5767_v18  ;;  %v5464_v18 = vld [vmem:[#allocation26 + $0x3a8] sm:$0xff] }
 0xca7   : > { %v5707_v38 = vld [vmem:[#allocation26 + $0xb40] sm:$0xff]  ;;  %6041 = vmatpush.msrb.mxu3 %v5835_v42  ;;  %v11350_v0 = vld.sshfl [vmem:[#allocation1 + $0x8] sm:$0xff pattern:$0x75316420] }
 0xca8   : > { %v5635_v6 = vld [vmem:[#allocation26 + $0x900] sm:$0xff]  ;;  %6001 = vmatpush.msrb.mxu1 %v5707_v38  ;;  %v11353_v4 = vld.sshfl [vmem:[#allocation1 + $0x30] sm:$0xff pattern:$0x75316420]  ;;  %v5392_v42 = vld [vmem:[#allocation26 + $0x168] sm:$0xff] }
 0xca9   : > { %v5763_v51 = vld [vmem:[#allocation26 + $0xd00] sm:$0xff]  ;;  %5983 = vmatpush.msrb.mxu0 %v5635_v6  ;;  %5932 = vmatmul.f32.vlgmr.msra.gmra.mxu1 %v11350_v0  ;;  %v5520_v38 = vld [vmem:[#allocation26 + $0x568] sm:$0xff] }
 0xcaa   : > { %v5831_v63 = vld [vmem:[#allocation26 + $0xf20] sm:$0xff]  ;;  %6023 = vmatpush.msrb.mxu2 %v5763_v51  ;;  %v5588_v49 = vld [vmem:[#allocation26 + $0x788] sm:$0xff] }
 0xcab   : > { %v5703_v17 = vld [vmem:[#allocation26 + $0xb20] sm:$0xff]  ;;  %6042 = vmatpush.msrb.mxu3 %v5831_v63  ;;  %v5460_v6 = vld [vmem:[#allocation26 + $0x388] sm:$0xff] }
 0xcac   : > { %v5631_v8 = vld [vmem:[#allocation26 + $0x8e0] sm:$0xff]  ;;  %6002 = vmatpush.msrb.mxu1 %v5703_v17  ;;  %v5388_v51 = vld [vmem:[#allocation26 + $0x148] sm:$0xff] }
 0xcad   : > { %v5759_v10 = vld [vmem:[#allocation26 + $0xce0] sm:$0xff]  ;;  %5984 = vmatpush.msrb.mxu0 %v5631_v8  ;;  %v5516_v63 = vld [vmem:[#allocation26 + $0x548] sm:$0xff] }
 0xcae   : > { %v5827_v43 = vld [vmem:[#allocation26 + $0xf00] sm:$0xff]  ;;  %6024 = vmatpush.msrb.mxu2 %v5759_v10  ;;  %v5584_v17 = vld [vmem:[#allocation26 + $0x768] sm:$0xff] }
 0xcaf   : > { %v5699_v27 = vld [vmem:[#allocation26 + $0xb00] sm:$0xff]  ;;  %6043 = vmatpush.msrb.mxu3 %v5827_v43  ;;  %v5456_v8 = vld [vmem:[#allocation26 + $0x368] sm:$0xff] }
 0xcb0   : > { %v5627_v33 = vld [vmem:[#allocation26 + $0x8c0] sm:$0xff]  ;;  %6003 = vmatpush.msrb.mxu1 %v5699_v27  ;;  %v5384_v10 = vld [vmem:[#allocation26 + $0x128] sm:$0xff] }
 0xcb1   : > { %v5755_v53 = vld [vmem:[#allocation26 + $0xcc0] sm:$0xff]  ;;  %5985 = vmatpush.msrb.mxu0 %v5627_v33  ;;  %v5580_v43 = vld [vmem:[#allocation26 + $0x748] sm:$0xff] }
 0xcb2   : > { %v5823_v7 = vld [vmem:[#allocation26 + $0xee0] sm:$0xff]  ;;  %6025 = vmatpush.msrb.mxu2 %v5755_v53  ;;  %v5452_v27 = vld [vmem:[#allocation26 + $0x348] sm:$0xff] }
 0xcb3   : > { %v5695_v57 = vld [vmem:[#allocation26 + $0xae0] sm:$0xff]  ;;  %6044 = vmatpush.msrb.mxu3 %v5823_v7  ;;  %v5380_v33 = vld [vmem:[#allocation26 + $0x108] sm:$0xff] }
 0xcb4   : > { %v5623_v1 = vld [vmem:[#allocation26 + $0x8a0] sm:$0xff]  ;;  %6004 = vmatpush.msrb.mxu1 %v5695_v57  ;;  %v5508_v53 = vld [vmem:[#allocation26 + $0x508] sm:$0xff] }
 0xcb5   : > { %v5751_v24 = vld [vmem:[#allocation26 + $0xca0] sm:$0xff]  ;;  %5986 = vmatpush.msrb.mxu0 %v5623_v1  ;;  %v5576_v7 = vld [vmem:[#allocation26 + $0x728] sm:$0xff] }
 0xcb6   : > { %v5819_v30 = vld [vmem:[#allocation26 + $0xec0] sm:$0xff]  ;;  %6026 = vmatpush.msrb.mxu2 %v5751_v24  ;;  %v5448_v57 = vld [vmem:[#allocation26 + $0x328] sm:$0xff] }
 0xcb7   : > { %v5691_v48 = vld [vmem:[#allocation26 + $0xac0] sm:$0xff]  ;;  %6045 = vmatpush.msrb.mxu3 %v5819_v30  ;;  %v5376_v1 = vld [vmem:[#allocation26 + $0xe8] sm:$0xff] }
 0xcb8   : > { %v5619_v55 = vld [vmem:[#allocation26 + $0x880] sm:$0xff]  ;;  %6005 = vmatpush.msrb.mxu1 %v5691_v48  ;;  %v5504_v24 = vld [vmem:[#allocation26 + $0x4e8] sm:$0xff] }
 0xcb9   : > { %v5747_v41 = vld [vmem:[#allocation26 + $0xc80] sm:$0xff]  ;;  %5987 = vmatpush.msrb.mxu0 %v5619_v55  ;;  %v5572_v30 = vld [vmem:[#allocation26 + $0x708] sm:$0xff] }
 0xcba   : > { %v5815_v26 = vld [vmem:[#allocation26 + $0xea0] sm:$0xff]  ;;  %6027 = vmatpush.msrb.mxu2 %v5747_v41  ;;  %v5444_v48 = vld [vmem:[#allocation26 + $0x308] sm:$0xff] }
 0xcbb   : > { %v5687_v36 = vld [vmem:[#allocation26 + $0xaa0] sm:$0xff]  ;;  %6046 = vmatpush.msrb.mxu3 %v5815_v26  ;;  %v5372_v55 = vld [vmem:[#allocation26 + $0xc8] sm:$0xff] }
 0xcbc   : > { %v5615_v22 = vld [vmem:[#allocation26 + $0x860] sm:$0xff]  ;;  %6006 = vmatpush.msrb.mxu1 %v5687_v36  ;;  %v5500_v41 = vld [vmem:[#allocation26 + $0x4c8] sm:$0xff] }
 0xcbd   : > { %v5743_v23 = vld [vmem:[#allocation26 + $0xc60] sm:$0xff]  ;;  %5988 = vmatpush.msrb.mxu0 %v5615_v22  ;;  %v5568_v26 = vld [vmem:[#allocation26 + $0x6e8] sm:$0xff] }
 0xcbe   : > { %v5811_v52 = vld [vmem:[#allocation26 + $0xe80] sm:$0xff]  ;;  %6028 = vmatpush.msrb.mxu2 %v5743_v23  ;;  %v5440_v36 = vld [vmem:[#allocation26 + $0x2e8] sm:$0xff] }
 0xcbf   : > { %v11344_v54 = vld.sshfl [vmem:[#allocation1] sm:$0xff pattern:$0x75316420]  ;;  %v11346_v32 = vld.sshfl [vmem:[#allocation1 + $0x18] sm:$0xff pattern:$0x75316420]  ;;  %6047 = vmatpush.msrb.mxu3 %v5811_v52 }
 0xcc0   : > { %v5683_v45 = vld [vmem:[#allocation26 + $0xa80] sm:$0xff]  ;;  %5912 = vmatmul.f32.vlgmr.msra.gmra.mxu0 %v11344_v54  ;;  %5972 = vmatmul.f32.vlgmr.msra.gmra.mxu3 %v11346_v32  ;;  %v5368_v22 = vld [vmem:[#allocation26 + $0xa8] sm:$0xff] }
 0xcc1   : > { %v5611_v13 = vld [vmem:[#allocation26 + $0x840] sm:$0xff]  ;;  %6007 = vmatpush.msrb.mxu1 %v5683_v45  ;;  %v5496_v23 = vld [vmem:[#allocation26 + $0x4a8] sm:$0xff] }
 0xcc2   : > { %v5739_v12 = vld [vmem:[#allocation26 + $0xc40] sm:$0xff]  ;;  %5989 = vmatpush.msrb.mxu0 %v5611_v13  ;;  %v5564_v52 = vld [vmem:[#allocation26 + $0x6c8] sm:$0xff] }
 0xcc3   : > { %v5807_v9 = vld [vmem:[#allocation26 + $0xe60] sm:$0xff]  ;;  %6029 = vmatpush.msrb.mxu2 %v5739_v12  ;;  %v5436_v45 = vld [vmem:[#allocation26 + $0x2c8] sm:$0xff] }
 0xcc4   : > { %v5607_v62 = vld [vmem:[#allocation26 + $0x820] sm:$0xff]  ;;  %6048 = vmatpush.msrb.mxu3 %v5807_v9  ;;  %v5364_v13 = vld [vmem:[#allocation26 + $0x88] sm:$0xff] }
 0xcc5   : > { %v5679_v61 = vld [vmem:[#allocation26 + $0xa60] sm:$0xff]  ;;  %5990 = vmatpush.msrb.mxu0 %v5607_v62  ;;  %v5492_v12 = vld [vmem:[#allocation26 + $0x488] sm:$0xff] }
 0xcc6   : > { %v5735_v34 = vld [vmem:[#allocation26 + $0xc20] sm:$0xff]  ;;  %6008 = vmatpush.msrb.mxu1 %v5679_v61  ;;  %v5560_v9 = vld [vmem:[#allocation26 + $0x6a8] sm:$0xff] }
 0xcc7   : > { %v5803_v40 = vld [vmem:[#allocation26 + $0xe40] sm:$0xff]  ;;  %6030 = vmatpush.msrb.mxu2 %v5735_v34  ;;  %v5432_v62 = vld [vmem:[#allocation26 + $0x2a8] sm:$0xff] }
 0xcc8   : > { %v5603_v60 = vld [vmem:[#allocation26 + $0x800] sm:$0xff]  ;;  %6049 = vmatpush.msrb.mxu3 %v5803_v40  ;;  %v5360_v61 = vld [vmem:[#allocation26 + $0x68] sm:$0xff] }
 0xcc9   : > { %v5675_v21 = vld [vmem:[#allocation26 + $0xa40] sm:$0xff]  ;;  %5991 = vmatpush.msrb.mxu0 %v5603_v60  ;;  %v5488_v34 = vld [vmem:[#allocation26 + $0x468] sm:$0xff] }
 0xcca   : > { %v5731_v50 = vld [vmem:[#allocation26 + $0xc00] sm:$0xff]  ;;  %6009 = vmatpush.msrb.mxu1 %v5675_v21  ;;  %v5556_v40 = vld [vmem:[#allocation26 + $0x688] sm:$0xff] }
 0xccb   : > { %v5799_v2 = vld [vmem:[#allocation26 + $0xe20] sm:$0xff]  ;;  %6031 = vmatpush.msrb.mxu2 %v5731_v50  ;;  %6056 = vmatpush.msra.mxu0 %v5408_v5  ;;  %v5428_v60 = vld [vmem:[#allocation26 + $0x288] sm:$0xff] }
 0xccc   : > { %v5671_v44 = vld [vmem:[#allocation26 + $0xa20] sm:$0xff]  ;;  %6050 = vmatpush.msrb.mxu3 %v5799_v2  ;;  %6032 = vmatmul.f32.vlgmr.msrb.gmra.mxu2 %v11353_v4  ;;  %v5356_v21 = vld [vmem:[#allocation26 + $0x48] sm:$0xff] }
 0xccd   : > { %v5795_v31 = vld [vmem:[#allocation26 + $0xe00] sm:$0xff]  ;;  %6010 = vmatpush.msrb.mxu1 %v5671_v44  ;;  %6096 = vmatpush.msra.mxu2 %v5536_v3  ;;  %v5484_v50 = vld [vmem:[#allocation26 + $0x448] sm:$0xff] }
 0xcce   : > { %v11356_v19 = vld.sshfl [vmem:[#allocation1 + $0x20] sm:$0xff pattern:$0x75316420]  ;;  %v11358_v14 = vld.sshfl [vmem:[#allocation1 + $0x38] sm:$0xff pattern:$0x75316420]  ;;  %6051 = vmatpush.msrb.mxu3 %v5795_v31  ;;  %6057 = vmatpush.msra.mxu0 %v5404_v39 }
 0xccf   : > { %v5667_v11 = vld [vmem:[#allocation26 + $0xa00] sm:$0xff]  ;;  %5992 = vmatmul.f32.vlgmr.msrb.gmra.mxu0 %v11356_v19  ;;  %6052 = vmatmul.f32.vlgmr.msrb.gmra.mxu3 %v11358_v14  ;;  %v5552_v2 = vld [vmem:[#allocation26 + $0x668] sm:$0xff] }
 0xcd0   : > { %6011 = vmatpush.msrb.mxu1 %v5667_v11  ;;  %6097 = vmatpush.msra.mxu2 %v5532_v15  ;;  %v5424_v44 = vld [vmem:[#allocation26 + $0x268] sm:$0xff] }
 0xcd1   : > { %6116 = vmatpush.msra.mxu3 %v5600_v46  ;;  %6058 = vmatpush.msra.mxu0 %v5400_v37  ;;  %v5352_v5 = vld [vmem:[#allocation26 + $0x28] sm:$0xff] }
 0xcd2   : > { %6076 = vmatpush.msra.mxu1 %v5472_v20  ;;  %6098 = vmatpush.msra.mxu2 %v5528_v35  ;;  %v5480_v3 = vld [vmem:[#allocation26 + $0x428] sm:$0xff] }
 0xcd3   : > { %6012 = vmatmul.f32.vlgmr.msrb.gmra.mxu1 %v11362_v29  ;;  %6117 = vmatpush.msra.mxu3 %v5596_v56  ;;  %v5548_v31 = vld [vmem:[#allocation26 + $0x648] sm:$0xff] }
 0xcd4   : > { %6077 = vmatpush.msra.mxu1 %v5468_v47  ;;  %6059 = vmatpush.msra.mxu0 %v5396_v58  ;;  %v5420_v11 = vld [vmem:[#allocation26 + $0x248] sm:$0xff] }
 0xcd5   : > { %6099 = vmatpush.msra.mxu2 %v5524_v59  ;;  %6118 = vmatpush.msra.mxu3 %v5592_v28  ;;  %v5348_v39 = vld [vmem:[#allocation26 + $0x8] sm:$0xff] }
 0xcd6   : > { %6078 = vmatpush.msra.mxu1 %v5464_v18  ;;  %6060 = vmatpush.msra.mxu0 %v5392_v42  ;;  %v5476_v15 = vld [vmem:[#allocation26 + $0x408] sm:$0xff] }
 0xcd7   : > { %6100 = vmatpush.msra.mxu2 %v5520_v38  ;;  %6119 = vmatpush.msra.mxu3 %v5588_v49  ;;  %v5544_v46 = vld [vmem:[#allocation26 + $0x628] sm:$0xff] }
 0xcd8   : > { %6079 = vmatpush.msra.mxu1 %v5460_v6  ;;  %6061 = vmatpush.msra.mxu0 %v5388_v51  ;;  %v5416_v20 = vld [vmem:[#allocation26 + $0x228] sm:$0xff] }
 0xcd9   : > { %6101 = vmatpush.msra.mxu2 %v5516_v63  ;;  %6120 = vmatpush.msra.mxu3 %v5584_v17  ;;  %v5664_v37 = vld [vmem:[#allocation26 + $0x9e8] sm:$0xff] }
 0xcda   : > { %6080 = vmatpush.msra.mxu1 %v5456_v8  ;;  %6062 = vmatpush.msra.mxu0 %v5384_v10  ;;  %v5792_v35 = vld [vmem:[#allocation26 + $0xde8] sm:$0xff] }
 0xcdb   : > { %6102 = vmatpush.msra.mxu2 %v5512_v25  ;;  %6121 = vmatpush.msra.mxu3 %v5580_v43  ;;  %v5540_v56 = vld [vmem:[#allocation26 + $0x608] sm:$0xff] }
 0xcdc   : > { %6081 = vmatpush.msra.mxu1 %v5452_v27  ;;  %6063 = vmatpush.msra.mxu0 %v5380_v33  ;;  %v5412_v47 = vld [vmem:[#allocation26 + $0x208] sm:$0xff] }
 0xcdd   : > { %6103 = vmatpush.msra.mxu2 %v5508_v53  ;;  %6122 = vmatpush.msra.mxu3 %v5576_v7  ;;  %v5660_v58 = vld [vmem:[#allocation26 + $0x9c8] sm:$0xff] }
 0xcde   : > { %6082 = vmatpush.msra.mxu1 %v5448_v57  ;;  %6064 = vmatpush.msra.mxu0 %v5376_v1  ;;  %v5788_v59 = vld [vmem:[#allocation26 + $0xdc8] sm:$0xff] }
 0xcdf   : > { %6104 = vmatpush.msra.mxu2 %v5504_v24  ;;  %6123 = vmatpush.msra.mxu3 %v5572_v30  ;;  %v5856_v28 = vld [vmem:[#allocation26 + $0xfe8] sm:$0xff] }
 0xce0   : > { %6083 = vmatpush.msra.mxu1 %v5444_v48  ;;  %6065 = vmatpush.msra.mxu0 %v5372_v55  ;;  %v5728_v18 = vld [vmem:[#allocation26 + $0xbe8] sm:$0xff] }
 0xce1   : > { %6105 = vmatpush.msra.mxu2 %v5500_v41  ;;  %6124 = vmatpush.msra.mxu3 %v5568_v26  ;;  %v5656_v42 = vld [vmem:[#allocation26 + $0x9a8] sm:$0xff] }
 0xce2   : > { %6084 = vmatpush.msra.mxu1 %v5440_v36  ;;  %6066 = vmatpush.msra.mxu0 %v5368_v22  ;;  %v5784_v38 = vld [vmem:[#allocation26 + $0xda8] sm:$0xff] }
 0xce3   : > { %6106 = vmatpush.msra.mxu2 %v5496_v23  ;;  %6125 = vmatpush.msra.mxu3 %v5564_v52  ;;  %v5852_v49 = vld [vmem:[#allocation26 + $0xfc8] sm:$0xff] }
 0xce4   : > { %6085 = vmatpush.msra.mxu1 %v5436_v45  ;;  %6067 = vmatpush.msra.mxu0 %v5364_v13  ;;  %v5724_v6 = vld [vmem:[#allocation26 + $0xbc8] sm:$0xff] }
 0xce5   : > { %6107 = vmatpush.msra.mxu2 %v5492_v12  ;;  %6126 = vmatpush.msra.mxu3 %v5560_v9  ;;  %v5652_v51 = vld [vmem:[#allocation26 + $0x988] sm:$0xff] }
 0xce6   : > { %6086 = vmatpush.msra.mxu1 %v5432_v62  ;;  %6068 = vmatpush.msra.mxu0 %v5360_v61  ;;  %v5780_v63 = vld [vmem:[#allocation26 + $0xd88] sm:$0xff] }
 0xce7   : > { %6108 = vmatpush.msra.mxu2 %v5488_v34  ;;  %6127 = vmatpush.msra.mxu3 %v5556_v40  ;;  %v5848_v17 = vld [vmem:[#allocation26 + $0xfa8] sm:$0xff] }
 0xce8   : > { %6087 = vmatpush.msra.mxu1 %v5428_v60  ;;  %6069 = vmatpush.msra.mxu0 %v5356_v21  ;;  %v5720_v8 = vld [vmem:[#allocation26 + $0xba8] sm:$0xff] }
 0xce9   : > { %6109 = vmatpush.msra.mxu2 %v5484_v50  ;;  %6128 = vmatpush.msra.mxu3 %v5552_v2  ;;  %v5648_v10 = vld [vmem:[#allocation26 + $0x968] sm:$0xff] }
 0xcea   : > { %6088 = vmatpush.msra.mxu1 %v5424_v44  ;;  %6070 = vmatpush.msra.mxu0 %v5352_v5  ;;  %v5776_v25 = vld [vmem:[#allocation26 + $0xd68] sm:$0xff] }
 0xceb   : > { %6110 = vmatpush.msra.mxu2 %v5480_v3  ;;  %6129 = vmatpush.msra.mxu3 %v5548_v31  ;;  %v5844_v43 = vld [vmem:[#allocation26 + $0xf88] sm:$0xff] }
 0xcec   : > { %6089 = vmatpush.msra.mxu1 %v5420_v11  ;;  %6071 = vmatpush.msra.mxu0 %v5348_v39  ;;  %v5716_v27 = vld [vmem:[#allocation26 + $0xb88] sm:$0xff] }
 0xced   : > { %6111 = vmatpush.msra.mxu2 %v5476_v15  ;;  %6130 = vmatpush.msra.mxu3 %v5544_v46  ;;  %v5644_v33 = vld [vmem:[#allocation26 + $0x948] sm:$0xff] }
 0xcee   : > { %6090 = vmatpush.msra.mxu1 %v5416_v20  ;;  %6136 = vmatpush.msrb.mxu0 %v5664_v37  ;;  %v5772_v53 = vld [vmem:[#allocation26 + $0xd48] sm:$0xff] }
 0xcef   : > { %6176 = vmatpush.msrb.mxu2 %v5792_v35  ;;  %6131 = vmatpush.msra.mxu3 %v5540_v56  ;;  %v5840_v7 = vld [vmem:[#allocation26 + $0xf68] sm:$0xff] }
 0xcf0   : > { %6091 = vmatpush.msra.mxu1 %v5412_v47  ;;  %6137 = vmatpush.msrb.mxu0 %v5660_v58  ;;  %v5712_v57 = vld [vmem:[#allocation26 + $0xb68] sm:$0xff] }
 0xcf1   : > { %6177 = vmatpush.msrb.mxu2 %v5788_v59  ;;  %6196 = vmatpush.msrb.mxu3 %v5856_v28  ;;  %v5640_v1 = vld [vmem:[#allocation26 + $0x928] sm:$0xff]  ;;  %v5537_v28 = vld [vmem:[#allocation26 + $0x5f0] sm:$0xff] }
 0xcf2   : > { %6156 = vmatpush.msrb.mxu1 %v5728_v18  ;;  %6138 = vmatpush.msrb.mxu0 %v5656_v42  ;;  %v5768_v24 = vld [vmem:[#allocation26 + $0xd28] sm:$0xff] }
 0xcf3   : > { %6178 = vmatpush.msrb.mxu2 %v5784_v38  ;;  %6197 = vmatpush.msrb.mxu3 %v5852_v49  ;;  %v5836_v30 = vld [vmem:[#allocation26 + $0xf48] sm:$0xff]  ;;  %v5533_v38 = vld [vmem:[#allocation26 + $0x5d0] sm:$0xff] }
 0xcf4   : > { %6157 = vmatpush.msrb.mxu1 %v5724_v6  ;;  %6139 = vmatpush.msrb.mxu0 %v5652_v51  ;;  %v5708_v48 = vld [vmem:[#allocation26 + $0xb48] sm:$0xff]  ;;  %v5601_v49 = vld [vmem:[#allocation26 + $0x7f0] sm:$0xff] }
 0xcf5   : > { %6179 = vmatpush.msrb.mxu2 %v5780_v63  ;;  %6198 = vmatpush.msrb.mxu3 %v5848_v17  ;;  %v5636_v55 = vld [vmem:[#allocation26 + $0x908] sm:$0xff]  ;;  %v5473_v6 = vld [vmem:[#allocation26 + $0x3f0] sm:$0xff] }
 0xcf6   : > { %6158 = vmatpush.msrb.mxu1 %v5720_v8  ;;  %6140 = vmatpush.msrb.mxu0 %v5648_v10  ;;  %v5764_v41 = vld [vmem:[#allocation26 + $0xd08] sm:$0xff]  ;;  %v5401_v51 = vld [vmem:[#allocation26 + $0x1b0] sm:$0xff] }
 0xcf7   : > { %6180 = vmatpush.msrb.mxu2 %v5776_v25  ;;  %6199 = vmatpush.msrb.mxu3 %v5844_v43  ;;  %v5832_v26 = vld [vmem:[#allocation26 + $0xf28] sm:$0xff]  ;;  %v5529_v63 = vld [vmem:[#allocation26 + $0x5b0] sm:$0xff] }
 0xcf8   : > { %6159 = vmatpush.msrb.mxu1 %v5716_v27  ;;  %6141 = vmatpush.msrb.mxu0 %v5644_v33  ;;  %v5704_v36 = vld [vmem:[#allocation26 + $0xb28] sm:$0xff]  ;;  %v5469_v17 = vld [vmem:[#allocation26 + $0x3d0] sm:$0xff] }
 0xcf9   : > { %6181 = vmatpush.msrb.mxu2 %v5772_v53  ;;  %6200 = vmatpush.msrb.mxu3 %v5840_v7  ;;  %v5632_v22 = vld [vmem:[#allocation26 + $0x8e8] sm:$0xff]  ;;  %v5397_v8 = vld [vmem:[#allocation26 + $0x190] sm:$0xff] }
 0xcfa   : > { %6160 = vmatpush.msrb.mxu1 %v5712_v57  ;;  %6142 = vmatpush.msrb.mxu0 %v5640_v1  ;;  %v5760_v23 = vld [vmem:[#allocation26 + $0xce8] sm:$0xff]  ;;  %v5525_v10 = vld [vmem:[#allocation26 + $0x590] sm:$0xff] }
 0xcfb   : > { %6182 = vmatpush.msrb.mxu2 %v5768_v24  ;;  %6201 = vmatpush.msrb.mxu3 %v5836_v30  ;;  %v5828_v52 = vld [vmem:[#allocation26 + $0xf08] sm:$0xff]  ;;  %v5593_v25 = vld [vmem:[#allocation26 + $0x7b0] sm:$0xff] }
 0xcfc   : > { %6161 = vmatpush.msrb.mxu1 %v5708_v48  ;;  %6143 = vmatpush.msrb.mxu0 %v5636_v55  ;;  %v5700_v45 = vld [vmem:[#allocation26 + $0xb08] sm:$0xff]  ;;  %v5393_v43 = vld [vmem:[#allocation26 + $0x170] sm:$0xff] }
 0xcfd   : > { %6183 = vmatpush.msrb.mxu2 %v5764_v41  ;;  %6202 = vmatpush.msrb.mxu3 %v5832_v26  ;;  %v5628_v13 = vld [vmem:[#allocation26 + $0x8c8] sm:$0xff]  ;;  %v5521_v27 = vld [vmem:[#allocation26 + $0x570] sm:$0xff] }
 0xcfe   : > { %6162 = vmatpush.msrb.mxu1 %v5704_v36  ;;  %v5756_v12 = vld [vmem:[#allocation26 + $0xcc8] sm:$0xff]  ;;  %6144 = vmatpush.msrb.mxu0 %v5632_v22  ;;  %v5461_v33 = vld [vmem:[#allocation26 + $0x390] sm:$0xff] }
 0xcff   : > { %6184 = vmatpush.msrb.mxu2 %v5760_v23  ;;  %v5824_v9 = vld [vmem:[#allocation26 + $0xee8] sm:$0xff]  ;;  %6203 = vmatpush.msrb.mxu3 %v5828_v52  ;;  %v5389_v53 = vld [vmem:[#allocation26 + $0x150] sm:$0xff] }
 0xd00   : > { %v5696_v62 = vld [vmem:[#allocation26 + $0xae8] sm:$0xff]  ;;  %6163 = vmatpush.msrb.mxu1 %v5700_v45  ;;  %6145 = vmatpush.msrb.mxu0 %v5628_v13  ;;  %v5517_v7 = vld [vmem:[#allocation26 + $0x550] sm:$0xff] }
 0xd01   : > { %v5624_v61 = vld [vmem:[#allocation26 + $0x8a8] sm:$0xff]  ;;  %6185 = vmatpush.msrb.mxu2 %v5756_v12  ;;  %6204 = vmatpush.msrb.mxu3 %v5824_v9  ;;  %v5585_v57 = vld [vmem:[#allocation26 + $0x770] sm:$0xff] }
 0xd02   : > { %v5752_v34 = vld [vmem:[#allocation26 + $0xca8] sm:$0xff]  ;;  %6164 = vmatpush.msrb.mxu1 %v5696_v62  ;;  %6146 = vmatpush.msrb.mxu0 %v5624_v61  ;;  %v5457_v1 = vld [vmem:[#allocation26 + $0x370] sm:$0xff] }
 0xd03   : > { %v5820_v40 = vld [vmem:[#allocation26 + $0xec8] sm:$0xff]  ;;  %6186 = vmatpush.msrb.mxu2 %v5752_v34  ;;  %6072 = vmatmul.f32.vlgmr.msra.gmra.mxu0 %v11344_v54  ;;  %v5513_v24 = vld [vmem:[#allocation26 + $0x530] sm:$0xff] }
 0xd04   : > { %v5692_v60 = vld [vmem:[#allocation26 + $0xac8] sm:$0xff]  ;;  %6205 = vmatpush.msrb.mxu3 %v5820_v40  ;;  %6112 = vmatmul.f32.vlgmr.msra.gmra.mxu2 %v11341_v16  ;;  %v5581_v30 = vld [vmem:[#allocation26 + $0x750] sm:$0xff] }
 0xd05   : > { %v5620_v21 = vld [vmem:[#allocation26 + $0x888] sm:$0xff]  ;;  %6165 = vmatpush.msrb.mxu1 %v5692_v60  ;;  %6132 = vmatmul.f32.vlgmr.msra.gmra.mxu3 %v11346_v32  ;;  %v5409_v32 = vld [vmem:[#allocation26 + $0x1f0] sm:$0xff] }
 0xd06   : > { %v5748_v50 = vld [vmem:[#allocation26 + $0xc88] sm:$0xff]  ;;  %6147 = vmatpush.msrb.mxu0 %v5620_v21  ;;  %6092 = vmatmul.f32.vlgmr.msra.gmra.mxu1 %v11350_v0  ;;  %v5405_v0 = vld [vmem:[#allocation26 + $0x1d0] sm:$0xff] }
 0xd07   : > { %v5816_v2 = vld [vmem:[#allocation26 + $0xea8] sm:$0xff]  ;;  %6187 = vmatpush.msrb.mxu2 %v5748_v50  ;;  %v5453_v48 = vld [vmem:[#allocation26 + $0x350] sm:$0xff] }
 0xd08   : > { %v5688_v44 = vld [vmem:[#allocation26 + $0xaa8] sm:$0xff]  ;;  %6206 = vmatpush.msrb.mxu3 %v5816_v2  ;;  %v5381_v55 = vld [vmem:[#allocation26 + $0x110] sm:$0xff] }
 0xd09   : > { %v5616_v5 = vld [vmem:[#allocation26 + $0x868] sm:$0xff]  ;;  %6166 = vmatpush.msrb.mxu1 %v5688_v44  ;;  %v5509_v41 = vld [vmem:[#allocation26 + $0x510] sm:$0xff] }
 0xd0a   : > { %v5744_v3 = vld [vmem:[#allocation26 + $0xc68] sm:$0xff]  ;;  %6148 = vmatpush.msrb.mxu0 %v5616_v5  ;;  %v5577_v26 = vld [vmem:[#allocation26 + $0x730] sm:$0xff] }
 0xd0b   : > { %v5812_v31 = vld [vmem:[#allocation26 + $0xe88] sm:$0xff]  ;;  %6188 = vmatpush.msrb.mxu2 %v5744_v3  ;;  %v5449_v36 = vld [vmem:[#allocation26 + $0x330] sm:$0xff] }
 0xd0c   : > { %v5684_v11 = vld [vmem:[#allocation26 + $0xa88] sm:$0xff]  ;;  %6207 = vmatpush.msrb.mxu3 %v5812_v31  ;;  %v5377_v22 = vld [vmem:[#allocation26 + $0xf0] sm:$0xff] }
 0xd0d   : > { %v5612_v39 = vld [vmem:[#allocation26 + $0x848] sm:$0xff]  ;;  %6167 = vmatpush.msrb.mxu1 %v5684_v11  ;;  %v5505_v23 = vld [vmem:[#allocation26 + $0x4f0] sm:$0xff] }
 0xd0e   : > { %v5740_v15 = vld [vmem:[#allocation26 + $0xc48] sm:$0xff]  ;;  %6149 = vmatpush.msrb.mxu0 %v5612_v39  ;;  %v5573_v52 = vld [vmem:[#allocation26 + $0x710] sm:$0xff] }
 0xd0f   : > { %v5808_v46 = vld [vmem:[#allocation26 + $0xe68] sm:$0xff]  ;;  %6189 = vmatpush.msrb.mxu2 %v5740_v15  ;;  %v5445_v45 = vld [vmem:[#allocation26 + $0x310] sm:$0xff] }
 0xd10   : > { %v5608_v20 = vld [vmem:[#allocation26 + $0x828] sm:$0xff]  ;;  %6208 = vmatpush.msrb.mxu3 %v5808_v46  ;;  %v5373_v13 = vld [vmem:[#allocation26 + $0xd0] sm:$0xff] }
 0xd11   : > { %v5680_v37 = vld [vmem:[#allocation26 + $0xa68] sm:$0xff]  ;;  %6150 = vmatpush.msrb.mxu0 %v5608_v20  ;;  %v5501_v12 = vld [vmem:[#allocation26 + $0x4d0] sm:$0xff] }
 0xd12   : > { %v5736_v35 = vld [vmem:[#allocation26 + $0xc28] sm:$0xff]  ;;  %6168 = vmatpush.msrb.mxu1 %v5680_v37  ;;  %v5569_v9 = vld [vmem:[#allocation26 + $0x6f0] sm:$0xff] }
 0xd13   : > { %v5804_v16 = vld [vmem:[#allocation26 + $0xe48] sm:$0xff]  ;;  %6190 = vmatpush.msrb.mxu2 %v5736_v35  ;;  %v5441_v62 = vld [vmem:[#allocation26 + $0x2f0] sm:$0xff] }
 0xd14   : > { %v5604_v56 = vld [vmem:[#allocation26 + $0x808] sm:$0xff]  ;;  %6209 = vmatpush.msrb.mxu3 %v5804_v16  ;;  %v5369_v61 = vld [vmem:[#allocation26 + $0xb0] sm:$0xff] }
 0xd15   : > { %v5676_v47 = vld [vmem:[#allocation26 + $0xa48] sm:$0xff]  ;;  %6151 = vmatpush.msrb.mxu0 %v5604_v56  ;;  %v5497_v34 = vld [vmem:[#allocation26 + $0x4b0] sm:$0xff] }
 0xd16   : > { %v5732_v58 = vld [vmem:[#allocation26 + $0xc08] sm:$0xff]  ;;  %6169 = vmatpush.msrb.mxu1 %v5676_v47  ;;  %6152 = vmatmul.f32.vlgmr.msrb.gmra.mxu0 %v11356_v19  ;;  %v5465_v19 = vld [vmem:[#allocation26 + $0x3b0] sm:$0xff] }
 0xd17   : > { %v5800_v59 = vld [vmem:[#allocation26 + $0xe28] sm:$0xff]  ;;  %6191 = vmatpush.msrb.mxu2 %v5732_v58  ;;  %6216 = vmatpush.msra.mxu0 %v5409_v32  ;;  %v5565_v40 = vld [vmem:[#allocation26 + $0x6d0] sm:$0xff] }
 0xd18   : > { %v5672_v54 = vld [vmem:[#allocation26 + $0xa28] sm:$0xff]  ;;  %6210 = vmatpush.msrb.mxu3 %v5800_v59  ;;  %6192 = vmatmul.f32.vlgmr.msrb.gmra.mxu2 %v11353_v4  ;;  %v5597_v4 = vld [vmem:[#allocation26 + $0x7d0] sm:$0xff] }
 0xd19   : > { %v5796_v18 = vld [vmem:[#allocation26 + $0xe08] sm:$0xff]  ;;  %6170 = vmatpush.msrb.mxu1 %v5672_v54  ;;  %6256 = vmatpush.msra.mxu2 %v5537_v28  ;;  %v5437_v60 = vld [vmem:[#allocation26 + $0x2d0] sm:$0xff] }
 0xd1a   : > { %v5668_v42 = vld [vmem:[#allocation26 + $0xa08] sm:$0xff]  ;;  %6211 = vmatpush.msrb.mxu3 %v5796_v18  ;;  %6217 = vmatpush.msra.mxu0 %v5405_v0  ;;  %v5365_v21 = vld [vmem:[#allocation26 + $0x90] sm:$0xff] }
 0xd1b   : > { %6171 = vmatpush.msrb.mxu1 %v5668_v42  ;;  %6212 = vmatmul.f32.vlgmr.msrb.gmra.mxu3 %v11358_v14  ;;  %v5589_v14 = vld [vmem:[#allocation26 + $0x790] sm:$0xff] }
 0xd1c   : > { %6257 = vmatpush.msra.mxu2 %v5533_v38  ;;  %6276 = vmatpush.msra.mxu3 %v5601_v49  ;;  %v5493_v50 = vld [vmem:[#allocation26 + $0x490] sm:$0xff] }
 0xd1d   : > { %6236 = vmatpush.msra.mxu1 %v5473_v6  ;;  %6218 = vmatpush.msra.mxu0 %v5401_v51  ;;  %v5561_v2 = vld [vmem:[#allocation26 + $0x6b0] sm:$0xff] }
 0xd1e   : > { %6172 = vmatmul.f32.vlgmr.msrb.gmra.mxu1 %v11362_v29  ;;  %6258 = vmatpush.msra.mxu2 %v5529_v63  ;;  %v5385_v29 = vld [vmem:[#allocation26 + $0x130] sm:$0xff] }
 0xd1f   : > { %6277 = vmatpush.msra.mxu3 %v5597_v4  ;;  %6237 = vmatpush.msra.mxu1 %v5469_v17  ;;  %v5433_v44 = vld [vmem:[#allocation26 + $0x2b0] sm:$0xff] }
 0xd20   : > { %6219 = vmatpush.msra.mxu0 %v5397_v8  ;;  %6259 = vmatpush.msra.mxu2 %v5525_v10  ;;  %v5361_v5 = vld [vmem:[#allocation26 + $0x70] sm:$0xff] }
 0xd21   : > { %6278 = vmatpush.msra.mxu3 %v5593_v25  ;;  %6238 = vmatpush.msra.mxu1 %v5465_v19  ;;  %v5489_v3 = vld [vmem:[#allocation26 + $0x470] sm:$0xff] }
 0xd22   : > { %6220 = vmatpush.msra.mxu0 %v5393_v43  ;;  %6260 = vmatpush.msra.mxu2 %v5521_v27  ;;  %v5557_v31 = vld [vmem:[#allocation26 + $0x690] sm:$0xff] }
 0xd23   : > { %6279 = vmatpush.msra.mxu3 %v5589_v14  ;;  %6239 = vmatpush.msra.mxu1 %v5461_v33  ;;  %v5429_v11 = vld [vmem:[#allocation26 + $0x290] sm:$0xff] }
 0xd24   : > { %6221 = vmatpush.msra.mxu0 %v5389_v53  ;;  %6261 = vmatpush.msra.mxu2 %v5517_v7  ;;  %v5357_v39 = vld [vmem:[#allocation26 + $0x50] sm:$0xff] }
 0xd25   : > { %6280 = vmatpush.msra.mxu3 %v5585_v57  ;;  %6240 = vmatpush.msra.mxu1 %v5457_v1  ;;  %v5485_v15 = vld [vmem:[#allocation26 + $0x450] sm:$0xff] }
 0xd26   : > { %6222 = vmatpush.msra.mxu0 %v5385_v29  ;;  %6262 = vmatpush.msra.mxu2 %v5513_v24  ;;  %v5553_v46 = vld [vmem:[#allocation26 + $0x670] sm:$0xff] }
 0xd27   : > { %6281 = vmatpush.msra.mxu3 %v5581_v30  ;;  %6241 = vmatpush.msra.mxu1 %v5453_v48  ;;  %v5425_v20 = vld [vmem:[#allocation26 + $0x270] sm:$0xff] }
 0xd28   : > { %6223 = vmatpush.msra.mxu0 %v5381_v55  ;;  %6263 = vmatpush.msra.mxu2 %v5509_v41  ;;  %v5353_v37 = vld [vmem:[#allocation26 + $0x30] sm:$0xff]  ;;  %v11373_v55 = vld [vmem:[#allocation27] sm:$0xf] }
 0xd29   : > { %6282 = vmatpush.msra.mxu3 %v5577_v26  ;;  %6242 = vmatpush.msra.mxu1 %v5449_v36  ;;  %v5481_v35 = vld [vmem:[#allocation26 + $0x430] sm:$0xff] }
 0xd2a   : > { %6224 = vmatpush.msra.mxu0 %v5377_v22  ;;  %6264 = vmatpush.msra.mxu2 %v5505_v23  ;;  %v5549_v16 = vld [vmem:[#allocation26 + $0x650] sm:$0xff] }
 0xd2b   : > { %6283 = vmatpush.msra.mxu3 %v5573_v52  ;;  %6243 = vmatpush.msra.mxu1 %v5445_v45  ;;  %v5421_v56 = vld [vmem:[#allocation26 + $0x250] sm:$0xff]  ;;  %v5861_v45 = vperm.slane %v11373_v55, 0 }
 0xd2c   : > { %6225 = vmatpush.msra.mxu0 %v5373_v13  ;;  %6265 = vmatpush.msra.mxu2 %v5501_v12  ;;  %v5349_v47 = vld [vmem:[#allocation26 + $0x10] sm:$0xff] }
 0xd2d   : > { %6284 = vmatpush.msra.mxu3 %v5569_v9  ;;  %6244 = vmatpush.msra.mxu1 %v5441_v62  ;;  %v5477_v58 = vld [vmem:[#allocation26 + $0x410] sm:$0xff] }
 0xd2e   : > { %6226 = vmatpush.msra.mxu0 %v5369_v61  ;;  %6266 = vmatpush.msra.mxu2 %v5497_v34  ;;  %v5545_v59 = vld [vmem:[#allocation26 + $0x630] sm:$0xff] }
 0xd2f   : > { %6285 = vmatpush.msra.mxu3 %v5565_v40  ;;  %6245 = vmatpush.msra.mxu1 %v5437_v60  ;;  %v5417_v54 = vld [vmem:[#allocation26 + $0x230] sm:$0xff] }
 0xd30   : > { %6227 = vmatpush.msra.mxu0 %v5365_v21  ;;  %6267 = vmatpush.msra.mxu2 %v5493_v50  ;;  %v5665_v32 = vld [vmem:[#allocation26 + $0x9f0] sm:$0xff] }
 0xd31   : > { %6286 = vmatpush.msra.mxu3 %v5561_v2  ;;  %6246 = vmatpush.msra.mxu1 %v5433_v44  ;;  %v5793_v28 = vld [vmem:[#allocation26 + $0xdf0] sm:$0xff] }
 0xd32   : > { %6228 = vmatpush.msra.mxu0 %v5361_v5  ;;  %6268 = vmatpush.msra.mxu2 %v5489_v3  ;;  %v5541_v18 = vld [vmem:[#allocation26 + $0x610] sm:$0xff]  ;;  %v5933_v5 = vpop.f32.mrf.mxu1 }
 0xd33   : > { %6287 = vmatpush.msra.mxu3 %v5557_v31  ;;  %6247 = vmatpush.msra.mxu1 %v5429_v11  ;;  %v5413_v42 = vld [vmem:[#allocation26 + $0x210] sm:$0xff] }
 0xd34   : > { %6229 = vmatpush.msra.mxu0 %v5357_v39  ;;  %6269 = vmatpush.msra.mxu2 %v5485_v15  ;;  %v5661_v0 = vld [vmem:[#allocation26 + $0x9d0] sm:$0xff] }
 0xd35   : > { %6288 = vmatpush.msra.mxu3 %v5553_v46  ;;  %6248 = vmatpush.msra.mxu1 %v5425_v20  ;;  %v5789_v38 = vld [vmem:[#allocation26 + $0xdd0] sm:$0xff] }
 0xd36   : > { %6230 = vmatpush.msra.mxu0 %v5353_v37  ;;  %6270 = vmatpush.msra.mxu2 %v5481_v35  ;;  %v5857_v49 = vld [vmem:[#allocation26 + $0xff0] sm:$0xff]  ;;  %v5953_v35 = vpop.f32.mrf.mxu2 }
 0xd37   : > { %6289 = vmatpush.msra.mxu3 %v5549_v16  ;;  %6249 = vmatpush.msra.mxu1 %v5421_v56  ;;  %v5729_v6 = vld [vmem:[#allocation26 + $0xbf0] sm:$0xff] }
 0xd38   : > { %6231 = vmatpush.msra.mxu0 %v5349_v47  ;;  %6271 = vmatpush.msra.mxu2 %v5477_v58  ;;  %v5657_v51 = vld [vmem:[#allocation26 + $0x9b0] sm:$0xff] }
 0xd39   : > { %6290 = vmatpush.msra.mxu3 %v5545_v59  ;;  %6250 = vmatpush.msra.mxu1 %v5417_v54  ;;  %v5785_v63 = vld [vmem:[#allocation26 + $0xdb0] sm:$0xff] }
 0xd3a   : > { %6296 = vmatpush.msrb.mxu0 %v5665_v32  ;;  %6336 = vmatpush.msrb.mxu2 %v5793_v28  ;;  %v5853_v4 = vld [vmem:[#allocation26 + $0xfd0] sm:$0xff]  ;;  %v11379_v32 = vld.sshfl [vmem:[#allocation1] sm:$0xff pattern:$0x75316420] }
 0xd3b   : > { %6291 = vmatpush.msra.mxu3 %v5541_v18  ;;  %6251 = vmatpush.msra.mxu1 %v5413_v42  ;;  %v5725_v17 = vld [vmem:[#allocation26 + $0xbd0] sm:$0xff]  ;;  %v11382_v28 = vld.sshfl [vmem:[#allocation1 + $0x18] sm:$0xff pattern:$0x75316420] }
 0xd3c   : > { %6297 = vmatpush.msrb.mxu0 %v5661_v0  ;;  %6337 = vmatpush.msrb.mxu2 %v5789_v38  ;;  %v5653_v8 = vld [vmem:[#allocation26 + $0x990] sm:$0xff] }
 0xd3d   : > { %6356 = vmatpush.msrb.mxu3 %v5857_v49  ;;  %6316 = vmatpush.msrb.mxu1 %v5729_v6  ;;  %v5781_v10 = vld [vmem:[#allocation26 + $0xd90] sm:$0xff]  ;;  %v5913_v61 = vpop.f32.mrf.mxu0 }
 0xd3e   : > { %6298 = vmatpush.msrb.mxu0 %v5657_v51  ;;  %6338 = vmatpush.msrb.mxu2 %v5785_v63  ;;  %v5849_v25 = vld [vmem:[#allocation26 + $0xfb0] sm:$0xff]  ;;  %v5914_v50 = vadd.f32 %v5913_v61, %v5861_v45  ;;  %v5398_v45 = vld [vmem:[#allocation26 + $0x198] sm:$0xff] }
 0xd3f   : > { %v5721_v19 = vld [vmem:[#allocation26 + $0xbb0] sm:$0xff]  ;;  %6357 = vmatpush.msrb.mxu3 %v5853_v4  ;;  %6317 = vmatpush.msrb.mxu1 %v5725_v17 }
 0xd40   : > { %v5649_v43 = vld [vmem:[#allocation26 + $0x970] sm:$0xff]  ;;  %6299 = vmatpush.msrb.mxu0 %v5653_v8  ;;  %6339 = vmatpush.msrb.mxu2 %v5781_v10  ;;  %v5934_v46 = vadd.f32 %v5933_v5, %v5914_v50  ;;  %v5462_v50 = vld [vmem:[#allocation26 + $0x398] sm:$0xff] }
 0xd41   : > { %v5777_v27 = vld [vmem:[#allocation26 + $0xd70] sm:$0xff]  ;;  %6358 = vmatpush.msrb.mxu3 %v5849_v25  ;;  %6318 = vmatpush.msrb.mxu1 %v5721_v19  ;;  %v5410_v19 = vld [vmem:[#allocation26 + $0x1f8] sm:$0xff] }
 0xd42   : > { %v5845_v14 = vld [vmem:[#allocation26 + $0xf90] sm:$0xff]  ;;  %6300 = vmatpush.msrb.mxu0 %v5649_v43  ;;  %6340 = vmatpush.msrb.mxu2 %v5777_v27  ;;  %v5954_v54 = vadd.f32 %v5953_v35, %v5934_v46  ;;  %v5538_v43 = vld [vmem:[#allocation26 + $0x5f8] sm:$0xff]  ;;  %v9505_v35 = vmov 4.0  }
 0xd43   : > { %v5717_v33 = vld [vmem:[#allocation26 + $0xb90] sm:$0xff]  ;;  %6359 = vmatpush.msrb.mxu3 %v5845_v14  ;;  %6232 = vmatmul.f32.vlgmr.msra.gmra.mxu0 %v11379_v32  ;;  %v5973_v42 = vpop.f32.mrf.mxu3  ;;  %v5586_v5 = vld [vmem:[#allocation26 + $0x778] sm:$0xff]  ;;  %8631 = vrcp.f32 %v9505_v35 }
 0xd44   : > { %v5645_v53 = vld [vmem:[#allocation26 + $0x950] sm:$0xff]  ;;  %6319 = vmatpush.msrb.mxu1 %v5717_v33  ;;  %6292 = vmatmul.f32.vlgmr.msra.gmra.mxu3 %v11382_v28  ;;  %v5974_v17 = vadd.f32 %v5973_v42, %v5954_v54  ;;  %v5454_v46 = vld [vmem:[#allocation26 + $0x358] sm:$0xff] }
 0xd45   : > { %v5773_v7 = vld [vmem:[#allocation26 + $0xd50] sm:$0xff]  ;;  %6301 = vmatpush.msrb.mxu0 %v5645_v53  ;;  %v5378_v54 = vld [vmem:[#allocation26 + $0xf8] sm:$0xff] }
 0xd46   : > { %v5841_v57 = vld [vmem:[#allocation26 + $0xf70] sm:$0xff]  ;;  %6341 = vmatpush.msrb.mxu2 %v5773_v7  ;;  %v5406_v7 = vld [vmem:[#allocation26 + $0x1d8] sm:$0xff] }
 0xd47   : > { %v5713_v1 = vld [vmem:[#allocation26 + $0xb70] sm:$0xff]  ;;  %6360 = vmatpush.msrb.mxu3 %v5841_v57  ;;  %v5574_v42 = vld [vmem:[#allocation26 + $0x718] sm:$0xff] }
 0xd48   : > { %v5641_v29 = vld [vmem:[#allocation26 + $0x930] sm:$0xff]  ;;  %6320 = vmatpush.msrb.mxu1 %v5713_v1  ;;  %v5534_v1 = vld [vmem:[#allocation26 + $0x5d8] sm:$0xff] }
 0xd49   : > { %v5769_v24 = vld [vmem:[#allocation26 + $0xd30] sm:$0xff]  ;;  %6302 = vmatpush.msrb.mxu0 %v5641_v29  ;;  %v5602_v29 = vld [vmem:[#allocation26 + $0x7f8] sm:$0xff] }
 0xd4a   : > { %v5837_v30 = vld [vmem:[#allocation26 + $0xf50] sm:$0xff]  ;;  %6342 = vmatpush.msrb.mxu2 %v5769_v24  ;;  %v11391_v24 = vld.sshfl [vmem:[#allocation1 + $0x20] sm:$0xff pattern:$0x75316420]  ;;  %v5790_v35 = vld [vmem:[#allocation26 + $0xdd8] sm:$0xff] }
 0xd4b   : > { %v5709_v48 = vld [vmem:[#allocation26 + $0xb50] sm:$0xff]  ;;  %6361 = vmatpush.msrb.mxu3 %v5837_v30  ;;  %v5474_v30 = vld [vmem:[#allocation26 + $0x3f8] sm:$0xff] }
 0xd4c   : > { %v5637_v41 = vld [vmem:[#allocation26 + $0x910] sm:$0xff]  ;;  %6321 = vmatpush.msrb.mxu1 %v5709_v48  ;;  %v5993_v10 = vpop.f32.mrf.mxu0  ;;  %v5402_v48 = vld [vmem:[#allocation26 + $0x1b8] sm:$0xff] }
 0xd4d   : > { %v5765_v26 = vld [vmem:[#allocation26 + $0xd10] sm:$0xff]  ;;  %6303 = vmatpush.msrb.mxu0 %v5637_v41  ;;  %v5994_v53 = vadd.f32 %v5993_v10, %v5974_v17  ;;  %v11394_v41 = vld.sshfl [vmem:[#allocation1 + $0x38] sm:$0xff pattern:$0x75316420] }
 0xd4e   : > { %v5833_v36 = vld [vmem:[#allocation26 + $0xf30] sm:$0xff]  ;;  %6343 = vmatpush.msrb.mxu2 %v5765_v26  ;;  %v5530_v26 = vld [vmem:[#allocation26 + $0x5b8] sm:$0xff] }
 0xd4f   : > { %v5705_v22 = vld [vmem:[#allocation26 + $0xb30] sm:$0xff]  ;;  %6362 = vmatpush.msrb.mxu3 %v5833_v36  ;;  %v5498_v10 = vld [vmem:[#allocation26 + $0x4b8] sm:$0xff] }
 0xd50   : > { %v5633_v23 = vld [vmem:[#allocation26 + $0x8f0] sm:$0xff]  ;;  %6322 = vmatpush.msrb.mxu1 %v5705_v22  ;;  %v6013_v57 = vpop.f32.mrf.mxu1  ;;  %v5598_v22 = vld [vmem:[#allocation26 + $0x7d8] sm:$0xff] }
 0xd51   : > { %v5761_v52 = vld [vmem:[#allocation26 + $0xcf0] sm:$0xff]  ;;  %6304 = vmatpush.msrb.mxu0 %v5633_v23  ;;  %v6014_v36 = vadd.f32 %v6013_v57, %v5994_v53  ;;  %v5470_v23 = vld [vmem:[#allocation26 + $0x3d8] sm:$0xff] }
 0xd52   : > { %v5829_v13 = vld [vmem:[#allocation26 + $0xf10] sm:$0xff]  ;;  %6344 = vmatpush.msrb.mxu2 %v5761_v52  ;;  %v6033_v52 = vpop.f32.mrf.mxu2  ;;  %v5562_v57 = vld [vmem:[#allocation26 + $0x6b8] sm:$0xff] }
 0xd53   : > { %v5701_v12 = vld [vmem:[#allocation26 + $0xb10] sm:$0xff]  ;;  %6363 = vmatpush.msrb.mxu3 %v5829_v13  ;;  %v5526_v13 = vld [vmem:[#allocation26 + $0x598] sm:$0xff]  ;;  %v6034_v61 = vadd.f32 %v6033_v52, %v6014_v36 }
 0xd54   : > { %v5629_v9 = vld [vmem:[#allocation26 + $0x8d0] sm:$0xff]  ;;  %6323 = vmatpush.msrb.mxu1 %v5701_v12  ;;  %v5430_v36 = vld [vmem:[#allocation26 + $0x298] sm:$0xff] }
 0xd55   : > { %v5757_v62 = vld [vmem:[#allocation26 + $0xcd0] sm:$0xff]  ;;  %6305 = vmatpush.msrb.mxu0 %v5629_v9  ;;  %v5594_v9 = vld [vmem:[#allocation26 + $0x7b8] sm:$0xff] }
 0xd56   : > { %v5825_v34 = vld [vmem:[#allocation26 + $0xef0] sm:$0xff]  ;;  %6345 = vmatpush.msrb.mxu2 %v5757_v62  ;;  %v5466_v62 = vld [vmem:[#allocation26 + $0x3b8] sm:$0xff] }
 0xd57   : > { %v5697_v40 = vld [vmem:[#allocation26 + $0xaf0] sm:$0xff]  ;;  %6364 = vmatpush.msrb.mxu3 %v5825_v34  ;;  %v5394_v34 = vld [vmem:[#allocation26 + $0x178] sm:$0xff] }
 0xd58   : > { %v5625_v60 = vld [vmem:[#allocation26 + $0x8b0] sm:$0xff]  ;;  %6324 = vmatpush.msrb.mxu1 %v5697_v40  ;;  %v5522_v40 = vld [vmem:[#allocation26 + $0x578] sm:$0xff] }
 0xd59   : > { %v5753_v21 = vld [vmem:[#allocation26 + $0xcb0] sm:$0xff]  ;;  %6306 = vmatpush.msrb.mxu0 %v5625_v60  ;;  %v5590_v60 = vld [vmem:[#allocation26 + $0x798] sm:$0xff] }
 0xd5a   : > { %v5821_v2 = vld [vmem:[#allocation26 + $0xed0] sm:$0xff]  ;;  %6346 = vmatpush.msrb.mxu2 %v5753_v21  ;;  %v6053_v21 = vpop.f32.mrf.mxu3 }
 0xd5b   : > { %v5693_v44 = vld [vmem:[#allocation26 + $0xad0] sm:$0xff]  ;;  %6365 = vmatpush.msrb.mxu3 %v5821_v2  ;;  %v5390_v2 = vld [vmem:[#allocation26 + $0x158] sm:$0xff] }
 0xd5c   : > { %v5621_v3 = vld [vmem:[#allocation26 + $0x890] sm:$0xff]  ;;  %6325 = vmatpush.msrb.mxu1 %v5693_v44  ;;  %v5518_v44 = vld [vmem:[#allocation26 + $0x558] sm:$0xff] }
 0xd5d   : > { %v5749_v31 = vld [vmem:[#allocation26 + $0xc90] sm:$0xff]  ;;  %6307 = vmatpush.msrb.mxu0 %v5621_v3  ;;  %v5458_v3 = vld [vmem:[#allocation26 + $0x378] sm:$0xff] }
 0xd5e   : > { %v5817_v11 = vld [vmem:[#allocation26 + $0xeb0] sm:$0xff]  ;;  %6347 = vmatpush.msrb.mxu2 %v5749_v31  ;;  %v11400_v31 = vadd.f32 %v6053_v21, %v6034_v61  ;;  %v5354_v61 = vld [vmem:[#allocation26 + $0x38] sm:$0xff] }
 0xd5f   : > { %v5689_v39 = vld [vmem:[#allocation26 + $0xab0] sm:$0xff]  ;;  %6366 = vmatpush.msrb.mxu3 %v5817_v11  ;;  %v5386_v11 = vld [vmem:[#allocation26 + $0x138] sm:$0xff] }
 0xd60   : > { %v5617_v15 = vld [vmem:[#allocation26 + $0x870] sm:$0xff]  ;;  %6326 = vmatpush.msrb.mxu1 %v5689_v39  ;;  %v5514_v39 = vld [vmem:[#allocation26 + $0x538] sm:$0xff] }
 0xd61   : > { %v5745_v20 = vld [vmem:[#allocation26 + $0xc70] sm:$0xff]  ;;  %6308 = vmatpush.msrb.mxu0 %v5617_v15  ;;  %v5582_v15 = vld [vmem:[#allocation26 + $0x758] sm:$0xff] }
 0xd62   : > { %v5813_v37 = vld [vmem:[#allocation26 + $0xe90] sm:$0xff]  ;;  %6348 = vmatpush.msrb.mxu2 %v5745_v20  ;;  %v5382_v20 = vld [vmem:[#allocation26 + $0x118] sm:$0xff] }
 0xd63   : > { %v11376_v16 = vld.sshfl [vmem:[#allocation1 + $0x10] sm:$0xff pattern:$0x75316420]  ;;  %6367 = vmatpush.msrb.mxu3 %v5813_v37  ;;  %v11385_v51 = vld.sshfl [vmem:[#allocation1 + $0x8] sm:$0xff pattern:$0x75316420] }
 0xd64   : > { %6272 = vmatmul.f32.vlgmr.msra.gmra.mxu2 %v11376_v16  ;;  %v5685_v56 = vld [vmem:[#allocation26 + $0xa90] sm:$0xff]  ;;  %6252 = vmatmul.f32.vlgmr.msra.gmra.mxu1 %v11385_v51  ;;  %v5510_v37 = vld [vmem:[#allocation26 + $0x518] sm:$0xff] }
 0xd65   : > { %v5613_v47 = vld [vmem:[#allocation26 + $0x850] sm:$0xff]  ;;  %6327 = vmatpush.msrb.mxu1 %v5685_v56  ;;  %v5578_v56 = vld [vmem:[#allocation26 + $0x738] sm:$0xff] }
 0xd66   : > { %v5741_v58 = vld [vmem:[#allocation26 + $0xc50] sm:$0xff]  ;;  %6309 = vmatpush.msrb.mxu0 %v5613_v47  ;;  %v5450_v47 = vld [vmem:[#allocation26 + $0x338] sm:$0xff] }
 0xd67   : > { %v5809_v59 = vld [vmem:[#allocation26 + $0xe70] sm:$0xff]  ;;  %6349 = vmatpush.msrb.mxu2 %v5741_v58  ;;  %v6538_v58 = vsel %vm3510_vm10, %v11400_v31, 0.0  ;;  %v5350_v21 = vld [vmem:[#allocation26 + $0x18] sm:$0xff] }
 0xd68   : > { %v5609_v18 = vld [vmem:[#allocation26 + $0x830] sm:$0xff]  ;;  %6368 = vmatpush.msrb.mxu3 %v5809_v59  ;;  %v6577_v59 = vmul.f32 %v11400_v31, %v11400_v31 }
 0xd69   : > { %v5681_v0 = vld [vmem:[#allocation26 + $0xa70] sm:$0xff]  ;;  %6310 = vmatpush.msrb.mxu0 %v5609_v18  ;;  %v5506_v18 = vld [vmem:[#allocation26 + $0x4f8] sm:$0xff] }
 0xd6a   : > { %v5737_v38 = vld [vmem:[#allocation26 + $0xc30] sm:$0xff]  ;;  %6328 = vmatpush.msrb.mxu1 %v5681_v0  ;;  %v5446_v0 = vld [vmem:[#allocation26 + $0x318] sm:$0xff]  ;;  %v6581_v17 = vsel %vm3510_vm10, %v6577_v59, 0.0 }
 0xd6b   : > { %v5805_v49 = vld [vmem:[#allocation26 + $0xe50] sm:$0xff]  ;;  %6350 = vmatpush.msrb.mxu2 %v5737_v38  ;;  %v5374_v38 = vld [vmem:[#allocation26 + $0xd8] sm:$0xff] }
 0xd6c   : > { %v5605_v6 = vld [vmem:[#allocation26 + $0x810] sm:$0xff]  ;;  %6369 = vmatpush.msrb.mxu3 %v5805_v49  ;;  %v5502_v49 = vld [vmem:[#allocation26 + $0x4d8] sm:$0xff] }
 0xd6d   : > { %v5677_v63 = vld [vmem:[#allocation26 + $0xa50] sm:$0xff]  ;;  %6311 = vmatpush.msrb.mxu0 %v5605_v6  ;;  %v6539_v6 = vrot.slane %v6538_v58, 4  ;;  %v5730_v59 = vld [vmem:[#allocation26 + $0xbf8] sm:$0xff] }
 0xd6e   : > { %v5733_v4 = vld [vmem:[#allocation26 + $0xc10] sm:$0xff]  ;;  %6329 = vmatpush.msrb.mxu1 %v5677_v63  ;;  %6312 = vmatmul.f32.vlgmr.msrb.gmra.mxu0 %v11391_v24  ;;  %v5570_v63 = vld [vmem:[#allocation26 + $0x6f8] sm:$0xff] }
 0xd6f   : > { %v5801_v8 = vld [vmem:[#allocation26 + $0xe30] sm:$0xff]  ;;  %6351 = vmatpush.msrb.mxu2 %v5733_v4  ;;  %6376 = vmatpush.msra.mxu0 %v5410_v19  ;;  %v5442_v4 = vld [vmem:[#allocation26 + $0x2f8] sm:$0xff]  ;;  %v6540_v53 = vadd.f32 %v6539_v6, %v6538_v58 }
 0xd70   : > { %v5673_v25 = vld [vmem:[#allocation26 + $0xa30] sm:$0xff]  ;;  %6370 = vmatpush.msrb.mxu3 %v5801_v8  ;;  %v5370_v8 = vld [vmem:[#allocation26 + $0xb8] sm:$0xff] }
 0xd71   : > { %v5797_v27 = vld [vmem:[#allocation26 + $0xe10] sm:$0xff]  ;;  %6330 = vmatpush.msrb.mxu1 %v5673_v25  ;;  %6416 = vmatpush.msra.mxu2 %v5538_v43  ;;  %v11407_v25 = vpop.eup %8631  ;;  %v5566_v19 = vld [vmem:[#allocation26 + $0x6d8] sm:$0xff]  ;;  %v6541_v52 = vrot.slane %v6540_v53, 2 }
 0xd72   : > { %v11388_v14 = vld.sshfl [vmem:[#allocation1 + $0x30] sm:$0xff pattern:$0x75316420]  ;;  %6371 = vmatpush.msrb.mxu3 %v5797_v27  ;;  %6377 = vmatpush.msra.mxu0 %v5406_v7  ;;  %v11397_v12 = vld.sshfl [vmem:[#allocation1 + $0x28] sm:$0xff pattern:$0x75316420]  ;;  %vm6571_vm14 = vweird.f32 %v11407_v25 }
 0xd73   : > { %6352 = vmatmul.f32.vlgmr.msrb.gmra.mxu2 %v11388_v14  ;;  %v5669_v33 = vld [vmem:[#allocation26 + $0xa10] sm:$0xff]  ;;  %6372 = vmatmul.f32.vlgmr.msrb.gmra.mxu3 %v11394_v41  ;;  %v5438_v43 = vld [vmem:[#allocation26 + $0x2d8] sm:$0xff]  ;;  %v6582_v7 = vrot.slane %v6581_v17, 4 }
 0xd74   : > { %6331 = vmatpush.msrb.mxu1 %v5669_v33  ;;  %6417 = vmatpush.msra.mxu2 %v5534_v1  ;;  %v5366_v27 = vld [vmem:[#allocation26 + $0x98] sm:$0xff] }
 0xd75   : > { %6436 = vmatpush.msra.mxu3 %v5602_v29  ;;  %6378 = vmatpush.msra.mxu0 %v5402_v48  ;;  %v5494_v33 = vld [vmem:[#allocation26 + $0x498] sm:$0xff]  ;;  %v6567_v29 = vmul.f32 4.0, %v11407_v25 }
 0xd76   : > { %6396 = vmatpush.msra.mxu1 %v5474_v30  ;;  %6418 = vmatpush.msra.mxu2 %v5530_v26  ;;  %v5434_v1 = vld [vmem:[#allocation26 + $0x2b8] sm:$0xff] }
 0xd77   : > { %6332 = vmatmul.f32.vlgmr.msrb.gmra.mxu1 %v11397_v12  ;;  %6437 = vmatpush.msra.mxu3 %v5598_v22  ;;  %v5362_v30 = vld [vmem:[#allocation26 + $0x78] sm:$0xff] }
 0xd78   : > { %6397 = vmatpush.msra.mxu1 %v5470_v23  ;;  %6379 = vmatpush.msra.mxu0 %v5398_v45  ;;  %v5490_v48 = vld [vmem:[#allocation26 + $0x478] sm:$0xff]  ;;  %v6583_v45 = vadd.f32 %v6582_v7, %v6581_v17 }
 0xd79   : > { %6419 = vmatpush.msra.mxu2 %v5526_v13  ;;  %6438 = vmatpush.msra.mxu3 %v5594_v9  ;;  %v5558_v26 = vld [vmem:[#allocation26 + $0x698] sm:$0xff] }
 0xd7a   : > { %6398 = vmatpush.msra.mxu1 %v5466_v62  ;;  %6380 = vmatpush.msra.mxu0 %v5394_v34  ;;  %v5358_v22 = vld [vmem:[#allocation26 + $0x58] sm:$0xff]  ;;  %v6568_v62 = vsub.f32 1.0, %v6567_v29 }
 0xd7b   : > { %6420 = vmatpush.msra.mxu2 %v5522_v40  ;;  %6439 = vmatpush.msra.mxu3 %v5590_v60  ;;  %v5486_v23 = vld [vmem:[#allocation26 + $0x458] sm:$0xff] }
 0xd7c   : > { %6399 = vmatpush.msra.mxu1 %v5462_v50  ;;  %6381 = vmatpush.msra.mxu0 %v5390_v2  ;;  %v5554_v13 = vld [vmem:[#allocation26 + $0x678] sm:$0xff]  ;;  %v6542_v2 = vadd.f32 %v6541_v52, %v6540_v53 }
 0xd7d   : > { %6421 = vmatpush.msra.mxu2 %v5518_v44  ;;  %6440 = vmatpush.msra.mxu3 %v5586_v5  ;;  %v5426_v9 = vld [vmem:[#allocation26 + $0x278] sm:$0xff]  ;;  %v6584_v44 = vrot.slane %v6583_v45, 2 }
 0xd7e   : > { %6400 = vmatpush.msra.mxu1 %v5458_v3  ;;  %6382 = vmatpush.msra.mxu0 %v5386_v11  ;;  %v5482_v34 = vld [vmem:[#allocation26 + $0x438] sm:$0xff]  ;;  %v6569_v11 = vmul.f32 %v11407_v25, %v6568_v62  ;;  %v5862_v62 = vperm.slane %v11373_v55, 1 }
 0xd7f   : > { %6422 = vmatpush.msra.mxu2 %v5514_v39  ;;  %6441 = vmatpush.msra.mxu3 %v5582_v15  ;;  %v5550_v40 = vld [vmem:[#allocation26 + $0x658] sm:$0xff] }
 0xd80   : > { %6401 = vmatpush.msra.mxu1 %v5454_v46  ;;  %6383 = vmatpush.msra.mxu0 %v5382_v20  ;;  %v5422_v60 = vld [vmem:[#allocation26 + $0x258] sm:$0xff] }
 0xd81   : > { %6423 = vmatpush.msra.mxu2 %v5510_v37  ;;  %6442 = vmatpush.msra.mxu3 %v5578_v56  ;;  %v5478_v50 = vld [vmem:[#allocation26 + $0x418] sm:$0xff]  ;;  %v6543_v56 = vrot.slane %v6542_v2, 1 }
 0xd82   : > { %6402 = vmatpush.msra.mxu1 %v5450_v47  ;;  %6384 = vmatpush.msra.mxu0 %v5378_v54  ;;  %v5546_v5 = vld [vmem:[#allocation26 + $0x638] sm:$0xff]  ;;  %v6585_v47 = vadd.f32 %v6584_v44, %v6583_v45  ;;  %v6570_v54 = vadd.f32 %v11407_v25, %v6569_v11 }
 0xd83   : > { %6424 = vmatpush.msra.mxu2 %v5506_v18  ;;  %6443 = vmatpush.msra.mxu3 %v5574_v42  ;;  %v5418_v3 = vld [vmem:[#allocation26 + $0x238] sm:$0xff] }
 0xd84   : > { %6403 = vmatpush.msra.mxu1 %v5446_v0  ;;  %6385 = vmatpush.msra.mxu0 %v5374_v38  ;;  %v5666_v39 = vld [vmem:[#allocation26 + $0x9f8] sm:$0xff] }
 0xd85   : > { %6425 = vmatpush.msra.mxu2 %v5502_v49  ;;  %6444 = vmatpush.msra.mxu3 %v5570_v63  ;;  %v5794_v15 = vld [vmem:[#allocation26 + $0xdf8] sm:$0xff]  ;;  %v6544_v63 = vadd.f32 %v6543_v56, %v6542_v2  ;;  %v6073_v2 = vpop.f32.mrf.mxu0 }
 0xd86   : > { %6404 = vmatpush.msra.mxu1 %v5442_v4  ;;  %6386 = vmatpush.msra.mxu0 %v5370_v8  ;;  %v5542_v46 = vld [vmem:[#allocation26 + $0x618] sm:$0xff]  ;;  %v6586_v4 = vrot.slane %v6585_v47, 1  ;;  %v6074_v11 = vadd.f32 %v6073_v2, %v5862_v62 }
 0xd87   : > { %6426 = vmatpush.msra.mxu2 %v5498_v10  ;;  %6445 = vmatpush.msra.mxu3 %v5566_v19  ;;  %v5414_v20 = vld [vmem:[#allocation26 + $0x218] sm:$0xff]  ;;  %v11414_v10 = vsel %vm6571_vm14, %v11407_v25, %v6570_v54 }
 0xd88   : > { %6405 = vmatpush.msra.mxu1 %v5438_v43  ;;  %6387 = vmatpush.msra.mxu0 %v5366_v27  ;;  %v5662_v37 = vld [vmem:[#allocation26 + $0x9d8] sm:$0xff] }
 0xd89   : > { %6427 = vmatpush.msra.mxu2 %v5494_v33  ;;  %6446 = vmatpush.msra.mxu3 %v5562_v57  ;;  %v5858_v58 = vld [vmem:[#allocation26 + $0xff8] sm:$0xff]  ;;  %v11417_v57 = vmul.f32 %v11414_v10, %v6544_v63 }
 0xd8a   : > { %6406 = vmatpush.msra.mxu1 %v5434_v1  ;;  %6388 = vmatpush.msra.mxu0 %v5362_v30  ;;  %v5658_v18 = vld [vmem:[#allocation26 + $0x9b8] sm:$0xff]  ;;  %v6587_v1 = vadd.f32 %v6586_v4, %v6585_v47 }
 0xd8b   : > { %6428 = vmatpush.msra.mxu2 %v5490_v48  ;;  %6447 = vmatpush.msra.mxu3 %v5558_v26  ;;  %v5786_v42 = vld [vmem:[#allocation26 + $0xdb8] sm:$0xff]  ;;  %v6613_v45 = vmul.f32 %v11417_v57, %v11417_v57 }
 0xd8c   : > { %6407 = vmatpush.msra.mxu1 %v5430_v36  ;;  %6389 = vmatpush.msra.mxu0 %v5358_v22  ;;  %v5854_v0 = vld [vmem:[#allocation26 + $0xfd8] sm:$0xff]  ;;  %v6609_v52 = vmul.f32 %v6587_v1, %v11414_v10 }
 0xd8d   : > { %6429 = vmatpush.msra.mxu2 %v5486_v23  ;;  %6448 = vmatpush.msra.mxu3 %v5554_v13  ;;  %v5726_v38 = vld [vmem:[#allocation26 + $0xbd8] sm:$0xff] }
 0xd8e   : > { %6408 = vmatpush.msra.mxu1 %v5426_v9  ;;  %6390 = vmatpush.msra.mxu0 %v5354_v61  ;;  %v5654_v49 = vld [vmem:[#allocation26 + $0x998] sm:$0xff]  ;;  %v6617_v44 = vsub.f32 %v6609_v52, %v6613_v45 }
 0xd8f   : > { %6430 = vmatpush.msra.mxu2 %v5482_v34  ;;  %6449 = vmatpush.msra.mxu3 %v5550_v40  ;;  %v5782_v6 = vld [vmem:[#allocation26 + $0xd98] sm:$0xff] }
 0xd90   : > { %6409 = vmatpush.msra.mxu1 %v5422_v60  ;;  %6391 = vmatpush.msra.mxu0 %v5350_v21  ;;  %v5850_v17 = vld [vmem:[#allocation26 + $0xfb8] sm:$0xff] }
 0xd91   : > { %6431 = vmatpush.msra.mxu2 %v5478_v50  ;;  %6450 = vmatpush.msra.mxu3 %v5546_v5  ;;  %v5722_v8 = vld [vmem:[#allocation26 + $0xbb8] sm:$0xff] }
 0xd92   : > { %6410 = vmatpush.msra.mxu1 %v5418_v3  ;;  %6456 = vmatpush.msrb.mxu0 %v5666_v39  ;;  %v5650_v19 = vld [vmem:[#allocation26 + $0x978] sm:$0xff] }
 0xd93   : > { %6496 = vmatpush.msrb.mxu2 %v5794_v15  ;;  %6451 = vmatpush.msra.mxu3 %v5542_v46  ;;  %v5778_v43 = vld [vmem:[#allocation26 + $0xd78] sm:$0xff] }
 0xd94   : > { %6411 = vmatpush.msra.mxu1 %v5414_v20  ;;  %6457 = vmatpush.msrb.mxu0 %v5662_v37  ;;  %v5846_v27 = vld [vmem:[#allocation26 + $0xf98] sm:$0xff]  ;;  %v6093_v20 = vpop.f32.mrf.mxu1  ;;  %v6113_v37 = vpop.f32.mrf.mxu2 }
 0xd95   : > { %6497 = vmatpush.msrb.mxu2 %v5790_v35  ;;  %6516 = vmatpush.msrb.mxu3 %v5858_v58  ;;  %v5718_v33 = vld [vmem:[#allocation26 + $0xb98] sm:$0xff]  ;;  %v6094_v47 = vadd.f32 %v6093_v20, %v6074_v11  ;;  %v11423_v58 = vadd.f32 1e-05, %v6617_v44 }
 0xd96   : > { %6476 = vmatpush.msrb.mxu1 %v5730_v59  ;;  %6458 = vmatpush.msrb.mxu0 %v5658_v18  ;;  %v5646_v53 = vld [vmem:[#allocation26 + $0x958] sm:$0xff] }
 0xd97   : > { %6498 = vmatpush.msrb.mxu2 %v5786_v42  ;;  %6517 = vmatpush.msrb.mxu3 %v5854_v0  ;;  %v5774_v7 = vld [vmem:[#allocation26 + $0xd58] sm:$0xff]  ;;  %v6114_v42 = vadd.f32 %v6113_v37, %v6094_v47  ;;  %v6133_v0 = vpop.f32.mrf.mxu3  ;;  %8633 = vrsqrt.f32 %v11423_v58  ;;  %vm6648_vm0 = vweird.f32 %v11423_v58 }
 0xd98   : > { %6477 = vmatpush.msrb.mxu1 %v5726_v38  ;;  %6459 = vmatpush.msrb.mxu0 %v5654_v49  ;;  %v5842_v25 = vld [vmem:[#allocation26 + $0xf78] sm:$0xff] }
 0xd99   : > { %6499 = vmatpush.msrb.mxu2 %v5782_v6  ;;  %6518 = vmatpush.msrb.mxu3 %v5850_v17  ;;  %v5714_v29 = vld [vmem:[#allocation26 + $0xb78] sm:$0xff]  ;;  %v6134_v6 = vadd.f32 %v6133_v0, %v6114_v42  ;;  %v11446_v42 = vld [vmem:[#allocation29] sm:$0xf] }
 0xd9a   : > { %6478 = vmatpush.msrb.mxu1 %v5722_v8  ;;  %6460 = vmatpush.msrb.mxu0 %v5650_v19  ;;  %v5642_v30 = vld [vmem:[#allocation26 + $0x938] sm:$0xff]  ;;  %v6153_v19 = vpop.f32.mrf.mxu0 }
 0xd9b   : > { %6500 = vmatpush.msrb.mxu2 %v5778_v43  ;;  %6519 = vmatpush.msrb.mxu3 %v5846_v27  ;;  %v5770_v48 = vld [vmem:[#allocation26 + $0xd38] sm:$0xff]  ;;  %v6154_v27 = vadd.f32 %v6153_v19, %v6134_v6  ;;  %v6751_v6 = vld [vmem:[#allocation32 + $0x180] sm:$0xff]  ;;  %v6626_v19 = vperm.slane %v11446_v42, 0 }
 0xd9c   : > { %6479 = vmatpush.msrb.mxu1 %v5718_v33  ;;  %6461 = vmatpush.msrb.mxu0 %v5646_v53  ;;  %v5838_v26 = vld [vmem:[#allocation26 + $0xf58] sm:$0xff] }
 0xd9d   : > { %6501 = vmatpush.msrb.mxu2 %v5774_v7  ;;  %v5710_v36 = vld [vmem:[#allocation26 + $0xb58] sm:$0xff]  ;;  %6520 = vmatpush.msrb.mxu3 %v5842_v25 }
 0xd9e   : > { %6480 = vmatpush.msrb.mxu1 %v5714_v29  ;;  %v5638_v22 = vld [vmem:[#allocation26 + $0x918] sm:$0xff]  ;;  %6462 = vmatpush.msrb.mxu0 %v5642_v30  ;;  %v6173_v29 = vpop.f32.mrf.mxu1  ;;  %v6193_v30 = vpop.f32.mrf.mxu2 }
 0xd9f   : > { %v5766_v23 = vld [vmem:[#allocation26 + $0xd18] sm:$0xff]  ;;  %6502 = vmatpush.msrb.mxu2 %v5770_v48  ;;  %6521 = vmatpush.msrb.mxu3 %v5838_v26  ;;  %v6174_v48 = vadd.f32 %v6173_v29, %v6154_v27  ;;  %v6711_v29 = vld [vmem:[#allocation32 + $0x40] sm:$0xff] }
 0xda0   : > { %v5834_v13 = vld [vmem:[#allocation26 + $0xf38] sm:$0xff]  ;;  %6481 = vmatpush.msrb.mxu1 %v5710_v36  ;;  %6463 = vmatpush.msrb.mxu0 %v5638_v22 }
 0xda1   : > { %v5706_v9 = vld [vmem:[#allocation26 + $0xb38] sm:$0xff]  ;;  %6503 = vmatpush.msrb.mxu2 %v5766_v23  ;;  %6522 = vmatpush.msrb.mxu3 %v5834_v13  ;;  %v6194_v23 = vadd.f32 %v6193_v30, %v6174_v48  ;;  %v6731_v13 = vld [vmem:[#allocation32 + $0xe0] sm:$0xff] }
 0xda2   : > { %v5634_v61 = vld [vmem:[#allocation26 + $0x8f8] sm:$0xff]  ;;  %6482 = vmatpush.msrb.mxu1 %v5706_v9  ;;  %6432 = vmatmul.f32.vlgmr.msra.gmra.mxu2 %v11376_v16 }
 0xda3   : > { %v5762_v34 = vld [vmem:[#allocation26 + $0xcf8] sm:$0xff]  ;;  %6464 = vmatpush.msrb.mxu0 %v5634_v61  ;;  %6452 = vmatmul.f32.vlgmr.msra.gmra.mxu3 %v11382_v28 }
 0xda4   : > { %v5830_v40 = vld [vmem:[#allocation26 + $0xf18] sm:$0xff]  ;;  %6504 = vmatpush.msrb.mxu2 %v5762_v34  ;;  %6392 = vmatmul.f32.vlgmr.msra.gmra.mxu0 %v11379_v32  ;;  %v11430_v32 = vpop.eup %8633  ;;  %v6763_v34 = vld [vmem:[#allocation32 + $0x1e0] sm:$0xff] }
 0xda5   : > { %v5702_v60 = vld [vmem:[#allocation26 + $0xb18] sm:$0xff]  ;;  %6523 = vmatpush.msrb.mxu3 %v5830_v40  ;;  %6412 = vmatmul.f32.vlgmr.msra.gmra.mxu1 %v11385_v51  ;;  %v6213_v51 = vpop.f32.mrf.mxu3  ;;  %v6643_v52 = vmul.f32 %v11430_v32, %v11423_v58  ;;  %vm6649_vm15 = vweird.f32 %v11430_v32 }
 0xda6   : > { %v5630_v21 = vld [vmem:[#allocation26 + $0x8d8] sm:$0xff]  ;;  %6483 = vmatpush.msrb.mxu1 %v5702_v60  ;;  %v11435_v62 = vadd.f32 %v6213_v51, %v6194_v23  ;;  %vm6650_vm1 = vmor %vm6648_vm0, %vm6649_vm15  ;;  %v6739_v51 = vld [vmem:[#allocation32 + $0x120] sm:$0xff] }
 0xda7   : > { %v5758_v50 = vld [vmem:[#allocation26 + $0xcd8] sm:$0xff]  ;;  %6465 = vmatpush.msrb.mxu0 %v5630_v21  ;;  %v6644_v60 = vmul.f32 %v11430_v32, %v6643_v52 }
 0xda8   : > { %v5826_v5 = vld [vmem:[#allocation26 + $0xef8] sm:$0xff]  ;;  %6505 = vmatpush.msrb.mxu2 %v5758_v50  ;;  %v6545_v40 = vsel %vm3510_vm10, %v11435_v62, 0.0  ;;  %v6727_v50 = vld [vmem:[#allocation32 + $0xc0] sm:$0xff] }
 0xda9   : > { %v5698_v3 = vld [vmem:[#allocation26 + $0xaf8] sm:$0xff]  ;;  %6524 = vmatpush.msrb.mxu3 %v5826_v5  ;;  %v6546_v21 = vrot.slane %v6545_v40, 4  ;;  %v6645_v11 = vmul.f32 0.5, %v6644_v60  ;;  %v6766_v60 = vld [vmem:[#allocation32 + $0x1f8] sm:$0xff] }
 0xdaa   : > { %v5626_v55 = vld [vmem:[#allocation26 + $0x8b8] sm:$0xff]  ;;  %6484 = vmatpush.msrb.mxu1 %v5698_v3  ;;  %v6759_v3 = vld [vmem:[#allocation32 + $0x1c0] sm:$0xff] }
 0xdab   : > { %v5754_v39 = vld [vmem:[#allocation26 + $0xcb8] sm:$0xff]  ;;  %6466 = vmatpush.msrb.mxu0 %v5626_v55 }
 0xdac   : > { %v5822_v15 = vld [vmem:[#allocation26 + $0xed8] sm:$0xff]  ;;  %6506 = vmatpush.msrb.mxu2 %v5754_v39 }
 0xdad   : > { %v5694_v46 = vld [vmem:[#allocation26 + $0xad8] sm:$0xff]  ;;  %6525 = vmatpush.msrb.mxu3 %v5822_v15  ;;  %v6723_v15 = vld [vmem:[#allocation32 + $0xa0] sm:$0xff] }
 0xdae   : > { %v5622_v35 = vld [vmem:[#allocation26 + $0x898] sm:$0xff]  ;;  %6485 = vmatpush.msrb.mxu1 %v5694_v46 }
 0xdaf   : > { %v5750_v56 = vld [vmem:[#allocation26 + $0xc98] sm:$0xff]  ;;  %6467 = vmatpush.msrb.mxu0 %v5622_v35  ;;  %v6755_v35 = vld [vmem:[#allocation32 + $0x1a0] sm:$0xff] }
 0xdb0   : > { %v5818_v59 = vld [vmem:[#allocation26 + $0xeb8] sm:$0xff]  ;;  %6507 = vmatpush.msrb.mxu2 %v5750_v56  ;;  %v6646_v56 = vsub.f32 1.5, %v6645_v11  ;;  %v6627_v11 = vperm.slane %v11446_v42, 1 }
 0xdb1   : > { %v5690_v54 = vld [vmem:[#allocation26 + $0xab8] sm:$0xff]  ;;  %6526 = vmatpush.msrb.mxu3 %v5818_v59 }
 0xdb2   : > { %v5618_v18 = vld [vmem:[#allocation26 + $0x878] sm:$0xff]  ;;  %6486 = vmatpush.msrb.mxu1 %v5690_v54  ;;  %v6719_v54 = vld [vmem:[#allocation32 + $0x80] sm:$0xff] }
 0xdb3   : > { %v5746_v38 = vld [vmem:[#allocation26 + $0xc78] sm:$0xff]  ;;  %6468 = vmatpush.msrb.mxu0 %v5618_v18 }
 0xdb4   : > { %v5814_v49 = vld [vmem:[#allocation26 + $0xe98] sm:$0xff]  ;;  %6508 = vmatpush.msrb.mxu2 %v5746_v38 }
 0xdb5   : > { %v5686_v63 = vld [vmem:[#allocation26 + $0xa98] sm:$0xff]  ;;  %6527 = vmatpush.msrb.mxu3 %v5814_v49 }
 0xdb6   : > { %v5614_v4 = vld [vmem:[#allocation26 + $0x858] sm:$0xff]  ;;  %6487 = vmatpush.msrb.mxu1 %v5686_v63  ;;  %v6647_v63 = vmul.f32 %v11430_v32, %v6646_v56 }
 0xdb7   : > { %v5742_v17 = vld [vmem:[#allocation26 + $0xc58] sm:$0xff]  ;;  %6469 = vmatpush.msrb.mxu0 %v5614_v4 }
 0xdb8   : > { %v5810_v8 = vld [vmem:[#allocation26 + $0xe78] sm:$0xff]  ;;  %6509 = vmatpush.msrb.mxu2 %v5742_v17 }
 0xdb9   : > { %v5610_v43 = vld [vmem:[#allocation26 + $0x838] sm:$0xff]  ;;  %6528 = vmatpush.msrb.mxu3 %v5810_v8  ;;  %v6621_v8 = vsub.f32 %v11400_v31, %v11417_v57  ;;  %v11461_v31 = vld [vmem:[#allocation30] sm:$0xf] }
 0xdba   : > { %v5682_v16 = vld [vmem:[#allocation26 + $0xa78] sm:$0xff]  ;;  %6470 = vmatpush.msrb.mxu0 %v5610_v43  ;;  %v6715_v43 = vld [vmem:[#allocation32 + $0x60] sm:$0xff]  ;;  %v6688_v56 = vperm.slane %v11461_v31, 1 }
 0xdbb   : > { %v5738_v33 = vld [vmem:[#allocation26 + $0xc38] sm:$0xff]  ;;  %6488 = vmatpush.msrb.mxu1 %v5682_v16  ;;  %v6634_v57 = vmul.f32 %v6626_v19, %v6621_v8 }
 0xdbc   : > { %v5806_v53 = vld [vmem:[#allocation26 + $0xe58] sm:$0xff]  ;;  %6510 = vmatpush.msrb.mxu2 %v5738_v33 }
 0xdbd   : > { %v5606_v7 = vld [vmem:[#allocation26 + $0x818] sm:$0xff]  ;;  %6529 = vmatpush.msrb.mxu3 %v5806_v53 }
 0xdbe   : > { %v5678_v1 = vld [vmem:[#allocation26 + $0xa58] sm:$0xff]  ;;  %6471 = vmatpush.msrb.mxu0 %v5606_v7  ;;  %v6747_v7 = vld [vmem:[#allocation32 + $0x160] sm:$0xff] }
 0xdbf   : > { %v5734_v25 = vld [vmem:[#allocation26 + $0xc18] sm:$0xff]  ;;  %6489 = vmatpush.msrb.mxu1 %v5678_v1  ;;  %6472 = vmatmul.f32.vlgmr.msrb.gmra.mxu0 %v11391_v24  ;;  %v6651_v1 = vsel %vm6650_vm1, %v11430_v32, %v6647_v63  ;;  %v6707_v32 = vld [vmem:[#allocation32 + $0x20] sm:$0xff]  ;;  %vm7160_vm1 = vcmask 68608  }
 0xdc0   : > { %v5802_v28 = vld [vmem:[#allocation26 + $0xe38] sm:$0xff]  ;;  %6511 = vmatpush.msrb.mxu2 %v5734_v25 }
 0xdc1   : > { %v5674_v26 = vld [vmem:[#allocation26 + $0xa38] sm:$0xff]  ;;  %6530 = vmatpush.msrb.mxu3 %v5802_v28  ;;  %6512 = vmatmul.f32.vlgmr.msrb.gmra.mxu2 %v11388_v14  ;;  %v6578_v14 = vmul.f32 %v11435_v62, %v11435_v62  ;;  %v6682_v28 = vmul.f32 %v6651_v1, %v6634_v57  ;;  %v6783_v1 = vld [vmem:[#allocation32 + $0x280] sm:$0xff]  ;;  %v6233_v57 = vpop.f32.mrf.mxu0 }
 0xdc2   : > { %v6733_v36 = vld [vmem:[#allocation32 + $0xf0] sm:$0xff]  ;;  %6490 = vmatpush.msrb.mxu1 %v5674_v26  ;;  %v6743_v26 = vld [vmem:[#allocation32 + $0x140] sm:$0xff]  ;;  %v6752_v8 = vld [vmem:[#allocation32 + $0x188] sm:$0xff] }
 0xdc3   : > { %v5798_v22 = vld [vmem:[#allocation26 + $0xe18] sm:$0xff]  ;;  %6837 = vmatpush.msra.mxu0 %v6733_v36  ;;  %v6588_v2 = vsel %vm3510_vm10, %v6578_v14, 0.0  ;;  %v6687_v36 = vperm.slane %v11461_v31, 0  ;;  %v6735_v14 = vld [vmem:[#allocation32 + $0x100] sm:$0xff] }
 0xdc4   : > { %v5670_v45 = vld [vmem:[#allocation26 + $0xa18] sm:$0xff]  ;;  %6531 = vmatpush.msrb.mxu3 %v5798_v22  ;;  %v6589_v44 = vrot.slane %v6588_v2, 4 }
 0xdc5   : > { %v6765_v9 = vld [vmem:[#allocation32 + $0x1f0] sm:$0xff]  ;;  %6491 = vmatpush.msrb.mxu1 %v5670_v45  ;;  %6532 = vmatmul.f32.vlgmr.msrb.gmra.mxu3 %v11394_v41  ;;  %v6547_v41 = vadd.f32 %v6546_v21, %v6545_v40  ;;  %v11464_v52 = vadd.f32 %v6687_v36, %v6682_v28  ;;  %v6703_v45 = vld [vmem:[#allocation32] sm:$0xff]  ;;  %v6734_v40 = vld [vmem:[#allocation32 + $0xf8] sm:$0xff] }
 0xdc6   : > { %v6729_v61 = vld [vmem:[#allocation32 + $0xd0] sm:$0xff]  ;;  %6838 = vmatpush.msra.mxu0 %v6731_v13  ;;  %6492 = vmatmul.f32.vlgmr.msrb.gmra.mxu1 %v11397_v12  ;;  %v6590_v39 = vadd.f32 %v6589_v44, %v6588_v2  ;;  %v6764_v2 = vld [vmem:[#allocation32 + $0x1e8] sm:$0xff]  ;;  %v6746_v28 = vld [vmem:[#allocation32 + $0x158] sm:$0xff] }
 0xdc7   : > { %6857 = vmatpush.msra.mxu1 %v6765_v9  ;;  %v6761_v24 = vld [vmem:[#allocation32 + $0x1d0] sm:$0xff]  ;;  %v6548_v55 = vrot.slane %v6547_v41, 2 }
 0xdc8   : > { %6839 = vmatpush.msra.mxu0 %v6729_v61  ;;  %v6725_v5 = vld [vmem:[#allocation32 + $0xb0] sm:$0xff]  ;;  %v6591_v12 = vrot.slane %v6590_v39, 2 }
 0xdc9   : > { %6858 = vmatpush.msra.mxu1 %v6763_v34  ;;  %v6757_v46 = vld [vmem:[#allocation32 + $0x1b0] sm:$0xff]  ;;  %v6549_v20 = vadd.f32 %v6548_v55, %v6547_v41  ;;  %v6699_v34 = vmax.f32 %v11464_v52, 0.0  ;;  %v6795_v41 = vld [vmem:[#allocation32 + $0x2e0] sm:$0xff]  ;;  %v6762_v55 = vld [vmem:[#allocation32 + $0x1d8] sm:$0xff] }
 0xdca   : > { %6840 = vmatpush.msra.mxu0 %v6727_v50  ;;  %v6721_v37 = vld [vmem:[#allocation32 + $0x90] sm:$0xff]  ;;  %v6592_v59 = vadd.f32 %v6591_v12, %v6590_v39  ;;  %v6732_v50 = vld [vmem:[#allocation32 + $0xe8] sm:$0xff] }
 0xdcb   : > { %6859 = vmatpush.msra.mxu1 %v6761_v24  ;;  %v6550_v47 = vrot.slane %v6549_v20, 1  ;;  %v6753_v18 = vld [vmem:[#allocation32 + $0x190] sm:$0xff] }
 0xdcc   : > { %6841 = vmatpush.msra.mxu0 %v6725_v5  ;;  %v6593_v38 = vrot.slane %v6592_v59, 1  ;;  %v6717_v49 = vld [vmem:[#allocation32 + $0x70] sm:$0xff]  ;;  %v6730_v5 = vld [vmem:[#allocation32 + $0xd8] sm:$0xff] }
 0xdcd   : > { %6860 = vmatpush.msra.mxu1 %v6759_v3  ;;  %v6551_v0 = vadd.f32 %v6550_v47, %v6549_v20  ;;  %v6749_v27 = vld [vmem:[#allocation32 + $0x170] sm:$0xff]  ;;  %v6760_v20 = vld [vmem:[#allocation32 + $0x1c8] sm:$0xff] }
 0xdce   : > { %6842 = vmatpush.msra.mxu0 %v6723_v15  ;;  %v6594_v17 = vadd.f32 %v6593_v38, %v6592_v59  ;;  %v6713_v53 = vld [vmem:[#allocation32 + $0x50] sm:$0xff]  ;;  %v6724_v59 = vld [vmem:[#allocation32 + $0xa8] sm:$0xff]  ;;  %v6722_v38 = vld [vmem:[#allocation32 + $0x98] sm:$0xff] }
 0xdcf   : > { %6861 = vmatpush.msra.mxu1 %v6757_v46  ;;  %v11451_v4 = vmul.f32 %v11414_v10, %v6551_v0  ;;  %v6745_v58 = vld [vmem:[#allocation32 + $0x150] sm:$0xff]  ;;  %v6728_v46 = vld [vmem:[#allocation32 + $0xc8] sm:$0xff] }
 0xdd0   : > { %6843 = vmatpush.msra.mxu0 %v6721_v37  ;;  %v6610_v16 = vmul.f32 %v6594_v17, %v11414_v10  ;;  %v6709_v48 = vld [vmem:[#allocation32 + $0x30] sm:$0xff]  ;;  %v6726_v37 = vld [vmem:[#allocation32 + $0xb8] sm:$0xff]  ;;  %v6756_v0 = vld [vmem:[#allocation32 + $0x1a8] sm:$0xff] }
 0xdd1   : > { %6862 = vmatpush.msra.mxu1 %v6755_v35  ;;  %v6614_v33 = vmul.f32 %v11451_v4, %v11451_v4  ;;  %v6741_v22 = vld [vmem:[#allocation32 + $0x130] sm:$0xff]  ;;  %v6622_v3 = vsub.f32 %v11435_v62, %v11451_v4  ;;  %v6758_v62 = vld [vmem:[#allocation32 + $0x1b8] sm:$0xff]  ;;  %v6720_v4 = vld [vmem:[#allocation32 + $0x88] sm:$0xff] }
 0xdd2   : > { %6844 = vmatpush.msra.mxu0 %v6719_v54  ;;  %v6705_v23 = vld [vmem:[#allocation32 + $0x10] sm:$0xff]  ;;  %v6791_v54 = vld [vmem:[#allocation32 + $0x2c0] sm:$0xff] }
 0xdd3   : > { %6863 = vmatpush.msra.mxu1 %v6753_v18  ;;  %v6618_v25 = vsub.f32 %v6610_v16, %v6614_v33  ;;  %v6737_v13 = vld [vmem:[#allocation32 + $0x110] sm:$0xff]  ;;  %v6635_v35 = vmul.f32 %v6627_v11, %v6622_v3  ;;  %v6787_v17 = vld [vmem:[#allocation32 + $0x2a0] sm:$0xff]  ;;  %v6736_v11 = vld [vmem:[#allocation32 + $0x108] sm:$0xff] }
 0xdd4   : > { %6845 = vmatpush.msra.mxu0 %v6717_v49  ;;  %v6797_v24 = vld [vmem:[#allocation32 + $0x2f0] sm:$0xff]  ;;  %v6771_v3 = vld [vmem:[#allocation32 + $0x220] sm:$0xff] }
 0xdd5   : > { %6864 = vmatpush.msra.mxu1 %v6751_v6  ;;  %v6639_v30 = vadd.f32 1e-05, %v6618_v25  ;;  %6877 = vmatpush.msra.mxu2 %v6797_v24  ;;  %v6793_v39 = vld [vmem:[#allocation32 + $0x2d0] sm:$0xff]  ;;  %v6754_v6 = vld [vmem:[#allocation32 + $0x198] sm:$0xff]  ;;  %v6748_v25 = vld [vmem:[#allocation32 + $0x168] sm:$0xff] }
 0xdd6   : > { %6846 = vmatpush.msra.mxu0 %v6715_v43  ;;  %v6789_v49 = vld [vmem:[#allocation32 + $0x2b0] sm:$0xff]  ;;  %v6718_v43 = vld [vmem:[#allocation32 + $0x78] sm:$0xff] }
 0xdd7   : > { %6865 = vmatpush.msra.mxu1 %v6749_v27  ;;  %8635 = vrsqrt.f32 %v6639_v30  ;;  %6878 = vmatpush.msra.mxu2 %v6795_v41  ;;  %vm6658_vm3 = vweird.f32 %v6639_v30  ;;  %v11476_v27 = vld [vmem:[#allocation27] sm:$0xf] }
 0xdd8   : > { %6847 = vmatpush.msra.mxu0 %v6713_v53  ;;  %v5863_v16 = vperm.slane %v11476_v27, 2  ;;  %v6785_v33 = vld [vmem:[#allocation32 + $0x290] sm:$0xff]  ;;  %v6750_v53 = vld [vmem:[#allocation32 + $0x178] sm:$0xff] }
 0xdd9   : > { %6866 = vmatpush.msra.mxu1 %v6747_v7  ;;  %6879 = vmatpush.msra.mxu2 %v6793_v39  ;;  %v6716_v7 = vld [vmem:[#allocation32 + $0x68] sm:$0xff]  ;;  %v6773_v24 = vld [vmem:[#allocation32 + $0x230] sm:$0xff] }
 0xdda   : > { %6848 = vmatpush.msra.mxu0 %v6711_v29  ;;  %v6714_v29 = vld [vmem:[#allocation32 + $0x58] sm:$0xff] }
 0xddb   : > { %6867 = vmatpush.msra.mxu1 %v6745_v58  ;;  %6880 = vmatpush.msra.mxu2 %v6791_v54  ;;  %v6234_v58 = vadd.f32 %v6233_v57, %v5863_v16  ;;  %v6792_v54 = vld [vmem:[#allocation32 + $0x2c8] sm:$0xff] }
 0xddc   : > { %6849 = vmatpush.msra.mxu0 %v6709_v48  ;;  %v6712_v48 = vld [vmem:[#allocation32 + $0x48] sm:$0xff] }
 0xddd   : > { %6868 = vmatpush.msra.mxu1 %v6743_v26  ;;  %v8636_v9 = vpop.eup %8635  ;;  %6881 = vmatpush.msra.mxu2 %v6789_v49  ;;  %v6790_v49 = vld [vmem:[#allocation32 + $0x2b8] sm:$0xff] }
 0xdde   : > { %6850 = vmatpush.msra.mxu0 %v6707_v32  ;;  %v6653_v61 = vmul.f32 %v8636_v9, %v6639_v30  ;;  %vm6659_vm2 = vweird.f32 %v8636_v9  ;;  %v6781_v30 = vld [vmem:[#allocation32 + $0x270] sm:$0xff]  ;;  %v6779_v32 = vld [vmem:[#allocation32 + $0x260] sm:$0xff] }
 0xddf   : > { %6869 = vmatpush.msra.mxu1 %v6741_v22  ;;  %vm6660_vm4 = vmor %vm6658_vm3, %vm6659_vm2  ;;  %6882 = vmatpush.msra.mxu2 %v6787_v17  ;;  %v6744_v22 = vld [vmem:[#allocation32 + $0x148] sm:$0xff] }
 0xde0   : > { %6851 = vmatpush.msra.mxu0 %v6705_v23  ;;  %v6654_v21 = vmul.f32 %v8636_v9, %v6653_v61  ;;  %v6293_v61 = vpop.f32.mrf.mxu3 }
 0xde1   : > { %6870 = vmatpush.msra.mxu1 %v6739_v51  ;;  %6883 = vmatpush.msra.mxu2 %v6785_v33  ;;  %v6253_v26 = vpop.f32.mrf.mxu1  ;;  %v6710_v51 = vld [vmem:[#allocation32 + $0x38] sm:$0xff]  ;;  %v6784_v33 = vld [vmem:[#allocation32 + $0x288] sm:$0xff] }
 0xde2   : > { %6852 = vmatpush.msra.mxu0 %v6703_v45  ;;  %v6655_v44 = vmul.f32 0.5, %v6654_v21  ;;  %v6254_v23 = vadd.f32 %v6253_v26, %v6234_v58  ;;  %v6777_v45 = vld [vmem:[#allocation32 + $0x250] sm:$0xff]  ;;  %v6776_v26 = vld [vmem:[#allocation32 + $0x248] sm:$0xff] }
 0xde3   : > { %6871 = vmatpush.msra.mxu1 %v6737_v13  ;;  %6853 = vmatmul.f32.vlgmr.msra.gmra.mxu0 %v6699_v34  ;;  %v6742_v13 = vld [vmem:[#allocation32 + $0x138] sm:$0xff] }
 0xde4   : > { %6917 = vmatpush.msrb.mxu0 %v6734_v40  ;;  %v6656_v15 = vsub.f32 1.5, %v6655_v44  ;;  %6884 = vmatpush.msra.mxu2 %v6783_v1  ;;  %v6708_v40 = vld [vmem:[#allocation32 + $0x28] sm:$0xff]  ;;  %v6782_v1 = vld [vmem:[#allocation32 + $0x278] sm:$0xff] }
 0xde5   : > { %6872 = vmatpush.msra.mxu1 %v6735_v14  ;;  %v6775_v14 = vld [vmem:[#allocation32 + $0x240] sm:$0xff]  ;;  %v6704_v44 = vld [vmem:[#allocation32 + $0x8] sm:$0xff] }
 0xde6   : > { %6918 = vmatpush.msrb.mxu0 %v6732_v50  ;;  %v6657_v12 = vmul.f32 %v8636_v9, %v6656_v15  ;;  %6885 = vmatpush.msra.mxu2 %v6781_v30  ;;  %v6706_v50 = vld [vmem:[#allocation32 + $0x18] sm:$0xff] }
 0xde7   : > { %6937 = vmatpush.msrb.mxu1 %v6766_v60  ;;  %v6273_v36 = vpop.f32.mrf.mxu2  ;;  %v6740_v60 = vld [vmem:[#allocation32 + $0x128] sm:$0xff] }
 0xde8   : > { %6919 = vmatpush.msrb.mxu0 %v6730_v5  ;;  %v6661_v47 = vsel %vm6660_vm4, %v8636_v9, %v6657_v12  ;;  %6886 = vmatpush.msra.mxu2 %v6779_v32  ;;  %v6274_v9 = vadd.f32 %v6273_v36, %v6254_v23  ;;  %v6798_v12 = vld [vmem:[#allocation32 + $0x2f8] sm:$0xff] }
 0xde9   : > { %6938 = vmatpush.msrb.mxu1 %v6764_v2  ;;  %v6683_v18 = vmul.f32 %v6661_v47, %v6635_v35  ;;  %v6738_v2 = vld [vmem:[#allocation32 + $0x118] sm:$0xff] }
 0xdea   : > { %6920 = vmatpush.msrb.mxu0 %v6728_v46  ;;  %6887 = vmatpush.msra.mxu2 %v6777_v45  ;;  %v6294_v21 = vadd.f32 %v6293_v61, %v6274_v9  ;;  %v6794_v47 = vld [vmem:[#allocation32 + $0x2d8] sm:$0xff]  ;;  %v6829_v45 = vld [vmem:[#allocation32 + $0x3f0] sm:$0xff]  ;;  %v6827_v61 = vld [vmem:[#allocation32 + $0x3e0] sm:$0xff] }
 0xdeb   : > { %6939 = vmatpush.msrb.mxu1 %v6762_v55  ;;  %v11473_v63 = vadd.f32 %v6688_v56, %v6683_v18  ;;  %v6313_v41 = vpop.f32.mrf.mxu0  ;;  %v6769_v55 = vld [vmem:[#allocation32 + $0x210] sm:$0xff]  ;;  %v6774_v32 = vld [vmem:[#allocation32 + $0x238] sm:$0xff]  ;;  %6897 = vmatpush.msra.mxu3 %v6829_v45 }
 0xdec   : > { %6921 = vmatpush.msrb.mxu0 %v6726_v37  ;;  %6888 = vmatpush.msra.mxu2 %v6775_v14  ;;  %v6314_v5 = vadd.f32 %v6313_v41, %v6294_v21  ;;  %v6770_v23 = vld [vmem:[#allocation32 + $0x218] sm:$0xff]  ;;  %v6825_v14 = vld [vmem:[#allocation32 + $0x3d0] sm:$0xff]  ;;  %v6823_v21 = vld [vmem:[#allocation32 + $0x3c0] sm:$0xff] }
 0xded   : > { %6940 = vmatpush.msrb.mxu1 %v6760_v20  ;;  %v6700_v19 = vmax.f32 %v11473_v63, 0.0  ;;  %v6767_v20 = vld [vmem:[#allocation32 + $0x200] sm:$0xff]  ;;  %6898 = vmatpush.msra.mxu3 %v6827_v61  ;;  %v6821_v41 = vld [vmem:[#allocation32 + $0x3b0] sm:$0xff] }
 0xdee   : > { %6922 = vmatpush.msrb.mxu0 %v6724_v59  ;;  %6889 = vmatpush.msra.mxu2 %v6773_v24  ;;  %v6628_v24 = vperm.slane %v11446_v42, 2 }
 0xdef   : > { %6941 = vmatpush.msrb.mxu1 %v6758_v62  ;;  %v6796_v62 = vld [vmem:[#allocation32 + $0x2e8] sm:$0xff]  ;;  %6899 = vmatpush.msra.mxu3 %v6825_v14 }
 0xdf0   : > { %6923 = vmatpush.msrb.mxu0 %v6722_v38  ;;  %6873 = vmatmul.f32.vlgmr.msra.gmra.mxu1 %v6700_v19  ;;  %v6812_v14 = vld [vmem:[#allocation32 + $0x368] sm:$0xff] }
 0xdf1   : > { %6942 = vmatpush.msrb.mxu1 %v6756_v0  ;;  %6890 = vmatpush.msra.mxu2 %v6771_v3 }
 0xdf2   : > { %6924 = vmatpush.msrb.mxu0 %v6720_v4  ;;  %v6788_v4 = vld [vmem:[#allocation32 + $0x2a8] sm:$0xff]  ;;  %6900 = vmatpush.msra.mxu3 %v6823_v21 }
 0xdf3   : > { %6943 = vmatpush.msrb.mxu1 %v6754_v6  ;;  %6891 = vmatpush.msra.mxu2 %v6769_v55 }
 0xdf4   : > { %6925 = vmatpush.msrb.mxu0 %v6718_v43  ;;  %v6333_v39 = vpop.f32.mrf.mxu1  ;;  %6901 = vmatpush.msra.mxu3 %v6821_v41  ;;  %v6808_v41 = vld [vmem:[#allocation32 + $0x348] sm:$0xff] }
 0xdf5   : > { %6944 = vmatpush.msrb.mxu1 %v6752_v8  ;;  %v6334_v46 = vadd.f32 %v6333_v39, %v6314_v5  ;;  %6892 = vmatpush.msra.mxu2 %v6767_v20  ;;  %v6819_v5 = vld [vmem:[#allocation32 + $0x3a0] sm:$0xff]  ;;  %v6817_v39 = vld [vmem:[#allocation32 + $0x390] sm:$0xff] }
 0xdf6   : > { %6926 = vmatpush.msrb.mxu0 %v6716_v7  ;;  %v6353_v15 = vpop.f32.mrf.mxu2  ;;  %v6373_v35 = vpop.f32.mrf.mxu3  ;;  %6902 = vmatpush.msra.mxu3 %v6819_v5 }
 0xdf7   : > { %6945 = vmatpush.msrb.mxu1 %v6750_v53  ;;  %v6354_v37 = vadd.f32 %v6353_v15, %v6334_v46  ;;  %6957 = vmatpush.msrb.mxu2 %v6798_v12  ;;  %v6815_v46 = vld [vmem:[#allocation32 + $0x380] sm:$0xff]  ;;  %v6813_v12 = vld [vmem:[#allocation32 + $0x370] sm:$0xff] }
 0xdf8   : > { %6927 = vmatpush.msrb.mxu0 %v6714_v29  ;;  %v6780_v29 = vld [vmem:[#allocation32 + $0x268] sm:$0xff]  ;;  %6903 = vmatpush.msra.mxu3 %v6817_v39 }
 0xdf9   : > { %6946 = vmatpush.msrb.mxu1 %v6748_v25  ;;  %v11485_v56 = vadd.f32 %v6373_v35, %v6354_v37  ;;  %6958 = vmatpush.msrb.mxu2 %v6796_v62  ;;  %v5864_v35 = vperm.slane %v11476_v27, 3  ;;  %v6811_v62 = vld [vmem:[#allocation32 + $0x360] sm:$0xff]  ;;  %v6801_v27 = vld [vmem:[#allocation32 + $0x310] sm:$0xff]  ;;  %v6804_v39 = vld [vmem:[#allocation32 + $0x328] sm:$0xff] }
 0xdfa   : > { %6928 = vmatpush.msrb.mxu0 %v6712_v48  ;;  %6904 = vmatpush.msra.mxu3 %v6815_v46  ;;  %v6802_v46 = vld [vmem:[#allocation32 + $0x318] sm:$0xff] }
 0xdfb   : > { %6947 = vmatpush.msrb.mxu1 %v6746_v28  ;;  %v6552_v52 = vsel %vm3510_vm10, %v11485_v56, 0.0  ;;  %6959 = vmatpush.msrb.mxu2 %v6794_v47  ;;  %v6778_v28 = vld [vmem:[#allocation32 + $0x258] sm:$0xff] }
 0xdfc   : > { %6929 = vmatpush.msrb.mxu0 %v6710_v51  ;;  %v6553_v59 = vrot.slane %v6552_v52, 4  ;;  %v6768_v51 = vld [vmem:[#allocation32 + $0x208] sm:$0xff]  ;;  %6905 = vmatpush.msra.mxu3 %v6813_v12 }
 0xdfd   : > { %6948 = vmatpush.msrb.mxu1 %v6744_v22  ;;  %6960 = vmatpush.msrb.mxu2 %v6792_v54  ;;  %v6772_v22 = vld [vmem:[#allocation32 + $0x228] sm:$0xff] }
 0xdfe   : > { %6930 = vmatpush.msrb.mxu0 %v6708_v40  ;;  %v6554_v0 = vadd.f32 %v6553_v59, %v6552_v52  ;;  %6906 = vmatpush.msra.mxu3 %v6811_v62  ;;  %v6800_v12 = vld [vmem:[#allocation32 + $0x308] sm:$0xff] }
 0xdff   : > { %6949 = vmatpush.msrb.mxu1 %v6742_v13  ;;  %6961 = vmatpush.msrb.mxu2 %v6790_v49 }
 0xe00   : > { %6931 = vmatpush.msrb.mxu0 %v6706_v50  ;;  %v6555_v6 = vrot.slane %v6554_v0, 2 }
 0xe01   : > { %6950 = vmatpush.msrb.mxu1 %v6740_v60  ;;  %6962 = vmatpush.msrb.mxu2 %v6788_v4 }
 0xe02   : > { %6932 = vmatpush.msrb.mxu0 %v6704_v44  ;;  %v6556_v17 = vadd.f32 %v6555_v6, %v6554_v0 }
 0xe03   : > { %6951 = vmatpush.msrb.mxu1 %v6738_v2  ;;  %6933 = vmatmul.f32.vlgmr.msrb.gmra.mxu0 %v6699_v34  ;;  %v6579_v34 = vmul.f32 %v11485_v56, %v11485_v56 }
 0xe04   : > { %v6557_v43 = vrot.slane %v6556_v17, 1 }
 0xe05   : > { %6952 = vmatpush.msrb.mxu1 %v6736_v11  ;;  %v6595_v18 = vsel %vm3510_vm10, %v6579_v34, 0.0  ;;  %v6689_v11 = vperm.slane %v11461_v31, 2  ;;  %v6807_v34 = vld [vmem:[#allocation32 + $0x340] sm:$0xff] }
 0xe06   : > { %6953 = vmatmul.f32.vlgmr.msrb.gmra.mxu1 %v6700_v19  ;;  %v6596_v38 = vrot.slane %v6595_v18, 4  ;;  %v6786_v19 = vld [vmem:[#allocation32 + $0x298] sm:$0xff]  ;;  %v6558_v53 = vadd.f32 %v6557_v43, %v6556_v17  ;;  %v6799_v17 = vld [vmem:[#allocation32 + $0x300] sm:$0xff] }
 0xe07   : > { %6963 = vmatpush.msrb.mxu2 %v6786_v19  ;;  %v6830_v19 = vld [vmem:[#allocation32 + $0x3f8] sm:$0xff] }
 0xe08   : > { %v6597_v63 = vadd.f32 %v6596_v38, %v6595_v18  ;;  %v6575_v25 = vmul.f32 %v11414_v10, %v6558_v53  ;;  %v6805_v18 = vld [vmem:[#allocation32 + $0x330] sm:$0xff]  ;;  %v6803_v38 = vld [vmem:[#allocation32 + $0x320] sm:$0xff] }
 0xe09   : > { %6964 = vmatpush.msrb.mxu2 %v6784_v33 }
 0xe0a   : > { %v6598_v8 = vrot.slane %v6597_v63, 2  ;;  %v6615_v30 = vmul.f32 %v6575_v25, %v6575_v25  ;;  %v6623_v50 = vsub.f32 %v11485_v56, %v6575_v25  ;;  %v6809_v56 = vld [vmem:[#allocation32 + $0x350] sm:$0xff] }
 0xe0b   : > { %6965 = vmatpush.msrb.mxu2 %v6782_v1  ;;  %6907 = vmatpush.msra.mxu3 %v6809_v56 }
 0xe0c   : > { %v6599_v16 = vadd.f32 %v6598_v8, %v6597_v63  ;;  %v6636_v3 = vmul.f32 %v6628_v24, %v6623_v50  ;;  %v6810_v50 = vld [vmem:[#allocation32 + $0x358] sm:$0xff] }
 0xe0d   : > { %6966 = vmatpush.msrb.mxu2 %v6780_v29  ;;  %6908 = vmatpush.msra.mxu3 %v6807_v34 }
 0xe0e   : > { %v6600_v7 = vrot.slane %v6599_v16, 1 }
 0xe0f   : > { %6967 = vmatpush.msrb.mxu2 %v6778_v28  ;;  %6909 = vmatpush.msra.mxu3 %v6805_v18  ;;  %v6690_v18 = vperm.slane %v11461_v31, 3  ;;  %v7092_v31 = vld [vmem:[%s11768_s10 + $0x68] sm:$0xff] }
 0xe10   : > { %v6601_v57 = vadd.f32 %v6600_v7, %v6599_v16  ;;  %v6828_v16 = vld [vmem:[#allocation32 + $0x3e8] sm:$0xff]  ;;  %v6826_v7 = vld [vmem:[#allocation32 + $0x3d8] sm:$0xff] }
 0xe11   : > { %6968 = vmatpush.msrb.mxu2 %v6776_v26  ;;  %6910 = vmatpush.msra.mxu3 %v6803_v38  ;;  %v6820_v26 = vld [vmem:[#allocation32 + $0x3a8] sm:$0xff] }
 0xe12   : > { %v6611_v58 = vmul.f32 %v6601_v57, %v11414_v10  ;;  %v6824_v57 = vld [vmem:[#allocation32 + $0x3c8] sm:$0xff] }
 0xe13   : > { %6969 = vmatpush.msrb.mxu2 %v6774_v32  ;;  %6911 = vmatpush.msra.mxu3 %v6801_v27  ;;  %v7094_v27 = vld [vmem:[%s11768_s10 + $0x78] sm:$0xff] }
 0xe14   : > { %v6619_v48 = vsub.f32 %v6611_v58, %v6615_v30  ;;  %v6822_v58 = vld [vmem:[#allocation32 + $0x3b8] sm:$0xff]  ;;  %7115 = vmatpush.msra.mxu0 %v7094_v27  ;;  %v7080_v27 = vld [vmem:[%s11768_s10 + $0x8] sm:$0xff] }
 0xe15   : > { %6970 = vmatpush.msrb.mxu2 %v6772_v22  ;;  %6912 = vmatpush.msra.mxu3 %v6799_v17 }
 0xe16   : > { %v6640_v36 = vadd.f32 1e-05, %v6619_v48 }
 0xe17   : > { %6971 = vmatpush.msrb.mxu2 %v6770_v23  ;;  %6977 = vmatpush.msrb.mxu3 %v6830_v19  ;;  %v6818_v23 = vld [vmem:[#allocation32 + $0x398] sm:$0xff] }
 0xe18   : > { %8637 = vrsqrt.f32 %v6640_v36  ;;  %vm6668_vm6 = vweird.f32 %v6640_v36  ;;  %v7091_v19 = vld [vmem:[%s11768_s10 + $0x60] sm:$0xff] }
 0xe19   : > { %6972 = vmatpush.msrb.mxu2 %v6768_v51  ;;  %6978 = vmatpush.msrb.mxu3 %v6828_v16  ;;  %v7090_v16 = vld [vmem:[%s11768_s10 + $0x58] sm:$0xff] }
 0xe1b   : > { %6979 = vmatpush.msrb.mxu3 %v6826_v7  ;;  %v7089_v7 = vld [vmem:[%s11768_s10 + $0x50] sm:$0xff] }
 0xe1d   : > { %6980 = vmatpush.msrb.mxu3 %v6824_v57 }
 0xe1e   : > { %v8638_v13 = vpop.eup %8637 }
 0xe1f   : > { %v6663_v9 = vmul.f32 %v8638_v13, %v6640_v36  ;;  %vm6669_vm5 = vweird.f32 %v8638_v13  ;;  %6981 = vmatpush.msrb.mxu3 %v6822_v58  ;;  %v7088_v58 = vld [vmem:[%s11768_s10 + $0x48] sm:$0xff] }
 0xe20   : > { %vm6670_vm7 = vmor %vm6668_vm6, %vm6669_vm5 }
 0xe21   : > { %v6664_v40 = vmul.f32 %v8638_v13, %v6663_v9  ;;  %v6393_v47 = vpop.f32.mrf.mxu0  ;;  %6982 = vmatpush.msrb.mxu3 %v6820_v26  ;;  %v7087_v26 = vld [vmem:[%s11768_s10 + $0x40] sm:$0xff] }
 0xe22   : > { %v6394_v52 = vadd.f32 %v6393_v47, %v5864_v35  ;;  %v6413_v59 = vpop.f32.mrf.mxu1 }
 0xe23   : > { %v6665_v60 = vmul.f32 0.5, %v6664_v40  ;;  %6983 = vmatpush.msrb.mxu3 %v6818_v23  ;;  %v6814_v40 = vld [vmem:[#allocation32 + $0x378] sm:$0xff] }
 0xe24   : > { %v6414_v0 = vadd.f32 %v6413_v59, %v6394_v52  ;;  %v6629_v52 = vperm.slane %v11446_v42, 3  ;;  %v6831_v42 = vld [vmem:[#allocation33] sm:$0x3] }
 0xe25   : > { %v6666_v2 = vsub.f32 1.5, %v6665_v60  ;;  %v6433_v54 = vpop.f32.mrf.mxu2  ;;  %v6833_v17 = vperm.slane %v6831_v42, 0  ;;  %v6834_v57 = vperm.slane %v6831_v42, 1  ;;  %v7100_v42 = vld [vmem:[%s11768_s10 + $0xa8] sm:$0xff] }
 0xe26   : > { %v6434_v49 = vadd.f32 %v6433_v54, %v6414_v0  ;;  %v6453_v6 = vpop.f32.mrf.mxu3 }
 0xe27   : > { %v6667_v44 = vmul.f32 %v8638_v13, %v6666_v2 }
 0xe28   : > { %v6454_v63 = vadd.f32 %v6453_v6, %v6434_v49 }
 0xe29   : > { %v6671_v55 = vsel %vm6670_vm7, %v8638_v13, %v6667_v44  ;;  %v6816_v13 = vld [vmem:[#allocation32 + $0x388] sm:$0xff] }
 0xe2a   : > { %v6684_v15 = vmul.f32 %v6671_v55, %v6636_v3  ;;  %6984 = vmatpush.msrb.mxu3 %v6816_v13  ;;  %v6806_v3 = vld [vmem:[#allocation32 + $0x338] sm:$0xff] }
 0xe2c   : > { %v6697_v20 = vadd.f32 %v6689_v11, %v6684_v15  ;;  %6985 = vmatpush.msrb.mxu3 %v6814_v40 }
 0xe2e   : > { %v6701_v37 = vmax.f32 %v6697_v20, 0.0  ;;  %6986 = vmatpush.msrb.mxu3 %v6812_v14  ;;  %v7085_v14 = vld [vmem:[%s11768_s10 + $0x30] sm:$0xff] }
 0xe30   : > { %6893 = vmatmul.f32.vlgmr.msra.gmra.mxu2 %v6701_v37  ;;  %6987 = vmatpush.msrb.mxu3 %v6810_v50 }
 0xe32   : > { %6988 = vmatpush.msrb.mxu3 %v6808_v41  ;;  %v7084_v41 = vld [vmem:[%s11768_s10 + $0x28] sm:$0xff] }
 0xe34   : > { %6989 = vmatpush.msrb.mxu3 %v6806_v3 }
 0xe36   : > { %6990 = vmatpush.msrb.mxu3 %v6804_v39  ;;  %v7083_v39 = vld [vmem:[%s11768_s10 + $0x20] sm:$0xff] }
 0xe38   : > { %6973 = vmatmul.f32.vlgmr.msrb.gmra.mxu2 %v6701_v37  ;;  %6991 = vmatpush.msrb.mxu3 %v6802_v46 }
 0xe3a   : > { %6992 = vmatpush.msrb.mxu3 %v6800_v12 }
 0xe3c   : > { %v6473_v4 = vpop.f32.mrf.mxu0 }
 0xe3d   : > { %v6474_v8 = vadd.f32 %v6473_v4, %v6454_v63  ;;  %v7093_v63 = vld [vmem:[%s11768_s10 + $0x70] sm:$0xff] }
 0xe3e   : > { %7116 = vmatpush.msra.mxu0 %v7093_v63 }
 0xe40   : > { %7117 = vmatpush.msra.mxu0 %v7092_v31 }
 0xe42   : > { %7118 = vmatpush.msra.mxu0 %v7091_v19  ;;  %v7099_v19 = vld [vmem:[%s11768_s10 + $0xa0] sm:$0xff] }
 0xe43   : > { %v6493_v43 = vpop.f32.mrf.mxu1 }
 0xe44   : > { %v6494_v33 = vadd.f32 %v6493_v43, %v6474_v8  ;;  %v6513_v53 = vpop.f32.mrf.mxu2  ;;  %7119 = vmatpush.msra.mxu0 %v7090_v16 }
 0xe46   : > { %v6514_v1 = vadd.f32 %v6513_v53, %v6494_v33  ;;  %v7110_v33 = vld [vmem:[%s11768_s10 + $0xf8] sm:$0xff]  ;;  %7120 = vmatpush.msra.mxu0 %v7089_v7 }
 0xe47   : > { %7135 = vmatpush.msra.mxu1 %v7110_v33 }
 0xe48   : > { %v6533_v25 = vpop.f32.mrf.mxu3  ;;  %7121 = vmatpush.msra.mxu0 %v7088_v58 }
 0xe49   : > { %v6534_v29 = vadd.f32 %v6533_v25, %v6514_v1  ;;  %v7109_v1 = vld [vmem:[%s11768_s10 + $0xf0] sm:$0xff] }
 0xe4a   : > { %7136 = vmatpush.msra.mxu1 %v7109_v1  ;;  %7122 = vmatpush.msra.mxu0 %v7087_v26  ;;  %v7097_v1 = vld [vmem:[%s11768_s10 + $0x90] sm:$0xff] }
 0xe4b   : > { %v6559_v30 = vsel %vm3510_vm10, %v6534_v29, 0.0  ;;  %v6580_v28 = vmul.f32 %v6534_v29, %v6534_v29 }
 0xe4c   : > { %v6560_v48 = vrot.slane %v6559_v30, 4 }
 0xe4d   : > { %v6602_v36 = vsel %vm3510_vm10, %v6580_v28, 0.0 }
 0xe4e   : > { %v6561_v32 = vadd.f32 %v6560_v48, %v6559_v30  ;;  %v6603_v22 = vrot.slane %v6602_v36, 4  ;;  %v7108_v30 = vld [vmem:[%s11768_s10 + $0xe8] sm:$0xff] }
 0xe4f   : > { %7137 = vmatpush.msra.mxu1 %v7108_v30 }
 0xe50   : > { %v6562_v51 = vrot.slane %v6561_v32, 2  ;;  %v6604_v45 = vadd.f32 %v6603_v22, %v6602_v36  ;;  %v7107_v36 = vld [vmem:[%s11768_s10 + $0xe0] sm:$0xff] }
 0xe51   : > { %7138 = vmatpush.msra.mxu1 %v7107_v36 }
 0xe52   : > { %v6563_v9 = vadd.f32 %v6562_v51, %v6561_v32  ;;  %v6605_v61 = vrot.slane %v6604_v45, 2  ;;  %v7086_v51 = vld [vmem:[%s11768_s10 + $0x38] sm:$0xff] }
 0xe53   : > { %7123 = vmatpush.msra.mxu0 %v7086_v51 }
 0xe54   : > { %v6564_v60 = vrot.slane %v6563_v9, 1  ;;  %v6606_v21 = vadd.f32 %v6605_v61, %v6604_v45  ;;  %v7106_v45 = vld [vmem:[%s11768_s10 + $0xd8] sm:$0xff] }
 0xe55   : > { %7139 = vmatpush.msra.mxu1 %v7106_v45  ;;  %7124 = vmatpush.msra.mxu0 %v7085_v14 }
 0xe56   : > { %v6565_v24 = vadd.f32 %v6564_v60, %v6563_v9  ;;  %v6607_v2 = vrot.slane %v6606_v21, 1  ;;  %v7105_v60 = vld [vmem:[%s11768_s10 + $0xd0] sm:$0xff] }
 0xe57   : > { %7140 = vmatpush.msra.mxu1 %v7105_v60  ;;  %7125 = vmatpush.msra.mxu0 %v7084_v41 }
 0xe58   : > { %v6576_v44 = vmul.f32 %v11414_v10, %v6565_v24  ;;  %v6608_v5 = vadd.f32 %v6607_v2, %v6606_v21 }
 0xe59   : > { %7126 = vmatpush.msra.mxu0 %v7083_v39 }
 0xe5a   : > { %v6612_v11 = vmul.f32 %v6608_v5, %v11414_v10  ;;  %v6616_v55 = vmul.f32 %v6576_v44, %v6576_v44  ;;  %v6624_v47 = vsub.f32 %v6534_v29, %v6576_v44  ;;  %v7104_v44 = vld [vmem:[%s11768_s10 + $0xc8] sm:$0xff] }
 0xe5b   : > { %7141 = vmatpush.msra.mxu1 %v7104_v44 }
 0xe5c   : > { %v6620_v15 = vsub.f32 %v6612_v11, %v6616_v55  ;;  %v6637_v54 = vmul.f32 %v6629_v52, %v6624_v47 }
 0xe5e   : > { %v6641_v20 = vadd.f32 1e-05, %v6620_v15  ;;  %v7103_v15 = vld [vmem:[%s11768_s10 + $0xc0] sm:$0xff] }
 0xe5f   : > { %7142 = vmatpush.msra.mxu1 %v7103_v15 }
 0xe60   : > { %8639 = vrsqrt.f32 %v6641_v20  ;;  %vm6678_vm9 = vweird.f32 %v6641_v20  ;;  %v6854_v4 = vpop.f32.mrf.mxu0 }
 0xe61   : > { %v6855_v53 = vadd.f32 %v6854_v4, %v6833_v17 }
 0xe66   : > { %v8640_v37 = vpop.eup %8639 }
 0xe67   : > { %v6673_v35 = vmul.f32 %v8640_v37, %v6641_v20  ;;  %vm6679_vm8 = vweird.f32 %v8640_v37 }
 0xe68   : > { %vm6680_vm11 = vmor %vm6678_vm9, %vm6679_vm8 }
 0xe69   : > { %v6674_v62 = vmul.f32 %v8640_v37, %v6673_v35  ;;  %v7102_v35 = vld [vmem:[%s11768_s10 + $0xb8] sm:$0xff] }
 0xe6a   : > { %7143 = vmatpush.msra.mxu1 %v7102_v35 }
 0xe6b   : > { %v6675_v56 = vmul.f32 0.5, %v6674_v62 }
 0xe6d   : > { %v6676_v34 = vsub.f32 1.5, %v6675_v56  ;;  %v6874_v8 = vpop.f32.mrf.mxu1 }
 0xe6e   : > { %v6875_v25 = vadd.f32 %v6874_v8, %v6855_v53  ;;  %v7079_v8 = vld [vmem:[%s11768_s10] sm:$0xff]  ;;  %v7098_v53 = vld [vmem:[%s11768_s10 + $0x98] sm:$0xff] }
 0xe6f   : > { %v6677_v59 = vmul.f32 %v8640_v37, %v6676_v34 }
 0xe71   : > { %v6681_v0 = vsel %vm6680_vm11, %v8640_v37, %v6677_v59  ;;  %v7082_v37 = vld [vmem:[%s11768_s10 + $0x18] sm:$0xff]  ;;  %v7081_v59 = vld [vmem:[%s11768_s10 + $0x10] sm:$0xff] }
 0xe72   : > { %v6685_v38 = vmul.f32 %v6681_v0, %v6637_v54  ;;  %7127 = vmatpush.msra.mxu0 %v7082_v37  ;;  %v7101_v54 = vld [vmem:[%s11768_s10 + $0xb0] sm:$0xff] }
 0xe73   : > { %7144 = vmatpush.msra.mxu1 %v7101_v54 }
 0xe74   : > { %v6698_v49 = vadd.f32 %v6690_v18, %v6685_v38  ;;  %7128 = vmatpush.msra.mxu0 %v7081_v59 }
 0xe75   : > { %7145 = vmatpush.msra.mxu1 %v7100_v42 }
 0xe76   : > { %v6702_v6 = vmax.f32 %v6698_v49, 0.0  ;;  %7129 = vmatpush.msra.mxu0 %v7080_v27 }
 0xe77   : > { %7146 = vmatpush.msra.mxu1 %v7099_v19 }
 0xe78   : > { %6913 = vmatmul.f32.vlgmr.msra.gmra.mxu3 %v6702_v6  ;;  %7130 = vmatpush.msra.mxu0 %v7079_v8 }
 0xe79   : > { %7147 = vmatpush.msra.mxu1 %v7098_v53 }
 0xe7b   : > { %7148 = vmatpush.msra.mxu1 %v7097_v1 }
 0xe80   : > { %6993 = vmatmul.f32.vlgmr.msrb.gmra.mxu3 %v6702_v6  ;;  %v6934_v29 = vpop.f32.mrf.mxu0 }
 0xe81   : > { %v6935_v32 = vadd.f32 %v6934_v29, %v6834_v57  ;;  %v7096_v29 = vld [vmem:[%s11768_s10 + $0x88] sm:$0xff] }
 0xe82   : > { %7149 = vmatpush.msra.mxu1 %v7096_v29 }
 0xe83   : > { %v6954_v23 = vpop.f32.mrf.mxu1 }
 0xe84   : > { %v6955_v21 = vadd.f32 %v6954_v23, %v6935_v32 }
 0xeb3   : > { %v6894_v43 = vpop.f32.mrf.mxu2 }
 0xeb4   : > { %v6895_v28 = vadd.f32 %v6894_v43, %v6875_v25 }
 0xebb   : > { %v6974_v61 = vpop.f32.mrf.mxu2 }
 0xebc   : > { %v6975_v5 = vadd.f32 %v6974_v61, %v6955_v21 }
 0xefb   : > { %v6914_v48 = vpop.f32.mrf.mxu3 }
 0xefc   : > { %v11540_v22 = vadd.f32 %v6914_v48, %v6895_v28  ;;  %v7095_v48 = vld [vmem:[%s11768_s10 + $0x80] sm:$0xff] }
 0xefd   : > { %7150 = vmatpush.msra.mxu1 %v7095_v48 }
 0xefe   : > { %v6999_v13 = vsel %vm3510_vm10, %v11540_v22, 0.0  ;;  %v7015_v9 = vmul.f32 %v11540_v22, %v11540_v22 }
 0xeff   : > { %v7000_v40 = vrot.slane %v6999_v13, 4 }
 0xf00   : > { %v7017_v50 = vsel %vm3510_vm10, %v7015_v9, 0.0 }
 0xf01   : > { %v7001_v24 = vadd.f32 %v7000_v40, %v6999_v13  ;;  %v7018_v2 = vrot.slane %v7017_v50, 4  ;;  %v6997_v40 = vld [vmem:[#allocation35] sm:$0x3] }
 0xf02   : > { %v7041_v37 = vperm.slane %v6997_v40, 1 }
 0xf03   : > { %v7002_v3 = vrot.slane %v7001_v24, 2  ;;  %v7019_v11 = vadd.f32 %v7018_v2, %v7017_v50  ;;  %v6994_v55 = vpop.f32.mrf.mxu3  ;;  %v7040_v50 = vperm.slane %v6997_v40, 0  ;;  %v6998_v2 = vld [vmem:[#allocation36] sm:$0x3] }
 0xf04   : > { %v11571_v46 = vadd.f32 %v6994_v55, %v6975_v5 }
 0xf05   : > { %v7003_v20 = vadd.f32 %v7002_v3, %v7001_v24  ;;  %v7020_v12 = vrot.slane %v7019_v11, 2  ;;  %v7071_v3 = vperm.slane %v6998_v2, 0 }
 0xf06   : > { %v7006_v62 = vsel %vm3510_vm10, %v11571_v46, 0.0  ;;  %v7016_v56 = vmul.f32 %v11571_v46, %v11571_v46 }
 0xf07   : > { %v7004_v47 = vrot.slane %v7003_v20, 1  ;;  %v7021_v52 = vadd.f32 %v7020_v12, %v7019_v11  ;;  %v7007_v34 = vrot.slane %v7006_v62, 4 }
 0xf08   : > { %v7024_v18 = vsel %vm3510_vm10, %v7016_v56, 0.0 }
 0xf09   : > { %v7005_v0 = vadd.f32 %v7004_v47, %v7003_v20  ;;  %v7022_v38 = vrot.slane %v7021_v52, 1  ;;  %v7008_v49 = vadd.f32 %v7007_v34, %v7006_v62  ;;  %v7025_v6 = vrot.slane %v7024_v18, 4 }
 0xf0a   : > { %v7072_v47 = vperm.slane %v6998_v2, 1 }
 0xf0b   : > { %v7013_v63 = vmul.f32 %v7005_v0, %v11414_v10  ;;  %v7023_v4 = vadd.f32 %v7022_v38, %v7021_v52  ;;  %v7009_v31 = vrot.slane %v7008_v49, 2  ;;  %v7026_v17 = vadd.f32 %v7025_v6, %v7024_v18  ;;  %v8629_v18 = vld [vmem:[#allocation38] ss:$0 sm:$0xff] }
 0xf0d   : > { %v7031_v43 = vmul.f32 %v7023_v4, %v11414_v10  ;;  %v7033_v16 = vmul.f32 %v7013_v63, %v7013_v63  ;;  %v7010_v33 = vadd.f32 %v7009_v31, %v7008_v49  ;;  %v7027_v7 = vrot.slane %v7026_v17, 2  ;;  %v8630_v49 = vld [vmem:[#allocation39] ss:$0 sm:$0xff] }
 0xf0e   : > { %v7037_v21 = vsub.f32 %v11540_v22, %v7013_v63 }
 0xf0f   : > { %v7035_v25 = vsub.f32 %v7031_v43, %v7033_v16  ;;  %v7011_v57 = vrot.slane %v7010_v33, 1  ;;  %v7028_v58 = vadd.f32 %v7027_v7, %v7026_v17 }
 0xf10   : > { %v7044_v5 = vmul.f32 %v7040_v50, %v7037_v21 }
 0xf11   : > { %v7046_v30 = vadd.f32 1e-05, %v7035_v25  ;;  %v7012_v28 = vadd.f32 %v7011_v57, %v7010_v33  ;;  %v7029_v26 = vrot.slane %v7028_v58, 1 }
 0xf13   : > { %8641 = vrsqrt.f32 %v7046_v30  ;;  %v7014_v36 = vmul.f32 %v7012_v28, %v11414_v10  ;;  %v7030_v32 = vadd.f32 %v7029_v26, %v7028_v58  ;;  %vm7054_vm12 = vweird.f32 %v7046_v30 }
 0xf15   : > { %v7034_v23 = vmul.f32 %v7014_v36, %v7014_v36  ;;  %v7032_v51 = vmul.f32 %v7030_v32, %v11414_v10  ;;  %v7038_v12 = vsub.f32 %v11571_v46, %v7014_v36 }
 0xf17   : > { %v7036_v45 = vsub.f32 %v7032_v51, %v7034_v23  ;;  %v7045_v56 = vmul.f32 %v7041_v37, %v7038_v12 }
 0xf19   : > { %v8642_v13 = vpop.eup %8641  ;;  %v7047_v61 = vadd.f32 1e-05, %v7036_v45 }
 0xf1a   : > { %v7049_v9 = vmul.f32 %v8642_v13, %v7046_v30  ;;  %vm7055_vm10 = vweird.f32 %v8642_v13 }
 0xf1b   : > { %8643 = vrsqrt.f32 %v7047_v61  ;;  %vm7056_vm13 = vmor %vm7054_vm12, %vm7055_vm10  ;;  %vm7064_vm15 = vweird.f32 %v7047_v61 }
 0xf1c   : > { %v7050_v14 = vmul.f32 %v8642_v13, %v7049_v9 }
 0xf1e   : > { %v7051_v60 = vmul.f32 0.5, %v7050_v14 }
 0xf20   : > { %v7052_v24 = vsub.f32 1.5, %v7051_v60 }
 0xf21   : > { %v8644_v41 = vpop.eup %8643 }
 0xf22   : > { %v7053_v44 = vmul.f32 %v8642_v13, %v7052_v24  ;;  %v7059_v10 = vmul.f32 %v8644_v41, %v7047_v61  ;;  %vm7065_vm14 = vweird.f32 %v8644_v41 }
 0xf23   : > { %vm7066_vm0 = vmor %vm7064_vm15, %vm7065_vm14 }
 0xf24   : > { %v7057_v11 = vsel %vm7056_vm13, %v8642_v13, %v7053_v44  ;;  %v7060_v39 = vmul.f32 %v8644_v41, %v7059_v10 }
 0xf25   : > { %v7068_v55 = vmul.f32 %v7057_v11, %v7044_v5 }
 0xf26   : > { %v7061_v15 = vmul.f32 0.5, %v7060_v39 }
 0xf27   : > { %v7075_v20 = vadd.f32 %v7071_v3, %v7068_v55 }
 0xf28   : > { %v7062_v22 = vsub.f32 1.5, %v7061_v15 }
 0xf29   : > { %v7077_v35 = vmax.f32 %v7075_v20, 0.0 }
 0xf2a   : > { %v7063_v62 = vmul.f32 %v8644_v41, %v7062_v22 }
 0xf2b   : > { %7131 = vmatmul.f32.vlgmr.msra.gmra.mxu0 %v7077_v35 }
 0xf2c   : > { %v7067_v52 = vsel %vm7066_vm0, %v8644_v41, %v7063_v62 }
 0xf2d   : > { %v7069_v34 = vmul.f32 %v7067_v52, %v7045_v56 }
 0xf2f   : > { %v7076_v59 = vadd.f32 %v7072_v47, %v7069_v34 }
 0xf31   : > { %v7078_v54 = vmax.f32 %v7076_v59, 0.0 }
 0xf33   : > { %7151 = vmatmul.f32.vlgmr.msra.gmra.mxu1 %v7078_v54 }
 0xfa8   : > { %v7132_v0 = vpop.f32.mrf.mxu0 }
 0xfa9   : > { %v7133_v38 = vadd.f32 %v8629_v18, %v7132_v0 }
 0xfb0   : > { %v7152_v46 = vpop.f32.mrf.mxu1 }
 0xfb1   : > { %v7153_v6 = vadd.f32 %v7152_v46, %v7133_v38 }
 0xfb3   : > { %v7159_v27 = vadd.f32 %v8630_v49, %v7153_v6 }
 0xfb5   : > { %7161 = vst.msk [vmem:[#allocation41] sm:$0xf] %vm7160_vm1, %v7159_v27 }
 0xfb6 PF: > { %s11769_s5 = sld [smem:[#allocation62_spill]]  ;;  %s9506_s14 = smov [#allocation41]  }
 0xfb7   : > { %s11771_s7 = sld [smem:[#allocation82_spill]]  ;;  %s7168_s12 = sshll.u32 %s9506_s14, 4  ;;  %s7169_s12 = int_to_ptr.vmem [resolvable:$true] %s7168_s12 }
 0xfbc   : > { %s11770_s24 = sadd.s32 4294967295, %s11769_s5  }
 0xfbd   : > { %p8487_p13 = scmp.eq.s32.totalorder %s11770_s24, 31  ;;  %s7170_s11 = sshll.u32 %s11771_s7, 4  ;;  %s7171_s11 = int_to_ptr.hbm [resolvable:$true] %s7170_s11 }
 0xfbf   : > { %8373 = dma.vmem_to_hbm [thread:$0]  (%p8487_p13), %s7169_s12, 64, %s7171_s11, [#allocation8]  }
 0xfc0   : > { %9431 = dma.done.wait (%p8487_p13), [#allocation8], 64  }
 0xfc1   : > { %9433 = vsyncadd (%p8487_p13), [#allocation8], 4294967232 }
 0xfc2 PF: > { %s11772_s13 = sld [smem:[#allocation62_spill]]  ;;  %s11776_s4 = smov %s11793_s26 }
 0xfc3   : > { %s11773_s5 = sld [smem:[#allocation56_spill]]  ;;  %s11778_s27 = smov %s9841_s25 }
 0xfc4   : > { %s11774_s6 = sld [smem:[#allocation57_spill]]  ;;  %s11779_s28 = smov %s9460_s29 }
 0xfc5   : > { %s11775_s2 = sld [smem:[#allocation61_spill]]  ;;  %s11781_s29 = smov %s11785_s21 }
 0xfc6   : > { %s11783_s7 = smov %s11776_s4 }
 0xfc8   : > { %s49_s30 = sadd.s32 1, %s11772_s13  }
 0xfc9   : > { %p46_p0 = scmp.ge.s32.totalorder %s49_s30, 34  }
 0xfca   : > { %s11777_s26 = smov %s11774_s6  ;;  %s11780_s6 = smov %s9464_s0 }
 0xfcb   : > { %s11782_s0 = smov %s11789_s23  ;;  %48 = sbr.rel (!%p46_p0) target bundleno = 37 (0x25), region = 300 }
 0xfd0   :  { %7184 = vsyncpa [#allocation7], 1 }
 0xfd1   :  { %7186 = vsyncpa [#allocation7 + $0x1], 1 }
 0xfd2   :  { %7187 = vsyncpa [#allocation10], 1 }
 0xfd3   :  { %7188 = vsyncpa [#allocation13], 1 }
 0xfd4   :  { %7189 = vsyncpa [#allocation16], 1 }
 0xfd5   :  { %7190 = vsyncpa [#allocation19], 1 }
 0xfd6   :  { %7191 = vsyncpa [#allocation22], 1 }
 0xfd7   :  { %7192 = vsyncpa [#allocation25], 1 }
 0xfd8   :  { %7193 = vsyncpa [#allocation28], 1 }
 0xfd9   :  { %7194 = vsyncpa [#allocation31], 1 }
 0xfda   :  { %7195 = vsyncpa [#allocation34], 1 }
 0xfdb   :  { %7196 = vsyncpa [#allocation37], 1 }
 0xfdc   :  { %7197 = vsyncpa [#allocation40], 1 }
 0xfdd   :  { %7198 = vsyncpa [#allocation8], 1 }
 0xfde   :  { %7200 = vsyncpa [#allocation8 + $0x1], 1 }

</bundles_post_ra>
